<compile_context>
chip_gen: v7x
topology: tpu7x:2x2x1
jax: 0.10.0
libtpu: 0.0.40
codegen_flags: <defaults>
</compile_context>

<pallas_src>
import functools

import jax
import jax.numpy as jnp
from jax.experimental import pallas as pl
from jax.experimental.pallas import tpu as pltpu

LATENT = 32
CHANNELS = 3


def _round_up(x, m):
    return (x + m - 1) // m * m


# --------------------------------------------------------------------------
# Pallas kernel:  y = act(A @ B + bias), full-K blocks (no reduction grid)
# --------------------------------------------------------------------------
def _mm_bias_act_kernel(a_ref, b_ref, bias_ref, o_ref, *, activation):
    acc = jnp.dot(a_ref[...], b_ref[...], preferred_element_type=jnp.float32)
    r = acc + bias_ref[...]
    if activation == "relu":
        r = jnp.maximum(r, 0.0)
    elif activation == "sigmoid":
        r = jax.nn.sigmoid(r)
    o_ref[...] = r.astype(o_ref.dtype)


def matmul_bias_act(a, b, bias, activation="none", tm=256, tn=512):
    """a: (M, K), b: (K, N), bias: (N,) -> act(a @ b + bias) in f32.

    bf16 MXU inputs, f32 accumulation.  K is always a single full-extent
    block (max K here is 4096 -> at most ~2 MiB bf16 per A tile, well inside
    VMEM on v5e/v6e/v7x).  N is never padded.  Only M is padded, and only
    when M > tm.
    """
    M, K = a.shape
    K2, N = b.shape
    assert K == K2

    a = a.astype(jnp.bfloat16)
    b = b.astype(jnp.bfloat16)
    bias = bias.astype(jnp.float32).reshape(1, N)

    # N blocking: full extent when small / non-dividing, else lane-dense 512.
    if N <= tn or N % tn != 0:
        tn = N

    # M blocking: full-extent single block when small (exempt from the 8-row
    # divisibility rule); otherwise pad M to a multiple of tm.
    if M <= tm:
        tm = M
        Mp = M
    else:
        Mp = _round_up(M, tm)
        if Mp != M:
            a = jnp.pad(a, ((0, Mp - M), (0, 0)))

    kernel = functools.partial(_mm_bias_act_kernel, activation=activation)
    out = pl.pallas_call(
        kernel,
        out_shape=jax.ShapeDtypeStruct((Mp, N), jnp.float32),
        grid_spec=pltpu.PrefetchScalarGridSpec(
            num_scalar_prefetch=0,
            grid=(Mp // tm, N // tn),
            in_specs=[
                pl.BlockSpec((tm, K), lambda i, j: (i, 0)),
                # constant block index when N fits one block -> weight stays
                # resident in VMEM across the M grid (DMA'd once).
                pl.BlockSpec((K, tn), lambda i, j: (0, j)),
                pl.BlockSpec((1, tn), lambda i, j: (0, j)),
            ],
            out_specs=pl.BlockSpec((tm, tn), lambda i, j: (i, j)),
        ),
        compiler_params=pltpu.CompilerParams(
            dimension_semantics=("parallel", "parallel")),
    )(a, b, bias)
    return out if Mp == M else out[:M]


# --------------------------------------------------------------------------
# JAX glue: im2col patch extraction (pure slicing / reshape), layer wrappers
# --------------------------------------------------------------------------
def im2col(x, k, stride):
    # x: (B, H, W, C) -> patches (B*OH*OW, k*k*C) with (kh, kw, C) ordering.
    B, H, W, C = x.shape
    OH = (H - k) // stride + 1
    OW = (W - k) // stride + 1
    cols = []
    for di in range(k):
        for dj in range(k):
            cols.append(
                x[:, di:di + stride * OH:stride, dj:dj + stride * OW:stride, :])
    patches = jnp.stack(cols, axis=3)  # (B, OH, OW, k*k, C)
    return patches.reshape(B * OH * OW, k * k * C), (B, OH, OW)


def conv2d(x, w, b, stride, activation):
    # x: NHWC; w: torch layout (Cout, Cin, kh, kw); b: (Cout,)
    Cout, Cin, kh, kw = w.shape
    patches, (B, OH, OW) = im2col(x, kh, stride)
    w_mat = jnp.transpose(w, (2, 3, 1, 0)).reshape(kh * kw * Cin, Cout)
    y = matmul_bias_act(patches, w_mat, b, activation)
    return y.reshape(B, OH, OW, Cout)


def conv_transpose2d(x, w, b, activation):
    """ConvTranspose2d(kernel=4, stride=2, padding=1) via sub-pixel conv.

    out[2m+r, 2n+s, co] = sum_{dy,dx,ci} xp[m+r+dy, n+s+dx, ci]
                                         * w[ci, co, 3-r-2*dy, 3-s-2*dx]
    with xp = x padded by 1 on every spatial side.  One stride-1 im2col
    (2x2 windows) + one matmul with the 4-phase weight (N = 4*Cout), then a
    shifted depth-to-space.  No zero-dilated tensor, ~4x fewer MACs.
    """
    Cin, Cout, kh, kw = w.shape  # torch ConvTranspose2d layout (Cin, Cout, 4, 4)
    B, H, W, C = x.shape
    assert kh == 4 and kw == 4 and C == Cin

    xp = jnp.pad(x, ((0, 0), (1, 1), (1, 1), (0, 0)))
    patches, (_, OH, OW) = im2col(xp, 2, 1)            # OH=H+1, OW=W+1, cols (dy,dx,ci)

    # Phase weight: rows (dy,dx,ci), cols (r,s,co).
    wf = jnp.flip(w, axis=(2, 3))                      # wf[ci,co,a,b] = w[ci,co,3-a,3-b]
    wf = wf.reshape(Cin, Cout, 2, 2, 2, 2)             # (ci,co,dy,r,dx,s)
    w_mat = jnp.transpose(wf, (2, 4, 0, 3, 5, 1)).reshape(4 * Cin, 4 * Cout)
    bias4 = jnp.tile(b, 4)                             # bias per co, repeated per (r,s)

    y = matmul_bias_act(patches, w_mat, bias4, activation)   # (B*OH*OW, 4*Cout)
    y = y.reshape(B, OH, OW, 2, 2, Cout)               # (b, m', n', r, s, co)

    # out[b, 2m+r, 2n+s, co] = y[b, m+r, n+s, r, s, co]
    phases = jnp.stack(
        [y[:, r:r + H, s:s + W, r, s, :] for r in (0, 1) for s in (0, 1)],
        axis=3)                                        # (B, H, W, 4, Cout)
    phases = phases.reshape(B, H, W, 2, 2, Cout)
    out = jnp.transpose(phases, (0, 1, 3, 2, 4, 5)).reshape(B, 2 * H, 2 * W, Cout)
    return out


def linear(x, w, b, activation="none"):
    # torch Linear weight layout (out, in)
    return matmul_bias_act(x, w.T, b, activation)


# --------------------------------------------------------------------------
# VAE forward
# --------------------------------------------------------------------------
def vae_forward(params, x_nchw, eps):
    p = params
    x = jnp.transpose(x_nchw, (0, 2, 3, 1))  # NCHW -> NHWC

    # Encoder
    h = conv2d(x, p["conv1_w"], p["conv1_b"], 2, "relu")   # (B, 47, 47, 32)
    h = conv2d(h, p["conv2_w"], p["conv2_b"], 2, "relu")   # (B, 22, 22, 64)
    h = conv2d(h, p["conv3_w"], p["conv3_b"], 2, "relu")   # (B, 10, 10, 128)
    h = conv2d(h, p["conv4_w"], p["conv4_b"], 2, "relu")   # (B, 4, 4, 256)
    # torch flattens NCHW channel-major:
    flat = jnp.transpose(h, (0, 3, 1, 2)).reshape(h.shape[0], -1)  # (B, 4096)

    # Fused mu/logvar projection: one (B,4096) x (4096,64) matmul.
    w_mu_lv = jnp.concatenate([p["fc_mu_w"], p["fc_logvar_w"]], axis=0).T
    b_mu_lv = jnp.concatenate([p["fc_mu_b"], p["fc_logvar_b"]], axis=0)
    stats = matmul_bias_act(flat, w_mu_lv, b_mu_lv)
    mu, logvar = stats[:, :LATENT], stats[:, LATENT:]

    # Reparameterization: 2x32 elements -> plain jnp (a kernel launch costs more).
    z = mu + eps * jnp.exp(0.5 * logvar)

    # Decoder
    d = linear(z, p["dec_fc_w"], p["dec_fc_b"], "relu")     # (B, 9216)
    d = d.reshape(-1, 256, 6, 6)                            # torch .view NCHW
    d = jnp.transpose(d, (0, 2, 3, 1))                      # NHWC (B, 6, 6, 256)
    d = conv_transpose2d(d, p["deconv1_w"], p["deconv1_b"], "relu")    # 12x12x128
    d = conv_transpose2d(d, p["deconv2_w"], p["deconv2_b"], "relu")    # 24x24x64
    d = conv_transpose2d(d, p["deconv3_w"], p["deconv3_b"], "relu")    # 48x48x32
    d = conv_transpose2d(d, p["deconv4_w"], p["deconv4_b"], "sigmoid") # 96x96x3
    recon = jnp.transpose(d, (0, 3, 1, 2))                  # back to NCHW
    return recon, mu, logvar


# --------------------------------------------------------------------------
# Deterministic parameter init (shapes from the module's __init__)
# --------------------------------------------------------------------------
def init_params(key):
    ks = jax.random.split(key, 22)

    def w(k, shape, fan_in):
        return jax.random.normal(k, shape, jnp.float32) / jnp.sqrt(float(fan_in))

    P = {}
    # Encoder convs: Conv2d(cin, cout, 4, stride=2) -> weight (cout, cin, 4, 4)
    P["conv1_w"] = w(ks[0], (32, CHANNELS, 4, 4), CHANNELS * 16)
    P["conv1_b"] = jnp.zeros((32,), jnp.float32)
    P["conv2_w"] = w(ks[1], (64, 32, 4, 4), 32 * 16)
    P["conv2_b"] = jnp.zeros((64,), jnp.float32)
    P["conv3_w"] = w(ks[2], (128, 64, 4, 4), 64 * 16)
    P["conv3_b"] = jnp.zeros((128,), jnp.float32)
    P["conv4_w"] = w(ks[3], (256, 128, 4, 4), 128 * 16)
    P["conv4_b"] = jnp.zeros((256,), jnp.float32)
    # Encoder FCs: Linear(256*4*4 -> 32), weight (out, in)
    P["fc_mu_w"] = w(ks[4], (LATENT, 256 * 4 * 4), 256 * 4 * 4)
    P["fc_mu_b"] = jnp.zeros((LATENT,), jnp.float32)
    P["fc_logvar_w"] = w(ks[5], (LATENT, 256 * 4 * 4), 256 * 4 * 4)
    P["fc_logvar_b"] = jnp.zeros((LATENT,), jnp.float32)
    # Decoder FC: Linear(32 -> 256*6*6)
    P["dec_fc_w"] = w(ks[6], (256 * 6 * 6, LATENT), LATENT)
    P["dec_fc_b"] = jnp.zeros((256 * 6 * 6,), jnp.float32)
    # Decoder deconvs: ConvTranspose2d weight layout (cin, cout, 4, 4)
    P["deconv1_w"] = w(ks[7], (256, 128, 4, 4), 256 * 16)
    P["deconv1_b"] = jnp.zeros((128,), jnp.float32)
    P["deconv2_w"] = w(ks[8], (128, 64, 4, 4), 128 * 16)
    P["deconv2_b"] = jnp.zeros((64,), jnp.float32)
    P["deconv3_w"] = w(ks[9], (64, 32, 4, 4), 64 * 16)
    P["deconv3_b"] = jnp.zeros((32,), jnp.float32)
    P["deconv4_w"] = w(ks[10], (32, 3, 4, 4), 32 * 16)
    P["deconv4_b"] = jnp.zeros((3,), jnp.float32)
    return P


if __name__ == "__main__":
    key = jax.random.PRNGKey(0)
    k_param, k_x, k_eps = jax.random.split(key, 3)

    params = init_params(k_param)
    batch = 2
    # Input shape is dictated by the module: 96x96 RGB -> encoder ends at 4x4x256.
    x = jax.random.uniform(k_x, (batch, CHANNELS, 96, 96), jnp.float32)
    # eps for the reparameterization trick (torch.randn_like(std) in the module).
    eps = jax.random.normal(k_eps, (batch, LATENT), jnp.float32)

    fwd = jax.jit(vae_forward)
    recon, mu, logvar = fwd(params, x, eps)
    jax.block_until_ready((recon, mu, logvar))

    assert recon.shape == (batch, CHANNELS, 96, 96)
    assert mu.shape == (batch, LATENT) and logvar.shape == (batch, LATENT)
    assert bool(jnp.all(jnp.isfinite(recon)))
    assert bool(jnp.all((recon >= 0.0) & (recon <= 1.0)))  # sigmoid output
    print("KERNEL_OK")
</pallas_src>

<mosaic_0001>
module attributes {stable_mosaic.version = 11 : i64} {
  func.func @_mm_bias_act_kernel(%arg0: i32, %arg1: i32, %arg2: memref<256x48xbf16, #tpu.memory_space<vmem>>, %arg3: memref<48x32xbf16, #tpu.memory_space<vmem>>, %arg4: memref<1x32xf32, #tpu.memory_space<vmem>>, %arg5: memref<256x32xf32, #tpu.memory_space<vmem>>) attributes {dimension_semantics = [#tpu.dimension_semantics<parallel>, #tpu.dimension_semantics<parallel>], iteration_bounds = array<i64: 18, 1>, scalar_prefetch = 0 : i64, scratch_operands = 0 : i64, tpu.core_type = #tpu.core_type<tc>, window_params = [{transform_indices = @transform_0, window_bounds = array<i64: 256, 48>}, {transform_indices = @transform_1, window_bounds = array<i64: 48, 32>}, {transform_indices = @transform_2, window_bounds = array<i64: 1, 32>}, {transform_indices = @transform_3, window_bounds = array<i64: 256, 32>}]} {
    %c0 = arith.constant 0 : index
    %c0_0 = arith.constant 0 : index
    %0 = vector.load %arg2[%c0, %c0_0] : memref<256x48xbf16, #tpu.memory_space<vmem>>, vector<256x48xbf16>
    %c0_1 = arith.constant 0 : index
    %c0_2 = arith.constant 0 : index
    %1 = vector.load %arg3[%c0_1, %c0_2] : memref<48x32xbf16, #tpu.memory_space<vmem>>, vector<48x32xbf16>
    %cst = arith.constant dense<0.000000e+00> : vector<256x32xf32>
    %2 = tpu.matmul %0, %1, %cst {dimension_numbers = #tpu.dot_dimension_numbers<[1], [0], [0], [1], [0, 0, 1, 1], [], []>} : vector<256x48xbf16>, vector<48x32xbf16>, vector<256x32xf32> -> vector<256x32xf32>
    %c0_3 = arith.constant 0 : index
    %c0_4 = arith.constant 0 : index
    %3 = vector.load %arg4[%c0_3, %c0_4] : memref<1x32xf32, #tpu.memory_space<vmem>>, vector<1x32xf32>
    %4 = vector.broadcast %3 : vector<1x32xf32> to vector<256x32xf32>
    %5 = arith.addf %2, %4 : vector<256x32xf32>
    %cst_5 = arith.constant 0.000000e+00 : f32
    %6 = vector.broadcast %cst_5 : f32 to vector<256x32xf32>
    %7 = arith.maximumf %5, %6 : vector<256x32xf32>
    %c0_6 = arith.constant 0 : index
    %c0_7 = arith.constant 0 : index
    %8 = vector.load %arg5[%c0_6, %c0_7] : memref<256x32xf32, #tpu.memory_space<vmem>>, vector<256x32xf32>
    tpu.vector_store %arg5[%c0_6, %c0_7], %7 {strides = array<i32>} : memref<256x32xf32, #tpu.memory_space<vmem>>, vector<256x32xf32>,
    return
  }
  func.func @transform_0(%arg0: i32, %arg1: i32) -> (i32, i32) {
    %c0_i32 = arith.constant 0 : i32
    %c0_i32_0 = arith.constant 0 : i32
    return %arg0, %c0_i32 : i32, i32
  }
  func.func @transform_1(%arg0: i32, %arg1: i32) -> (i32, i32) {
    %c0_i32 = arith.constant 0 : i32
    %c0_i32_0 = arith.constant 0 : i32
    return %c0_i32, %arg1 : i32, i32
  }
  func.func @transform_2(%arg0: i32, %arg1: i32) -> (i32, i32) {
    %c0_i32 = arith.constant 0 : i32
    %c0_i32_0 = arith.constant 0 : i32
    return %c0_i32, %arg1 : i32, i32
  }
  func.func @transform_3(%arg0: i32, %arg1: i32) -> (i32, i32) {
    %c0_i32 = arith.constant 0 : i32
    return %arg0, %arg1 : i32, i32
  }
}

module attributes {stable_mosaic.version = 11 : i64} {
  func.func @_mm_bias_act_kernel(%arg0: i32, %arg1: i32, %arg2: memref<256x512xbf16, #tpu.memory_space<vmem>>, %arg3: memref<512x64xbf16, #tpu.memory_space<vmem>>, %arg4: memref<1x64xf32, #tpu.memory_space<vmem>>, %arg5: memref<256x64xf32, #tpu.memory_space<vmem>>) attributes {dimension_semantics = [#tpu.dimension_semantics<parallel>, #tpu.dimension_semantics<parallel>], iteration_bounds = array<i64: 4, 1>, scalar_prefetch = 0 : i64, scratch_operands = 0 : i64, tpu.core_type = #tpu.core_type<tc>, window_params = [{transform_indices = @transform_0, window_bounds = array<i64: 256, 512>}, {transform_indices = @transform_1, window_bounds = array<i64: 512, 64>}, {transform_indices = @transform_2, window_bounds = array<i64: 1, 64>}, {transform_indices = @transform_3, window_bounds = array<i64: 256, 64>}]} {
    %c0 = arith.constant 0 : index
    %c0_0 = arith.constant 0 : index
    %0 = vector.load %arg2[%c0, %c0_0] : memref<256x512xbf16, #tpu.memory_space<vmem>>, vector<256x512xbf16>
    %c0_1 = arith.constant 0 : index
    %c0_2 = arith.constant 0 : index
    %1 = vector.load %arg3[%c0_1, %c0_2] : memref<512x64xbf16, #tpu.memory_space<vmem>>, vector<512x64xbf16>
    %cst = arith.constant dense<0.000000e+00> : vector<256x64xf32>
    %2 = tpu.matmul %0, %1, %cst {dimension_numbers = #tpu.dot_dimension_numbers<[1], [0], [0], [1], [0, 0, 1, 1], [], []>} : vector<256x512xbf16>, vector<512x64xbf16>, vector<256x64xf32> -> vector<256x64xf32>
    %c0_3 = arith.constant 0 : index
    %c0_4 = arith.constant 0 : index
    %3 = vector.load %arg4[%c0_3, %c0_4] : memref<1x64xf32, #tpu.memory_space<vmem>>, vector<1x64xf32>
    %4 = vector.broadcast %3 : vector<1x64xf32> to vector<256x64xf32>
    %5 = arith.addf %2, %4 : vector<256x64xf32>
    %cst_5 = arith.constant 0.000000e+00 : f32
    %6 = vector.broadcast %cst_5 : f32 to vector<256x64xf32>
    %7 = arith.maximumf %5, %6 : vector<256x64xf32>
    %c0_6 = arith.constant 0 : index
    %c0_7 = arith.constant 0 : index
    %8 = vector.load %arg5[%c0_6, %c0_7] : memref<256x64xf32, #tpu.memory_space<vmem>>, vector<256x64xf32>
    tpu.vector_store %arg5[%c0_6, %c0_7], %7 {strides = array<i32>} : memref<256x64xf32, #tpu.memory_space<vmem>>, vector<256x64xf32>,
    return
  }
  func.func @transform_0(%arg0: i32, %arg1: i32) -> (i32, i32) {
    %c0_i32 = arith.constant 0 : i32
    %c0_i32_0 = arith.constant 0 : i32
    return %arg0, %c0_i32 : i32, i32
  }
  func.func @transform_1(%arg0: i32, %arg1: i32) -> (i32, i32) {
    %c0_i32 = arith.constant 0 : i32
    %c0_i32_0 = arith.constant 0 : i32
    return %c0_i32, %arg1 : i32, i32
  }
  func.func @transform_2(%arg0: i32, %arg1: i32) -> (i32, i32) {
    %c0_i32 = arith.constant 0 : i32
    %c0_i32_0 = arith.constant 0 : i32
    return %c0_i32, %arg1 : i32, i32
  }
  func.func @transform_3(%arg0: i32, %arg1: i32) -> (i32, i32) {
    %c0_i32 = arith.constant 0 : i32
    return %arg0, %arg1 : i32, i32
  }
}

module attributes {stable_mosaic.version = 11 : i64} {
  func.func @_mm_bias_act_kernel(%arg0: i32, %arg1: i32, %arg2: memref<200x1024xbf16, #tpu.memory_space<vmem>>, %arg3: memref<1024x128xbf16, #tpu.memory_space<vmem>>, %arg4: memref<1x128xf32, #tpu.memory_space<vmem>>, %arg5: memref<200x128xf32, #tpu.memory_space<vmem>>) attributes {dimension_semantics = [#tpu.dimension_semantics<parallel>, #tpu.dimension_semantics<parallel>], iteration_bounds = array<i64: 1, 1>, scalar_prefetch = 0 : i64, scratch_operands = 0 : i64, tpu.core_type = #tpu.core_type<tc>, window_params = [{transform_indices = @transform_0, window_bounds = array<i64: 200, 1024>}, {transform_indices = @transform_1, window_bounds = array<i64: 1024, 128>}, {transform_indices = @transform_2, window_bounds = array<i64: 1, 128>}, {transform_indices = @transform_3, window_bounds = array<i64: 200, 128>}]} {
    %c0 = arith.constant 0 : index
    %c0_0 = arith.constant 0 : index
    %0 = vector.load %arg2[%c0, %c0_0] : memref<200x1024xbf16, #tpu.memory_space<vmem>>, vector<200x1024xbf16>
    %c0_1 = arith.constant 0 : index
    %c0_2 = arith.constant 0 : index
    %1 = vector.load %arg3[%c0_1, %c0_2] : memref<1024x128xbf16, #tpu.memory_space<vmem>>, vector<1024x128xbf16>
    %cst = arith.constant dense<0.000000e+00> : vector<200x128xf32>
    %2 = tpu.matmul %0, %1, %cst {dimension_numbers = #tpu.dot_dimension_numbers<[1], [0], [0], [1], [0, 0, 1, 1], [], []>} : vector<200x1024xbf16>, vector<1024x128xbf16>, vector<200x128xf32> -> vector<200x128xf32>
    %c0_3 = arith.constant 0 : index
    %c0_4 = arith.constant 0 : index
    %3 = vector.load %arg4[%c0_3, %c0_4] : memref<1x128xf32, #tpu.memory_space<vmem>>, vector<1x128xf32>
    %4 = vector.broadcast %3 : vector<1x128xf32> to vector<200x128xf32>
    %5 = arith.addf %2, %4 : vector<200x128xf32>
    %cst_5 = arith.constant 0.000000e+00 : f32
    %6 = vector.broadcast %cst_5 : f32 to vector<200x128xf32>
    %7 = arith.maximumf %5, %6 : vector<200x128xf32>
    %c0_6 = arith.constant 0 : index
    %c0_7 = arith.constant 0 : index
    %8 = vector.load %arg5[%c0_6, %c0_7] : memref<200x128xf32, #tpu.memory_space<vmem>>, vector<200x128xf32>
    tpu.vector_store %arg5[%c0_6, %c0_7], %7 {strides = array<i32>} : memref<200x128xf32, #tpu.memory_space<vmem>>, vector<200x128xf32>,
    return
  }
  func.func @transform_0(%arg0: i32, %arg1: i32) -> (i32, i32) {
    %c0_i32 = arith.constant 0 : i32
    %c0_i32_0 = arith.constant 0 : i32
    return %arg0, %c0_i32 : i32, i32
  }
  func.func @transform_1(%arg0: i32, %arg1: i32) -> (i32, i32) {
    %c0_i32 = arith.constant 0 : i32
    %c0_i32_0 = arith.constant 0 : i32
    return %c0_i32, %arg1 : i32, i32
  }
  func.func @transform_2(%arg0: i32, %arg1: i32) -> (i32, i32) {
    %c0_i32 = arith.constant 0 : i32
    %c0_i32_0 = arith.constant 0 : i32
    return %c0_i32, %arg1 : i32, i32
  }
  func.func @transform_3(%arg0: i32, %arg1: i32) -> (i32, i32) {
    %c0_i32 = arith.constant 0 : i32
    return %arg0, %arg1 : i32, i32
  }
}

module attributes {stable_mosaic.version = 11 : i64} {
  func.func @_mm_bias_act_kernel(%arg0: i32, %arg1: i32, %arg2: memref<32x2048xbf16, #tpu.memory_space<vmem>>, %arg3: memref<2048x256xbf16, #tpu.memory_space<vmem>>, %arg4: memref<1x256xf32, #tpu.memory_space<vmem>>, %arg5: memref<32x256xf32, #tpu.memory_space<vmem>>) attributes {dimension_semantics = [#tpu.dimension_semantics<parallel>, #tpu.dimension_semantics<parallel>], iteration_bounds = array<i64: 1, 1>, scalar_prefetch = 0 : i64, scratch_operands = 0 : i64, tpu.core_type = #tpu.core_type<tc>, window_params = [{transform_indices = @transform_0, window_bounds = array<i64: 32, 2048>}, {transform_indices = @transform_1, window_bounds = array<i64: 2048, 256>}, {transform_indices = @transform_2, window_bounds = array<i64: 1, 256>}, {transform_indices = @transform_3, window_bounds = array<i64: 32, 256>}]} {
    %c0 = arith.constant 0 : index
    %c0_0 = arith.constant 0 : index
    %0 = vector.load %arg2[%c0, %c0_0] : memref<32x2048xbf16, #tpu.memory_space<vmem>>, vector<32x2048xbf16>
    %c0_1 = arith.constant 0 : index
    %c0_2 = arith.constant 0 : index
    %1 = vector.load %arg3[%c0_1, %c0_2] : memref<2048x256xbf16, #tpu.memory_space<vmem>>, vector<2048x256xbf16>
    %cst = arith.constant dense<0.000000e+00> : vector<32x256xf32>
    %2 = tpu.matmul %0, %1, %cst {dimension_numbers = #tpu.dot_dimension_numbers<[1], [0], [0], [1], [0, 0, 1, 1], [], []>} : vector<32x2048xbf16>, vector<2048x256xbf16>, vector<32x256xf32> -> vector<32x256xf32>
    %c0_3 = arith.constant 0 : index
    %c0_4 = arith.constant 0 : index
    %3 = vector.load %arg4[%c0_3, %c0_4] : memref<1x256xf32, #tpu.memory_space<vmem>>, vector<1x256xf32>
    %4 = vector.broadcast %3 : vector<1x256xf32> to vector<32x256xf32>
    %5 = arith.addf %2, %4 : vector<32x256xf32>
    %cst_5 = arith.constant 0.000000e+00 : f32
    %6 = vector.broadcast %cst_5 : f32 to vector<32x256xf32>
    %7 = arith.maximumf %5, %6 : vector<32x256xf32>
    %c0_6 = arith.constant 0 : index
    %c0_7 = arith.constant 0 : index
    %8 = vector.load %arg5[%c0_6, %c0_7] : memref<32x256xf32, #tpu.memory_space<vmem>>, vector<32x256xf32>
    tpu.vector_store %arg5[%c0_6, %c0_7], %7 {strides = array<i32>} : memref<32x256xf32, #tpu.memory_space<vmem>>, vector<32x256xf32>,
    return
  }
  func.func @transform_0(%arg0: i32, %arg1: i32) -> (i32, i32) {
    %c0_i32 = arith.constant 0 : i32
    %c0_i32_0 = arith.constant 0 : i32
    return %arg0, %c0_i32 : i32, i32
  }
  func.func @transform_1(%arg0: i32, %arg1: i32) -> (i32, i32) {
    %c0_i32 = arith.constant 0 : i32
    %c0_i32_0 = arith.constant 0 : i32
    return %c0_i32, %arg1 : i32, i32
  }
  func.func @transform_2(%arg0: i32, %arg1: i32) -> (i32, i32) {
    %c0_i32 = arith.constant 0 : i32
    %c0_i32_0 = arith.constant 0 : i32
    return %c0_i32, %arg1 : i32, i32
  }
  func.func @transform_3(%arg0: i32, %arg1: i32) -> (i32, i32) {
    %c0_i32 = arith.constant 0 : i32
    return %arg0, %arg1 : i32, i32
  }
}

module attributes {stable_mosaic.version = 11 : i64} {
  func.func @_mm_bias_act_kernel(%arg0: i32, %arg1: i32, %arg2: memref<2x4096xbf16, #tpu.memory_space<vmem>>, %arg3: memref<4096x64xbf16, #tpu.memory_space<vmem>>, %arg4: memref<1x64xf32, #tpu.memory_space<vmem>>, %arg5: memref<2x64xf32, #tpu.memory_space<vmem>>) attributes {dimension_semantics = [#tpu.dimension_semantics<parallel>, #tpu.dimension_semantics<parallel>], iteration_bounds = array<i64: 1, 1>, scalar_prefetch = 0 : i64, scratch_operands = 0 : i64, tpu.core_type = #tpu.core_type<tc>, window_params = [{transform_indices = @transform_0, window_bounds = array<i64: 2, 4096>}, {transform_indices = @transform_1, window_bounds = array<i64: 4096, 64>}, {transform_indices = @transform_2, window_bounds = array<i64: 1, 64>}, {transform_indices = @transform_3, window_bounds = array<i64: 2, 64>}]} {
    %c0 = arith.constant 0 : index
    %c0_0 = arith.constant 0 : index
    %0 = vector.load %arg2[%c0, %c0_0] : memref<2x4096xbf16, #tpu.memory_space<vmem>>, vector<2x4096xbf16>
    %c0_1 = arith.constant 0 : index
    %c0_2 = arith.constant 0 : index
    %1 = vector.load %arg3[%c0_1, %c0_2] : memref<4096x64xbf16, #tpu.memory_space<vmem>>, vector<4096x64xbf16>
    %cst = arith.constant dense<0.000000e+00> : vector<2x64xf32>
    %2 = tpu.matmul %0, %1, %cst {dimension_numbers = #tpu.dot_dimension_numbers<[1], [0], [0], [1], [0, 0, 1, 1], [], []>} : vector<2x4096xbf16>, vector<4096x64xbf16>, vector<2x64xf32> -> vector<2x64xf32>
    %c0_3 = arith.constant 0 : index
    %c0_4 = arith.constant 0 : index
    %3 = vector.load %arg4[%c0_3, %c0_4] : memref<1x64xf32, #tpu.memory_space<vmem>>, vector<1x64xf32>
    %4 = vector.broadcast %3 : vector<1x64xf32> to vector<2x64xf32>
    %5 = arith.addf %2, %4 : vector<2x64xf32>
    %c0_5 = arith.constant 0 : index
    %c0_6 = arith.constant 0 : index
    %6 = vector.load %arg5[%c0_5, %c0_6] : memref<2x64xf32, #tpu.memory_space<vmem>>, vector<2x64xf32>
    tpu.vector_store %arg5[%c0_5, %c0_6], %5 {strides = array<i32>} : memref<2x64xf32, #tpu.memory_space<vmem>>, vector<2x64xf32>,
    return
  }
  func.func @transform_0(%arg0: i32, %arg1: i32) -> (i32, i32) {
    %c0_i32 = arith.constant 0 : i32
    %c0_i32_0 = arith.constant 0 : i32
    return %arg0, %c0_i32 : i32, i32
  }
  func.func @transform_1(%arg0: i32, %arg1: i32) -> (i32, i32) {
    %c0_i32 = arith.constant 0 : i32
    %c0_i32_0 = arith.constant 0 : i32
    return %c0_i32, %arg1 : i32, i32
  }
  func.func @transform_2(%arg0: i32, %arg1: i32) -> (i32, i32) {
    %c0_i32 = arith.constant 0 : i32
    %c0_i32_0 = arith.constant 0 : i32
    return %c0_i32, %arg1 : i32, i32
  }
  func.func @transform_3(%arg0: i32, %arg1: i32) -> (i32, i32) {
    %c0_i32 = arith.constant 0 : i32
    return %arg0, %arg1 : i32, i32
  }
}

module attributes {stable_mosaic.version = 11 : i64} {
  func.func @_mm_bias_act_kernel(%arg0: i32, %arg1: i32, %arg2: memref<2x32xbf16, #tpu.memory_space<vmem>>, %arg3: memref<32x512xbf16, #tpu.memory_space<vmem>>, %arg4: memref<1x512xf32, #tpu.memory_space<vmem>>, %arg5: memref<2x512xf32, #tpu.memory_space<vmem>>) attributes {dimension_semantics = [#tpu.dimension_semantics<parallel>, #tpu.dimension_semantics<parallel>], iteration_bounds = array<i64: 1, 18>, scalar_prefetch = 0 : i64, scratch_operands = 0 : i64, tpu.core_type = #tpu.core_type<tc>, window_params = [{transform_indices = @transform_0, window_bounds = array<i64: 2, 32>}, {transform_indices = @transform_1, window_bounds = array<i64: 32, 512>}, {transform_indices = @transform_2, window_bounds = array<i64: 1, 512>}, {transform_indices = @transform_3, window_bounds = array<i64: 2, 512>}]} {
    %c0 = arith.constant 0 : index
    %c0_0 = arith.constant 0 : index
    %0 = vector.load %arg2[%c0, %c0_0] : memref<2x32xbf16, #tpu.memory_space<vmem>>, vector<2x32xbf16>
    %c0_1 = arith.constant 0 : index
    %c0_2 = arith.constant 0 : index
    %1 = vector.load %arg3[%c0_1, %c0_2] : memref<32x512xbf16, #tpu.memory_space<vmem>>, vector<32x512xbf16>
    %cst = arith.constant dense<0.000000e+00> : vector<2x512xf32>
    %2 = tpu.matmul %0, %1, %cst {dimension_numbers = #tpu.dot_dimension_numbers<[1], [0], [0], [1], [0, 0, 1, 1], [], []>} : vector<2x32xbf16>, vector<32x512xbf16>, vector<2x512xf32> -> vector<2x512xf32>
    %c0_3 = arith.constant 0 : index
    %c0_4 = arith.constant 0 : index
    %3 = vector.load %arg4[%c0_3, %c0_4] : memref<1x512xf32, #tpu.memory_space<vmem>>, vector<1x512xf32>
    %4 = vector.broadcast %3 : vector<1x512xf32> to vector<2x512xf32>
    %5 = arith.addf %2, %4 : vector<2x512xf32>
    %cst_5 = arith.constant 0.000000e+00 : f32
    %6 = vector.broadcast %cst_5 : f32 to vector<2x512xf32>
    %7 = arith.maximumf %5, %6 : vector<2x512xf32>
    %c0_6 = arith.constant 0 : index
    %c0_7 = arith.constant 0 : index
    %8 = vector.load %arg5[%c0_6, %c0_7] : memref<2x512xf32, #tpu.memory_space<vmem>>, vector<2x512xf32>
    tpu.vector_store %arg5[%c0_6, %c0_7], %7 {strides = array<i32>} : memref<2x512xf32, #tpu.memory_space<vmem>>, vector<2x512xf32>,
    return
  }
  func.func @transform_0(%arg0: i32, %arg1: i32) -> (i32, i32) {
    %c0_i32 = arith.constant 0 : i32
    %c0_i32_0 = arith.constant 0 : i32
    return %arg0, %c0_i32 : i32, i32
  }
  func.func @transform_1(%arg0: i32, %arg1: i32) -> (i32, i32) {
    %c0_i32 = arith.constant 0 : i32
    %c0_i32_0 = arith.constant 0 : i32
    return %c0_i32, %arg1 : i32, i32
  }
  func.func @transform_2(%arg0: i32, %arg1: i32) -> (i32, i32) {
    %c0_i32 = arith.constant 0 : i32
    %c0_i32_0 = arith.constant 0 : i32
    return %c0_i32, %arg1 : i32, i32
  }
  func.func @transform_3(%arg0: i32, %arg1: i32) -> (i32, i32) {
    %c0_i32 = arith.constant 0 : i32
    return %arg0, %arg1 : i32, i32
  }
}

module attributes {stable_mosaic.version = 11 : i64} {
  func.func @_mm_bias_act_kernel(%arg0: i32, %arg1: i32, %arg2: memref<98x1024xbf16, #tpu.memory_space<vmem>>, %arg3: memref<1024x512xbf16, #tpu.memory_space<vmem>>, %arg4: memref<1x512xf32, #tpu.memory_space<vmem>>, %arg5: memref<98x512xf32, #tpu.memory_space<vmem>>) attributes {dimension_semantics = [#tpu.dimension_semantics<parallel>, #tpu.dimension_semantics<parallel>], iteration_bounds = array<i64: 1, 1>, scalar_prefetch = 0 : i64, scratch_operands = 0 : i64, tpu.core_type = #tpu.core_type<tc>, window_params = [{transform_indices = @transform_0, window_bounds = array<i64: 98, 1024>}, {transform_indices = @transform_1, window_bounds = array<i64: 1024, 512>}, {transform_indices = @transform_2, window_bounds = array<i64: 1, 512>}, {transform_indices = @transform_3, window_bounds = array<i64: 98, 512>}]} {
    %c0 = arith.constant 0 : index
    %c0_0 = arith.constant 0 : index
    %0 = vector.load %arg2[%c0, %c0_0] : memref<98x1024xbf16, #tpu.memory_space<vmem>>, vector<98x1024xbf16>
    %c0_1 = arith.constant 0 : index
    %c0_2 = arith.constant 0 : index
    %1 = vector.load %arg3[%c0_1, %c0_2] : memref<1024x512xbf16, #tpu.memory_space<vmem>>, vector<1024x512xbf16>
    %cst = arith.constant dense<0.000000e+00> : vector<98x512xf32>
    %2 = tpu.matmul %0, %1, %cst {dimension_numbers = #tpu.dot_dimension_numbers<[1], [0], [0], [1], [0, 0, 1, 1], [], []>} : vector<98x1024xbf16>, vector<1024x512xbf16>, vector<98x512xf32> -> vector<98x512xf32>
    %c0_3 = arith.constant 0 : index
    %c0_4 = arith.constant 0 : index
    %3 = vector.load %arg4[%c0_3, %c0_4] : memref<1x512xf32, #tpu.memory_space<vmem>>, vector<1x512xf32>
    %4 = vector.broadcast %3 : vector<1x512xf32> to vector<98x512xf32>
    %5 = arith.addf %2, %4 : vector<98x512xf32>
    %cst_5 = arith.constant 0.000000e+00 : f32
    %6 = vector.broadcast %cst_5 : f32 to vector<98x512xf32>
    %7 = arith.maximumf %5, %6 : vector<98x512xf32>
    %c0_6 = arith.constant 0 : index
    %c0_7 = arith.constant 0 : index
    %8 = vector.load %arg5[%c0_6, %c0_7] : memref<98x512xf32, #tpu.memory_space<vmem>>, vector<98x512xf32>
    tpu.vector_store %arg5[%c0_6, %c0_7], %7 {strides = array<i32>} : memref<98x512xf32, #tpu.memory_space<vmem>>, vector<98x512xf32>,
    return
  }
  func.func @transform_0(%arg0: i32, %arg1: i32) -> (i32, i32) {
    %c0_i32 = arith.constant 0 : i32
    %c0_i32_0 = arith.constant 0 : i32
    return %arg0, %c0_i32 : i32, i32
  }
  func.func @transform_1(%arg0: i32, %arg1: i32) -> (i32, i32) {
    %c0_i32 = arith.constant 0 : i32
    %c0_i32_0 = arith.constant 0 : i32
    return %c0_i32, %arg1 : i32, i32
  }
  func.func @transform_2(%arg0: i32, %arg1: i32) -> (i32, i32) {
    %c0_i32 = arith.constant 0 : i32
    %c0_i32_0 = arith.constant 0 : i32
    return %c0_i32, %arg1 : i32, i32
  }
  func.func @transform_3(%arg0: i32, %arg1: i32) -> (i32, i32) {
    %c0_i32 = arith.constant 0 : i32
    return %arg0, %arg1 : i32, i32
  }
}

module attributes {stable_mosaic.version = 11 : i64} {
  func.func @_mm_bias_act_kernel(%arg0: i32, %arg1: i32, %arg2: memref<256x512xbf16, #tpu.memory_space<vmem>>, %arg3: memref<512x256xbf16, #tpu.memory_space<vmem>>, %arg4: memref<1x256xf32, #tpu.memory_space<vmem>>, %arg5: memref<256x256xf32, #tpu.memory_space<vmem>>) attributes {dimension_semantics = [#tpu.dimension_semantics<parallel>, #tpu.dimension_semantics<parallel>], iteration_bounds = array<i64: 2, 1>, scalar_prefetch = 0 : i64, scratch_operands = 0 : i64, tpu.core_type = #tpu.core_type<tc>, window_params = [{transform_indices = @transform_0, window_bounds = array<i64: 256, 512>}, {transform_indices = @transform_1, window_bounds = array<i64: 512, 256>}, {transform_indices = @transform_2, window_bounds = array<i64: 1, 256>}, {transform_indices = @transform_3, window_bounds = array<i64: 256, 256>}]} {
    %c0 = arith.constant 0 : index
    %c0_0 = arith.constant 0 : index
    %0 = vector.load %arg2[%c0, %c0_0] : memref<256x512xbf16, #tpu.memory_space<vmem>>, vector<256x512xbf16>
    %c0_1 = arith.constant 0 : index
    %c0_2 = arith.constant 0 : index
    %1 = vector.load %arg3[%c0_1, %c0_2] : memref<512x256xbf16, #tpu.memory_space<vmem>>, vector<512x256xbf16>
    %cst = arith.constant dense<0.000000e+00> : vector<256x256xf32>
    %2 = tpu.matmul %0, %1, %cst {dimension_numbers = #tpu.dot_dimension_numbers<[1], [0], [0], [1], [0, 0, 1, 1], [], []>} : vector<256x512xbf16>, vector<512x256xbf16>, vector<256x256xf32> -> vector<256x256xf32>
    %c0_3 = arith.constant 0 : index
    %c0_4 = arith.constant 0 : index
    %3 = vector.load %arg4[%c0_3, %c0_4] : memref<1x256xf32, #tpu.memory_space<vmem>>, vector<1x256xf32>
    %4 = vector.broadcast %3 : vector<1x256xf32> to vector<256x256xf32>
    %5 = arith.addf %2, %4 : vector<256x256xf32>
    %cst_5 = arith.constant 0.000000e+00 : f32
    %6 = vector.broadcast %cst_5 : f32 to vector<256x256xf32>
    %7 = arith.maximumf %5, %6 : vector<256x256xf32>
    %c0_6 = arith.constant 0 : index
    %c0_7 = arith.constant 0 : index
    %8 = vector.load %arg5[%c0_6, %c0_7] : memref<256x256xf32, #tpu.memory_space<vmem>>, vector<256x256xf32>
    tpu.vector_store %arg5[%c0_6, %c0_7], %7 {strides = array<i32>} : memref<256x256xf32, #tpu.memory_space<vmem>>, vector<256x256xf32>,
    return
  }
  func.func @transform_0(%arg0: i32, %arg1: i32) -> (i32, i32) {
    %c0_i32 = arith.constant 0 : i32
    %c0_i32_0 = arith.constant 0 : i32
    return %arg0, %c0_i32 : i32, i32
  }
  func.func @transform_1(%arg0: i32, %arg1: i32) -> (i32, i32) {
    %c0_i32 = arith.constant 0 : i32
    %c0_i32_0 = arith.constant 0 : i32
    return %c0_i32, %arg1 : i32, i32
  }
  func.func @transform_2(%arg0: i32, %arg1: i32) -> (i32, i32) {
    %c0_i32 = arith.constant 0 : i32
    %c0_i32_0 = arith.constant 0 : i32
    return %c0_i32, %arg1 : i32, i32
  }
  func.func @transform_3(%arg0: i32, %arg1: i32) -> (i32, i32) {
    %c0_i32 = arith.constant 0 : i32
    return %arg0, %arg1 : i32, i32
  }
}

module attributes {stable_mosaic.version = 11 : i64} {
  func.func @_mm_bias_act_kernel(%arg0: i32, %arg1: i32, %arg2: memref<256x256xbf16, #tpu.memory_space<vmem>>, %arg3: memref<256x128xbf16, #tpu.memory_space<vmem>>, %arg4: memref<1x128xf32, #tpu.memory_space<vmem>>, %arg5: memref<256x128xf32, #tpu.memory_space<vmem>>) attributes {dimension_semantics = [#tpu.dimension_semantics<parallel>, #tpu.dimension_semantics<parallel>], iteration_bounds = array<i64: 5, 1>, scalar_prefetch = 0 : i64, scratch_operands = 0 : i64, tpu.core_type = #tpu.core_type<tc>, window_params = [{transform_indices = @transform_0, window_bounds = array<i64: 256, 256>}, {transform_indices = @transform_1, window_bounds = array<i64: 256, 128>}, {transform_indices = @transform_2, window_bounds = array<i64: 1, 128>}, {transform_indices = @transform_3, window_bounds = array<i64: 256, 128>}]} {
    %c0 = arith.constant 0 : index
    %c0_0 = arith.constant 0 : index
    %0 = vector.load %arg2[%c0, %c0_0] : memref<256x256xbf16, #tpu.memory_space<vmem>>, vector<256x256xbf16>
    %c0_1 = arith.constant 0 : index
    %c0_2 = arith.constant 0 : index
    %1 = vector.load %arg3[%c0_1, %c0_2] : memref<256x128xbf16, #tpu.memory_space<vmem>>, vector<256x128xbf16>
    %cst = arith.constant dense<0.000000e+00> : vector<256x128xf32>
    %2 = tpu.matmul %0, %1, %cst {dimension_numbers = #tpu.dot_dimension_numbers<[1], [0], [0], [1], [0, 0, 1, 1], [], []>} : vector<256x256xbf16>, vector<256x128xbf16>, vector<256x128xf32> -> vector<256x128xf32>
    %c0_3 = arith.constant 0 : index
    %c0_4 = arith.constant 0 : index
    %3 = vector.load %arg4[%c0_3, %c0_4] : memref<1x128xf32, #tpu.memory_space<vmem>>, vector<1x128xf32>
    %4 = vector.broadcast %3 : vector<1x128xf32> to vector<256x128xf32>
    %5 = arith.addf %2, %4 : vector<256x128xf32>
    %cst_5 = arith.constant 0.000000e+00 : f32
    %6 = vector.broadcast %cst_5 : f32 to vector<256x128xf32>
    %7 = arith.maximumf %5, %6 : vector<256x128xf32>
    %c0_6 = arith.constant 0 : index
    %c0_7 = arith.constant 0 : index
    %8 = vector.load %arg5[%c0_6, %c0_7] : memref<256x128xf32, #tpu.memory_space<vmem>>, vector<256x128xf32>
    tpu.vector_store %arg5[%c0_6, %c0_7], %7 {strides = array<i32>} : memref<256x128xf32, #tpu.memory_space<vmem>>, vector<256x128xf32>,
    return
  }
  func.func @transform_0(%arg0: i32, %arg1: i32) -> (i32, i32) {
    %c0_i32 = arith.constant 0 : i32
    %c0_i32_0 = arith.constant 0 : i32
    return %arg0, %c0_i32 : i32, i32
  }
  func.func @transform_1(%arg0: i32, %arg1: i32) -> (i32, i32) {
    %c0_i32 = arith.constant 0 : i32
    %c0_i32_0 = arith.constant 0 : i32
    return %c0_i32, %arg1 : i32, i32
  }
  func.func @transform_2(%arg0: i32, %arg1: i32) -> (i32, i32) {
    %c0_i32 = arith.constant 0 : i32
    %c0_i32_0 = arith.constant 0 : i32
    return %c0_i32, %arg1 : i32, i32
  }
  func.func @transform_3(%arg0: i32, %arg1: i32) -> (i32, i32) {
    %c0_i32 = arith.constant 0 : i32
    return %arg0, %arg1 : i32, i32
  }
}

module attributes {stable_mosaic.version = 11 : i64} {
  func.func @_mm_bias_act_kernel(%arg0: i32, %arg1: i32, %arg2: memref<256x128xbf16, #tpu.memory_space<vmem>>, %arg3: memref<128x12xbf16, #tpu.memory_space<vmem>>, %arg4: memref<1x12xf32, #tpu.memory_space<vmem>>, %arg5: memref<256x12xf32, #tpu.memory_space<vmem>>) attributes {dimension_semantics = [#tpu.dimension_semantics<parallel>, #tpu.dimension_semantics<parallel>], iteration_bounds = array<i64: 19, 1>, scalar_prefetch = 0 : i64, scratch_operands = 0 : i64, tpu.core_type = #tpu.core_type<tc>, window_params = [{transform_indices = @transform_0, window_bounds = array<i64: 256, 128>}, {transform_indices = @transform_1, window_bounds = array<i64: 128, 12>}, {transform_indices = @transform_2, window_bounds = array<i64: 1, 12>}, {transform_indices = @transform_3, window_bounds = array<i64: 256, 12>}]} {
    %c0 = arith.constant 0 : index
    %c0_0 = arith.constant 0 : index
    %0 = vector.load %arg2[%c0, %c0_0] : memref<256x128xbf16, #tpu.memory_space<vmem>>, vector<256x128xbf16>
    %c0_1 = arith.constant 0 : index
    %c0_2 = arith.constant 0 : index
    %1 = vector.load %arg3[%c0_1, %c0_2] : memref<128x12xbf16, #tpu.memory_space<vmem>>, vector<128x12xbf16>
    %cst = arith.constant dense<0.000000e+00> : vector<256x12xf32>
    %2 = tpu.matmul %0, %1, %cst {dimension_numbers = #tpu.dot_dimension_numbers<[1], [0], [0], [1], [0, 0, 1, 1], [], []>} : vector<256x128xbf16>, vector<128x12xbf16>, vector<256x12xf32> -> vector<256x12xf32>
    %c0_3 = arith.constant 0 : index
    %c0_4 = arith.constant 0 : index
    %3 = vector.load %arg4[%c0_3, %c0_4] : memref<1x12xf32, #tpu.memory_space<vmem>>, vector<1x12xf32>
    %4 = vector.broadcast %3 : vector<1x12xf32> to vector<256x12xf32>
    %5 = arith.addf %2, %4 : vector<256x12xf32>
    %6 = arith.negf %5 : vector<256x12xf32>
    %7 = math.exp %6 : vector<256x12xf32>
    %cst_5 = arith.constant 1.000000e+00 : f32
    %8 = vector.broadcast %cst_5 : f32 to vector<256x12xf32>
    %9 = arith.addf %8, %7 : vector<256x12xf32>
    %10 = arith.divf %8, %9 : vector<256x12xf32>
    %c0_6 = arith.constant 0 : index
    %c0_7 = arith.constant 0 : index
    %11 = vector.load %arg5[%c0_6, %c0_7] : memref<256x12xf32, #tpu.memory_space<vmem>>, vector<256x12xf32>
    tpu.vector_store %arg5[%c0_6, %c0_7], %10 {strides = array<i32>} : memref<256x12xf32, #tpu.memory_space<vmem>>, vector<256x12xf32>,
    return
  }
  func.func @transform_0(%arg0: i32, %arg1: i32) -> (i32, i32) {
    %c0_i32 = arith.constant 0 : i32
    %c0_i32_0 = arith.constant 0 : i32
    return %arg0, %c0_i32 : i32, i32
  }
  func.func @transform_1(%arg0: i32, %arg1: i32) -> (i32, i32) {
    %c0_i32 = arith.constant 0 : i32
    %c0_i32_0 = arith.constant 0 : i32
    return %c0_i32, %arg1 : i32, i32
  }
  func.func @transform_2(%arg0: i32, %arg1: i32) -> (i32, i32) {
    %c0_i32 = arith.constant 0 : i32
    %c0_i32_0 = arith.constant 0 : i32
    return %c0_i32, %arg1 : i32, i32
  }
  func.func @transform_3(%arg0: i32, %arg1: i32) -> (i32, i32) {
    %c0_i32 = arith.constant 0 : i32
    return %arg0, %arg1 : i32, i32
  }
}

</mosaic_0001>

<bundles_post_ra>
// kernel: vae_forward.10
= control target key start
LH: loop header
LB: loop body
LE: loop exit
PB: predicated region body
PF: predicated region fallthrough
CT: control target
= control target key end

     0   :  { %s945_s12 = smov 0   ;;  %s947_s13 = smov 0   ;;  %s1128_s0 = inlined_call_operand.vmem [shape: bf16[4608,48], index: 0, kind: input, shape index: {}]   ;;  %s1129_s1 = inlined_call_operand.vmem [shape: bf16[48,32], index: 1, kind: input, shape index: {}]   ;;  %s1130_s2 = inlined_call_operand.vmem [shape: f32[1,32], index: 2, kind: input, shape index: {}]   ;;  %s1131_s3 = inlined_call_operand.vmem [shape: f32[4608,32], index: 3, kind: output, shape index: {}]  }
   0x1   :  { %s949_s14 = smov 0  }
   0x2 LB: > { %s25_s15 = sadd.s32 1, %s919_s13  ;;  %p752_p0 = scmp.ge.s32.totalorder %s923_s14, 1  ;;  %s923_s14 = sphi %s949_s14, %s13_s14   ;;  %s919_s13 = sphi %s947_s13, %s1133_s13   ;;  %s915_s12 = sphi %s945_s12, %s1132_s12  }
   0x3   : > { %p27_p1 = scmp.ge.s32.totalorder %s25_s15, 18  ;;  %p169_p2 = scmp.lt.s32.totalorder %s923_s14, 19 }
   0x5   : > { %s1135_s15 = smov (%p27_p1, %s25_s15), 0  ;;  %p170_p3 = pnand %p752_p0, %p169_p2 }
   0x6   : > { %v882_v0 = vld [vmem:[%s1129_s1] sm:$0xff] (!%p170_p3)   ;;  %s753_s18 = sshll.u32 (!%p170_p3), %s915_s12, 5  ;;  %v883_v1 = vld [vmem:[%s1129_s1 + $0x8] sm:$0xff] (!%p170_p3)   ;;  %v884_v2 = vld [vmem:[%s1129_s1 + $0x10] sm:$0xff] (!%p170_p3)   ;;  %vm369_vm0 = vcmask (!%p170_p3), 392192   ;;  %vm611_vm1 = vcmask (!%p170_p3), 261120  }
   0x7   : > { %173 = sbr.rel (%p170_p3) target bundleno = 264 (0x108), region = 32  ;;  %p204_p4 = scmp.lt.s32.totalorder (!%p170_p3), %s753_s18, 575  ;;  %814 = vmatprep.subr.bf16.mxu0 (!%p170_p3), %v882_v0  ;;  %852 = vmatprep.subr.bf16.mxu1 (!%p170_p3), %v882_v0  ;;  %v1015_v19 = vld [vmem:[%s1130_s2] ss:$0 sm:$0xff] (!%p170_p3) }
   0x8   : > { %815 = vmatpush3.bf16.msra.mxu0 (!%p170_p3), %v882_v0  ;;  %855 = vmatpush3.bf16.msra.mxu1 (!%p170_p3), %v882_v0 }
   0x9   : > { %816 = vmatprep.subr.bf16.mxu0 (!%p170_p3), %v883_v1  ;;  %853 = vmatprep.subr.bf16.mxu1 (!%p170_p3), %v883_v1 }
   0xc   : > { %817 = vmatpush3.bf16.msra.mxu0 (!%p170_p3), %v883_v1  ;;  %856 = vmatpush3.bf16.msra.mxu1 (!%p170_p3), %v883_v1 }
   0xd   : > { %818 = vmatprep.subr.bf16.mxu0 (!%p170_p3), %v884_v2  ;;  %854 = vmatprep.subr.bf16.mxu1 (!%p170_p3), %v884_v2 }
   0xe   : > { %s1137_s18 = smov (!%p204_p4, %s753_s18), 575 }
   0xf   : > { %s754_s23 = sshll.u32 %s1137_s18, 2  ;;  %s756_s29 = sshll.u32 %s1137_s18, 3 }
  0x10   : > { %s978_s26 = scalar_lea.vmem %s1128_s0, %s754_s23  ;;  %819 = vmatpush3.bf16.msra.mxu0 %v884_v2  ;;  %857 = vmatpush3.bf16.msra.mxu1 %v884_v2  ;;  %s1023_s5 = scalar_lea.vmem %s1131_s3, %s756_s29 }
  0x11   : > { %v885_v3 = vld [vmem:[%s978_s26] sm:$0xff]   ;;  %v887_v5 = vld [vmem:[%s978_s26 + $0x8] sm:$0xff]   ;;  %v889_v7 = vld [vmem:[%s978_s26 + $0x10] sm:$0xff]  }
  0x12   : > { %v886_v4 = vld [vmem:[%s978_s26 + $0x40] sm:$0xff]   ;;  %820 = vmatprep.mubr.msk.bf16.mxu0 %vm369_vm0, %v885_v3  ;;  %v888_v6 = vld [vmem:[%s978_s26 + $0x48] sm:$0xff]   ;;  %v890_v8 = vld [vmem:[%s978_s26 + $0x50] sm:$0xff]  }
  0x13   : > { %836 = vmatprep.mubr.msk.bf16.mxu1 %vm369_vm0, %v886_v4  ;;  %821 = vmatmul.mubr.msk.bf16.vlgmr.msra.gmra.mrb[0].mxu0 %vm369_vm0, %v887_v5  ;;  %v891_v9 = vld [vmem:[%s978_s26 + $0x18] sm:$0xff]   ;;  %v893_v11 = vld [vmem:[%s978_s26 + $0x20] sm:$0xff]   ;;  %v895_v13 = vld [vmem:[%s978_s26 + $0x28] sm:$0xff]  }
  0x14   : > { %837 = vmatmul.mubr.msk.bf16.vlgmr.msra.gmra.mrb[0].mxu1 %vm369_vm0, %v888_v6  ;;  %824 = vmatprep.mubr.msk.bf16.mxu0 %vm369_vm0, %v889_v7  ;;  %v892_v10 = vld [vmem:[%s978_s26 + $0x58] sm:$0xff]   ;;  %v894_v12 = vld [vmem:[%s978_s26 + $0x60] sm:$0xff]   ;;  %v896_v14 = vld [vmem:[%s978_s26 + $0x68] sm:$0xff]  }
  0x15   : > { %840 = vmatprep.mubr.msk.bf16.mxu1 %vm369_vm0, %v890_v8  ;;  %v897_v15 = vld [vmem:[%s978_s26 + $0x30] sm:$0xff]   ;;  %v899_v17 = vld [vmem:[%s978_s26 + $0x38] sm:$0xff]  }
  0x16   : > { %v898_v16 = vld [vmem:[%s978_s26 + $0x70] sm:$0xff]   ;;  %v900_v18 = vld [vmem:[%s978_s26 + $0x78] sm:$0xff]  }
  0x1b   : > { %825 = vmatmul.mubr.msk.bf16.gmra.mrb[4].mxu0 %vm369_vm0, %v891_v9 }
  0x1c   : > { %841 = vmatmul.mubr.msk.bf16.gmra.mrb[4].mxu1 %vm369_vm0, %v892_v10  ;;  %828 = vmatprep.mubr.msk.bf16.mxu0 %vm369_vm0, %v893_v11 }
  0x1d   : > { %844 = vmatprep.mubr.msk.bf16.mxu1 %vm369_vm0, %v894_v12 }
  0x23   : > { %829 = vmatmul.mubr.msk.bf16.gmra.mrb[8].mxu0 %vm369_vm0, %v895_v13 }
  0x24   : > { %845 = vmatmul.mubr.msk.bf16.gmra.mrb[8].mxu1 %vm369_vm0, %v896_v14  ;;  %832 = vmatprep.mubr.msk.bf16.mxu0 %vm369_vm0, %v897_v15 }
  0x25   : > { %848 = vmatprep.mubr.msk.bf16.mxu1 %vm369_vm0, %v898_v16 }
  0x2b   : > { %833 = vmatmul.mubr.msk.bf16.gmra.mrb[12].mxu0 %vm369_vm0, %v899_v17 }
  0x2c   : > { %849 = vmatmul.mubr.msk.bf16.gmra.mrb[12].mxu1 %vm369_vm0, %v900_v18 }
  0xe6   : > { %v822_v20 = vpop.f32.mrb[0].mxu0 }
  0xe7   : > { %v838_v21 = vpop.f32.mrb[0].mxu1  ;;  %v461_v22 = vadd.f32 %v822_v20, %v1015_v19  ;;  %v452_v24 = vpop.f32.mrb[1].mxu0 }
  0xe8   : > { %v525_v23 = vadd.f32 %v838_v21, %v1015_v19  ;;  %v516_v25 = vpop.f32.mrb[1].mxu1  ;;  %v453_v26 = vadd.f32 %v1015_v19, %v452_v24  ;;  %v823_v28 = vpop.f32.mrb[2].mxu0 }
  0xe9   : > { %v517_v27 = vadd.f32 %v1015_v19, %v516_v25  ;;  %v839_v29 = vpop.f32.mrb[2].mxu1  ;;  %v581_v30 = vmax.f32 %v461_v22, 0.0  ;;  %v464_v32 = vadd.f32 %v823_v28, %v1015_v19  ;;  %v455_v34 = vpop.f32.mrb[3].mxu0 }
  0xea   : > { %v597_v31 = vmax.f32 %v525_v23, 0.0  ;;  %v528_v33 = vadd.f32 %v839_v29, %v1015_v19  ;;  %v519_v35 = vpop.f32.mrb[3].mxu1  ;;  %v579_v36 = vmax.f32 %v453_v26, 0.0  ;;  %v456_v38 = vadd.f32 %v1015_v19, %v455_v34 }
  0xeb   : > { %v595_v37 = vmax.f32 %v517_v27, 0.0  ;;  %v520_v39 = vadd.f32 %v1015_v19, %v519_v35  ;;  %614 = vst.msk [vmem:[%s1023_s5 + $0x10] sm:$0xff] %vm611_vm1, %v581_v30  ;;  %v582_v40 = vmax.f32 %v464_v32, 0.0 }
  0xec   : > { %630 = vst.msk [vmem:[%s1023_s5 + $0x90] sm:$0xff] %vm611_vm1, %v597_v31  ;;  %v598_v41 = vmax.f32 %v528_v33, 0.0  ;;  %612 = vst.msk [vmem:[%s1023_s5] sm:$0xff] %vm611_vm1, %v579_v36  ;;  %v580_v42 = vmax.f32 %v456_v38, 0.0 }
  0xed   : > { %628 = vst.msk [vmem:[%s1023_s5 + $0x80] sm:$0xff] %vm611_vm1, %v595_v37  ;;  %v596_v43 = vmax.f32 %v520_v39, 0.0  ;;  %615 = vst.msk [vmem:[%s1023_s5 + $0x18] sm:$0xff] %vm611_vm1, %v582_v40 }
  0xee   : > { %631 = vst.msk [vmem:[%s1023_s5 + $0x98] sm:$0xff] %vm611_vm1, %v598_v41  ;;  %613 = vst.msk [vmem:[%s1023_s5 + $0x8] sm:$0xff] %vm611_vm1, %v580_v42  ;;  %v826_v44 = vpop.f32.mrb[4].mxu0 }
  0xef   : > { %629 = vst.msk [vmem:[%s1023_s5 + $0x88] sm:$0xff] %vm611_vm1, %v596_v43  ;;  %v842_v45 = vpop.f32.mrb[4].mxu1  ;;  %v477_v46 = vadd.f32 %v826_v44, %v1015_v19  ;;  %v468_v48 = vpop.f32.mrb[5].mxu0 }
  0xf0   : > { %v541_v47 = vadd.f32 %v842_v45, %v1015_v19  ;;  %v532_v49 = vpop.f32.mrb[5].mxu1  ;;  %v469_v50 = vadd.f32 %v1015_v19, %v468_v48  ;;  %v827_v52 = vpop.f32.mrb[6].mxu0 }
  0xf1   : > { %v533_v51 = vadd.f32 %v1015_v19, %v532_v49  ;;  %v843_v53 = vpop.f32.mrb[6].mxu1  ;;  %v585_v54 = vmax.f32 %v477_v46, 0.0  ;;  %v480_v56 = vadd.f32 %v827_v52, %v1015_v19  ;;  %v471_v58 = vpop.f32.mrb[7].mxu0 }
  0xf2   : > { %v601_v55 = vmax.f32 %v541_v47, 0.0  ;;  %v544_v57 = vadd.f32 %v843_v53, %v1015_v19  ;;  %v535_v59 = vpop.f32.mrb[7].mxu1  ;;  %v583_v60 = vmax.f32 %v469_v50, 0.0  ;;  %v472_v62 = vadd.f32 %v1015_v19, %v471_v58 }
  0xf3   : > { %v599_v61 = vmax.f32 %v533_v51, 0.0  ;;  %v536_v63 = vadd.f32 %v1015_v19, %v535_v59  ;;  %618 = vst.msk [vmem:[%s1023_s5 + $0x30] sm:$0xff] %vm611_vm1, %v585_v54  ;;  %v586_v0 = vmax.f32 %v480_v56, 0.0 }
  0xf4   : > { %634 = vst.msk [vmem:[%s1023_s5 + $0xb0] sm:$0xff] %vm611_vm1, %v601_v55  ;;  %v602_v1 = vmax.f32 %v544_v57, 0.0  ;;  %616 = vst.msk [vmem:[%s1023_s5 + $0x20] sm:$0xff] %vm611_vm1, %v583_v60  ;;  %v584_v2 = vmax.f32 %v472_v62, 0.0 }
  0xf5   : > { %632 = vst.msk [vmem:[%s1023_s5 + $0xa0] sm:$0xff] %vm611_vm1, %v599_v61  ;;  %v600_v3 = vmax.f32 %v536_v63, 0.0  ;;  %619 = vst.msk [vmem:[%s1023_s5 + $0x38] sm:$0xff] %vm611_vm1, %v586_v0 }
  0xf6   : > { %635 = vst.msk [vmem:[%s1023_s5 + $0xb8] sm:$0xff] %vm611_vm1, %v602_v1  ;;  %617 = vst.msk [vmem:[%s1023_s5 + $0x28] sm:$0xff] %vm611_vm1, %v584_v2  ;;  %v830_v4 = vpop.f32.mrb[8].mxu0 }
  0xf7   : > { %633 = vst.msk [vmem:[%s1023_s5 + $0xa8] sm:$0xff] %vm611_vm1, %v600_v3  ;;  %v846_v5 = vpop.f32.mrb[8].mxu1  ;;  %v493_v6 = vadd.f32 %v830_v4, %v1015_v19  ;;  %v484_v8 = vpop.f32.mrb[9].mxu0 }
  0xf8   : > { %v557_v7 = vadd.f32 %v846_v5, %v1015_v19  ;;  %v548_v9 = vpop.f32.mrb[9].mxu1  ;;  %v485_v10 = vadd.f32 %v1015_v19, %v484_v8  ;;  %v831_v12 = vpop.f32.mrb[10].mxu0 }
  0xf9   : > { %v549_v11 = vadd.f32 %v1015_v19, %v548_v9  ;;  %v847_v13 = vpop.f32.mrb[10].mxu1  ;;  %v589_v14 = vmax.f32 %v493_v6, 0.0  ;;  %v496_v16 = vadd.f32 %v831_v12, %v1015_v19  ;;  %v487_v18 = vpop.f32.mrb[11].mxu0 }
  0xfa   : > { %v605_v15 = vmax.f32 %v557_v7, 0.0  ;;  %v560_v17 = vadd.f32 %v847_v13, %v1015_v19  ;;  %v551_v20 = vpop.f32.mrb[11].mxu1  ;;  %v587_v21 = vmax.f32 %v485_v10, 0.0  ;;  %v488_v23 = vadd.f32 %v1015_v19, %v487_v18 }
  0xfb   : > { %v603_v22 = vmax.f32 %v549_v11, 0.0  ;;  %v552_v24 = vadd.f32 %v1015_v19, %v551_v20  ;;  %622 = vst.msk [vmem:[%s1023_s5 + $0x50] sm:$0xff] %vm611_vm1, %v589_v14  ;;  %v590_v25 = vmax.f32 %v496_v16, 0.0 }
  0xfc   : > { %638 = vst.msk [vmem:[%s1023_s5 + $0xd0] sm:$0xff] %vm611_vm1, %v605_v15  ;;  %v606_v26 = vmax.f32 %v560_v17, 0.0  ;;  %620 = vst.msk [vmem:[%s1023_s5 + $0x40] sm:$0xff] %vm611_vm1, %v587_v21  ;;  %v588_v27 = vmax.f32 %v488_v23, 0.0 }
  0xfd   : > { %636 = vst.msk [vmem:[%s1023_s5 + $0xc0] sm:$0xff] %vm611_vm1, %v603_v22  ;;  %v604_v28 = vmax.f32 %v552_v24, 0.0  ;;  %623 = vst.msk [vmem:[%s1023_s5 + $0x58] sm:$0xff] %vm611_vm1, %v590_v25 }
  0xfe   : > { %639 = vst.msk [vmem:[%s1023_s5 + $0xd8] sm:$0xff] %vm611_vm1, %v606_v26  ;;  %621 = vst.msk [vmem:[%s1023_s5 + $0x48] sm:$0xff] %vm611_vm1, %v588_v27  ;;  %v834_v29 = vpop.f32.mrb[12].mxu0 }
  0xff   : > { %637 = vst.msk [vmem:[%s1023_s5 + $0xc8] sm:$0xff] %vm611_vm1, %v604_v28  ;;  %v850_v30 = vpop.f32.mrb[12].mxu1  ;;  %v509_v31 = vadd.f32 %v834_v29, %v1015_v19  ;;  %v500_v33 = vpop.f32.mrb[13].mxu0 }
 0x100   : > { %v573_v32 = vadd.f32 %v850_v30, %v1015_v19  ;;  %v564_v34 = vpop.f32.mrb[13].mxu1  ;;  %v501_v35 = vadd.f32 %v1015_v19, %v500_v33  ;;  %v835_v37 = vpop.f32.mrb[14].mxu0 }
 0x101   : > { %v565_v36 = vadd.f32 %v1015_v19, %v564_v34  ;;  %v851_v38 = vpop.f32.mrb[14].mxu1  ;;  %v593_v39 = vmax.f32 %v509_v31, 0.0  ;;  %v512_v41 = vadd.f32 %v835_v37, %v1015_v19  ;;  %v503_v43 = vpop.f32.mrb[15].mxu0 }
 0x102   : > { %v609_v40 = vmax.f32 %v573_v32, 0.0  ;;  %v576_v42 = vadd.f32 %v851_v38, %v1015_v19  ;;  %v567_v44 = vpop.f32.mrb[15].mxu1  ;;  %v591_v45 = vmax.f32 %v501_v35, 0.0  ;;  %v504_v47 = vadd.f32 %v1015_v19, %v503_v43 }
 0x103   : > { %v607_v46 = vmax.f32 %v565_v36, 0.0  ;;  %v568_v48 = vadd.f32 %v1015_v19, %v567_v44  ;;  %626 = vst.msk [vmem:[%s1023_s5 + $0x70] sm:$0xff] %vm611_vm1, %v593_v39  ;;  %v594_v49 = vmax.f32 %v512_v41, 0.0 }
 0x104   : > { %642 = vst.msk [vmem:[%s1023_s5 + $0xf0] sm:$0xff] %vm611_vm1, %v609_v40  ;;  %v610_v50 = vmax.f32 %v576_v42, 0.0  ;;  %624 = vst.msk [vmem:[%s1023_s5 + $0x60] sm:$0xff] %vm611_vm1, %v591_v45  ;;  %v592_v51 = vmax.f32 %v504_v47, 0.0 }
 0x105   : > { %640 = vst.msk [vmem:[%s1023_s5 + $0xe0] sm:$0xff] %vm611_vm1, %v607_v46  ;;  %v608_v52 = vmax.f32 %v568_v48, 0.0  ;;  %627 = vst.msk [vmem:[%s1023_s5 + $0x78] sm:$0xff] %vm611_vm1, %v594_v49 }
 0x106   : > { %643 = vst.msk [vmem:[%s1023_s5 + $0xf8] sm:$0xff] %vm611_vm1, %v610_v50  ;;  %625 = vst.msk [vmem:[%s1023_s5 + $0x68] sm:$0xff] %vm611_vm1, %v592_v51 }
 0x107   : > { %641 = vst.msk [vmem:[%s1023_s5 + $0xe8] sm:$0xff] %vm611_vm1, %v608_v52 }
 0x108 PF: > { %s13_s14 = sadd.s32 1, %s923_s14   ;;  %s1132_s12 = smov %s919_s13 }
 0x109   : > { %p10_p5 = scmp.ge.s32.totalorder %s13_s14, 20   ;;  %s1133_s13 = smov %s1135_s15 }
 0x10b   :  { %12 = sbr.rel (!%p10_p5) target bundleno = 2 (0x2), region = 68 }

// kernel: vae_forward.11
= control target key start
LH: loop header
LB: loop body
LE: loop exit
PB: predicated region body
PF: predicated region fallthrough
CT: control target
= control target key end

     0   :  { %s1897_s12 = smov 0   ;;  %s1899_s13 = smov 0   ;;  %s2202_s0 = inlined_call_operand.vmem [shape: bf16[1024,512], index: 0, kind: input, shape index: {}]   ;;  %s2203_s1 = inlined_call_operand.vmem [shape: bf16[512,64], index: 1, kind: input, shape index: {}]   ;;  %s2204_s2 = inlined_call_operand.vmem [shape: f32[1,64], index: 2, kind: input, shape index: {}]   ;;  %s2205_s3 = inlined_call_operand.vmem [shape: f32[1024,64], index: 3, kind: output, shape index: {}]  }
   0x1   :  { %s1901_s14 = smov 0  }
   0x2 LB: > { %s25_s15 = sadd.s32 1, %s1871_s13  ;;  %p1371_p0 = scmp.ge.s32.totalorder %s1875_s14, 1  ;;  %s1875_s14 = sphi %s1901_s14, %s13_s14   ;;  %s1871_s13 = sphi %s1899_s13, %s2207_s13   ;;  %s1867_s12 = sphi %s1897_s12, %s2206_s12  }
   0x3   : > { %p27_p1 = scmp.ge.s32.totalorder %s25_s15, 4  ;;  %p170_p2 = scmp.lt.s32.totalorder %s1875_s14, 5 }
   0x5   : > { %s2209_s15 = smov (%p27_p1, %s25_s15), 0  ;;  %p171_p3 = pnand %p1371_p0, %p170_p2 }
   0x6   : > { %v1725_v0 = vld [vmem:[%s2203_s1 + $0x40] sm:$0xff] (!%p171_p3)   ;;  %v1729_v4 = vld [vmem:[%s2203_s1 + $0x48] sm:$0xff] (!%p171_p3)   ;;  %v1733_v8 = vld [vmem:[%s2203_s1 + $0x50] sm:$0xff] (!%p171_p3)   ;;  %s1372_s25 = sshll.u32 (!%p171_p3), %s1867_s12, 5  ;;  %vm1230_vm0 = vcmask (!%p171_p3), 523264  }
   0x7   : > { %174 = sbr.rel (%p171_p3) target bundleno = 384 (0x180), region = 32  ;;  %v1726_v1 = vld [vmem:[%s2203_s1 + $0xc0] sm:$0xff] (!%p171_p3)   ;;  %1477 = vmatprep.subr.bf16.mxu0 (!%p171_p3), %v1725_v0  ;;  %v1730_v5 = vld [vmem:[%s2203_s1 + $0xc8] sm:$0xff] (!%p171_p3)   ;;  %v1734_v9 = vld [vmem:[%s2203_s1 + $0xd0] sm:$0xff] (!%p171_p3)   ;;  %p206_p4 = scmp.lt.s32.totalorder (!%p171_p3), %s1372_s25, 127 }
   0x8   : > { %v1727_v2 = vld [vmem:[%s2203_s1] sm:$0xff] (!%p171_p3)   ;;  %1589 = vmatprep.subr.bf16.mxu1 (!%p171_p3), %v1726_v1  ;;  %v1731_v6 = vld [vmem:[%s2203_s1 + $0x8] sm:$0xff] (!%p171_p3)   ;;  %v1735_v10 = vld [vmem:[%s2203_s1 + $0x10] sm:$0xff] (!%p171_p3)  }
   0x9   : > { %v1728_v3 = vld [vmem:[%s2203_s1 + $0x80] sm:$0xff] (!%p171_p3)   ;;  %1478 = vmatpush3.bf16.msra.mxu0 (!%p171_p3), %v1727_v2  ;;  %v1732_v7 = vld [vmem:[%s2203_s1 + $0x88] sm:$0xff] (!%p171_p3)   ;;  %v1736_v11 = vld [vmem:[%s2203_s1 + $0x90] sm:$0xff] (!%p171_p3)  }
   0xa   : > { %1590 = vmatpush3.bf16.msra.mxu1 (!%p171_p3), %v1728_v3  ;;  %1479 = vmatprep.subr.bf16.mxu0 (!%p171_p3), %v1729_v4  ;;  %v1737_v12 = vld [vmem:[%s2203_s1 + $0x58] sm:$0xff] (!%p171_p3)   ;;  %v1741_v16 = vld [vmem:[%s2203_s1 + $0x60] sm:$0xff] (!%p171_p3)   ;;  %v1745_v20 = vld [vmem:[%s2203_s1 + $0x68] sm:$0xff] (!%p171_p3)  }
   0xb   : > { %1591 = vmatprep.subr.bf16.mxu1 (!%p171_p3), %v1730_v5  ;;  %v1738_v13 = vld [vmem:[%s2203_s1 + $0xd8] sm:$0xff] (!%p171_p3)   ;;  %v1742_v17 = vld [vmem:[%s2203_s1 + $0xe0] sm:$0xff] (!%p171_p3)   ;;  %v1746_v21 = vld [vmem:[%s2203_s1 + $0xe8] sm:$0xff] (!%p171_p3)  }
   0xc   : > { %v1739_v14 = vld [vmem:[%s2203_s1 + $0x18] sm:$0xff] (!%p171_p3)   ;;  %v1743_v18 = vld [vmem:[%s2203_s1 + $0x20] sm:$0xff] (!%p171_p3)   ;;  %v1747_v22 = vld [vmem:[%s2203_s1 + $0x28] sm:$0xff] (!%p171_p3)  }
   0xd   : > { %1480 = vmatpush3.bf16.msra.mxu0 (!%p171_p3), %v1731_v6  ;;  %v1740_v15 = vld [vmem:[%s2203_s1 + $0x98] sm:$0xff] (!%p171_p3)   ;;  %v1744_v19 = vld [vmem:[%s2203_s1 + $0xa0] sm:$0xff] (!%p171_p3)   ;;  %v1748_v23 = vld [vmem:[%s2203_s1 + $0xa8] sm:$0xff] (!%p171_p3)  }
   0xe   : > { %1592 = vmatpush3.bf16.msra.mxu1 %v1732_v7  ;;  %1481 = vmatprep.subr.bf16.mxu0 %v1733_v8  ;;  %s2211_s25 = smov (!%p206_p4, %s1372_s25), 127  ;;  %v1749_v24 = vld [vmem:[%s2203_s1 + $0x70] sm:$0xff]   ;;  %v1753_v28 = vld [vmem:[%s2203_s1 + $0x78] sm:$0xff]  }
   0xf   : > { %1593 = vmatprep.subr.bf16.mxu1 %v1734_v9  ;;  %v1750_v25 = vld [vmem:[%s2203_s1 + $0xf0] sm:$0xff]   ;;  %s1476_s24 = sshll.u32 %s2211_s25, 4  ;;  %v1754_v29 = vld [vmem:[%s2203_s1 + $0xf8] sm:$0xff]   ;;  %s1376_s17 = sshll.u32 %s2211_s25, 3 }
  0x10   : > { %v1751_v26 = vld [vmem:[%s2203_s1 + $0x30] sm:$0xff]   ;;  %s2014_s12 = scalar_lea.vmem %s2202_s0, %s1476_s24  ;;  %v1755_v30 = vld [vmem:[%s2203_s1 + $0x38] sm:$0xff]   ;;  %s2097_s20 = scalar_lea.vmem %s2205_s3, %s1376_s17 }
  0x11   : > { %1482 = vmatpush3.bf16.msra.mxu0 %v1735_v10  ;;  %v1752_v27 = vld [vmem:[%s2203_s1 + $0xb0] sm:$0xff]   ;;  %v1756_v31 = vld [vmem:[%s2203_s1 + $0xb8] sm:$0xff]  }
  0x12   : > { %1594 = vmatpush3.bf16.msra.mxu1 %v1736_v11  ;;  %1483 = vmatprep.subr.bf16.mxu0 %v1737_v12  ;;  %v1757_v32 = vld [vmem:[%s2014_s12] ss:$16 sps:$4 sm:$0xff]   ;;  %v1759_v33 = vld [vmem:[%s2014_s12 + $0x4] ss:$16 sps:$4 sm:$0xff]   ;;  %v1760_v34 = vld [vmem:[%s2014_s12 + $0x8] ss:$16 sps:$4 sm:$0xff]  }
  0x13   : > { %1595 = vmatprep.subr.bf16.mxu1 %v1738_v13  ;;  %v1762_v35 = vld [vmem:[%s2014_s12 + $0xc] ss:$16 sps:$4 sm:$0xff]   ;;  %908 = vmatprep.mubr.bf16.mxu0 %v1759_v33  ;;  %v1763_v36 = vld [vmem:[%s2014_s12 + $0x24] ss:$16 sps:$4 sm:$0xff]   ;;  %v1767_v38 = vld [vmem:[%s2014_s12 + $0x20] ss:$16 sps:$4 sm:$0xff]  }
  0x14   : > { %1069 = vmatprep.mubr.bf16.mxu1 %v1762_v35  ;;  %v1765_v37 = vld [vmem:[%s2014_s12 + $0x2c] ss:$16 sps:$4 sm:$0xff]   ;;  %v1768_v39 = vld [vmem:[%s2014_s12 + $0x28] ss:$16 sps:$4 sm:$0xff]   ;;  %v1769_v40 = vld [vmem:[%s2014_s12 + $0x44] ss:$16 sps:$4 sm:$0xff]  }
  0x15   : > { %1484 = vmatpush3.bf16.msra.mxu0 %v1739_v14  ;;  %v1771_v41 = vld [vmem:[%s2014_s12 + $0x4c] ss:$16 sps:$4 sm:$0xff]   ;;  %v1773_v42 = vld [vmem:[%s2014_s12 + $0x40] ss:$16 sps:$4 sm:$0xff]   ;;  %v1774_v43 = vld [vmem:[%s2014_s12 + $0x48] ss:$16 sps:$4 sm:$0xff]  }
  0x16   : > { %1596 = vmatpush3.bf16.msra.mxu1 %v1740_v15  ;;  %1485 = vmatprep.subr.bf16.mxu0 %v1741_v16  ;;  %v1775_v44 = vld [vmem:[%s2014_s12 + $0x64] ss:$16 sps:$4 sm:$0xff]   ;;  %v1777_v45 = vld [vmem:[%s2014_s12 + $0x6c] ss:$16 sps:$4 sm:$0xff]   ;;  %v1779_v46 = vld [vmem:[%s2014_s12 + $0x60] ss:$16 sps:$4 sm:$0xff]  }
  0x17   : > { %1597 = vmatprep.subr.bf16.mxu1 %v1742_v17  ;;  %v1780_v47 = vld [vmem:[%s2014_s12 + $0x68] ss:$16 sps:$4 sm:$0xff]   ;;  %v1781_v48 = vld [vmem:[%s2014_s12 + $0x84] ss:$16 sps:$4 sm:$0xff]   ;;  %v1783_v49 = vld [vmem:[%s2014_s12 + $0x8c] ss:$16 sps:$4 sm:$0xff]  }
  0x18   : > { %v1785_v50 = vld [vmem:[%s2014_s12 + $0x80] ss:$16 sps:$4 sm:$0xff]   ;;  %v1786_v51 = vld [vmem:[%s2014_s12 + $0x88] ss:$16 sps:$4 sm:$0xff]   ;;  %v1787_v52 = vld [vmem:[%s2014_s12 + $0xa4] ss:$16 sps:$4 sm:$0xff]  }
  0x19   : > { %1486 = vmatpush3.bf16.msra.mxu0 %v1743_v18  ;;  %v1789_v53 = vld [vmem:[%s2014_s12 + $0xac] ss:$16 sps:$4 sm:$0xff]   ;;  %v1791_v54 = vld [vmem:[%s2014_s12 + $0xa0] ss:$16 sps:$4 sm:$0xff]   ;;  %v1792_v55 = vld [vmem:[%s2014_s12 + $0xa8] ss:$16 sps:$4 sm:$0xff]  }
  0x1a   : > { %1598 = vmatpush3.bf16.msra.mxu1 %v1744_v19  ;;  %1487 = vmatprep.subr.bf16.mxu0 %v1745_v20  ;;  %v1793_v56 = vld [vmem:[%s2014_s12 + $0xc4] ss:$16 sps:$4 sm:$0xff]   ;;  %v1795_v57 = vld [vmem:[%s2014_s12 + $0xcc] ss:$16 sps:$4 sm:$0xff]   ;;  %v1797_v58 = vld [vmem:[%s2014_s12 + $0xc0] ss:$16 sps:$4 sm:$0xff]  }
  0x1b   : > { %1599 = vmatprep.subr.bf16.mxu1 %v1746_v21  ;;  %v1798_v59 = vld [vmem:[%s2014_s12 + $0xc8] ss:$16 sps:$4 sm:$0xff]   ;;  %v1799_v60 = vld [vmem:[%s2014_s12 + $0xe4] ss:$16 sps:$4 sm:$0xff]   ;;  %v1801_v61 = vld [vmem:[%s2014_s12 + $0xec] ss:$16 sps:$4 sm:$0xff]  }
  0x1c   : > { %v1803_v62 = vld [vmem:[%s2014_s12 + $0xe0] ss:$16 sps:$4 sm:$0xff]   ;;  %v1804_v63 = vld [vmem:[%s2014_s12 + $0xe8] ss:$16 sps:$4 sm:$0xff]   ;;  %v1805_v0 = vld [vmem:[%s2014_s12 + $0x104] ss:$16 sps:$4 sm:$0xff]  }
  0x1d   : > { %1488 = vmatpush3.bf16.msra.mxu0 %v1747_v22  ;;  %v1807_v1 = vld [vmem:[%s2014_s12 + $0x10c] ss:$16 sps:$4 sm:$0xff]   ;;  %v1809_v2 = vld [vmem:[%s2014_s12 + $0x100] ss:$16 sps:$4 sm:$0xff]   ;;  %v1810_v3 = vld [vmem:[%s2014_s12 + $0x108] ss:$16 sps:$4 sm:$0xff]  }
  0x1e   : > { %1600 = vmatpush3.bf16.msra.mxu1 %v1748_v23  ;;  %1489 = vmatprep.subr.bf16.mxu0 %v1749_v24  ;;  %v1811_v4 = vld [vmem:[%s2014_s12 + $0x124] ss:$16 sps:$4 sm:$0xff]   ;;  %v1813_v5 = vld [vmem:[%s2014_s12 + $0x12c] ss:$16 sps:$4 sm:$0xff]   ;;  %v1815_v6 = vld [vmem:[%s2014_s12 + $0x120] ss:$16 sps:$4 sm:$0xff]  }
  0x1f   : > { %1601 = vmatprep.subr.bf16.mxu1 %v1750_v25  ;;  %v1816_v7 = vld [vmem:[%s2014_s12 + $0x128] ss:$16 sps:$4 sm:$0xff]   ;;  %v1817_v8 = vld [vmem:[%s2014_s12 + $0x144] ss:$16 sps:$4 sm:$0xff]   ;;  %v1819_v9 = vld [vmem:[%s2014_s12 + $0x14c] ss:$16 sps:$4 sm:$0xff]  }
  0x20   : > { %v1821_v10 = vld [vmem:[%s2014_s12 + $0x140] ss:$16 sps:$4 sm:$0xff]   ;;  %v1822_v11 = vld [vmem:[%s2014_s12 + $0x148] ss:$16 sps:$4 sm:$0xff]   ;;  %v1823_v12 = vld [vmem:[%s2014_s12 + $0x164] ss:$16 sps:$4 sm:$0xff]  }
  0x21   : > { %1490 = vmatpush3.bf16.msra.mxu0 %v1751_v26  ;;  %v1825_v13 = vld [vmem:[%s2014_s12 + $0x16c] ss:$16 sps:$4 sm:$0xff]   ;;  %v1827_v14 = vld [vmem:[%s2014_s12 + $0x160] ss:$16 sps:$4 sm:$0xff]   ;;  %v1828_v15 = vld [vmem:[%s2014_s12 + $0x168] ss:$16 sps:$4 sm:$0xff]  }
  0x22   : > { %1602 = vmatpush3.bf16.msra.mxu1 %v1752_v27  ;;  %1491 = vmatprep.subr.bf16.mxu0 %v1753_v28  ;;  %v1829_v16 = vld [vmem:[%s2014_s12 + $0x184] ss:$16 sps:$4 sm:$0xff]   ;;  %v1831_v17 = vld [vmem:[%s2014_s12 + $0x18c] ss:$16 sps:$4 sm:$0xff]   ;;  %v1833_v18 = vld [vmem:[%s2014_s12 + $0x180] ss:$16 sps:$4 sm:$0xff]  }
  0x23   : > { %1603 = vmatprep.subr.bf16.mxu1 %v1754_v29  ;;  %v1834_v19 = vld [vmem:[%s2014_s12 + $0x188] ss:$16 sps:$4 sm:$0xff]   ;;  %v1835_v20 = vld [vmem:[%s2014_s12 + $0x1a4] ss:$16 sps:$4 sm:$0xff]   ;;  %v1837_v21 = vld [vmem:[%s2014_s12 + $0x1ac] ss:$16 sps:$4 sm:$0xff]  }
  0x24   : > { %v1839_v22 = vld [vmem:[%s2014_s12 + $0x1a0] ss:$16 sps:$4 sm:$0xff]   ;;  %v1840_v23 = vld [vmem:[%s2014_s12 + $0x1a8] ss:$16 sps:$4 sm:$0xff]   ;;  %v1841_v24 = vld [vmem:[%s2014_s12 + $0x1c4] ss:$16 sps:$4 sm:$0xff]  }
  0x25   : > { %1492 = vmatpush3.bf16.msra.mxu0 %v1755_v30  ;;  %v1843_v25 = vld [vmem:[%s2014_s12 + $0x1cc] ss:$16 sps:$4 sm:$0xff]   ;;  %v1845_v26 = vld [vmem:[%s2014_s12 + $0x1c0] ss:$16 sps:$4 sm:$0xff]   ;;  %v1846_v27 = vld [vmem:[%s2014_s12 + $0x1c8] ss:$16 sps:$4 sm:$0xff]  }
  0x26   : > { %1604 = vmatpush3.bf16.msra.mxu1 %v1756_v31  ;;  %v1847_v28 = vld [vmem:[%s2014_s12 + $0x1e4] ss:$16 sps:$4 sm:$0xff]   ;;  %v1849_v29 = vld [vmem:[%s2014_s12 + $0x1ec] ss:$16 sps:$4 sm:$0xff]   ;;  %v1851_v30 = vld [vmem:[%s2014_s12 + $0x1e0] ss:$16 sps:$4 sm:$0xff]  }
  0x27   : > { %v1852_v31 = vld [vmem:[%s2014_s12 + $0x1e8] ss:$16 sps:$4 sm:$0xff]  }
  0x28   : > { %909 = vmatmul.mubr.bf16.vlgmr.msra.gmra.mrb[0].mxu0 %v1757_v32 }
  0x29   : > { %1070 = vmatmul.mubr.bf16.vlgmr.msra.gmra.mrb[0].mxu1 %v1760_v34  ;;  %916 = vmatprep.mubr.bf16.mxu0 %v1763_v36  ;;  %v2089_v34 = vld [vmem:[%s2204_s2] ss:$0 sm:$0xff] }
  0x2a   : > { %1077 = vmatprep.mubr.bf16.mxu1 %v1765_v37 }
  0x30   : > { %917 = vmatmul.mubr.bf16.gmra.mrb[4].mxu0 %v1767_v38 }
  0x31   : > { %1078 = vmatmul.mubr.bf16.gmra.mrb[4].mxu1 %v1768_v39  ;;  %924 = vmatprep.mubr.bf16.mxu0 %v1769_v40 }
  0x32   : > { %1085 = vmatprep.mubr.bf16.mxu1 %v1771_v41 }
  0x38   : > { %925 = vmatmul.mubr.bf16.gmra.mrb[8].mxu0 %v1773_v42 }
  0x39   : > { %1086 = vmatmul.mubr.bf16.gmra.mrb[8].mxu1 %v1774_v43  ;;  %932 = vmatprep.mubr.bf16.mxu0 %v1775_v44 }
  0x3a   : > { %1093 = vmatprep.mubr.bf16.mxu1 %v1777_v45 }
  0x40   : > { %933 = vmatmul.mubr.bf16.gmra.mrb[12].mxu0 %v1779_v46 }
  0x41   : > { %1094 = vmatmul.mubr.bf16.gmra.mrb[12].mxu1 %v1780_v47  ;;  %940 = vmatprep.mubr.bf16.mxu0 %v1781_v48 }
  0x42   : > { %1101 = vmatprep.mubr.bf16.mxu1 %v1783_v49 }
  0x48   : > { %941 = vmatmul.mubr.bf16.gmra.mrb[16].mxu0 %v1785_v50 }
  0x49   : > { %1102 = vmatmul.mubr.bf16.gmra.mrb[16].mxu1 %v1786_v51  ;;  %948 = vmatprep.mubr.bf16.mxu0 %v1787_v52 }
  0x4a   : > { %1109 = vmatprep.mubr.bf16.mxu1 %v1789_v53 }
  0x50   : > { %949 = vmatmul.mubr.bf16.gmra.mrb[20].mxu0 %v1791_v54 }
  0x51   : > { %1110 = vmatmul.mubr.bf16.gmra.mrb[20].mxu1 %v1792_v55  ;;  %956 = vmatprep.mubr.bf16.mxu0 %v1793_v56 }
  0x52   : > { %1117 = vmatprep.mubr.bf16.mxu1 %v1795_v57 }
  0x58   : > { %957 = vmatmul.mubr.bf16.gmra.mrb[24].mxu0 %v1797_v58 }
  0x59   : > { %1118 = vmatmul.mubr.bf16.gmra.mrb[24].mxu1 %v1798_v59  ;;  %964 = vmatprep.mubr.bf16.mxu0 %v1799_v60 }
  0x5a   : > { %1125 = vmatprep.mubr.bf16.mxu1 %v1801_v61 }
  0x60   : > { %965 = vmatmul.mubr.bf16.gmra.mrb[28].mxu0 %v1803_v62 }
  0x61   : > { %1126 = vmatmul.mubr.bf16.gmra.mrb[28].mxu1 %v1804_v63  ;;  %972 = vmatprep.mubr.bf16.mxu0 %v1805_v0 }
  0x62   : > { %1133 = vmatprep.mubr.bf16.mxu1 %v1807_v1 }
  0x68   : > { %973 = vmatmul.mubr.bf16.gmra.mrb[32].mxu0 %v1809_v2 }
  0x69   : > { %1134 = vmatmul.mubr.bf16.gmra.mrb[32].mxu1 %v1810_v3  ;;  %980 = vmatprep.mubr.bf16.mxu0 %v1811_v4 }
  0x6a   : > { %1141 = vmatprep.mubr.bf16.mxu1 %v1813_v5 }
  0x70   : > { %981 = vmatmul.mubr.bf16.gmra.mrb[36].mxu0 %v1815_v6 }
  0x71   : > { %1142 = vmatmul.mubr.bf16.gmra.mrb[36].mxu1 %v1816_v7  ;;  %988 = vmatprep.mubr.bf16.mxu0 %v1817_v8 }
  0x72   : > { %1149 = vmatprep.mubr.bf16.mxu1 %v1819_v9 }
  0x78   : > { %989 = vmatmul.mubr.bf16.gmra.mrb[40].mxu0 %v1821_v10 }
  0x79   : > { %1150 = vmatmul.mubr.bf16.gmra.mrb[40].mxu1 %v1822_v11  ;;  %996 = vmatprep.mubr.bf16.mxu0 %v1823_v12 }
  0x7a   : > { %1157 = vmatprep.mubr.bf16.mxu1 %v1825_v13 }
  0x80   : > { %997 = vmatmul.mubr.bf16.gmra.mrb[44].mxu0 %v1827_v14 }
  0x81   : > { %1158 = vmatmul.mubr.bf16.gmra.mrb[44].mxu1 %v1828_v15  ;;  %1004 = vmatprep.mubr.bf16.mxu0 %v1829_v16 }
  0x82   : > { %1165 = vmatprep.mubr.bf16.mxu1 %v1831_v17 }
  0x88   : > { %1005 = vmatmul.mubr.bf16.gmra.mrb[48].mxu0 %v1833_v18 }
  0x89   : > { %1166 = vmatmul.mubr.bf16.gmra.mrb[48].mxu1 %v1834_v19  ;;  %1012 = vmatprep.mubr.bf16.mxu0 %v1835_v20 }
  0x8a   : > { %1173 = vmatprep.mubr.bf16.mxu1 %v1837_v21 }
  0x90   : > { %1013 = vmatmul.mubr.bf16.gmra.mrb[52].mxu0 %v1839_v22 }
  0x91   : > { %1174 = vmatmul.mubr.bf16.gmra.mrb[52].mxu1 %v1840_v23  ;;  %1020 = vmatprep.mubr.bf16.mxu0 %v1841_v24 }
  0x92   : > { %1181 = vmatprep.mubr.bf16.mxu1 %v1843_v25 }
  0x98   : > { %1021 = vmatmul.mubr.bf16.gmra.mrb[56].mxu0 %v1845_v26 }
  0x99   : > { %1182 = vmatmul.mubr.bf16.gmra.mrb[56].mxu1 %v1846_v27  ;;  %1028 = vmatprep.mubr.bf16.mxu0 %v1847_v28 }
  0x9a   : > { %1189 = vmatprep.mubr.bf16.mxu1 %v1849_v29 }
  0xa0   : > { %1029 = vmatmul.mubr.bf16.gmra.mrb[60].mxu0 %v1851_v30 }
  0xa1   : > { %1190 = vmatmul.mubr.bf16.gmra.mrb[60].mxu1 %v1852_v31 }
  0xfb   : > { %v1493_v32 = vpop.f32.mrb[0].mxu0 }
  0xfc   : > { %v1605_v33 = vpop.f32.mrb[0].mxu1  ;;  %v1494_v35 = vpop.f32.mrb[1].mxu0 }
  0xfd   : > { %v1495_v36 = vadd.f32 %v1494_v35, %v1493_v32  ;;  %v1606_v37 = vpop.f32.mrb[1].mxu1  ;;  %v1496_v38 = vpop.f32.mrb[2].mxu0 }
  0xfe   : > { %v1607_v39 = vadd.f32 %v1606_v37, %v1605_v33  ;;  %v1608_v40 = vpop.f32.mrb[2].mxu1  ;;  %v1497_v41 = vpop.f32.mrb[3].mxu0 }
  0xff   : > { %v911_v42 = vadd.f32 %v1495_v36, %v2089_v34  ;;  %v1498_v43 = vadd.f32 %v1497_v41, %v1496_v38  ;;  %v1609_v44 = vpop.f32.mrb[3].mxu1 }
 0x100   : > { %v1610_v45 = vadd.f32 %v1609_v44, %v1608_v40 }
 0x101   : > { %v1072_v46 = vadd.f32 %v1607_v39, %v911_v42  ;;  %v914_v47 = vadd.f32 %v1498_v43, %v2089_v34 }
 0x103   : > { %v1198_v48 = vmax.f32 %v1072_v46, 0.0  ;;  %v1075_v49 = vadd.f32 %v1610_v45, %v914_v47  ;;  %v1499_v50 = vpop.f32.mrb[4].mxu0 }
 0x104   : > { %v1611_v51 = vpop.f32.mrb[4].mxu1  ;;  %v1500_v52 = vpop.f32.mrb[5].mxu0 }
 0x105   : > { %1231 = vst.msk [vmem:[%s2097_s20] sm:$0xff] %vm1230_vm0, %v1198_v48  ;;  %v1199_v53 = vmax.f32 %v1075_v49, 0.0  ;;  %v1501_v54 = vadd.f32 %v1500_v52, %v1499_v50  ;;  %v1612_v55 = vpop.f32.mrb[5].mxu1  ;;  %v1502_v56 = vpop.f32.mrb[6].mxu0 }
 0x106   : > { %v1613_v57 = vadd.f32 %v1612_v55, %v1611_v51  ;;  %v1614_v58 = vpop.f32.mrb[6].mxu1  ;;  %v1503_v59 = vpop.f32.mrb[7].mxu0 }
 0x107   : > { %1232 = vst.msk [vmem:[%s2097_s20 + $0x8] sm:$0xff] %vm1230_vm0, %v1199_v53  ;;  %v919_v60 = vadd.f32 %v1501_v54, %v2089_v34  ;;  %v1504_v61 = vadd.f32 %v1503_v59, %v1502_v56  ;;  %v1615_v62 = vpop.f32.mrb[7].mxu1 }
 0x108   : > { %v1616_v63 = vadd.f32 %v1615_v62, %v1614_v58 }
 0x109   : > { %v1080_v0 = vadd.f32 %v1613_v57, %v919_v60  ;;  %v922_v1 = vadd.f32 %v1504_v61, %v2089_v34 }
 0x10b   : > { %v1200_v2 = vmax.f32 %v1080_v0, 0.0  ;;  %v1083_v3 = vadd.f32 %v1616_v63, %v922_v1  ;;  %v1505_v4 = vpop.f32.mrb[8].mxu0 }
 0x10c   : > { %v1617_v5 = vpop.f32.mrb[8].mxu1  ;;  %v1506_v6 = vpop.f32.mrb[9].mxu0 }
 0x10d   : > { %1233 = vst.msk [vmem:[%s2097_s20 + $0x10] sm:$0xff] %vm1230_vm0, %v1200_v2  ;;  %v1201_v7 = vmax.f32 %v1083_v3, 0.0  ;;  %v1507_v8 = vadd.f32 %v1506_v6, %v1505_v4  ;;  %v1618_v9 = vpop.f32.mrb[9].mxu1  ;;  %v1508_v10 = vpop.f32.mrb[10].mxu0 }
 0x10e   : > { %v1619_v11 = vadd.f32 %v1618_v9, %v1617_v5  ;;  %v1620_v12 = vpop.f32.mrb[10].mxu1  ;;  %v1509_v13 = vpop.f32.mrb[11].mxu0 }
 0x10f   : > { %1234 = vst.msk [vmem:[%s2097_s20 + $0x18] sm:$0xff] %vm1230_vm0, %v1201_v7  ;;  %v927_v14 = vadd.f32 %v1507_v8, %v2089_v34  ;;  %v1510_v15 = vadd.f32 %v1509_v13, %v1508_v10  ;;  %v1621_v16 = vpop.f32.mrb[11].mxu1 }
 0x110   : > { %v1622_v17 = vadd.f32 %v1621_v16, %v1620_v12 }
 0x111   : > { %v1088_v18 = vadd.f32 %v1619_v11, %v927_v14  ;;  %v930_v19 = vadd.f32 %v1510_v15, %v2089_v34 }
 0x113   : > { %v1202_v20 = vmax.f32 %v1088_v18, 0.0  ;;  %v1091_v21 = vadd.f32 %v1622_v17, %v930_v19  ;;  %v1511_v22 = vpop.f32.mrb[12].mxu0 }
 0x114   : > { %v1623_v23 = vpop.f32.mrb[12].mxu1  ;;  %v1512_v24 = vpop.f32.mrb[13].mxu0 }
 0x115   : > { %1235 = vst.msk [vmem:[%s2097_s20 + $0x20] sm:$0xff] %vm1230_vm0, %v1202_v20  ;;  %v1203_v25 = vmax.f32 %v1091_v21, 0.0  ;;  %v1513_v26 = vadd.f32 %v1512_v24, %v1511_v22  ;;  %v1624_v27 = vpop.f32.mrb[13].mxu1  ;;  %v1514_v28 = vpop.f32.mrb[14].mxu0 }
 0x116   : > { %v1625_v29 = vadd.f32 %v1624_v27, %v1623_v23  ;;  %v1626_v30 = vpop.f32.mrb[14].mxu1  ;;  %v1515_v31 = vpop.f32.mrb[15].mxu0 }
 0x117   : > { %1236 = vst.msk [vmem:[%s2097_s20 + $0x28] sm:$0xff] %vm1230_vm0, %v1203_v25  ;;  %v935_v32 = vadd.f32 %v1513_v26, %v2089_v34  ;;  %v1516_v33 = vadd.f32 %v1515_v31, %v1514_v28  ;;  %v1627_v35 = vpop.f32.mrb[15].mxu1 }
 0x118   : > { %v1628_v36 = vadd.f32 %v1627_v35, %v1626_v30 }
 0x119   : > { %v1096_v37 = vadd.f32 %v1625_v29, %v935_v32  ;;  %v938_v38 = vadd.f32 %v1516_v33, %v2089_v34 }
 0x11b   : > { %v1204_v39 = vmax.f32 %v1096_v37, 0.0  ;;  %v1099_v40 = vadd.f32 %v1628_v36, %v938_v38  ;;  %v1517_v41 = vpop.f32.mrb[16].mxu0 }
 0x11c   : > { %v1629_v42 = vpop.f32.mrb[16].mxu1  ;;  %v1518_v43 = vpop.f32.mrb[17].mxu0 }
 0x11d   : > { %1237 = vst.msk [vmem:[%s2097_s20 + $0x30] sm:$0xff] %vm1230_vm0, %v1204_v39  ;;  %v1205_v44 = vmax.f32 %v1099_v40, 0.0  ;;  %v1519_v45 = vadd.f32 %v1518_v43, %v1517_v41  ;;  %v1630_v46 = vpop.f32.mrb[17].mxu1  ;;  %v1520_v47 = vpop.f32.mrb[18].mxu0 }
 0x11e   : > { %v1631_v48 = vadd.f32 %v1630_v46, %v1629_v42  ;;  %v1632_v49 = vpop.f32.mrb[18].mxu1  ;;  %v1521_v50 = vpop.f32.mrb[19].mxu0 }
 0x11f   : > { %1238 = vst.msk [vmem:[%s2097_s20 + $0x38] sm:$0xff] %vm1230_vm0, %v1205_v44  ;;  %v943_v51 = vadd.f32 %v1519_v45, %v2089_v34  ;;  %v1522_v52 = vadd.f32 %v1521_v50, %v1520_v47  ;;  %v1633_v53 = vpop.f32.mrb[19].mxu1 }
 0x120   : > { %v1634_v54 = vadd.f32 %v1633_v53, %v1632_v49 }
 0x121   : > { %v1104_v55 = vadd.f32 %v1631_v48, %v943_v51  ;;  %v946_v56 = vadd.f32 %v1522_v52, %v2089_v34 }
 0x123   : > { %v1206_v57 = vmax.f32 %v1104_v55, 0.0  ;;  %v1107_v58 = vadd.f32 %v1634_v54, %v946_v56  ;;  %v1523_v59 = vpop.f32.mrb[20].mxu0 }
 0x124   : > { %v1635_v60 = vpop.f32.mrb[20].mxu1  ;;  %v1524_v61 = vpop.f32.mrb[21].mxu0 }
 0x125   : > { %1239 = vst.msk [vmem:[%s2097_s20 + $0x40] sm:$0xff] %vm1230_vm0, %v1206_v57  ;;  %v1207_v62 = vmax.f32 %v1107_v58, 0.0  ;;  %v1525_v63 = vadd.f32 %v1524_v61, %v1523_v59  ;;  %v1636_v0 = vpop.f32.mrb[21].mxu1  ;;  %v1526_v1 = vpop.f32.mrb[22].mxu0 }
 0x126   : > { %v1637_v2 = vadd.f32 %v1636_v0, %v1635_v60  ;;  %v1638_v3 = vpop.f32.mrb[22].mxu1  ;;  %v1527_v4 = vpop.f32.mrb[23].mxu0 }
 0x127   : > { %1240 = vst.msk [vmem:[%s2097_s20 + $0x48] sm:$0xff] %vm1230_vm0, %v1207_v62  ;;  %v951_v5 = vadd.f32 %v1525_v63, %v2089_v34  ;;  %v1528_v6 = vadd.f32 %v1527_v4, %v1526_v1  ;;  %v1639_v7 = vpop.f32.mrb[23].mxu1 }
 0x128   : > { %v1640_v8 = vadd.f32 %v1639_v7, %v1638_v3 }
 0x129   : > { %v1112_v9 = vadd.f32 %v1637_v2, %v951_v5  ;;  %v954_v10 = vadd.f32 %v1528_v6, %v2089_v34 }
 0x12b   : > { %v1208_v11 = vmax.f32 %v1112_v9, 0.0  ;;  %v1115_v12 = vadd.f32 %v1640_v8, %v954_v10  ;;  %v1529_v13 = vpop.f32.mrb[24].mxu0 }
 0x12c   : > { %v1641_v14 = vpop.f32.mrb[24].mxu1  ;;  %v1530_v15 = vpop.f32.mrb[25].mxu0 }
 0x12d   : > { %1241 = vst.msk [vmem:[%s2097_s20 + $0x50] sm:$0xff] %vm1230_vm0, %v1208_v11  ;;  %v1209_v16 = vmax.f32 %v1115_v12, 0.0  ;;  %v1531_v17 = vadd.f32 %v1530_v15, %v1529_v13  ;;  %v1642_v18 = vpop.f32.mrb[25].mxu1  ;;  %v1532_v19 = vpop.f32.mrb[26].mxu0 }
 0x12e   : > { %v1643_v20 = vadd.f32 %v1642_v18, %v1641_v14  ;;  %v1644_v21 = vpop.f32.mrb[26].mxu1  ;;  %v1533_v22 = vpop.f32.mrb[27].mxu0 }
 0x12f   : > { %1242 = vst.msk [vmem:[%s2097_s20 + $0x58] sm:$0xff] %vm1230_vm0, %v1209_v16  ;;  %v959_v23 = vadd.f32 %v1531_v17, %v2089_v34  ;;  %v1534_v24 = vadd.f32 %v1533_v22, %v1532_v19  ;;  %v1645_v25 = vpop.f32.mrb[27].mxu1 }
 0x130   : > { %v1646_v26 = vadd.f32 %v1645_v25, %v1644_v21 }
 0x131   : > { %v1120_v27 = vadd.f32 %v1643_v20, %v959_v23  ;;  %v962_v28 = vadd.f32 %v1534_v24, %v2089_v34 }
 0x133   : > { %v1210_v29 = vmax.f32 %v1120_v27, 0.0  ;;  %v1123_v30 = vadd.f32 %v1646_v26, %v962_v28  ;;  %v1535_v31 = vpop.f32.mrb[28].mxu0 }
 0x134   : > { %v1647_v32 = vpop.f32.mrb[28].mxu1  ;;  %v1536_v33 = vpop.f32.mrb[29].mxu0 }
 0x135   : > { %1243 = vst.msk [vmem:[%s2097_s20 + $0x60] sm:$0xff] %vm1230_vm0, %v1210_v29  ;;  %v1211_v35 = vmax.f32 %v1123_v30, 0.0  ;;  %v1537_v36 = vadd.f32 %v1536_v33, %v1535_v31  ;;  %v1648_v37 = vpop.f32.mrb[29].mxu1  ;;  %v1538_v38 = vpop.f32.mrb[30].mxu0 }
 0x136   : > { %v1649_v39 = vadd.f32 %v1648_v37, %v1647_v32  ;;  %v1650_v40 = vpop.f32.mrb[30].mxu1  ;;  %v1539_v41 = vpop.f32.mrb[31].mxu0 }
 0x137   : > { %1244 = vst.msk [vmem:[%s2097_s20 + $0x68] sm:$0xff] %vm1230_vm0, %v1211_v35  ;;  %v967_v42 = vadd.f32 %v1537_v36, %v2089_v34  ;;  %v1540_v43 = vadd.f32 %v1539_v41, %v1538_v38  ;;  %v1651_v44 = vpop.f32.mrb[31].mxu1 }
 0x138   : > { %v1652_v45 = vadd.f32 %v1651_v44, %v1650_v40 }
 0x139   : > { %v1128_v46 = vadd.f32 %v1649_v39, %v967_v42  ;;  %v970_v47 = vadd.f32 %v1540_v43, %v2089_v34 }
 0x13b   : > { %v1212_v48 = vmax.f32 %v1128_v46, 0.0  ;;  %v1131_v49 = vadd.f32 %v1652_v45, %v970_v47  ;;  %v1541_v50 = vpop.f32.mrb[32].mxu0 }
 0x13c   : > { %v1653_v51 = vpop.f32.mrb[32].mxu1  ;;  %v1542_v52 = vpop.f32.mrb[33].mxu0 }
 0x13d   : > { %1245 = vst.msk [vmem:[%s2097_s20 + $0x70] sm:$0xff] %vm1230_vm0, %v1212_v48  ;;  %v1213_v53 = vmax.f32 %v1131_v49, 0.0  ;;  %v1543_v54 = vadd.f32 %v1542_v52, %v1541_v50  ;;  %v1654_v55 = vpop.f32.mrb[33].mxu1  ;;  %v1544_v56 = vpop.f32.mrb[34].mxu0 }
 0x13e   : > { %v1655_v57 = vadd.f32 %v1654_v55, %v1653_v51  ;;  %v1656_v58 = vpop.f32.mrb[34].mxu1  ;;  %v1545_v59 = vpop.f32.mrb[35].mxu0 }
 0x13f   : > { %1246 = vst.msk [vmem:[%s2097_s20 + $0x78] sm:$0xff] %vm1230_vm0, %v1213_v53  ;;  %v975_v60 = vadd.f32 %v1543_v54, %v2089_v34  ;;  %v1546_v61 = vadd.f32 %v1545_v59, %v1544_v56  ;;  %v1657_v62 = vpop.f32.mrb[35].mxu1 }
 0x140   : > { %v1658_v63 = vadd.f32 %v1657_v62, %v1656_v58 }
 0x141   : > { %v1136_v0 = vadd.f32 %v1655_v57, %v975_v60  ;;  %v978_v1 = vadd.f32 %v1546_v61, %v2089_v34 }
 0x143   : > { %v1214_v2 = vmax.f32 %v1136_v0, 0.0  ;;  %v1139_v3 = vadd.f32 %v1658_v63, %v978_v1  ;;  %v1547_v4 = vpop.f32.mrb[36].mxu0 }
 0x144   : > { %v1659_v5 = vpop.f32.mrb[36].mxu1  ;;  %v1548_v6 = vpop.f32.mrb[37].mxu0 }
 0x145   : > { %1247 = vst.msk [vmem:[%s2097_s20 + $0x80] sm:$0xff] %vm1230_vm0, %v1214_v2  ;;  %v1215_v7 = vmax.f32 %v1139_v3, 0.0  ;;  %v1549_v8 = vadd.f32 %v1548_v6, %v1547_v4  ;;  %v1660_v9 = vpop.f32.mrb[37].mxu1  ;;  %v1550_v10 = vpop.f32.mrb[38].mxu0 }
 0x146   : > { %v1661_v11 = vadd.f32 %v1660_v9, %v1659_v5  ;;  %v1662_v12 = vpop.f32.mrb[38].mxu1  ;;  %v1551_v13 = vpop.f32.mrb[39].mxu0 }
 0x147   : > { %1248 = vst.msk [vmem:[%s2097_s20 + $0x88] sm:$0xff] %vm1230_vm0, %v1215_v7  ;;  %v983_v14 = vadd.f32 %v1549_v8, %v2089_v34  ;;  %v1552_v15 = vadd.f32 %v1551_v13, %v1550_v10  ;;  %v1663_v16 = vpop.f32.mrb[39].mxu1 }
 0x148   : > { %v1664_v17 = vadd.f32 %v1663_v16, %v1662_v12 }
 0x149   : > { %v1144_v18 = vadd.f32 %v1661_v11, %v983_v14  ;;  %v986_v19 = vadd.f32 %v1552_v15, %v2089_v34 }
 0x14b   : > { %v1216_v20 = vmax.f32 %v1144_v18, 0.0  ;;  %v1147_v21 = vadd.f32 %v1664_v17, %v986_v19  ;;  %v1553_v22 = vpop.f32.mrb[40].mxu0 }
 0x14c   : > { %v1665_v23 = vpop.f32.mrb[40].mxu1  ;;  %v1554_v24 = vpop.f32.mrb[41].mxu0 }
 0x14d   : > { %1249 = vst.msk [vmem:[%s2097_s20 + $0x90] sm:$0xff] %vm1230_vm0, %v1216_v20  ;;  %v1217_v25 = vmax.f32 %v1147_v21, 0.0  ;;  %v1555_v26 = vadd.f32 %v1554_v24, %v1553_v22  ;;  %v1666_v27 = vpop.f32.mrb[41].mxu1  ;;  %v1556_v28 = vpop.f32.mrb[42].mxu0 }
 0x14e   : > { %v1667_v29 = vadd.f32 %v1666_v27, %v1665_v23  ;;  %v1668_v30 = vpop.f32.mrb[42].mxu1  ;;  %v1557_v31 = vpop.f32.mrb[43].mxu0 }
 0x14f   : > { %1250 = vst.msk [vmem:[%s2097_s20 + $0x98] sm:$0xff] %vm1230_vm0, %v1217_v25  ;;  %v991_v32 = vadd.f32 %v1555_v26, %v2089_v34  ;;  %v1558_v33 = vadd.f32 %v1557_v31, %v1556_v28  ;;  %v1669_v35 = vpop.f32.mrb[43].mxu1 }
 0x150   : > { %v1670_v36 = vadd.f32 %v1669_v35, %v1668_v30 }
 0x151   : > { %v1152_v37 = vadd.f32 %v1667_v29, %v991_v32  ;;  %v994_v38 = vadd.f32 %v1558_v33, %v2089_v34 }
 0x153   : > { %v1218_v39 = vmax.f32 %v1152_v37, 0.0  ;;  %v1155_v40 = vadd.f32 %v1670_v36, %v994_v38  ;;  %v1559_v41 = vpop.f32.mrb[44].mxu0 }
 0x154   : > { %v1671_v42 = vpop.f32.mrb[44].mxu1  ;;  %v1560_v43 = vpop.f32.mrb[45].mxu0 }
 0x155   : > { %1251 = vst.msk [vmem:[%s2097_s20 + $0xa0] sm:$0xff] %vm1230_vm0, %v1218_v39  ;;  %v1219_v44 = vmax.f32 %v1155_v40, 0.0  ;;  %v1561_v45 = vadd.f32 %v1560_v43, %v1559_v41  ;;  %v1672_v46 = vpop.f32.mrb[45].mxu1  ;;  %v1562_v47 = vpop.f32.mrb[46].mxu0 }
 0x156   : > { %v1673_v48 = vadd.f32 %v1672_v46, %v1671_v42  ;;  %v1674_v49 = vpop.f32.mrb[46].mxu1  ;;  %v1563_v50 = vpop.f32.mrb[47].mxu0 }
 0x157   : > { %1252 = vst.msk [vmem:[%s2097_s20 + $0xa8] sm:$0xff] %vm1230_vm0, %v1219_v44  ;;  %v999_v51 = vadd.f32 %v1561_v45, %v2089_v34  ;;  %v1564_v52 = vadd.f32 %v1563_v50, %v1562_v47  ;;  %v1675_v53 = vpop.f32.mrb[47].mxu1 }
 0x158   : > { %v1676_v54 = vadd.f32 %v1675_v53, %v1674_v49 }
 0x159   : > { %v1160_v55 = vadd.f32 %v1673_v48, %v999_v51  ;;  %v1002_v56 = vadd.f32 %v1564_v52, %v2089_v34 }
 0x15b   : > { %v1220_v57 = vmax.f32 %v1160_v55, 0.0  ;;  %v1163_v58 = vadd.f32 %v1676_v54, %v1002_v56  ;;  %v1565_v59 = vpop.f32.mrb[48].mxu0 }
 0x15c   : > { %v1677_v60 = vpop.f32.mrb[48].mxu1  ;;  %v1566_v61 = vpop.f32.mrb[49].mxu0 }
 0x15d   : > { %1253 = vst.msk [vmem:[%s2097_s20 + $0xb0] sm:$0xff] %vm1230_vm0, %v1220_v57  ;;  %v1221_v62 = vmax.f32 %v1163_v58, 0.0  ;;  %v1567_v63 = vadd.f32 %v1566_v61, %v1565_v59  ;;  %v1678_v0 = vpop.f32.mrb[49].mxu1  ;;  %v1568_v1 = vpop.f32.mrb[50].mxu0 }
 0x15e   : > { %v1679_v2 = vadd.f32 %v1678_v0, %v1677_v60  ;;  %v1680_v3 = vpop.f32.mrb[50].mxu1  ;;  %v1569_v4 = vpop.f32.mrb[51].mxu0 }
 0x15f   : > { %1254 = vst.msk [vmem:[%s2097_s20 + $0xb8] sm:$0xff] %vm1230_vm0, %v1221_v62  ;;  %v1007_v5 = vadd.f32 %v1567_v63, %v2089_v34  ;;  %v1570_v6 = vadd.f32 %v1569_v4, %v1568_v1  ;;  %v1681_v7 = vpop.f32.mrb[51].mxu1 }
 0x160   : > { %v1682_v8 = vadd.f32 %v1681_v7, %v1680_v3 }
 0x161   : > { %v1168_v9 = vadd.f32 %v1679_v2, %v1007_v5  ;;  %v1010_v10 = vadd.f32 %v1570_v6, %v2089_v34 }
 0x163   : > { %v1222_v11 = vmax.f32 %v1168_v9, 0.0  ;;  %v1171_v12 = vadd.f32 %v1682_v8, %v1010_v10  ;;  %v1571_v13 = vpop.f32.mrb[52].mxu0 }
 0x164   : > { %v1683_v14 = vpop.f32.mrb[52].mxu1  ;;  %v1572_v15 = vpop.f32.mrb[53].mxu0 }
 0x165   : > { %1255 = vst.msk [vmem:[%s2097_s20 + $0xc0] sm:$0xff] %vm1230_vm0, %v1222_v11  ;;  %v1223_v16 = vmax.f32 %v1171_v12, 0.0  ;;  %v1573_v17 = vadd.f32 %v1572_v15, %v1571_v13  ;;  %v1684_v18 = vpop.f32.mrb[53].mxu1  ;;  %v1574_v19 = vpop.f32.mrb[54].mxu0 }
 0x166   : > { %v1685_v20 = vadd.f32 %v1684_v18, %v1683_v14  ;;  %v1686_v21 = vpop.f32.mrb[54].mxu1  ;;  %v1575_v22 = vpop.f32.mrb[55].mxu0 }
 0x167   : > { %1256 = vst.msk [vmem:[%s2097_s20 + $0xc8] sm:$0xff] %vm1230_vm0, %v1223_v16  ;;  %v1015_v23 = vadd.f32 %v1573_v17, %v2089_v34  ;;  %v1576_v24 = vadd.f32 %v1575_v22, %v1574_v19  ;;  %v1687_v25 = vpop.f32.mrb[55].mxu1 }
 0x168   : > { %v1688_v26 = vadd.f32 %v1687_v25, %v1686_v21 }
 0x169   : > { %v1176_v27 = vadd.f32 %v1685_v20, %v1015_v23  ;;  %v1018_v28 = vadd.f32 %v1576_v24, %v2089_v34 }
 0x16b   : > { %v1224_v29 = vmax.f32 %v1176_v27, 0.0  ;;  %v1179_v30 = vadd.f32 %v1688_v26, %v1018_v28  ;;  %v1577_v31 = vpop.f32.mrb[56].mxu0 }
 0x16c   : > { %v1689_v32 = vpop.f32.mrb[56].mxu1  ;;  %v1578_v33 = vpop.f32.mrb[57].mxu0 }
 0x16d   : > { %1257 = vst.msk [vmem:[%s2097_s20 + $0xd0] sm:$0xff] %vm1230_vm0, %v1224_v29  ;;  %v1225_v35 = vmax.f32 %v1179_v30, 0.0  ;;  %v1579_v36 = vadd.f32 %v1578_v33, %v1577_v31  ;;  %v1690_v37 = vpop.f32.mrb[57].mxu1  ;;  %v1580_v38 = vpop.f32.mrb[58].mxu0 }
 0x16e   : > { %v1691_v39 = vadd.f32 %v1690_v37, %v1689_v32  ;;  %v1692_v40 = vpop.f32.mrb[58].mxu1  ;;  %v1581_v41 = vpop.f32.mrb[59].mxu0 }
 0x16f   : > { %1258 = vst.msk [vmem:[%s2097_s20 + $0xd8] sm:$0xff] %vm1230_vm0, %v1225_v35  ;;  %v1023_v42 = vadd.f32 %v1579_v36, %v2089_v34  ;;  %v1582_v43 = vadd.f32 %v1581_v41, %v1580_v38  ;;  %v1693_v44 = vpop.f32.mrb[59].mxu1 }
 0x170   : > { %v1694_v45 = vadd.f32 %v1693_v44, %v1692_v40 }
 0x171   : > { %v1184_v46 = vadd.f32 %v1691_v39, %v1023_v42  ;;  %v1026_v47 = vadd.f32 %v1582_v43, %v2089_v34 }
 0x173   : > { %v1226_v48 = vmax.f32 %v1184_v46, 0.0  ;;  %v1187_v49 = vadd.f32 %v1694_v45, %v1026_v47  ;;  %v1583_v50 = vpop.f32.mrb[60].mxu0 }
 0x174   : > { %v1695_v51 = vpop.f32.mrb[60].mxu1  ;;  %v1584_v52 = vpop.f32.mrb[61].mxu0 }
 0x175   : > { %1259 = vst.msk [vmem:[%s2097_s20 + $0xe0] sm:$0xff] %vm1230_vm0, %v1226_v48  ;;  %v1227_v53 = vmax.f32 %v1187_v49, 0.0  ;;  %v1585_v54 = vadd.f32 %v1584_v52, %v1583_v50  ;;  %v1696_v55 = vpop.f32.mrb[61].mxu1  ;;  %v1586_v56 = vpop.f32.mrb[62].mxu0 }
 0x176   : > { %v1697_v57 = vadd.f32 %v1696_v55, %v1695_v51  ;;  %v1698_v58 = vpop.f32.mrb[62].mxu1  ;;  %v1587_v59 = vpop.f32.mrb[63].mxu0 }
 0x177   : > { %1260 = vst.msk [vmem:[%s2097_s20 + $0xe8] sm:$0xff] %vm1230_vm0, %v1227_v53  ;;  %v1031_v60 = vadd.f32 %v1585_v54, %v2089_v34  ;;  %v1588_v61 = vadd.f32 %v1587_v59, %v1586_v56  ;;  %v1699_v62 = vpop.f32.mrb[63].mxu1 }
 0x178   : > { %v1700_v63 = vadd.f32 %v1699_v62, %v1698_v58 }
 0x179   : > { %v1192_v0 = vadd.f32 %v1697_v57, %v1031_v60  ;;  %v1034_v1 = vadd.f32 %v1588_v61, %v2089_v34 }
 0x17b   : > { %v1228_v2 = vmax.f32 %v1192_v0, 0.0  ;;  %v1195_v3 = vadd.f32 %v1700_v63, %v1034_v1 }
 0x17d   : > { %1261 = vst.msk [vmem:[%s2097_s20 + $0xf0] sm:$0xff] %vm1230_vm0, %v1228_v2  ;;  %v1229_v4 = vmax.f32 %v1195_v3, 0.0 }
 0x17f   : > { %1262 = vst.msk [vmem:[%s2097_s20 + $0xf8] sm:$0xff] %vm1230_vm0, %v1229_v4 }
 0x180 PF: > { %s13_s14 = sadd.s32 1, %s1875_s14   ;;  %s2206_s12 = smov %s1871_s13 }
 0x181   : > { %p10_p5 = scmp.ge.s32.totalorder %s13_s14, 6   ;;  %s2207_s13 = smov %s2209_s15 }
 0x183   :  { %12 = sbr.rel (!%p10_p5) target bundleno = 2 (0x2), region = 68 }

// kernel: vae_forward.12
= control target key start
LH: loop header
LB: loop body
LE: loop exit
PB: predicated region body
PF: predicated region fallthrough
CT: control target
= control target key end

     0   :  { %s3049_s1 = inlined_call_operand.vmem [shape: bf16[1024,128], index: 1, kind: input, shape index: {}]   ;;  %s3050_s0 = inlined_call_operand.vmem [shape: bf16[200,1024], index: 0, kind: input, shape index: {}]   ;;  %s3051_s2 = inlined_call_operand.vmem [shape: f32[1,128], index: 2, kind: input, shape index: {}]   ;;  %s3052_s3 = inlined_call_operand.vmem [shape: f32[200,128], index: 3, kind: output, shape index: {}]  }
   0x1   :  { %v2285_v0 = vld [vmem:[%s3049_s1 + $0x40] sm:$0xff]   ;;  %v2289_v4 = vld [vmem:[%s3049_s1 + $0x48] sm:$0xff]   ;;  %v2293_v8 = vld [vmem:[%s3049_s1 + $0x50] sm:$0xff]  }
   0x2   :  { %v2286_v1 = vld [vmem:[%s3049_s1 + $0xc0] sm:$0xff]   ;;  %1909 = vmatprep.subr.bf16.mxu0 %v2285_v0  ;;  %v2290_v5 = vld [vmem:[%s3049_s1 + $0xc8] sm:$0xff]   ;;  %v2294_v9 = vld [vmem:[%s3049_s1 + $0xd0] sm:$0xff]  }
   0x3   :  { %v2287_v2 = vld [vmem:[%s3049_s1] sm:$0xff]   ;;  %2003 = vmatprep.subr.bf16.mxu1 %v2286_v1  ;;  %v2291_v6 = vld [vmem:[%s3049_s1 + $0x8] sm:$0xff]   ;;  %v2295_v10 = vld [vmem:[%s3049_s1 + $0x10] sm:$0xff]  }
   0x4   :  { %v2288_v3 = vld [vmem:[%s3049_s1 + $0x80] sm:$0xff]   ;;  %1910 = vmatpush3.bf16.msra.mxu0 %v2287_v2  ;;  %v2292_v7 = vld [vmem:[%s3049_s1 + $0x88] sm:$0xff]   ;;  %v2296_v11 = vld [vmem:[%s3049_s1 + $0x90] sm:$0xff]  }
   0x5   :  { %2004 = vmatpush3.bf16.msra.mxu1 %v2288_v3  ;;  %1911 = vmatprep.subr.bf16.mxu0 %v2289_v4  ;;  %v2297_v12 = vld [vmem:[%s3049_s1 + $0x58] sm:$0xff]   ;;  %v2301_v16 = vld [vmem:[%s3049_s1 + $0x60] sm:$0xff]   ;;  %v2305_v20 = vld [vmem:[%s3049_s1 + $0x68] sm:$0xff]  }
   0x6   :  { %2005 = vmatprep.subr.bf16.mxu1 %v2290_v5  ;;  %v2298_v13 = vld [vmem:[%s3049_s1 + $0xd8] sm:$0xff]   ;;  %v2302_v17 = vld [vmem:[%s3049_s1 + $0xe0] sm:$0xff]   ;;  %v2306_v21 = vld [vmem:[%s3049_s1 + $0xe8] sm:$0xff]  }
   0x7   :  { %v2299_v14 = vld [vmem:[%s3049_s1 + $0x18] sm:$0xff]   ;;  %v2303_v18 = vld [vmem:[%s3049_s1 + $0x20] sm:$0xff]   ;;  %v2307_v22 = vld [vmem:[%s3049_s1 + $0x28] sm:$0xff]  }
   0x8   :  { %1912 = vmatpush3.bf16.msra.mxu0 %v2291_v6  ;;  %v2300_v15 = vld [vmem:[%s3049_s1 + $0x98] sm:$0xff]   ;;  %v2304_v19 = vld [vmem:[%s3049_s1 + $0xa0] sm:$0xff]   ;;  %v2308_v23 = vld [vmem:[%s3049_s1 + $0xa8] sm:$0xff]  }
   0x9   :  { %2006 = vmatpush3.bf16.msra.mxu1 %v2292_v7  ;;  %1913 = vmatprep.subr.bf16.mxu0 %v2293_v8  ;;  %v2309_v24 = vld [vmem:[%s3049_s1 + $0x70] sm:$0xff]   ;;  %v2313_v28 = vld [vmem:[%s3049_s1 + $0x78] sm:$0xff]   ;;  %v15_v32 = vld [vmem:[%s3050_s0] sm:$0xff] }
   0xa   :  { %2007 = vmatprep.subr.bf16.mxu1 %v2294_v9  ;;  %v2310_v25 = vld [vmem:[%s3049_s1 + $0xf0] sm:$0xff]   ;;  %v2314_v29 = vld [vmem:[%s3049_s1 + $0xf8] sm:$0xff]   ;;  %v19_v33 = vld [vmem:[%s3050_s0 + $0x20] sm:$0xff] }
   0xb   :  { %v2311_v26 = vld [vmem:[%s3049_s1 + $0x30] sm:$0xff]   ;;  %v2315_v30 = vld [vmem:[%s3049_s1 + $0x38] sm:$0xff]   ;;  %v16_v34 = vld [vmem:[%s3050_s0 + $0x8] sm:$0xff]  ;;  %v1741_v35 = vcombine.low %v15_v32, %v19_v33  ;;  %v1742_v36 = vcombine.high %v15_v32, %v19_v33 }
   0xc   :  { %1914 = vmatpush3.bf16.msra.mxu0 %v2295_v10  ;;  %v2312_v27 = vld [vmem:[%s3049_s1 + $0xb0] sm:$0xff]   ;;  %v2316_v31 = vld [vmem:[%s3049_s1 + $0xb8] sm:$0xff]   ;;  %v20_v37 = vld [vmem:[%s3050_s0 + $0x28] sm:$0xff] }
   0xd   :  { %2008 = vmatpush3.bf16.msra.mxu1 %v2296_v11  ;;  %1915 = vmatprep.subr.bf16.mxu0 %v2297_v12  ;;  %v1743_v38 = vcombine.low %v16_v34, %v20_v37  ;;  %v1744_v39 = vcombine.high %v16_v34, %v20_v37  ;;  %v2317_v40 = vld [vmem:[%s3049_s1 + $0x140] sm:$0xff]   ;;  %v24_v47 = vld [vmem:[%s3050_s0 + $0x48] sm:$0xff]  ;;  %v2325_v2 = vld [vmem:[%s3049_s1 + $0x150] sm:$0xff]  }
   0xe   :  { %2009 = vmatprep.subr.bf16.mxu1 %v2298_v13  ;;  %1174 = vmatprep.mubr.bf16.mxu0 %v1742_v36  ;;  %v2318_v41 = vld [vmem:[%s3049_s1 + $0x100] sm:$0xff]   ;;  %v28_v48 = vld [vmem:[%s3050_s0 + $0x68] sm:$0xff]  ;;  %v2326_v3 = vld [vmem:[%s3049_s1 + $0x110] sm:$0xff]  }
   0xf   :  { %1310 = vmatprep.mubr.bf16.mxu1 %v1744_v39  ;;  %v2319_v42 = vld [vmem:[%s3049_s1 + $0x1c0] sm:$0xff]   ;;  %v1752_v49 = vcombine.high %v24_v47, %v28_v48  ;;  %v2321_v50 = vld [vmem:[%s3049_s1 + $0x148] sm:$0xff]   ;;  %v1751_v54 = vcombine.low %v24_v47, %v28_v48  ;;  %v2327_v5 = vld [vmem:[%s3049_s1 + $0x1d0] sm:$0xff]  }
  0x10   :  { %1916 = vmatpush3.bf16.msra.mxu0 %v2299_v14  ;;  %v2320_v43 = vld [vmem:[%s3049_s1 + $0x180] sm:$0xff]   ;;  %v2322_v52 = vld [vmem:[%s3049_s1 + $0x108] sm:$0xff]   ;;  %v2328_v8 = vld [vmem:[%s3049_s1 + $0x190] sm:$0xff]  }
  0x11   :  { %2010 = vmatpush3.bf16.msra.mxu1 %v2300_v15  ;;  %1917 = vmatprep.subr.bf16.mxu0 %v2301_v16  ;;  %v23_v44 = vld [vmem:[%s3050_s0 + $0x40] sm:$0xff]  ;;  %v32_v56 = vld [vmem:[%s3050_s0 + $0x88] sm:$0xff]  ;;  %v2329_v12 = vld [vmem:[%s3049_s1 + $0x158] sm:$0xff]  }
  0x12   :  { %2011 = vmatprep.subr.bf16.mxu1 %v2302_v17  ;;  %v27_v45 = vld [vmem:[%s3050_s0 + $0x60] sm:$0xff]  ;;  %v36_v57 = vld [vmem:[%s3050_s0 + $0xa8] sm:$0xff]  ;;  %v2330_v15 = vld [vmem:[%s3049_s1 + $0x118] sm:$0xff]  }
  0x13   :  { %v1750_v46 = vcombine.high %v23_v44, %v27_v45  ;;  %v1749_v51 = vcombine.low %v23_v44, %v27_v45  ;;  %v31_v53 = vld [vmem:[%s3050_s0 + $0x80] sm:$0xff]  ;;  %v1760_v59 = vcombine.high %v32_v56, %v36_v57  ;;  %v2323_v60 = vld [vmem:[%s3049_s1 + $0x1c8] sm:$0xff]   ;;  %v1759_v6 = vcombine.low %v32_v56, %v36_v57  ;;  %v2331_v16 = vld [vmem:[%s3049_s1 + $0x1d8] sm:$0xff]  }
  0x14   :  { %1918 = vmatpush3.bf16.msra.mxu0 %v2303_v18  ;;  %v35_v55 = vld [vmem:[%s3050_s0 + $0xa0] sm:$0xff]  ;;  %v2324_v61 = vld [vmem:[%s3049_s1 + $0x188] sm:$0xff]   ;;  %v2332_v17 = vld [vmem:[%s3049_s1 + $0x198] sm:$0xff]  }
  0x15   :  { %2012 = vmatpush3.bf16.msra.mxu1 %v2304_v19  ;;  %1919 = vmatprep.subr.bf16.mxu0 %v2305_v20  ;;  %v1758_v58 = vcombine.high %v31_v53, %v35_v55  ;;  %v39_v62 = vld [vmem:[%s3050_s0 + $0xc0] sm:$0xff]  ;;  %v40_v0 = vld [vmem:[%s3050_s0 + $0xc8] sm:$0xff]  ;;  %v1757_v4 = vcombine.low %v31_v53, %v35_v55  ;;  %v2342_v44 = vld [vmem:[%s3049_s1 + $0x130] sm:$0xff]  }
  0x16   :  { %2013 = vmatprep.subr.bf16.mxu1 %v2306_v21  ;;  %v43_v63 = vld [vmem:[%s3050_s0 + $0xe0] sm:$0xff]  ;;  %v44_v1 = vld [vmem:[%s3050_s0 + $0xe8] sm:$0xff]  ;;  %v2343_v47 = vld [vmem:[%s3049_s1 + $0x1f0] sm:$0xff]  }
  0x17   :  { %v1766_v7 = vcombine.high %v39_v62, %v43_v63  ;;  %v1768_v9 = vcombine.high %v40_v0, %v44_v1  ;;  %v47_v10 = vld [vmem:[%s3050_s0 + $0x100] sm:$0xff]  ;;  %v48_v13 = vld [vmem:[%s3050_s0 + $0x108] sm:$0xff]  ;;  %v1765_v18 = vcombine.low %v39_v62, %v43_v63  ;;  %v1767_v19 = vcombine.low %v40_v0, %v44_v1  ;;  %v2346_v55 = vld [vmem:[%s3049_s1 + $0x138] sm:$0xff]  }
  0x18   :  { %1920 = vmatpush3.bf16.msra.mxu0 %v2307_v22  ;;  %v51_v11 = vld [vmem:[%s3050_s0 + $0x120] sm:$0xff]  ;;  %v52_v14 = vld [vmem:[%s3050_s0 + $0x128] sm:$0xff]  ;;  %v2347_v56 = vld [vmem:[%s3049_s1 + $0x1f8] sm:$0xff]  }
  0x19   :  { %2014 = vmatpush3.bf16.msra.mxu1 %v2308_v23  ;;  %1921 = vmatprep.subr.bf16.mxu0 %v2309_v24  ;;  %v1774_v20 = vcombine.high %v47_v10, %v51_v11  ;;  %v1776_v21 = vcombine.high %v48_v13, %v52_v14  ;;  %v2333_v22 = vld [vmem:[%s3049_s1 + $0x160] sm:$0xff]   ;;  %v1775_v32 = vcombine.low %v48_v13, %v52_v14  ;;  %v2338_v34 = vld [vmem:[%s3049_s1 + $0x128] sm:$0xff]   ;;  %v2348_v57 = vld [vmem:[%s3049_s1 + $0x1b8] sm:$0xff]  }
  0x1a   :  { %2015 = vmatprep.subr.bf16.mxu1 %v2310_v25  ;;  %v2334_v23 = vld [vmem:[%s3049_s1 + $0x120] sm:$0xff]   ;;  %v2339_v36 = vld [vmem:[%s3049_s1 + $0x1e8] sm:$0xff]  }
  0x1b   :  { %v2335_v24 = vld [vmem:[%s3049_s1 + $0x1e0] sm:$0xff]   ;;  %v2340_v37 = vld [vmem:[%s3049_s1 + $0x1a8] sm:$0xff]  }
  0x1c   :  { %1922 = vmatpush3.bf16.msra.mxu0 %v2311_v26  ;;  %v55_v25 = vld [vmem:[%s3050_s0 + $0x140] sm:$0xff]  ;;  %v72_v53 = vld [vmem:[%s3050_s0 + $0x1c8] sm:$0xff] }
  0x1d   :  { %2016 = vmatpush3.bf16.msra.mxu1 %v2312_v27  ;;  %1923 = vmatprep.subr.bf16.mxu0 %v2313_v28  ;;  %v59_v26 = vld [vmem:[%s3050_s0 + $0x160] sm:$0xff]  ;;  %v56_v28 = vld [vmem:[%s3050_s0 + $0x148] sm:$0xff] }
  0x1e   :  { %2017 = vmatprep.subr.bf16.mxu1 %v2314_v29  ;;  %v2336_v27 = vld [vmem:[%s3049_s1 + $0x1a0] sm:$0xff]   ;;  %v60_v29 = vld [vmem:[%s3050_s0 + $0x168] sm:$0xff]  ;;  %v1782_v33 = vcombine.high %v55_v25, %v59_v26 }
  0x1f   :  { %v67_v39 = vld [vmem:[%s3050_s0 + $0x1a0] sm:$0xff]  ;;  %v1783_v45 = vcombine.low %v56_v28, %v60_v29  ;;  %v80_v0 = vld [vmem:[%s3050_s0 + $0x208] sm:$0xff] }
  0x20   :  { %1924 = vmatpush3.bf16.msra.mxu0 %v2315_v30  ;;  %v1773_v30 = vcombine.low %v47_v10, %v51_v11  ;;  %v79_v62 = vld [vmem:[%s3050_s0 + $0x200] sm:$0xff]  ;;  %v84_v1 = vld [vmem:[%s3050_s0 + $0x228] sm:$0xff] }
  0x21   :  { %2018 = vmatpush3.bf16.msra.mxu1 %v2316_v31  ;;  %2097 = vmatprep.subr.bf16.mxu0 %v2317_v40  ;;  %v2337_v31 = vld [vmem:[%s3049_s1 + $0x168] sm:$0xff]   ;;  %v2341_v40 = vld [vmem:[%s3049_s1 + $0x170] sm:$0xff]   ;;  %v83_v63 = vld [vmem:[%s3050_s0 + $0x220] sm:$0xff]  ;;  %v1807_v11 = vcombine.low %v80_v0, %v84_v1 }
  0x22   :  { %2191 = vmatprep.subr.bf16.mxu1 %v2319_v42  ;;  %v68_v42 = vld [vmem:[%s3050_s0 + $0x1a8] sm:$0xff]  ;;  %v1805_v10 = vcombine.low %v79_v62, %v83_v63  ;;  %v95_v14 = vld [vmem:[%s3050_s0 + $0x280] sm:$0xff] }
  0x23   :  { %1175 = vmatmul.mubr.bf16.vlgmr.msra.gmra.mrb[0].mxu0 %v1741_v35  ;;  %v1784_v35 = vcombine.high %v56_v28, %v60_v29 }
  0x24   :  { %1311 = vmatmul.mubr.bf16.vlgmr.msra.gmra.mrb[0].mxu1 %v1743_v38  ;;  %2098 = vmatpush3.bf16.msra.mxu0 %v2318_v41  ;;  %v63_v38 = vld [vmem:[%s3050_s0 + $0x180] sm:$0xff]  ;;  %v64_v41 = vld [vmem:[%s3050_s0 + $0x188] sm:$0xff] }
  0x25   :  { %2192 = vmatpush3.bf16.msra.mxu1 %v2320_v43  ;;  %1182 = vmatprep.mubr.bf16.mxu0 %v1750_v46  ;;  %v1781_v43 = vcombine.low %v55_v25, %v59_v26  ;;  %v1790_v46 = vcombine.high %v63_v38, %v67_v39  ;;  %v1792_v48 = vcombine.high %v64_v41, %v68_v42  ;;  %v108_v25 = vld [vmem:[%s3050_s0 + $0x2e8] sm:$0xff] }
  0x26   :  { %1318 = vmatprep.mubr.bf16.mxu1 %v1752_v49  ;;  %2099 = vmatprep.subr.bf16.mxu0 %v2321_v50  ;;  %v2344_v49 = vld [vmem:[%s3049_s1 + $0x1b0] sm:$0xff]   ;;  %v71_v50 = vld [vmem:[%s3050_s0 + $0x1c0] sm:$0xff] }
  0x27   :  { %2193 = vmatprep.subr.bf16.mxu1 %v2323_v60 }
  0x28   :  { %2100 = vmatpush3.bf16.msra.mxu0 %v2322_v52  ;;  %v2345_v52 = vld [vmem:[%s3049_s1 + $0x178] sm:$0xff]  }
  0x29   :  { %2194 = vmatpush3.bf16.msra.mxu1 %v2324_v61  ;;  %2101 = vmatprep.subr.bf16.mxu0 %v2325_v2 }
  0x2a   :  { %2195 = vmatprep.subr.bf16.mxu1 %v2327_v5  ;;  %v1808_v5 = vcombine.high %v80_v0, %v84_v1 }
  0x2b   :  { %1183 = vmatmul.mubr.bf16.gmra.mrb[4].mxu0 %v1749_v51  ;;  %v75_v51 = vld [vmem:[%s3050_s0 + $0x1e0] sm:$0xff] }
  0x2c   :  { %1319 = vmatmul.mubr.bf16.gmra.mrb[4].mxu1 %v1751_v54  ;;  %1190 = vmatprep.mubr.bf16.mxu0 %v1758_v58  ;;  %v76_v54 = vld [vmem:[%s3050_s0 + $0x1e8] sm:$0xff]  ;;  %v1789_v58 = vcombine.low %v63_v38, %v67_v39  ;;  %v1798_v60 = vcombine.high %v71_v50, %v75_v51  ;;  %v1797_v2 = vcombine.low %v71_v50, %v75_v51  ;;  %v18_v38 = vld [vmem:[%s3050_s0 + $0x18] sm:$0xff] }
  0x2d   :  { %1326 = vmatprep.mubr.bf16.mxu1 %v1760_v59  ;;  %2102 = vmatpush3.bf16.msra.mxu0 %v2326_v3  ;;  %v1791_v59 = vcombine.low %v64_v41, %v68_v42  ;;  %v1800_v61 = vcombine.high %v72_v53, %v76_v54  ;;  %v1799_v3 = vcombine.low %v72_v53, %v76_v54  ;;  %v22_v39 = vld [vmem:[%s3050_s0 + $0x38] sm:$0xff]  ;;  %v37_v53 = vld [vmem:[%s3050_s0 + $0xb0] sm:$0xff] }
  0x2e   :  { %2196 = vmatpush3.bf16.msra.mxu1 %v2328_v8  ;;  %2103 = vmatprep.subr.bf16.mxu0 %v2329_v12  ;;  %v88_v8 = vld [vmem:[%s3050_s0 + $0x248] sm:$0xff]  ;;  %v34_v54 = vld [vmem:[%s3050_s0 + $0x98] sm:$0xff] }
  0x2f   :  { %2197 = vmatprep.subr.bf16.mxu1 %v2331_v16  ;;  %v96_v16 = vld [vmem:[%s3050_s0 + $0x288] sm:$0xff] }
  0x31   :  { %2104 = vmatpush3.bf16.msra.mxu0 %v2330_v15  ;;  %v99_v15 = vld [vmem:[%s3050_s0 + $0x2a0] sm:$0xff] }
  0x32   :  { %2198 = vmatpush3.bf16.msra.mxu1 %v2332_v17  ;;  %2105 = vmatprep.subr.bf16.mxu0 %v2333_v22  ;;  %v100_v17 = vld [vmem:[%s3050_s0 + $0x2a8] sm:$0xff]  ;;  %v103_v22 = vld [vmem:[%s3050_s0 + $0x2c0] sm:$0xff]  ;;  %v1821_v26 = vcombine.low %v95_v14, %v99_v15 }
  0x33   :  { %1191 = vmatmul.mubr.bf16.gmra.mrb[8].mxu0 %v1757_v4  ;;  %2199 = vmatprep.subr.bf16.mxu1 %v2335_v24  ;;  %v1806_v4 = vcombine.high %v79_v62, %v83_v63  ;;  %v104_v24 = vld [vmem:[%s3050_s0 + $0x2c8] sm:$0xff]  ;;  %v42_v62 = vld [vmem:[%s3050_s0 + $0xd8] sm:$0xff] }
  0x34   :  { %1327 = vmatmul.mubr.bf16.gmra.mrb[8].mxu1 %v1759_v6  ;;  %1198 = vmatprep.mubr.bf16.mxu0 %v1766_v7  ;;  %v87_v6 = vld [vmem:[%s3050_s0 + $0x240] sm:$0xff]  ;;  %v1832_v29 = vcombine.high %v104_v24, %v108_v25  ;;  %v46_v63 = vld [vmem:[%s3050_s0 + $0xf8] sm:$0xff] }
  0x35   :  { %1334 = vmatprep.mubr.bf16.mxu1 %v1768_v9  ;;  %2106 = vmatpush3.bf16.msra.mxu0 %v2334_v23  ;;  %v91_v7 = vld [vmem:[%s3050_s0 + $0x260] sm:$0xff]  ;;  %v92_v9 = vld [vmem:[%s3050_s0 + $0x268] sm:$0xff] }
  0x36   :  { %2200 = vmatpush3.bf16.msra.mxu1 %v2336_v27  ;;  %2107 = vmatprep.subr.bf16.mxu0 %v2337_v31  ;;  %v1814_v12 = vcombine.high %v87_v6, %v91_v7  ;;  %v1816_v13 = vcombine.high %v88_v8, %v92_v9  ;;  %v107_v23 = vld [vmem:[%s3050_s0 + $0x2e0] sm:$0xff]  ;;  %v1823_v27 = vcombine.low %v96_v16, %v100_v17  ;;  %v112_v31 = vld [vmem:[%s3050_s0 + $0x308] sm:$0xff] }
  0x37   :  { %2201 = vmatprep.subr.bf16.mxu1 %v2339_v36  ;;  %v1830_v28 = vcombine.high %v103_v22, %v107_v23  ;;  %v17_v36 = vld [vmem:[%s3050_s0 + $0x10] sm:$0xff]  ;;  %v1839_v41 = vcombine.low %v112_v31, %v112_v31 }
  0x39   :  { %2108 = vmatpush3.bf16.msra.mxu0 %v2338_v34 }
  0x3a   :  { %2202 = vmatpush3.bf16.msra.mxu1 %v2340_v37  ;;  %2109 = vmatprep.subr.bf16.mxu0 %v2341_v40  ;;  %v21_v37 = vld [vmem:[%s3050_s0 + $0x30] sm:$0xff] }
  0x3b   :  { %1199 = vmatmul.mubr.bf16.gmra.mrb[12].mxu0 %v1765_v18  ;;  %2203 = vmatprep.subr.bf16.mxu1 %v2343_v47  ;;  %v1813_v18 = vcombine.low %v87_v6, %v91_v7  ;;  %v1746_v42 = vcombine.high %v17_v36, %v21_v37  ;;  %v30_v47 = vld [vmem:[%s3050_s0 + $0x78] sm:$0xff] }
  0x3c   :  { %1335 = vmatmul.mubr.bf16.gmra.mrb[12].mxu1 %v1767_v19  ;;  %1206 = vmatprep.mubr.bf16.mxu0 %v1774_v20  ;;  %v1815_v19 = vcombine.low %v88_v8, %v92_v9  ;;  %v1822_v20 = vcombine.high %v95_v14, %v99_v15  ;;  %v50_v6 = vld [vmem:[%s3050_s0 + $0x118] sm:$0xff]  ;;  %v1771_v9 = vcombine.low %v42_v62, %v46_v63 }
  0x3d   :  { %1342 = vmatprep.mubr.bf16.mxu1 %v1776_v21  ;;  %2110 = vmatpush3.bf16.msra.mxu0 %v2342_v44  ;;  %v1824_v21 = vcombine.high %v96_v16, %v100_v17  ;;  %v25_v44 = vld [vmem:[%s3050_s0 + $0x50] sm:$0xff]  ;;  %v54_v7 = vld [vmem:[%s3050_s0 + $0x138] sm:$0xff] }
  0x3e   :  { %2204 = vmatpush3.bf16.msra.mxu1 %v2344_v49  ;;  %2111 = vmatprep.subr.bf16.mxu0 %v2345_v52  ;;  %v1747_v49 = vcombine.low %v18_v38, %v22_v39  ;;  %v33_v52 = vld [vmem:[%s3050_s0 + $0x90] sm:$0xff]  ;;  %v58_v14 = vld [vmem:[%s3050_s0 + $0x158] sm:$0xff]  ;;  %v1779_v17 = vcombine.low %v50_v6, %v54_v7 }
  0x3f   :  { %2205 = vmatprep.subr.bf16.mxu1 %v2347_v56  ;;  %v1761_v0 = vcombine.low %v33_v52, %v37_v53  ;;  %v62_v15 = vld [vmem:[%s3050_s0 + $0x178] sm:$0xff] }
  0x41   :  { %2112 = vmatpush3.bf16.msra.mxu0 %v2346_v55  ;;  %v38_v55 = vld [vmem:[%s3050_s0 + $0xb8] sm:$0xff] }
  0x42   :  { %2206 = vmatpush3.bf16.msra.mxu1 %v2348_v57  ;;  %v1763_v1 = vcombine.low %v34_v54, %v38_v55 }
  0x43   :  { %1207 = vmatmul.mubr.bf16.gmra.mrb[16].mxu0 %v1773_v30  ;;  %v111_v30 = vld [vmem:[%s3050_s0 + $0x300] sm:$0xff] }
  0x44   :  { %1343 = vmatmul.mubr.bf16.gmra.mrb[16].mxu1 %v1775_v32  ;;  %1214 = vmatprep.mubr.bf16.mxu0 %v1782_v33  ;;  %v1829_v32 = vcombine.low %v103_v22, %v107_v23  ;;  %v1831_v33 = vcombine.low %v104_v24, %v108_v25  ;;  %v1838_v34 = vcombine.high %v111_v30, %v111_v30  ;;  %v66_v22 = vld [vmem:[%s3050_s0 + $0x198] sm:$0xff] }
  0x45   :  { %1350 = vmatprep.mubr.bf16.mxu1 %v1784_v35  ;;  %v1840_v35 = vcombine.high %v112_v31, %v112_v31  ;;  %v1837_v40 = vcombine.low %v111_v30, %v111_v30  ;;  %v70_v23 = vld [vmem:[%s3050_s0 + $0x1b8] sm:$0xff]  ;;  %v1787_v25 = vcombine.low %v58_v14, %v62_v15 }
  0x46   :  { %v74_v30 = vld [vmem:[%s3050_s0 + $0x1d8] sm:$0xff] }
  0x47   :  { %v78_v31 = vld [vmem:[%s3050_s0 + $0x1f8] sm:$0xff] }
  0x4b   :  { %1215 = vmatmul.mubr.bf16.gmra.mrb[20].mxu0 %v1781_v43  ;;  %v1748_v43 = vcombine.high %v18_v38, %v22_v39  ;;  %v82_v38 = vld [vmem:[%s3050_s0 + $0x218] sm:$0xff] }
  0x4c   :  { %1351 = vmatmul.mubr.bf16.gmra.mrb[20].mxu1 %v1783_v45  ;;  %1222 = vmatprep.mubr.bf16.mxu0 %v1790_v46  ;;  %v29_v45 = vld [vmem:[%s3050_s0 + $0x70] sm:$0xff]  ;;  %v26_v46 = vld [vmem:[%s3050_s0 + $0x58] sm:$0xff] }
  0x4d   :  { %1358 = vmatprep.mubr.bf16.mxu1 %v1792_v48  ;;  %v1745_v48 = vcombine.low %v17_v36, %v21_v37  ;;  %v1754_v50 = vcombine.high %v25_v44, %v29_v45  ;;  %v1756_v51 = vcombine.high %v26_v46, %v30_v47  ;;  %v1753_v56 = vcombine.low %v25_v44, %v29_v45  ;;  %v81_v36 = vld [vmem:[%s3050_s0 + $0x210] sm:$0xff]  ;;  %v86_v39 = vld [vmem:[%s3050_s0 + $0x238] sm:$0xff] }
  0x4e   :  { %v1755_v57 = vcombine.low %v26_v46, %v30_v47  ;;  %v85_v37 = vld [vmem:[%s3050_s0 + $0x230] sm:$0xff]  ;;  %v90_v46 = vld [vmem:[%s3050_s0 + $0x258] sm:$0xff] }
  0x4f   :  { %v89_v44 = vld [vmem:[%s3050_s0 + $0x250] sm:$0xff]  ;;  %v94_v47 = vld [vmem:[%s3050_s0 + $0x278] sm:$0xff] }
  0x50   :  { %v93_v45 = vld [vmem:[%s3050_s0 + $0x270] sm:$0xff] }
  0x53   :  { %1223 = vmatmul.mubr.bf16.gmra.mrb[24].mxu0 %v1789_v58  ;;  %v1762_v58 = vcombine.high %v33_v52, %v37_v53  ;;  %v97_v52 = vld [vmem:[%s3050_s0 + $0x290] sm:$0xff] }
  0x54   :  { %1359 = vmatmul.mubr.bf16.gmra.mrb[24].mxu1 %v1791_v59  ;;  %1230 = vmatprep.mubr.bf16.mxu0 %v1798_v60  ;;  %v1764_v59 = vcombine.high %v34_v54, %v38_v55  ;;  %v41_v60 = vld [vmem:[%s3050_s0 + $0xd0] sm:$0xff]  ;;  %v98_v54 = vld [vmem:[%s3050_s0 + $0x298] sm:$0xff] }
  0x55   :  { %1366 = vmatprep.mubr.bf16.mxu1 %v1800_v61  ;;  %v45_v61 = vld [vmem:[%s3050_s0 + $0xf0] sm:$0xff]  ;;  %v102_v55 = vld [vmem:[%s3050_s0 + $0x2b8] sm:$0xff] }
  0x56   :  { %v1769_v8 = vcombine.low %v41_v60, %v45_v61  ;;  %v101_v53 = vld [vmem:[%s3050_s0 + $0x2b0] sm:$0xff] }
  0x5b   :  { %1231 = vmatmul.mubr.bf16.gmra.mrb[28].mxu0 %v1797_v2  ;;  %v1770_v2 = vcombine.high %v41_v60, %v45_v61  ;;  %v105_v60 = vld [vmem:[%s3050_s0 + $0x2d0] sm:$0xff] }
  0x5c   :  { %1367 = vmatmul.mubr.bf16.gmra.mrb[28].mxu1 %v1799_v3  ;;  %1238 = vmatprep.mubr.bf16.mxu0 %v1806_v4  ;;  %v1772_v3 = vcombine.high %v42_v62, %v46_v63  ;;  %v49_v4 = vld [vmem:[%s3050_s0 + $0x110] sm:$0xff]  ;;  %v106_v62 = vld [vmem:[%s3050_s0 + $0x2d8] sm:$0xff] }
  0x5d   :  { %1374 = vmatprep.mubr.bf16.mxu1 %v1808_v5  ;;  %v53_v5 = vld [vmem:[%s3050_s0 + $0x130] sm:$0xff]  ;;  %v110_v63 = vld [vmem:[%s3050_s0 + $0x2f8] sm:$0xff] }
  0x5e   :  { %v1777_v16 = vcombine.low %v49_v4, %v53_v5  ;;  %v109_v61 = vld [vmem:[%s3050_s0 + $0x2f0] sm:$0xff] }
  0x63   :  { %1239 = vmatmul.mubr.bf16.gmra.mrb[32].mxu0 %v1805_v10  ;;  %v1778_v10 = vcombine.high %v49_v4, %v53_v5  ;;  %v113_v4 = vld [vmem:[%s3050_s0 + $0x310] sm:$0xff]  ;;  %v114_v5 = vld [vmem:[%s3050_s0 + $0x318] sm:$0xff] }
  0x64   :  { %1375 = vmatmul.mubr.bf16.gmra.mrb[32].mxu1 %v1807_v11  ;;  %1246 = vmatprep.mubr.bf16.mxu0 %v1814_v12  ;;  %v1780_v11 = vcombine.high %v50_v6, %v54_v7  ;;  %v57_v12 = vld [vmem:[%s3050_s0 + $0x150] sm:$0xff]  ;;  %v1833_v6 = vcombine.low %v105_v60, %v109_v61  ;;  %v1835_v7 = vcombine.low %v106_v62, %v110_v63 }
  0x65   :  { %1382 = vmatprep.mubr.bf16.mxu1 %v1816_v13  ;;  %v61_v13 = vld [vmem:[%s3050_s0 + $0x170] sm:$0xff] }
  0x66   :  { %v1785_v24 = vcombine.low %v57_v12, %v61_v13 }
  0x6b   :  { %1247 = vmatmul.mubr.bf16.gmra.mrb[36].mxu0 %v1813_v18  ;;  %v1786_v18 = vcombine.high %v57_v12, %v61_v13 }
  0x6c   :  { %1383 = vmatmul.mubr.bf16.gmra.mrb[36].mxu1 %v1815_v19  ;;  %1254 = vmatprep.mubr.bf16.mxu0 %v1822_v20  ;;  %v1788_v19 = vcombine.high %v58_v14, %v62_v15  ;;  %v65_v20 = vld [vmem:[%s3050_s0 + $0x190] sm:$0xff]  ;;  %v2872_v14 = vld [vmem:[%s3051_s2] ss:$0 sm:$0xff] }
  0x6d   :  { %1390 = vmatprep.mubr.bf16.mxu1 %v1824_v21  ;;  %v69_v21 = vld [vmem:[%s3050_s0 + $0x1b0] sm:$0xff] }
  0x73   :  { %1255 = vmatmul.mubr.bf16.gmra.mrb[40].mxu0 %v1821_v26  ;;  %v1794_v26 = vcombine.high %v65_v20, %v69_v21 }
  0x74   :  { %1391 = vmatmul.mubr.bf16.gmra.mrb[40].mxu1 %v1823_v27  ;;  %1262 = vmatprep.mubr.bf16.mxu0 %v1830_v28  ;;  %v1796_v27 = vcombine.high %v66_v22, %v70_v23  ;;  %v73_v28 = vld [vmem:[%s3050_s0 + $0x1d0] sm:$0xff] }
  0x75   :  { %1398 = vmatprep.mubr.bf16.mxu1 %v1832_v29  ;;  %v77_v29 = vld [vmem:[%s3050_s0 + $0x1f0] sm:$0xff] }
  0x7b   :  { %1263 = vmatmul.mubr.bf16.gmra.mrb[44].mxu0 %v1829_v32  ;;  %v1793_v32 = vcombine.low %v65_v20, %v69_v21 }
  0x7c   :  { %1399 = vmatmul.mubr.bf16.gmra.mrb[44].mxu1 %v1831_v33  ;;  %1270 = vmatprep.mubr.bf16.mxu0 %v1838_v34  ;;  %v1795_v33 = vcombine.low %v66_v22, %v70_v23  ;;  %v1802_v34 = vcombine.high %v73_v28, %v77_v29 }
  0x7d   :  { %1406 = vmatprep.mubr.bf16.mxu1 %v1840_v35  ;;  %v1804_v35 = vcombine.high %v74_v30, %v78_v31 }
  0x83   :  { %1271 = vmatmul.mubr.bf16.gmra.mrb[48].mxu0 %v1837_v40  ;;  %v1801_v40 = vcombine.low %v73_v28, %v77_v29 }
  0x84   :  { %1407 = vmatmul.mubr.bf16.gmra.mrb[48].mxu1 %v1839_v41  ;;  %1446 = vmatprep.mubr.bf16.mxu0 %v1746_v42  ;;  %v1803_v41 = vcombine.low %v74_v30, %v78_v31  ;;  %v1810_v42 = vcombine.high %v81_v36, %v85_v37 }
  0x85   :  { %1582 = vmatprep.mubr.bf16.mxu1 %v1748_v43  ;;  %v1812_v43 = vcombine.high %v82_v38, %v86_v39 }
  0x8b   :  { %1447 = vmatmul.mubr.bf16.vlgmr.msra.gmra.mrb[52].mxu0 %v1745_v48  ;;  %v1809_v48 = vcombine.low %v81_v36, %v85_v37 }
  0x8c   :  { %1583 = vmatmul.mubr.bf16.vlgmr.msra.gmra.mrb[52].mxu1 %v1747_v49  ;;  %1454 = vmatprep.mubr.bf16.mxu0 %v1754_v50  ;;  %v1811_v49 = vcombine.low %v82_v38, %v86_v39  ;;  %v1818_v50 = vcombine.high %v89_v44, %v93_v45 }
  0x8d   :  { %1590 = vmatprep.mubr.bf16.mxu1 %v1756_v51  ;;  %v1820_v51 = vcombine.high %v90_v46, %v94_v47 }
  0x93   :  { %1455 = vmatmul.mubr.bf16.gmra.mrb[56].mxu0 %v1753_v56  ;;  %v1817_v56 = vcombine.low %v89_v44, %v93_v45 }
  0x94   :  { %1591 = vmatmul.mubr.bf16.gmra.mrb[56].mxu1 %v1755_v57  ;;  %1462 = vmatprep.mubr.bf16.mxu0 %v1762_v58  ;;  %v1819_v57 = vcombine.low %v90_v46, %v94_v47  ;;  %v1826_v58 = vcombine.high %v97_v52, %v101_v53 }
  0x95   :  { %1598 = vmatprep.mubr.bf16.mxu1 %v1764_v59  ;;  %v1828_v59 = vcombine.high %v98_v54, %v102_v55 }
  0x9b   :  { %1463 = vmatmul.mubr.bf16.gmra.mrb[60].mxu0 %v1761_v0  ;;  %v1825_v0 = vcombine.low %v97_v52, %v101_v53 }
  0x9c   :  { %1599 = vmatmul.mubr.bf16.gmra.mrb[60].mxu1 %v1763_v1  ;;  %1470 = vmatprep.mubr.bf16.mxu0 %v1770_v2  ;;  %v1827_v1 = vcombine.low %v98_v54, %v102_v55  ;;  %v1834_v2 = vcombine.high %v105_v60, %v109_v61 }
  0x9d   :  { %1606 = vmatprep.mubr.bf16.mxu1 %v1772_v3  ;;  %v1836_v3 = vcombine.high %v106_v62, %v110_v63 }
  0xa3   :  { %1471 = vmatmul.mubr.bf16.gmra.mrb[64].mxu0 %v1769_v8  ;;  %v1842_v8 = vcombine.high %v113_v4, %v113_v4 }
  0xa4   :  { %1607 = vmatmul.mubr.bf16.gmra.mrb[64].mxu1 %v1771_v9  ;;  %1478 = vmatprep.mubr.bf16.mxu0 %v1778_v10  ;;  %v1844_v9 = vcombine.high %v114_v5, %v114_v5  ;;  %v1841_v10 = vcombine.low %v113_v4, %v113_v4 }
  0xa5   :  { %1614 = vmatprep.mubr.bf16.mxu1 %v1780_v11  ;;  %v1843_v11 = vcombine.low %v114_v5, %v114_v5 }
  0xab   :  { %1479 = vmatmul.mubr.bf16.gmra.mrb[68].mxu0 %v1777_v16 }
  0xac   :  { %1615 = vmatmul.mubr.bf16.gmra.mrb[68].mxu1 %v1779_v17  ;;  %1486 = vmatprep.mubr.bf16.mxu0 %v1786_v18 }
  0xad   :  { %1622 = vmatprep.mubr.bf16.mxu1 %v1788_v19 }
  0xb3   :  { %1487 = vmatmul.mubr.bf16.gmra.mrb[72].mxu0 %v1785_v24 }
  0xb4   :  { %1623 = vmatmul.mubr.bf16.gmra.mrb[72].mxu1 %v1787_v25  ;;  %1494 = vmatprep.mubr.bf16.mxu0 %v1794_v26 }
  0xb5   :  { %1630 = vmatprep.mubr.bf16.mxu1 %v1796_v27 }
  0xbb   :  { %1495 = vmatmul.mubr.bf16.gmra.mrb[76].mxu0 %v1793_v32 }
  0xbc   :  { %1631 = vmatmul.mubr.bf16.gmra.mrb[76].mxu1 %v1795_v33  ;;  %1502 = vmatprep.mubr.bf16.mxu0 %v1802_v34 }
  0xbd   :  { %1638 = vmatprep.mubr.bf16.mxu1 %v1804_v35 }
  0xc3   :  { %1503 = vmatmul.mubr.bf16.gmra.mrb[80].mxu0 %v1801_v40 }
  0xc4   :  { %1639 = vmatmul.mubr.bf16.gmra.mrb[80].mxu1 %v1803_v41  ;;  %1510 = vmatprep.mubr.bf16.mxu0 %v1810_v42 }
  0xc5   :  { %1646 = vmatprep.mubr.bf16.mxu1 %v1812_v43 }
  0xcb   :  { %1511 = vmatmul.mubr.bf16.gmra.mrb[84].mxu0 %v1809_v48 }
  0xcc   :  { %1647 = vmatmul.mubr.bf16.gmra.mrb[84].mxu1 %v1811_v49  ;;  %1518 = vmatprep.mubr.bf16.mxu0 %v1818_v50 }
  0xcd   :  { %1654 = vmatprep.mubr.bf16.mxu1 %v1820_v51 }
  0xd3   :  { %1519 = vmatmul.mubr.bf16.gmra.mrb[88].mxu0 %v1817_v56 }
  0xd4   :  { %1655 = vmatmul.mubr.bf16.gmra.mrb[88].mxu1 %v1819_v57  ;;  %1526 = vmatprep.mubr.bf16.mxu0 %v1826_v58 }
  0xd5   :  { %1662 = vmatprep.mubr.bf16.mxu1 %v1828_v59 }
  0xdb   :  { %1527 = vmatmul.mubr.bf16.gmra.mrb[92].mxu0 %v1825_v0 }
  0xdc   :  { %1663 = vmatmul.mubr.bf16.gmra.mrb[92].mxu1 %v1827_v1  ;;  %1534 = vmatprep.mubr.bf16.mxu0 %v1834_v2 }
  0xdd   :  { %1670 = vmatprep.mubr.bf16.mxu1 %v1836_v3 }
  0xe3   :  { %1535 = vmatmul.mubr.bf16.gmra.mrb[96].mxu0 %v1833_v6 }
  0xe4   :  { %1671 = vmatmul.mubr.bf16.gmra.mrb[96].mxu1 %v1835_v7  ;;  %1542 = vmatprep.mubr.bf16.mxu0 %v1842_v8 }
  0xe5   :  { %1678 = vmatprep.mubr.bf16.mxu1 %v1844_v9 }
  0xeb   :  { %1543 = vmatmul.mubr.bf16.gmra.mrb[100].mxu0 %v1841_v10 }
  0xec   :  { %1679 = vmatmul.mubr.bf16.gmra.mrb[100].mxu1 %v1843_v11 }
  0xf6   :  { %v1925_v12 = vpop.f32.mrb[0].mxu0 }
  0xf7   :  { %v2019_v13 = vpop.f32.mrb[0].mxu1  ;;  %v1926_v15 = vpop.f32.mrb[1].mxu0 }
  0xf8   :  { %v1927_v16 = vadd.f32 %v1926_v15, %v1925_v12  ;;  %v2020_v17 = vpop.f32.mrb[1].mxu1  ;;  %v1928_v18 = vpop.f32.mrb[2].mxu0 }
  0xf9   :  { %v2021_v19 = vadd.f32 %v2020_v17, %v2019_v13  ;;  %v2022_v20 = vpop.f32.mrb[2].mxu1  ;;  %v1929_v21 = vpop.f32.mrb[3].mxu0 }
  0xfa   :  { %v1177_v22 = vadd.f32 %v1927_v16, %v2872_v14  ;;  %v1930_v23 = vadd.f32 %v1929_v21, %v1928_v18  ;;  %v2023_v24 = vpop.f32.mrb[3].mxu1 }
  0xfb   :  { %v2024_v25 = vadd.f32 %v2023_v24, %v2022_v20 }
  0xfc   :  { %v2875_v26 = vadd.f32 %v2021_v19, %v1177_v22  ;;  %v1180_v27 = vadd.f32 %v1930_v23, %v2872_v14 }
  0xfe   :  { %v2878_v28 = vadd.f32 %v2024_v25, %v1180_v27  ;;  %v1931_v29 = vpop.f32.mrb[4].mxu0 }
  0xff   :  { %v2025_v30 = vpop.f32.mrb[4].mxu1  ;;  %v1932_v31 = vpop.f32.mrb[5].mxu0 }
 0x100   :  { %v1933_v32 = vadd.f32 %v1932_v31, %v1931_v29  ;;  %v2026_v33 = vpop.f32.mrb[5].mxu1  ;;  %v1934_v34 = vpop.f32.mrb[6].mxu0 }
 0x101   :  { %v2027_v35 = vadd.f32 %v2026_v33, %v2025_v30  ;;  %v2028_v36 = vpop.f32.mrb[6].mxu1  ;;  %v1935_v37 = vpop.f32.mrb[7].mxu0 }
 0x102   :  { %v1185_v38 = vadd.f32 %v1933_v32, %v2872_v14  ;;  %v1936_v39 = vadd.f32 %v1935_v37, %v1934_v34  ;;  %v2029_v40 = vpop.f32.mrb[7].mxu1 }
 0x103   :  { %v2030_v41 = vadd.f32 %v2029_v40, %v2028_v36 }
 0x104   :  { %v2881_v42 = vadd.f32 %v2027_v35, %v1185_v38  ;;  %v1188_v43 = vadd.f32 %v1936_v39, %v2872_v14 }
 0x106   :  { %v2884_v44 = vadd.f32 %v2030_v41, %v1188_v43  ;;  %v1937_v45 = vpop.f32.mrb[8].mxu0 }
 0x107   :  { %v2031_v46 = vpop.f32.mrb[8].mxu1  ;;  %v1938_v47 = vpop.f32.mrb[9].mxu0 }
 0x108   :  { %v1939_v48 = vadd.f32 %v1938_v47, %v1937_v45  ;;  %v2032_v49 = vpop.f32.mrb[9].mxu1  ;;  %v1940_v50 = vpop.f32.mrb[10].mxu0 }
 0x109   :  { %v2033_v51 = vadd.f32 %v2032_v49, %v2031_v46  ;;  %v2034_v52 = vpop.f32.mrb[10].mxu1  ;;  %v1941_v53 = vpop.f32.mrb[11].mxu0 }
 0x10a   :  { %v1193_v54 = vadd.f32 %v1939_v48, %v2872_v14  ;;  %v1942_v55 = vadd.f32 %v1941_v53, %v1940_v50  ;;  %v2035_v56 = vpop.f32.mrb[11].mxu1 }
 0x10b   :  { %v2036_v57 = vadd.f32 %v2035_v56, %v2034_v52 }
 0x10c   :  { %v2887_v58 = vadd.f32 %v2033_v51, %v1193_v54  ;;  %v1196_v59 = vadd.f32 %v1942_v55, %v2872_v14 }
 0x10e   :  { %v2890_v60 = vadd.f32 %v2036_v57, %v1196_v59  ;;  %v1943_v61 = vpop.f32.mrb[12].mxu0 }
 0x10f   :  { %v2037_v62 = vpop.f32.mrb[12].mxu1  ;;  %v1944_v63 = vpop.f32.mrb[13].mxu0 }
 0x110   :  { %v1945_v0 = vadd.f32 %v1944_v63, %v1943_v61  ;;  %v2038_v1 = vpop.f32.mrb[13].mxu1  ;;  %v1946_v2 = vpop.f32.mrb[14].mxu0 }
 0x111   :  { %v2039_v3 = vadd.f32 %v2038_v1, %v2037_v62  ;;  %v2040_v4 = vpop.f32.mrb[14].mxu1  ;;  %v1947_v5 = vpop.f32.mrb[15].mxu0 }
 0x112   :  { %v1201_v6 = vadd.f32 %v1945_v0, %v2872_v14  ;;  %v1948_v7 = vadd.f32 %v1947_v5, %v1946_v2  ;;  %v2041_v8 = vpop.f32.mrb[15].mxu1 }
 0x113   :  { %v2042_v9 = vadd.f32 %v2041_v8, %v2040_v4 }
 0x114   :  { %v2893_v10 = vadd.f32 %v2039_v3, %v1201_v6  ;;  %v1204_v11 = vadd.f32 %v1948_v7, %v2872_v14 }
 0x116   :  { %v2896_v12 = vadd.f32 %v2042_v9, %v1204_v11  ;;  %v1949_v13 = vpop.f32.mrb[16].mxu0 }
 0x117   :  { %v2043_v15 = vpop.f32.mrb[16].mxu1  ;;  %v1950_v16 = vpop.f32.mrb[17].mxu0 }
 0x118   :  { %v1951_v17 = vadd.f32 %v1950_v16, %v1949_v13  ;;  %v2044_v18 = vpop.f32.mrb[17].mxu1  ;;  %v1952_v19 = vpop.f32.mrb[18].mxu0 }
 0x119   :  { %v2045_v20 = vadd.f32 %v2044_v18, %v2043_v15  ;;  %v2046_v21 = vpop.f32.mrb[18].mxu1  ;;  %v1953_v22 = vpop.f32.mrb[19].mxu0 }
 0x11a   :  { %v1209_v23 = vadd.f32 %v1951_v17, %v2872_v14  ;;  %v1954_v24 = vadd.f32 %v1953_v22, %v1952_v19  ;;  %v2047_v25 = vpop.f32.mrb[19].mxu1 }
 0x11b   :  { %v2048_v27 = vadd.f32 %v2047_v25, %v2046_v21 }
 0x11c   :  { %v2899_v29 = vadd.f32 %v2045_v20, %v1209_v23  ;;  %v1212_v30 = vadd.f32 %v1954_v24, %v2872_v14 }
 0x11e   :  { %v2902_v31 = vadd.f32 %v2048_v27, %v1212_v30  ;;  %v1955_v32 = vpop.f32.mrb[20].mxu0 }
 0x11f   :  { %v2049_v33 = vpop.f32.mrb[20].mxu1  ;;  %v1956_v34 = vpop.f32.mrb[21].mxu0 }
 0x120   :  { %v1957_v35 = vadd.f32 %v1956_v34, %v1955_v32  ;;  %v2050_v36 = vpop.f32.mrb[21].mxu1  ;;  %v1958_v37 = vpop.f32.mrb[22].mxu0 }
 0x121   :  { %v2051_v38 = vadd.f32 %v2050_v36, %v2049_v33  ;;  %v2052_v39 = vpop.f32.mrb[22].mxu1  ;;  %v1959_v40 = vpop.f32.mrb[23].mxu0 }
 0x122   :  { %v1217_v41 = vadd.f32 %v1957_v35, %v2872_v14  ;;  %v1960_v43 = vadd.f32 %v1959_v40, %v1958_v37  ;;  %v2053_v45 = vpop.f32.mrb[23].mxu1 }
 0x123   :  { %v2054_v46 = vadd.f32 %v2053_v45, %v2052_v39 }
 0x124   :  { %v2905_v47 = vadd.f32 %v2051_v38, %v1217_v41  ;;  %v1220_v48 = vadd.f32 %v1960_v43, %v2872_v14 }
 0x126   :  { %v2908_v49 = vadd.f32 %v2054_v46, %v1220_v48  ;;  %v1961_v50 = vpop.f32.mrb[24].mxu0 }
 0x127   :  { %v2055_v51 = vpop.f32.mrb[24].mxu1  ;;  %v1962_v52 = vpop.f32.mrb[25].mxu0 }
 0x128   :  { %v1963_v53 = vadd.f32 %v1962_v52, %v1961_v50  ;;  %v2056_v54 = vpop.f32.mrb[25].mxu1  ;;  %v1964_v55 = vpop.f32.mrb[26].mxu0 }
 0x129   :  { %v2057_v56 = vadd.f32 %v2056_v54, %v2055_v51  ;;  %v2058_v57 = vpop.f32.mrb[26].mxu1  ;;  %v1965_v59 = vpop.f32.mrb[27].mxu0 }
 0x12a   :  { %v1225_v61 = vadd.f32 %v1963_v53, %v2872_v14  ;;  %v1966_v62 = vadd.f32 %v1965_v59, %v1964_v55  ;;  %v2059_v63 = vpop.f32.mrb[27].mxu1 }
 0x12b   :  { %v2060_v0 = vadd.f32 %v2059_v63, %v2058_v57 }
 0x12c   :  { %v2911_v1 = vadd.f32 %v2057_v56, %v1225_v61  ;;  %v1228_v2 = vadd.f32 %v1966_v62, %v2872_v14 }
 0x12e   :  { %v2914_v3 = vadd.f32 %v2060_v0, %v1228_v2  ;;  %v1967_v4 = vpop.f32.mrb[28].mxu0 }
 0x12f   :  { %v2061_v5 = vpop.f32.mrb[28].mxu1  ;;  %v1968_v6 = vpop.f32.mrb[29].mxu0 }
 0x130   :  { %v1969_v7 = vadd.f32 %v1968_v6, %v1967_v4  ;;  %v2062_v8 = vpop.f32.mrb[29].mxu1  ;;  %v1970_v9 = vpop.f32.mrb[30].mxu0 }
 0x131   :  { %v2063_v11 = vadd.f32 %v2062_v8, %v2061_v5  ;;  %v2064_v13 = vpop.f32.mrb[30].mxu1  ;;  %v1971_v15 = vpop.f32.mrb[31].mxu0 }
 0x132   :  { %v1233_v16 = vadd.f32 %v1969_v7, %v2872_v14  ;;  %v1972_v17 = vadd.f32 %v1971_v15, %v1970_v9  ;;  %v2065_v18 = vpop.f32.mrb[31].mxu1 }
 0x133   :  { %v2066_v19 = vadd.f32 %v2065_v18, %v2064_v13 }
 0x134   :  { %v2917_v20 = vadd.f32 %v2063_v11, %v1233_v16  ;;  %v1236_v21 = vadd.f32 %v1972_v17, %v2872_v14 }
 0x136   :  { %v2920_v22 = vadd.f32 %v2066_v19, %v1236_v21  ;;  %v1973_v23 = vpop.f32.mrb[32].mxu0 }
 0x137   :  { %v2067_v24 = vpop.f32.mrb[32].mxu1  ;;  %v1974_v25 = vpop.f32.mrb[33].mxu0 }
 0x138   :  { %v1975_v27 = vadd.f32 %v1974_v25, %v1973_v23  ;;  %v2068_v30 = vpop.f32.mrb[33].mxu1  ;;  %v1976_v32 = vpop.f32.mrb[34].mxu0 }
 0x139   :  { %v2069_v33 = vadd.f32 %v2068_v30, %v2067_v24  ;;  %v2070_v34 = vpop.f32.mrb[34].mxu1  ;;  %v1977_v35 = vpop.f32.mrb[35].mxu0 }
 0x13a   :  { %v1241_v36 = vadd.f32 %v1975_v27, %v2872_v14  ;;  %v1978_v37 = vadd.f32 %v1977_v35, %v1976_v32  ;;  %v2071_v38 = vpop.f32.mrb[35].mxu1 }
 0x13b   :  { %v2072_v39 = vadd.f32 %v2071_v38, %v2070_v34 }
 0x13c   :  { %v2923_v40 = vadd.f32 %v2069_v33, %v1241_v36  ;;  %v1244_v41 = vadd.f32 %v1978_v37, %v2872_v14 }
 0x13e   :  { %v2926_v43 = vadd.f32 %v2072_v39, %v1244_v41  ;;  %v1979_v45 = vpop.f32.mrb[36].mxu0 }
 0x13f   :  { %v2073_v46 = vpop.f32.mrb[36].mxu1  ;;  %v1980_v48 = vpop.f32.mrb[37].mxu0 }
 0x140   :  { %v1981_v50 = vadd.f32 %v1980_v48, %v1979_v45  ;;  %v2074_v51 = vpop.f32.mrb[37].mxu1  ;;  %v1982_v52 = vpop.f32.mrb[38].mxu0 }
 0x141   :  { %v2075_v53 = vadd.f32 %v2074_v51, %v2073_v46  ;;  %v2076_v54 = vpop.f32.mrb[38].mxu1  ;;  %v1983_v55 = vpop.f32.mrb[39].mxu0 }
 0x142   :  { %v1249_v56 = vadd.f32 %v1981_v50, %v2872_v14  ;;  %v1984_v57 = vadd.f32 %v1983_v55, %v1982_v52  ;;  %v2077_v59 = vpop.f32.mrb[39].mxu1 }
 0x143   :  { %v2078_v61 = vadd.f32 %v2077_v59, %v2076_v54 }
 0x144   :  { %v2929_v62 = vadd.f32 %v2075_v53, %v1249_v56  ;;  %v1252_v63 = vadd.f32 %v1984_v57, %v2872_v14 }
 0x146   :  { %v2932_v0 = vadd.f32 %v2078_v61, %v1252_v63  ;;  %v1985_v2 = vpop.f32.mrb[40].mxu0 }
 0x147   :  { %v2079_v4 = vpop.f32.mrb[40].mxu1  ;;  %v1986_v5 = vpop.f32.mrb[41].mxu0 }
 0x148   :  { %v1987_v6 = vadd.f32 %v1986_v5, %v1985_v2  ;;  %v2080_v7 = vpop.f32.mrb[41].mxu1  ;;  %v1988_v8 = vpop.f32.mrb[42].mxu0 }
 0x149   :  { %v2081_v9 = vadd.f32 %v2080_v7, %v2079_v4  ;;  %v2082_v11 = vpop.f32.mrb[42].mxu1  ;;  %v1989_v13 = vpop.f32.mrb[43].mxu0 }
 0x14a   :  { %v1257_v15 = vadd.f32 %v1987_v6, %v2872_v14  ;;  %v1990_v16 = vadd.f32 %v1989_v13, %v1988_v8  ;;  %v2083_v17 = vpop.f32.mrb[43].mxu1 }
 0x14b   :  { %v2084_v18 = vadd.f32 %v2083_v17, %v2082_v11 }
 0x14c   :  { %v2935_v19 = vadd.f32 %v2081_v9, %v1257_v15  ;;  %v1260_v21 = vadd.f32 %v1990_v16, %v2872_v14 }
 0x14e   :  { %v2938_v23 = vadd.f32 %v2084_v18, %v1260_v21  ;;  %v1991_v24 = vpop.f32.mrb[44].mxu0 }
 0x14f   :  { %v2085_v25 = vpop.f32.mrb[44].mxu1  ;;  %v1992_v27 = vpop.f32.mrb[45].mxu0 }
 0x150   :  { %v1993_v30 = vadd.f32 %v1992_v27, %v1991_v24  ;;  %v2086_v32 = vpop.f32.mrb[45].mxu1  ;;  %v1994_v33 = vpop.f32.mrb[46].mxu0 }
 0x151   :  { %v2087_v34 = vadd.f32 %v2086_v32, %v2085_v25  ;;  %v2088_v35 = vpop.f32.mrb[46].mxu1  ;;  %v1995_v36 = vpop.f32.mrb[47].mxu0 }
 0x152   :  { %v1265_v37 = vadd.f32 %v1993_v30, %v2872_v14  ;;  %v1996_v38 = vadd.f32 %v1995_v36, %v1994_v33  ;;  %v2089_v39 = vpop.f32.mrb[47].mxu1 }
 0x153   :  { %v2090_v41 = vadd.f32 %v2089_v39, %v2088_v35 }
 0x154   :  { %v2941_v45 = vadd.f32 %v2087_v34, %v1265_v37  ;;  %v1268_v46 = vadd.f32 %v1996_v38, %v2872_v14 }
 0x156   :  { %v2944_v48 = vadd.f32 %v2090_v41, %v1268_v46  ;;  %v1997_v50 = vpop.f32.mrb[48].mxu0 }
 0x157   :  { %v2091_v51 = vpop.f32.mrb[48].mxu1  ;;  %v1998_v52 = vpop.f32.mrb[49].mxu0 }
 0x158   :  { %v1999_v53 = vadd.f32 %v1998_v52, %v1997_v50  ;;  %v2092_v54 = vpop.f32.mrb[49].mxu1  ;;  %v2000_v55 = vpop.f32.mrb[50].mxu0 }
 0x159   :  { %v2093_v56 = vadd.f32 %v2092_v54, %v2091_v51  ;;  %v2094_v57 = vpop.f32.mrb[50].mxu1  ;;  %v2001_v59 = vpop.f32.mrb[51].mxu0 }
 0x15a   :  { %v1273_v61 = vadd.f32 %v1999_v53, %v2872_v14  ;;  %v2095_v63 = vpop.f32.mrb[51].mxu1 }
 0x15c   :  { %v2947_v2 = vadd.f32 %v2093_v56, %v1273_v61 }
 0x15e   :  { %v2113_v4 = vpop.f32.mrb[52].mxu0 }
 0x15f   :  { %v2207_v5 = vpop.f32.mrb[52].mxu1  ;;  %v2114_v6 = vpop.f32.mrb[53].mxu0 }
 0x160   :  { %v2115_v7 = vadd.f32 %v2114_v6, %v2113_v4  ;;  %v2208_v8 = vpop.f32.mrb[53].mxu1  ;;  %v2116_v9 = vpop.f32.mrb[54].mxu0 }
 0x161   :  { %v2209_v11 = vadd.f32 %v2208_v8, %v2207_v5  ;;  %v2210_v13 = vpop.f32.mrb[54].mxu1  ;;  %v2117_v15 = vpop.f32.mrb[55].mxu0 }
 0x162   :  { %v1449_v16 = vadd.f32 %v2115_v7, %v2875_v26  ;;  %v2118_v17 = vadd.f32 %v2117_v15, %v2116_v9  ;;  %v2211_v18 = vpop.f32.mrb[55].mxu1 }
 0x163   :  { %v2212_v21 = vadd.f32 %v2211_v18, %v2210_v13 }
 0x164   :  { %v1585_v24 = vadd.f32 %v2209_v11, %v1449_v16  ;;  %v1452_v14 = vadd.f32 %v2118_v17, %v2878_v28 }
 0x166   :  { %v1686_v25 = vmax.f32 %v1585_v24, 0.0  ;;  %v1588_v27 = vadd.f32 %v2212_v21, %v1452_v14  ;;  %v2119_v30 = vpop.f32.mrb[56].mxu0 }
 0x167   :  { %v2213_v32 = vpop.f32.mrb[56].mxu1  ;;  %v2120_v33 = vpop.f32.mrb[57].mxu0 }
 0x168   :  { %1711 = vst [vmem:[%s3052_s3] sm:$0xff] %v1686_v25  ;;  %v1687_v34 = vmax.f32 %v1588_v27, 0.0  ;;  %v2121_v35 = vadd.f32 %v2120_v33, %v2119_v30  ;;  %v2214_v36 = vpop.f32.mrb[57].mxu1  ;;  %v2122_v37 = vpop.f32.mrb[58].mxu0 }
 0x169   :  { %v2215_v26 = vadd.f32 %v2214_v36, %v2213_v32  ;;  %v2216_v38 = vpop.f32.mrb[58].mxu1  ;;  %v2123_v39 = vpop.f32.mrb[59].mxu0 }
 0x16a   :  { %1712 = vst [vmem:[%s3052_s3 + $0x8] sm:$0xff] %v1687_v34  ;;  %v1457_v28 = vadd.f32 %v2121_v35, %v2881_v42  ;;  %v2124_v41 = vadd.f32 %v2123_v39, %v2122_v37  ;;  %v2217_v46 = vpop.f32.mrb[59].mxu1 }
 0x16b   :  { %v2218_v50 = vadd.f32 %v2217_v46, %v2216_v38 }
 0x16c   :  { %v1593_v51 = vadd.f32 %v2215_v26, %v1457_v28  ;;  %v1460_v52 = vadd.f32 %v2124_v41, %v2884_v44 }
 0x16e   :  { %v1688_v53 = vmax.f32 %v1593_v51, 0.0  ;;  %v1596_v54 = vadd.f32 %v2218_v50, %v1460_v52  ;;  %v2125_v55 = vpop.f32.mrb[60].mxu0 }
 0x16f   :  { %v2219_v56 = vpop.f32.mrb[60].mxu1  ;;  %v2126_v57 = vpop.f32.mrb[61].mxu0 }
 0x170   :  { %1713 = vst [vmem:[%s3052_s3 + $0x10] sm:$0xff] %v1688_v53  ;;  %v1689_v59 = vmax.f32 %v1596_v54, 0.0  ;;  %v2127_v61 = vadd.f32 %v2126_v57, %v2125_v55  ;;  %v2220_v63 = vpop.f32.mrb[61].mxu1  ;;  %v2128_v4 = vpop.f32.mrb[62].mxu0 }
 0x171   :  { %v2221_v42 = vadd.f32 %v2220_v63, %v2219_v56  ;;  %v2222_v5 = vpop.f32.mrb[62].mxu1  ;;  %v2129_v6 = vpop.f32.mrb[63].mxu0 }
 0x172   :  { %1714 = vst [vmem:[%s3052_s3 + $0x18] sm:$0xff] %v1689_v59  ;;  %v1465_v44 = vadd.f32 %v2127_v61, %v2887_v58  ;;  %v2130_v7 = vadd.f32 %v2129_v6, %v2128_v4  ;;  %v2223_v8 = vpop.f32.mrb[63].mxu1 }
 0x173   :  { %v2224_v9 = vadd.f32 %v2223_v8, %v2222_v5 }
 0x174   :  { %v1601_v11 = vadd.f32 %v2221_v42, %v1465_v44  ;;  %v1468_v13 = vadd.f32 %v2130_v7, %v2890_v60 }
 0x176   :  { %v1690_v15 = vmax.f32 %v1601_v11, 0.0  ;;  %v1604_v16 = vadd.f32 %v2224_v9, %v1468_v13  ;;  %v2131_v17 = vpop.f32.mrb[64].mxu0 }
 0x177   :  { %v2225_v18 = vpop.f32.mrb[64].mxu1  ;;  %v2132_v21 = vpop.f32.mrb[65].mxu0 }
 0x178   :  { %1715 = vst [vmem:[%s3052_s3 + $0x20] sm:$0xff] %v1690_v15  ;;  %v1691_v24 = vmax.f32 %v1604_v16, 0.0  ;;  %v2133_v14 = vadd.f32 %v2132_v21, %v2131_v17  ;;  %v2226_v25 = vpop.f32.mrb[65].mxu1  ;;  %v2134_v27 = vpop.f32.mrb[66].mxu0 }
 0x179   :  { %v2227_v58 = vadd.f32 %v2226_v25, %v2225_v18  ;;  %v2228_v30 = vpop.f32.mrb[66].mxu1  ;;  %v2135_v32 = vpop.f32.mrb[67].mxu0 }
 0x17a   :  { %1716 = vst [vmem:[%s3052_s3 + $0x28] sm:$0xff] %v1691_v24  ;;  %v1473_v60 = vadd.f32 %v2133_v14, %v2893_v10  ;;  %v2136_v33 = vadd.f32 %v2135_v32, %v2134_v27  ;;  %v2229_v34 = vpop.f32.mrb[67].mxu1 }
 0x17b   :  { %v2230_v35 = vadd.f32 %v2229_v34, %v2228_v30 }
 0x17c   :  { %v1609_v36 = vadd.f32 %v2227_v58, %v1473_v60  ;;  %v1476_v37 = vadd.f32 %v2136_v33, %v2896_v12 }
 0x17e   :  { %v1692_v26 = vmax.f32 %v1609_v36, 0.0  ;;  %v1612_v38 = vadd.f32 %v2230_v35, %v1476_v37  ;;  %v2137_v39 = vpop.f32.mrb[68].mxu0 }
 0x17f   :  { %v2231_v28 = vpop.f32.mrb[68].mxu1  ;;  %v2138_v41 = vpop.f32.mrb[69].mxu0 }
 0x180   :  { %1717 = vst [vmem:[%s3052_s3 + $0x30] sm:$0xff] %v1692_v26  ;;  %v1693_v46 = vmax.f32 %v1612_v38, 0.0  ;;  %v2139_v50 = vadd.f32 %v2138_v41, %v2137_v39  ;;  %v2232_v51 = vpop.f32.mrb[69].mxu1  ;;  %v2140_v52 = vpop.f32.mrb[70].mxu0 }
 0x181   :  { %v2233_v10 = vadd.f32 %v2232_v51, %v2231_v28  ;;  %v2234_v53 = vpop.f32.mrb[70].mxu1  ;;  %v2141_v54 = vpop.f32.mrb[71].mxu0 }
 0x182   :  { %1718 = vst [vmem:[%s3052_s3 + $0x38] sm:$0xff] %v1693_v46  ;;  %v1481_v12 = vadd.f32 %v2139_v50, %v2899_v29  ;;  %v2142_v55 = vadd.f32 %v2141_v54, %v2140_v52  ;;  %v2235_v56 = vpop.f32.mrb[71].mxu1 }
 0x183   :  { %v2236_v57 = vadd.f32 %v2235_v56, %v2234_v53 }
 0x184   :  { %v1617_v59 = vadd.f32 %v2233_v10, %v1481_v12  ;;  %v1484_v61 = vadd.f32 %v2142_v55, %v2902_v31 }
 0x186   :  { %v1694_v63 = vmax.f32 %v1617_v59, 0.0  ;;  %v1620_v4 = vadd.f32 %v2236_v57, %v1484_v61  ;;  %v2143_v42 = vpop.f32.mrb[72].mxu0 }
 0x187   :  { %v2237_v5 = vpop.f32.mrb[72].mxu1  ;;  %v2144_v6 = vpop.f32.mrb[73].mxu0 }
 0x188   :  { %1719 = vst [vmem:[%s3052_s3 + $0x40] sm:$0xff] %v1694_v63  ;;  %v1695_v44 = vmax.f32 %v1620_v4, 0.0  ;;  %v2145_v7 = vadd.f32 %v2144_v6, %v2143_v42  ;;  %v2238_v8 = vpop.f32.mrb[73].mxu1  ;;  %v2146_v9 = vpop.f32.mrb[74].mxu0 }
 0x189   :  { %v2239_v29 = vadd.f32 %v2238_v8, %v2237_v5  ;;  %v2240_v11 = vpop.f32.mrb[74].mxu1  ;;  %v2147_v13 = vpop.f32.mrb[75].mxu0 }
 0x18a   :  { %1720 = vst [vmem:[%s3052_s3 + $0x48] sm:$0xff] %v1695_v44  ;;  %v1489_v31 = vadd.f32 %v2145_v7, %v2905_v47  ;;  %v2148_v15 = vadd.f32 %v2147_v13, %v2146_v9  ;;  %v2241_v16 = vpop.f32.mrb[75].mxu1 }
 0x18b   :  { %v2242_v17 = vadd.f32 %v2241_v16, %v2240_v11 }
 0x18c   :  { %v1625_v18 = vadd.f32 %v2239_v29, %v1489_v31  ;;  %v1492_v21 = vadd.f32 %v2148_v15, %v2908_v49 }
 0x18e   :  { %v1696_v24 = vmax.f32 %v1625_v18, 0.0  ;;  %v1628_v14 = vadd.f32 %v2242_v17, %v1492_v21  ;;  %v2149_v25 = vpop.f32.mrb[76].mxu0 }
 0x18f   :  { %v2243_v27 = vpop.f32.mrb[76].mxu1  ;;  %v2150_v58 = vpop.f32.mrb[77].mxu0 }
 0x190   :  { %1721 = vst [vmem:[%s3052_s3 + $0x50] sm:$0xff] %v1696_v24  ;;  %v1697_v30 = vmax.f32 %v1628_v14, 0.0  ;;  %v2151_v32 = vadd.f32 %v2150_v58, %v2149_v25  ;;  %v2244_v60 = vpop.f32.mrb[77].mxu1  ;;  %v2152_v33 = vpop.f32.mrb[78].mxu0 }
 0x191   :  { %v2245_v47 = vadd.f32 %v2244_v60, %v2243_v27  ;;  %v2246_v34 = vpop.f32.mrb[78].mxu1  ;;  %v2153_v35 = vpop.f32.mrb[79].mxu0 }
 0x192   :  { %1722 = vst [vmem:[%s3052_s3 + $0x58] sm:$0xff] %v1697_v30  ;;  %v1497_v49 = vadd.f32 %v2151_v32, %v2911_v1  ;;  %v2154_v36 = vadd.f32 %v2153_v35, %v2152_v33  ;;  %v2247_v37 = vpop.f32.mrb[79].mxu1 }
 0x193   :  { %v2248_v26 = vadd.f32 %v2247_v37, %v2246_v34 }
 0x194   :  { %v1633_v38 = vadd.f32 %v2245_v47, %v1497_v49  ;;  %v1500_v39 = vadd.f32 %v2154_v36, %v2914_v3 }
 0x196   :  { %v1698_v28 = vmax.f32 %v1633_v38, 0.0  ;;  %v1636_v41 = vadd.f32 %v2248_v26, %v1500_v39  ;;  %v2155_v46 = vpop.f32.mrb[80].mxu0 }
 0x197   :  { %v2249_v50 = vpop.f32.mrb[80].mxu1  ;;  %v2156_v51 = vpop.f32.mrb[81].mxu0 }
 0x198   :  { %1723 = vst [vmem:[%s3052_s3 + $0x60] sm:$0xff] %v1698_v28  ;;  %v1699_v52 = vmax.f32 %v1636_v41, 0.0  ;;  %v2157_v10 = vadd.f32 %v2156_v51, %v2155_v46  ;;  %v2250_v53 = vpop.f32.mrb[81].mxu1  ;;  %v2158_v54 = vpop.f32.mrb[82].mxu0 }
 0x199   :  { %v2251_v1 = vadd.f32 %v2250_v53, %v2249_v50  ;;  %v2252_v12 = vpop.f32.mrb[82].mxu1  ;;  %v2159_v55 = vpop.f32.mrb[83].mxu0 }
 0x19a   :  { %1724 = vst [vmem:[%s3052_s3 + $0x68] sm:$0xff] %v1699_v52  ;;  %v1505_v3 = vadd.f32 %v2157_v10, %v2917_v20  ;;  %v2160_v56 = vadd.f32 %v2159_v55, %v2158_v54  ;;  %v2253_v57 = vpop.f32.mrb[83].mxu1 }
 0x19b   :  { %v2254_v59 = vadd.f32 %v2253_v57, %v2252_v12 }
 0x19c   :  { %v1641_v61 = vadd.f32 %v2251_v1, %v1505_v3  ;;  %v1508_v63 = vadd.f32 %v2160_v56, %v2920_v22 }
 0x19e   :  { %v1700_v4 = vmax.f32 %v1641_v61, 0.0  ;;  %v1644_v42 = vadd.f32 %v2254_v59, %v1508_v63  ;;  %v2161_v5 = vpop.f32.mrb[84].mxu0 }
 0x19f   :  { %v2255_v6 = vpop.f32.mrb[84].mxu1  ;;  %v2162_v44 = vpop.f32.mrb[85].mxu0 }
 0x1a0   :  { %1725 = vst [vmem:[%s3052_s3 + $0x70] sm:$0xff] %v1700_v4  ;;  %v1701_v7 = vmax.f32 %v1644_v42, 0.0  ;;  %v2163_v8 = vadd.f32 %v2162_v44, %v2161_v5  ;;  %v2256_v9 = vpop.f32.mrb[85].mxu1  ;;  %v2164_v29 = vpop.f32.mrb[86].mxu0 }
 0x1a1   :  { %v2257_v20 = vadd.f32 %v2256_v9, %v2255_v6  ;;  %v2258_v11 = vpop.f32.mrb[86].mxu1  ;;  %v2165_v13 = vpop.f32.mrb[87].mxu0 }
 0x1a2   :  { %1726 = vst [vmem:[%s3052_s3 + $0x78] sm:$0xff] %v1701_v7  ;;  %v1513_v22 = vadd.f32 %v2163_v8, %v2923_v40  ;;  %v2166_v31 = vadd.f32 %v2165_v13, %v2164_v29  ;;  %v2259_v15 = vpop.f32.mrb[87].mxu1 }
 0x1a3   :  { %v2260_v16 = vadd.f32 %v2259_v15, %v2258_v11 }
 0x1a4   :  { %v1649_v17 = vadd.f32 %v2257_v20, %v1513_v22  ;;  %v1516_v18 = vadd.f32 %v2166_v31, %v2926_v43 }
 0x1a6   :  { %v1702_v21 = vmax.f32 %v1649_v17, 0.0  ;;  %v1652_v24 = vadd.f32 %v2260_v16, %v1516_v18  ;;  %v2167_v14 = vpop.f32.mrb[88].mxu0 }
 0x1a7   :  { %v2261_v25 = vpop.f32.mrb[88].mxu1  ;;  %v2168_v27 = vpop.f32.mrb[89].mxu0 }
 0x1a8   :  { %1727 = vst [vmem:[%s3052_s3 + $0x80] sm:$0xff] %v1702_v21  ;;  %v1703_v58 = vmax.f32 %v1652_v24, 0.0  ;;  %v2169_v30 = vadd.f32 %v2168_v27, %v2167_v14  ;;  %v2262_v32 = vpop.f32.mrb[89].mxu1  ;;  %v2170_v60 = vpop.f32.mrb[90].mxu0 }
 0x1a9   :  { %v2263_v40 = vadd.f32 %v2262_v32, %v2261_v25  ;;  %v2264_v33 = vpop.f32.mrb[90].mxu1  ;;  %v2171_v47 = vpop.f32.mrb[91].mxu0 }
 0x1aa   :  { %1728 = vst [vmem:[%s3052_s3 + $0x88] sm:$0xff] %v1703_v58  ;;  %v1521_v43 = vadd.f32 %v2169_v30, %v2929_v62  ;;  %v2172_v34 = vadd.f32 %v2171_v47, %v2170_v60  ;;  %v2265_v35 = vpop.f32.mrb[91].mxu1 }
 0x1ab   :  { %v2266_v49 = vadd.f32 %v2265_v35, %v2264_v33 }
 0x1ac   :  { %v1657_v36 = vadd.f32 %v2263_v40, %v1521_v43  ;;  %v1524_v37 = vadd.f32 %v2172_v34, %v2932_v0 }
 0x1ae   :  { %v1704_v26 = vmax.f32 %v1657_v36, 0.0  ;;  %v1660_v38 = vadd.f32 %v2266_v49, %v1524_v37  ;;  %v2173_v39 = vpop.f32.mrb[92].mxu0 }
 0x1af   :  { %v2267_v28 = vpop.f32.mrb[92].mxu1  ;;  %v2174_v41 = vpop.f32.mrb[93].mxu0 }
 0x1b0   :  { %1729 = vst [vmem:[%s3052_s3 + $0x90] sm:$0xff] %v1704_v26  ;;  %v1705_v46 = vmax.f32 %v1660_v38, 0.0  ;;  %v2175_v50 = vadd.f32 %v2174_v41, %v2173_v39  ;;  %v2268_v51 = vpop.f32.mrb[93].mxu1  ;;  %v2176_v52 = vpop.f32.mrb[94].mxu0 }
 0x1b1   :  { %v2269_v62 = vadd.f32 %v2268_v51, %v2267_v28  ;;  %v2270_v10 = vpop.f32.mrb[94].mxu1  ;;  %v2177_v53 = vpop.f32.mrb[95].mxu0 }
 0x1b2   :  { %1730 = vst [vmem:[%s3052_s3 + $0x98] sm:$0xff] %v1705_v46  ;;  %v1529_v0 = vadd.f32 %v2175_v50, %v2935_v19  ;;  %v2178_v54 = vadd.f32 %v2177_v53, %v2176_v52  ;;  %v2271_v1 = vpop.f32.mrb[95].mxu1 }
 0x1b3   :  { %v2272_v12 = vadd.f32 %v2271_v1, %v2270_v10 }
 0x1b4   :  { %v1665_v55 = vadd.f32 %v2269_v62, %v1529_v0  ;;  %v1532_v3 = vadd.f32 %v2178_v54, %v2938_v23 }
 0x1b6   :  { %v1706_v56 = vmax.f32 %v1665_v55, 0.0  ;;  %v1668_v57 = vadd.f32 %v2272_v12, %v1532_v3  ;;  %v2179_v59 = vpop.f32.mrb[96].mxu0 }
 0x1b7   :  { %v2273_v61 = vpop.f32.mrb[96].mxu1  ;;  %v2180_v63 = vpop.f32.mrb[97].mxu0 }
 0x1b8   :  { %1731 = vst [vmem:[%s3052_s3 + $0xa0] sm:$0xff] %v1706_v56  ;;  %v1707_v4 = vmax.f32 %v1668_v57, 0.0  ;;  %v2181_v42 = vadd.f32 %v2180_v63, %v2179_v59  ;;  %v2274_v5 = vpop.f32.mrb[97].mxu1  ;;  %v2182_v6 = vpop.f32.mrb[98].mxu0 }
 0x1b9   :  { %v2275_v19 = vadd.f32 %v2274_v5, %v2273_v61  ;;  %v2276_v44 = vpop.f32.mrb[98].mxu1  ;;  %v2183_v7 = vpop.f32.mrb[99].mxu0 }
 0x1ba   :  { %1732 = vst [vmem:[%s3052_s3 + $0xa8] sm:$0xff] %v1707_v4  ;;  %v1537_v23 = vadd.f32 %v2181_v42, %v2941_v45  ;;  %v2184_v8 = vadd.f32 %v2183_v7, %v2182_v6  ;;  %v2277_v9 = vpop.f32.mrb[99].mxu1 }
 0x1bb   :  { %v2278_v29 = vadd.f32 %v2277_v9, %v2276_v44 }
 0x1bc   :  { %v1673_v20 = vadd.f32 %v2275_v19, %v1537_v23  ;;  %v1540_v11 = vadd.f32 %v2184_v8, %v2944_v48 }
 0x1be   :  { %v1708_v13 = vmax.f32 %v1673_v20, 0.0  ;;  %v1676_v22 = vadd.f32 %v2278_v29, %v1540_v11  ;;  %v2185_v31 = vpop.f32.mrb[100].mxu0 }
 0x1bf   :  { %v2279_v15 = vpop.f32.mrb[100].mxu1  ;;  %v2186_v16 = vpop.f32.mrb[101].mxu0 }
 0x1c0   :  { %1733 = vst [vmem:[%s3052_s3 + $0xb0] sm:$0xff] %v1708_v13  ;;  %v1709_v17 = vmax.f32 %v1676_v22, 0.0  ;;  %v2187_v18 = vadd.f32 %v2186_v16, %v2185_v31  ;;  %v2280_v21 = vpop.f32.mrb[101].mxu1  ;;  %v2188_v24 = vpop.f32.mrb[102].mxu0 }
 0x1c1   :  { %v2281_v45 = vadd.f32 %v2280_v21, %v2279_v15  ;;  %v2282_v14 = vpop.f32.mrb[102].mxu1  ;;  %v2189_v25 = vpop.f32.mrb[103].mxu0 }
 0x1c2   :  { %1734 = vst [vmem:[%s3052_s3 + $0xb8] sm:$0xff] %v1709_v17  ;;  %v1545_v48 = vadd.f32 %v2187_v18, %v2947_v2  ;;  %v2283_v27 = vpop.f32.mrb[103].mxu1 }
 0x1c4   :  { %v1681_v58 = vadd.f32 %v2281_v45, %v1545_v48 }
 0x1c6   :  { %v1710_v30 = vmax.f32 %v1681_v58, 0.0 }
 0x1c8   :  { %1735 = vst [vmem:[%s3052_s3 + $0xc0] sm:$0xff] %v1710_v30 }

// kernel: vae_forward.13
= control target key start
LH: loop header
LB: loop body
LE: loop exit
PB: predicated region body
PF: predicated region fallthrough
CT: control target
= control target key end

     0   :  { %s3893_s1 = inlined_call_operand.vmem [shape: bf16[2048,256], index: 1, kind: input, shape index: {}]   ;;  %s3894_s0 = inlined_call_operand.vmem [shape: bf16[32,2048], index: 0, kind: input, shape index: {}]   ;;  %s3895_s2 = inlined_call_operand.vmem [shape: f32[1,256], index: 2, kind: input, shape index: {}]   ;;  %s3896_s3 = inlined_call_operand.vmem [shape: f32[32,256], index: 3, kind: output, shape index: {}]  }
   0x1   :  { %v2550_v0 = vld [vmem:[%s3893_s1 + $0x4] ss:$8 sps:$4 sm:$0xff]   ;;  %v2554_v2 = vld [vmem:[%s3893_s1] ss:$8 sps:$4 sm:$0xff]   ;;  %v2556_v4 = vld [vmem:[%s3893_s1 + $0x14] ss:$8 sps:$4 sm:$0xff]  }
   0x2   :  { %v2552_v1 = vld [vmem:[%s3893_s1 + $0x404] ss:$8 sps:$4 sm:$0xff]   ;;  %1754 = vmatprep.subr.bf16.mxu1 %v2550_v0  ;;  %v2555_v3 = vld [vmem:[%s3893_s1 + $0x400] ss:$8 sps:$4 sm:$0xff]   ;;  %v2558_v5 = vld [vmem:[%s3893_s1 + $0x414] ss:$8 sps:$4 sm:$0xff]  }
   0x3   :  { %1966 = vmatprep.subr.bf16.mxu0 %v2552_v1  ;;  %1755 = vmatpush1.bf16.msra.mxu1 %v2554_v2  ;;  %v2560_v6 = vld [vmem:[%s3893_s1 + $0x10] ss:$8 sps:$4 sm:$0xff]   ;;  %v2562_v8 = vld [vmem:[%s3893_s1 + $0x24] ss:$8 sps:$4 sm:$0xff]   ;;  %v2566_v10 = vld [vmem:[%s3893_s1 + $0x20] ss:$8 sps:$4 sm:$0xff]  }
   0x4   :  { %1967 = vmatpush1.bf16.msra.mxu0 %v2555_v3  ;;  %1756 = vmatprep.subr.bf16.mxu1 %v2556_v4  ;;  %v2561_v7 = vld [vmem:[%s3893_s1 + $0x410] ss:$8 sps:$4 sm:$0xff]   ;;  %v2564_v9 = vld [vmem:[%s3893_s1 + $0x424] ss:$8 sps:$4 sm:$0xff]   ;;  %v2567_v11 = vld [vmem:[%s3893_s1 + $0x420] ss:$8 sps:$4 sm:$0xff]  }
   0x5   :  { %1968 = vmatprep.subr.bf16.mxu0 %v2558_v5  ;;  %v2568_v12 = vld [vmem:[%s3893_s1 + $0x34] ss:$8 sps:$4 sm:$0xff]   ;;  %v2572_v14 = vld [vmem:[%s3893_s1 + $0x30] ss:$8 sps:$4 sm:$0xff]   ;;  %v2574_v16 = vld [vmem:[%s3893_s1 + $0x44] ss:$8 sps:$4 sm:$0xff]  }
   0x6   :  { %v2570_v13 = vld [vmem:[%s3893_s1 + $0x434] ss:$8 sps:$4 sm:$0xff]   ;;  %v2573_v15 = vld [vmem:[%s3893_s1 + $0x430] ss:$8 sps:$4 sm:$0xff]   ;;  %v2576_v17 = vld [vmem:[%s3893_s1 + $0x444] ss:$8 sps:$4 sm:$0xff]  }
   0x7   :  { %1757 = vmatpush1.bf16.msra.mxu1 %v2560_v6  ;;  %v2578_v18 = vld [vmem:[%s3893_s1 + $0x40] ss:$8 sps:$4 sm:$0xff]   ;;  %v2580_v20 = vld [vmem:[%s3893_s1 + $0x54] ss:$8 sps:$4 sm:$0xff]   ;;  %v2584_v22 = vld [vmem:[%s3893_s1 + $0x50] ss:$8 sps:$4 sm:$0xff]  }
   0x8   :  { %1969 = vmatpush1.bf16.msra.mxu0 %v2561_v7  ;;  %1758 = vmatprep.subr.bf16.mxu1 %v2562_v8  ;;  %v2579_v19 = vld [vmem:[%s3893_s1 + $0x440] ss:$8 sps:$4 sm:$0xff]   ;;  %v2582_v21 = vld [vmem:[%s3893_s1 + $0x454] ss:$8 sps:$4 sm:$0xff]   ;;  %v2585_v23 = vld [vmem:[%s3893_s1 + $0x450] ss:$8 sps:$4 sm:$0xff]  }
   0x9   :  { %1970 = vmatprep.subr.bf16.mxu0 %v2564_v9  ;;  %v2586_v24 = vld [vmem:[%s3893_s1 + $0x64] ss:$8 sps:$4 sm:$0xff]   ;;  %v2590_v26 = vld [vmem:[%s3893_s1 + $0x60] ss:$8 sps:$4 sm:$0xff]   ;;  %v2592_v28 = vld [vmem:[%s3893_s1 + $0x74] ss:$8 sps:$4 sm:$0xff]  }
   0xa   :  { %v2588_v25 = vld [vmem:[%s3893_s1 + $0x464] ss:$8 sps:$4 sm:$0xff]   ;;  %v2591_v27 = vld [vmem:[%s3893_s1 + $0x460] ss:$8 sps:$4 sm:$0xff]   ;;  %v2594_v29 = vld [vmem:[%s3893_s1 + $0x474] ss:$8 sps:$4 sm:$0xff]  }
   0xb   :  { %1759 = vmatpush1.bf16.msra.mxu1 %v2566_v10  ;;  %v2596_v30 = vld [vmem:[%s3893_s1 + $0x70] ss:$8 sps:$4 sm:$0xff]   ;;  %v2598_v32 = vld [vmem:[%s3893_s1 + $0x84] ss:$8 sps:$4 sm:$0xff]   ;;  %v2602_v34 = vld [vmem:[%s3893_s1 + $0x80] ss:$8 sps:$4 sm:$0xff]  }
   0xc   :  { %1971 = vmatpush1.bf16.msra.mxu0 %v2567_v11  ;;  %1760 = vmatprep.subr.bf16.mxu1 %v2568_v12  ;;  %v2597_v31 = vld [vmem:[%s3893_s1 + $0x470] ss:$8 sps:$4 sm:$0xff]   ;;  %v2600_v33 = vld [vmem:[%s3893_s1 + $0x484] ss:$8 sps:$4 sm:$0xff]   ;;  %v2603_v35 = vld [vmem:[%s3893_s1 + $0x480] ss:$8 sps:$4 sm:$0xff]  }
   0xd   :  { %1972 = vmatprep.subr.bf16.mxu0 %v2570_v13  ;;  %v2604_v36 = vld [vmem:[%s3893_s1 + $0x94] ss:$8 sps:$4 sm:$0xff]   ;;  %v2608_v38 = vld [vmem:[%s3893_s1 + $0x90] ss:$8 sps:$4 sm:$0xff]   ;;  %v2610_v40 = vld [vmem:[%s3893_s1 + $0xa4] ss:$8 sps:$4 sm:$0xff]  }
   0xe   :  { %v2606_v37 = vld [vmem:[%s3893_s1 + $0x494] ss:$8 sps:$4 sm:$0xff]   ;;  %v2609_v39 = vld [vmem:[%s3893_s1 + $0x490] ss:$8 sps:$4 sm:$0xff]   ;;  %v2612_v41 = vld [vmem:[%s3893_s1 + $0x4a4] ss:$8 sps:$4 sm:$0xff]  }
   0xf   :  { %1761 = vmatpush1.bf16.msra.mxu1 %v2572_v14  ;;  %v2614_v42 = vld [vmem:[%s3893_s1 + $0xa0] ss:$8 sps:$4 sm:$0xff]   ;;  %v2616_v44 = vld [vmem:[%s3893_s1 + $0xb4] ss:$8 sps:$4 sm:$0xff]   ;;  %v2620_v46 = vld [vmem:[%s3893_s1 + $0xb0] ss:$8 sps:$4 sm:$0xff]  }
  0x10   :  { %1973 = vmatpush1.bf16.msra.mxu0 %v2573_v15  ;;  %1762 = vmatprep.subr.bf16.mxu1 %v2574_v16  ;;  %v2615_v43 = vld [vmem:[%s3893_s1 + $0x4a0] ss:$8 sps:$4 sm:$0xff]   ;;  %v2618_v45 = vld [vmem:[%s3893_s1 + $0x4b4] ss:$8 sps:$4 sm:$0xff]   ;;  %v2621_v47 = vld [vmem:[%s3893_s1 + $0x4b0] ss:$8 sps:$4 sm:$0xff]  }
  0x11   :  { %1974 = vmatprep.subr.bf16.mxu0 %v2576_v17  ;;  %v14_v48 = vld [vmem:[%s3894_s0] sm:$0xff]  ;;  %v2628_v58 = vld [vmem:[%s3893_s1 + $0xd4] ss:$8 sps:$4 sm:$0xff]   ;;  %v2632_v60 = vld [vmem:[%s3893_s1 + $0xd0] ss:$8 sps:$4 sm:$0xff]  }
  0x12   :  { %v22_v49 = vld [vmem:[%s3894_s0 + $0x40] sm:$0xff]  ;;  %v2630_v59 = vld [vmem:[%s3893_s1 + $0x4d4] ss:$8 sps:$4 sm:$0xff]   ;;  %v2633_v61 = vld [vmem:[%s3893_s1 + $0x4d0] ss:$8 sps:$4 sm:$0xff]  }
  0x13   :  { %1763 = vmatpush1.bf16.msra.mxu1 %v2578_v18  ;;  %v2622_v50 = vld [vmem:[%s3893_s1 + $0xc4] ss:$8 sps:$4 sm:$0xff]   ;;  %v2199_v52 = vcombine.high %v14_v48, %v22_v49  ;;  %v2626_v56 = vld [vmem:[%s3893_s1 + $0xc0] ss:$8 sps:$4 sm:$0xff]   ;;  %v2640_v2 = vld [vmem:[%s3893_s1 + $0xf4] ss:$8 sps:$4 sm:$0xff]   ;;  %v2198_v8 = vcombine.low %v14_v48, %v22_v49 }
  0x14   :  { %1975 = vmatpush1.bf16.msra.mxu0 %v2579_v19  ;;  %1764 = vmatprep.subr.bf16.mxu1 %v2580_v20  ;;  %v2624_v51 = vld [vmem:[%s3893_s1 + $0x4c4] ss:$8 sps:$4 sm:$0xff]   ;;  %v2627_v57 = vld [vmem:[%s3893_s1 + $0x4c0] ss:$8 sps:$4 sm:$0xff]   ;;  %v2642_v3 = vld [vmem:[%s3893_s1 + $0x4f4] ss:$8 sps:$4 sm:$0xff]  }
  0x15   :  { %1976 = vmatprep.subr.bf16.mxu0 %v2582_v21  ;;  %v18_v53 = vld [vmem:[%s3894_s0 + $0x20] sm:$0xff]  ;;  %1786 = vmatprep.mubr.bf16.mxu1 %v2199_v52  ;;  %v2644_v4 = vld [vmem:[%s3893_s1 + $0xf0] ss:$8 sps:$4 sm:$0xff]   ;;  %v2654_v12 = vld [vmem:[%s3893_s1 + $0x114] ss:$8 sps:$4 sm:$0xff]  }
  0x16   :  { %v26_v54 = vld [vmem:[%s3894_s0 + $0x60] sm:$0xff]  ;;  %v2645_v5 = vld [vmem:[%s3893_s1 + $0x4f0] ss:$8 sps:$4 sm:$0xff]   ;;  %v2657_v13 = vld [vmem:[%s3893_s1 + $0x514] ss:$8 sps:$4 sm:$0xff]  }
  0x17   :  { %1765 = vmatpush1.bf16.msra.mxu1 %v2584_v22  ;;  %v2207_v55 = vcombine.high %v18_v53, %v26_v54  ;;  %v2634_v62 = vld [vmem:[%s3893_s1 + $0xe4] ss:$8 sps:$4 sm:$0xff]   ;;  %v2638_v0 = vld [vmem:[%s3893_s1 + $0xe0] ss:$8 sps:$4 sm:$0xff]   ;;  %v2206_v10 = vcombine.low %v18_v53, %v26_v54  ;;  %v2652_v14 = vld [vmem:[%s3893_s1 + $0x110] ss:$8 sps:$4 sm:$0xff]  }
  0x18   :  { %1977 = vmatpush1.bf16.msra.mxu0 %v2585_v23  ;;  %1766 = vmatprep.subr.bf16.mxu1 %v2586_v24  ;;  %v2636_v63 = vld [vmem:[%s3893_s1 + $0x4e4] ss:$8 sps:$4 sm:$0xff]   ;;  %v2639_v1 = vld [vmem:[%s3893_s1 + $0x4e0] ss:$8 sps:$4 sm:$0xff]   ;;  %v2655_v15 = vld [vmem:[%s3893_s1 + $0x510] ss:$8 sps:$4 sm:$0xff]  }
  0x19   :  { %1978 = vmatprep.subr.bf16.mxu0 %v2588_v25  ;;  %1998 = vmatprep.mubr.bf16.mxu0 %v2207_v55  ;;  %v2648_v6 = vld [vmem:[%s3893_s1 + $0x104] ss:$8 sps:$4 sm:$0xff]   ;;  %v2646_v9 = vld [vmem:[%s3893_s1 + $0x100] ss:$8 sps:$4 sm:$0xff]   ;;  %v2666_v20 = vld [vmem:[%s3893_s1 + $0x134] ss:$8 sps:$4 sm:$0xff]  }
  0x1a   :  { %v2651_v7 = vld [vmem:[%s3893_s1 + $0x504] ss:$8 sps:$4 sm:$0xff]   ;;  %v2649_v11 = vld [vmem:[%s3893_s1 + $0x500] ss:$8 sps:$4 sm:$0xff]   ;;  %v2669_v21 = vld [vmem:[%s3893_s1 + $0x534] ss:$8 sps:$4 sm:$0xff]  }
  0x1b   :  { %1767 = vmatpush1.bf16.msra.mxu1 %v2590_v26  ;;  %v2660_v16 = vld [vmem:[%s3893_s1 + $0x124] ss:$8 sps:$4 sm:$0xff]   ;;  %v2658_v18 = vld [vmem:[%s3893_s1 + $0x120] ss:$8 sps:$4 sm:$0xff]   ;;  %v2664_v22 = vld [vmem:[%s3893_s1 + $0x130] ss:$8 sps:$4 sm:$0xff]  }
  0x1c   :  { %1979 = vmatpush1.bf16.msra.mxu0 %v2591_v27  ;;  %1768 = vmatprep.subr.bf16.mxu1 %v2592_v28  ;;  %v2663_v17 = vld [vmem:[%s3893_s1 + $0x524] ss:$8 sps:$4 sm:$0xff]   ;;  %v2661_v19 = vld [vmem:[%s3893_s1 + $0x520] ss:$8 sps:$4 sm:$0xff]   ;;  %v2667_v23 = vld [vmem:[%s3893_s1 + $0x530] ss:$8 sps:$4 sm:$0xff]  }
  0x1d   :  { %1980 = vmatprep.subr.bf16.mxu0 %v2594_v29  ;;  %v2672_v24 = vld [vmem:[%s3893_s1 + $0x144] ss:$8 sps:$4 sm:$0xff]   ;;  %v2670_v26 = vld [vmem:[%s3893_s1 + $0x140] ss:$8 sps:$4 sm:$0xff]   ;;  %v2678_v28 = vld [vmem:[%s3893_s1 + $0x154] ss:$8 sps:$4 sm:$0xff]  }
  0x1e   :  { %v2675_v25 = vld [vmem:[%s3893_s1 + $0x544] ss:$8 sps:$4 sm:$0xff]   ;;  %v2673_v27 = vld [vmem:[%s3893_s1 + $0x540] ss:$8 sps:$4 sm:$0xff]   ;;  %v2681_v29 = vld [vmem:[%s3893_s1 + $0x554] ss:$8 sps:$4 sm:$0xff]  }
  0x1f   :  { %1769 = vmatpush1.bf16.msra.mxu1 %v2596_v30  ;;  %v30_v30 = vld [vmem:[%s3894_s0 + $0x80] sm:$0xff]  ;;  %v3275_v49 = vld [vmem:[%s3894_s0 + $0x28] sm:$0xff]  ;;  %v2691_v52 = vld [vmem:[%s3893_s1 + $0x570] ss:$8 sps:$4 sm:$0xff]  }
  0x20   :  { %1981 = vmatpush1.bf16.msra.mxu0 %v2597_v31  ;;  %1770 = vmatprep.subr.bf16.mxu1 %v2598_v32  ;;  %v38_v31 = vld [vmem:[%s3894_s0 + $0xc0] sm:$0xff]  ;;  %v2676_v32 = vld [vmem:[%s3893_s1 + $0x150] ss:$8 sps:$4 sm:$0xff]  }
  0x21   :  { %1982 = vmatprep.subr.bf16.mxu0 %v2600_v33  ;;  %v2215_v33 = vcombine.high %v30_v30, %v38_v31  ;;  %v2696_v54 = vld [vmem:[%s3893_s1 + $0x184] ss:$8 sps:$4 sm:$0xff]  }
  0x22   :  { %v2699_v55 = vld [vmem:[%s3893_s1 + $0x584] ss:$8 sps:$4 sm:$0xff]  }
  0x23   :  { %1771 = vmatpush1.bf16.msra.mxu1 %v2602_v34  ;;  %v2679_v34 = vld [vmem:[%s3893_s1 + $0x550] ss:$8 sps:$4 sm:$0xff]  }
  0x24   :  { %1983 = vmatpush1.bf16.msra.mxu0 %v2603_v35  ;;  %1772 = vmatprep.subr.bf16.mxu1 %v2604_v36  ;;  %v34_v35 = vld [vmem:[%s3894_s0 + $0xa0] sm:$0xff] }
  0x25   :  { %1984 = vmatprep.subr.bf16.mxu0 %v2606_v37  ;;  %v42_v36 = vld [vmem:[%s3894_s0 + $0xe0] sm:$0xff]  ;;  %v2214_v37 = vcombine.low %v30_v30, %v38_v31  ;;  %v2750_v30 = vld [vmem:[%s3893_s1 + $0x214] ss:$8 sps:$4 sm:$0xff]  }
  0x26   :  { %v2753_v31 = vld [vmem:[%s3893_s1 + $0x614] ss:$8 sps:$4 sm:$0xff]  }
  0x27   :  { %1773 = vmatpush1.bf16.msra.mxu1 %v2608_v38  ;;  %v2684_v38 = vld [vmem:[%s3893_s1 + $0x164] ss:$8 sps:$4 sm:$0xff]  }
  0x28   :  { %1985 = vmatpush1.bf16.msra.mxu0 %v2609_v39  ;;  %1774 = vmatprep.subr.bf16.mxu1 %v2610_v40  ;;  %v2223_v39 = vcombine.high %v34_v35, %v42_v36  ;;  %v2222_v40 = vcombine.low %v34_v35, %v42_v36  ;;  %v2748_v36 = vld [vmem:[%s3893_s1 + $0x210] ss:$8 sps:$4 sm:$0xff]  }
  0x29   :  { %1986 = vmatprep.subr.bf16.mxu0 %v2612_v41  ;;  %v2687_v41 = vld [vmem:[%s3893_s1 + $0x564] ss:$8 sps:$4 sm:$0xff]  }
  0x2b   :  { %1775 = vmatpush1.bf16.msra.mxu1 %v2614_v42  ;;  %v2682_v42 = vld [vmem:[%s3893_s1 + $0x160] ss:$8 sps:$4 sm:$0xff]  }
  0x2c   :  { %1987 = vmatpush1.bf16.msra.mxu0 %v2615_v43  ;;  %1776 = vmatprep.subr.bf16.mxu1 %v2616_v44  ;;  %v2685_v43 = vld [vmem:[%s3893_s1 + $0x560] ss:$8 sps:$4 sm:$0xff]  }
  0x2d   :  { %1988 = vmatprep.subr.bf16.mxu0 %v2618_v45  ;;  %v3257_v44 = vld [vmem:[%s3894_s0 + $0x8] sm:$0xff] }
  0x2e   :  { %v3262_v45 = vld [vmem:[%s3894_s0 + $0x48] sm:$0xff] }
  0x2f   :  { %1777 = vmatpush1.bf16.msra.mxu1 %v2620_v46  ;;  %v2690_v46 = vld [vmem:[%s3893_s1 + $0x174] ss:$8 sps:$4 sm:$0xff]   ;;  %v2201_v48 = vcombine.high %v3257_v44, %v3262_v45 }
  0x30   :  { %1989 = vmatpush1.bf16.msra.mxu0 %v2621_v47  ;;  %1778 = vmatprep.subr.bf16.mxu1 %v2622_v50  ;;  %v2693_v47 = vld [vmem:[%s3893_s1 + $0x574] ss:$8 sps:$4 sm:$0xff]   ;;  %v3280_v50 = vld [vmem:[%s3894_s0 + $0x68] sm:$0xff] }
  0x31   :  { %1990 = vmatprep.subr.bf16.mxu0 %v2624_v51  ;;  %v2688_v51 = vld [vmem:[%s3893_s1 + $0x170] ss:$8 sps:$4 sm:$0xff]   ;;  %v2209_v53 = vcombine.high %v3275_v49, %v3280_v50 }
  0x33   :  { %1779 = vmatpush1.bf16.msra.mxu1 %v2626_v56  ;;  %v2694_v56 = vld [vmem:[%s3893_s1 + $0x180] ss:$8 sps:$4 sm:$0xff]  }
  0x34   :  { %1991 = vmatpush1.bf16.msra.mxu0 %v2627_v57  ;;  %1780 = vmatprep.subr.bf16.mxu1 %v2628_v58  ;;  %v2697_v57 = vld [vmem:[%s3893_s1 + $0x580] ss:$8 sps:$4 sm:$0xff]   ;;  %v2702_v58 = vld [vmem:[%s3893_s1 + $0x194] ss:$8 sps:$4 sm:$0xff]  }
  0x35   :  { %1992 = vmatprep.subr.bf16.mxu0 %v2630_v59  ;;  %v2705_v59 = vld [vmem:[%s3893_s1 + $0x594] ss:$8 sps:$4 sm:$0xff]  }
  0x37   :  { %1781 = vmatpush1.bf16.msra.mxu1 %v2632_v60  ;;  %v2700_v60 = vld [vmem:[%s3893_s1 + $0x190] ss:$8 sps:$4 sm:$0xff]  }
  0x38   :  { %1993 = vmatpush1.bf16.msra.mxu0 %v2633_v61  ;;  %1782 = vmatprep.subr.bf16.mxu1 %v2634_v62  ;;  %v2703_v61 = vld [vmem:[%s3893_s1 + $0x590] ss:$8 sps:$4 sm:$0xff]   ;;  %v2708_v62 = vld [vmem:[%s3893_s1 + $0x1a4] ss:$8 sps:$4 sm:$0xff]  }
  0x39   :  { %1994 = vmatprep.subr.bf16.mxu0 %v2636_v63  ;;  %v2711_v63 = vld [vmem:[%s3893_s1 + $0x5a4] ss:$8 sps:$4 sm:$0xff]  }
  0x3b   :  { %1783 = vmatpush1.bf16.msra.mxu1 %v2638_v0  ;;  %v2706_v0 = vld [vmem:[%s3893_s1 + $0x1a0] ss:$8 sps:$4 sm:$0xff]  }
  0x3c   :  { %1995 = vmatpush1.bf16.msra.mxu0 %v2639_v1  ;;  %1784 = vmatprep.subr.bf16.mxu1 %v2640_v2  ;;  %v2709_v1 = vld [vmem:[%s3893_s1 + $0x5a0] ss:$8 sps:$4 sm:$0xff]   ;;  %v2714_v2 = vld [vmem:[%s3893_s1 + $0x1b4] ss:$8 sps:$4 sm:$0xff]  }
  0x3d   :  { %1996 = vmatprep.subr.bf16.mxu0 %v2642_v3  ;;  %v2717_v3 = vld [vmem:[%s3893_s1 + $0x5b4] ss:$8 sps:$4 sm:$0xff]  }
  0x3f   :  { %1785 = vmatpush1.bf16.msra.mxu1 %v2644_v4  ;;  %v2712_v4 = vld [vmem:[%s3893_s1 + $0x1b0] ss:$8 sps:$4 sm:$0xff]  }
  0x40   :  { %1997 = vmatpush1.bf16.msra.mxu0 %v2645_v5  ;;  %1807 = vmatprep.subr.bf16.mxu1 %v2648_v6  ;;  %v2715_v5 = vld [vmem:[%s3893_s1 + $0x5b0] ss:$8 sps:$4 sm:$0xff]   ;;  %v2720_v6 = vld [vmem:[%s3893_s1 + $0x1c4] ss:$8 sps:$4 sm:$0xff]  }
  0x41   :  { %2019 = vmatprep.subr.bf16.mxu0 %v2651_v7  ;;  %v2723_v7 = vld [vmem:[%s3893_s1 + $0x5c4] ss:$8 sps:$4 sm:$0xff]  }
  0x42   :  { %1787 = vmatmul.mubr.bf16.vlgmr.msra.gmra.mrb[0].mxu1 %v2198_v8  ;;  %v2718_v8 = vld [vmem:[%s3893_s1 + $0x1c0] ss:$8 sps:$4 sm:$0xff]  }
  0x43   :  { %1999 = vmatmul.mubr.bf16.vlgmr.msra.gmra.mrb[0].mxu0 %v2206_v10  ;;  %1808 = vmatpush1.bf16.msra.mxu1 %v2646_v9  ;;  %v2721_v9 = vld [vmem:[%s3893_s1 + $0x5c0] ss:$8 sps:$4 sm:$0xff]   ;;  %v2726_v10 = vld [vmem:[%s3893_s1 + $0x1d4] ss:$8 sps:$4 sm:$0xff]  }
  0x44   :  { %2020 = vmatpush1.bf16.msra.mxu0 %v2649_v11  ;;  %1809 = vmatprep.subr.bf16.mxu1 %v2654_v12  ;;  %v2729_v11 = vld [vmem:[%s3893_s1 + $0x5d4] ss:$8 sps:$4 sm:$0xff]   ;;  %v2724_v12 = vld [vmem:[%s3893_s1 + $0x1d0] ss:$8 sps:$4 sm:$0xff]  }
  0x45   :  { %2021 = vmatprep.subr.bf16.mxu0 %v2657_v13  ;;  %1796 = vmatprep.mubr.bf16.mxu1 %v2215_v33  ;;  %v2727_v13 = vld [vmem:[%s3893_s1 + $0x5d0] ss:$8 sps:$4 sm:$0xff]   ;;  %v43_v33 = vld [vmem:[%s3894_s0 + $0xe8] sm:$0xff] }
  0x46   :  { %2008 = vmatprep.mubr.bf16.mxu0 %v2223_v39  ;;  %v2759_v39 = vld [vmem:[%s3893_s1 + $0x624] ss:$8 sps:$4 sm:$0xff]  }
  0x47   :  { %1810 = vmatpush1.bf16.msra.mxu1 %v2652_v14  ;;  %v2732_v14 = vld [vmem:[%s3893_s1 + $0x1e4] ss:$8 sps:$4 sm:$0xff]  }
  0x48   :  { %2022 = vmatpush1.bf16.msra.mxu0 %v2655_v15  ;;  %1811 = vmatprep.subr.bf16.mxu1 %v2660_v16  ;;  %v2735_v15 = vld [vmem:[%s3893_s1 + $0x5e4] ss:$8 sps:$4 sm:$0xff]   ;;  %v2730_v16 = vld [vmem:[%s3893_s1 + $0x1e0] ss:$8 sps:$4 sm:$0xff]  }
  0x49   :  { %2023 = vmatprep.subr.bf16.mxu0 %v2663_v17  ;;  %v2733_v17 = vld [vmem:[%s3893_s1 + $0x5e0] ss:$8 sps:$4 sm:$0xff]  }
  0x4a   :  { %1797 = vmatmul.mubr.bf16.gmra.mrb[4].mxu1 %v2214_v37  ;;  %v2751_v37 = vld [vmem:[%s3893_s1 + $0x610] ss:$8 sps:$4 sm:$0xff]  }
  0x4b   :  { %1812 = vmatpush1.bf16.msra.mxu1 %v2658_v18  ;;  %2009 = vmatmul.mubr.bf16.gmra.mrb[4].mxu0 %v2222_v40  ;;  %v2738_v18 = vld [vmem:[%s3893_s1 + $0x1f4] ss:$8 sps:$4 sm:$0xff]   ;;  %v2754_v40 = vld [vmem:[%s3893_s1 + $0x220] ss:$8 sps:$4 sm:$0xff]  }
  0x4c   :  { %2024 = vmatpush1.bf16.msra.mxu0 %v2661_v19  ;;  %1813 = vmatprep.subr.bf16.mxu1 %v2666_v20  ;;  %v2741_v19 = vld [vmem:[%s3893_s1 + $0x5f4] ss:$8 sps:$4 sm:$0xff]   ;;  %v2736_v20 = vld [vmem:[%s3893_s1 + $0x1f0] ss:$8 sps:$4 sm:$0xff]  }
  0x4d   :  { %2025 = vmatprep.subr.bf16.mxu0 %v2669_v21  ;;  %1839 = vmatprep.mubr.bf16.mxu1 %v2201_v48  ;;  %v2739_v21 = vld [vmem:[%s3893_s1 + $0x5f0] ss:$8 sps:$4 sm:$0xff]   ;;  %v2762_v48 = vld [vmem:[%s3893_s1 + $0x234] ss:$8 sps:$4 sm:$0xff]  }
  0x4e   :  { %2051 = vmatprep.mubr.bf16.mxu0 %v2209_v53  ;;  %v2763_v53 = vld [vmem:[%s3893_s1 + $0x630] ss:$8 sps:$4 sm:$0xff]  }
  0x4f   :  { %1814 = vmatpush1.bf16.msra.mxu1 %v2664_v22  ;;  %v2744_v22 = vld [vmem:[%s3893_s1 + $0x204] ss:$8 sps:$4 sm:$0xff]  }
  0x50   :  { %2026 = vmatpush1.bf16.msra.mxu0 %v2667_v23  ;;  %1815 = vmatprep.subr.bf16.mxu1 %v2672_v24  ;;  %v2747_v23 = vld [vmem:[%s3893_s1 + $0x604] ss:$8 sps:$4 sm:$0xff]   ;;  %v2742_v24 = vld [vmem:[%s3893_s1 + $0x200] ss:$8 sps:$4 sm:$0xff]  }
  0x51   :  { %2027 = vmatprep.subr.bf16.mxu0 %v2675_v25  ;;  %v2745_v25 = vld [vmem:[%s3893_s1 + $0x600] ss:$8 sps:$4 sm:$0xff]  }
  0x53   :  { %1816 = vmatpush1.bf16.msra.mxu1 %v2670_v26  ;;  %v31_v26 = vld [vmem:[%s3894_s0 + $0x88] sm:$0xff] }
  0x54   :  { %2028 = vmatpush1.bf16.msra.mxu0 %v2673_v27  ;;  %1817 = vmatprep.subr.bf16.mxu1 %v2678_v28  ;;  %v2200_v27 = vcombine.low %v3257_v44, %v3262_v45  ;;  %v2208_v28 = vcombine.low %v3275_v49, %v3280_v50  ;;  %v3446_v45 = vld [vmem:[%s3894_s0 + $0x50] sm:$0xff] }
  0x55   :  { %2029 = vmatprep.subr.bf16.mxu0 %v2681_v29  ;;  %v39_v29 = vld [vmem:[%s3894_s0 + $0xc8] sm:$0xff]  ;;  %v2765_v49 = vld [vmem:[%s3893_s1 + $0x634] ss:$8 sps:$4 sm:$0xff]  }
  0x57   :  { %1818 = vmatpush1.bf16.msra.mxu1 %v2676_v32  ;;  %v35_v32 = vld [vmem:[%s3894_s0 + $0xa8] sm:$0xff] }
  0x58   :  { %2030 = vmatpush1.bf16.msra.mxu0 %v2679_v34  ;;  %1819 = vmatprep.subr.bf16.mxu1 %v2684_v38  ;;  %v2217_v34 = vcombine.high %v31_v26, %v39_v29  ;;  %v2225_v35 = vcombine.high %v35_v32, %v43_v33  ;;  %v2756_v38 = vld [vmem:[%s3893_s1 + $0x224] ss:$8 sps:$4 sm:$0xff]   ;;  %v2224_v44 = vcombine.low %v35_v32, %v43_v33  ;;  %v2826_v32 = vld [vmem:[%s3893_s1 + $0x2e0] ss:$8 sps:$4 sm:$0xff]  }
  0x59   :  { %2031 = vmatprep.subr.bf16.mxu0 %v2687_v41  ;;  %v2757_v41 = vld [vmem:[%s3893_s1 + $0x620] ss:$8 sps:$4 sm:$0xff]  }
  0x5a   :  { %v2829_v33 = vld [vmem:[%s3893_s1 + $0x6e0] ss:$8 sps:$4 sm:$0xff]  }
  0x5b   :  { %1820 = vmatpush1.bf16.msra.mxu1 %v2682_v42  ;;  %v3441_v42 = vld [vmem:[%s3894_s0 + $0x10] sm:$0xff] }
  0x5c   :  { %2032 = vmatpush1.bf16.msra.mxu0 %v2685_v43  ;;  %1821 = vmatprep.subr.bf16.mxu1 %v2690_v46  ;;  %v2216_v43 = vcombine.low %v31_v26, %v39_v29  ;;  %v3451_v46 = vld [vmem:[%s3894_s0 + $0x30] sm:$0xff]  ;;  %v2203_v50 = vcombine.high %v3441_v42, %v3446_v45 }
  0x5d   :  { %2033 = vmatprep.subr.bf16.mxu0 %v2693_v47  ;;  %v3456_v47 = vld [vmem:[%s3894_s0 + $0x70] sm:$0xff] }
  0x5e   :  { %v2822_v26 = vld [vmem:[%s3893_s1 + $0x2d4] ss:$8 sps:$4 sm:$0xff]   ;;  %v2823_v29 = vld [vmem:[%s3893_s1 + $0x6d0] ss:$8 sps:$4 sm:$0xff]  }
  0x5f   :  { %1822 = vmatpush1.bf16.msra.mxu1 %v2688_v51  ;;  %v2211_v51 = vcombine.high %v3451_v46, %v3456_v47 }
  0x60   :  { %2034 = vmatpush1.bf16.msra.mxu0 %v2691_v52  ;;  %1823 = vmatprep.subr.bf16.mxu1 %v2696_v54  ;;  %v2760_v52 = vld [vmem:[%s3893_s1 + $0x230] ss:$8 sps:$4 sm:$0xff]   ;;  %v2768_v54 = vld [vmem:[%s3893_s1 + $0x244] ss:$8 sps:$4 sm:$0xff]  }
  0x61   :  { %2035 = vmatprep.subr.bf16.mxu0 %v2699_v55  ;;  %v2771_v55 = vld [vmem:[%s3893_s1 + $0x644] ss:$8 sps:$4 sm:$0xff]  }
  0x63   :  { %1824 = vmatpush1.bf16.msra.mxu1 %v2694_v56  ;;  %v2766_v56 = vld [vmem:[%s3893_s1 + $0x240] ss:$8 sps:$4 sm:$0xff]  }
  0x64   :  { %2036 = vmatpush1.bf16.msra.mxu0 %v2697_v57  ;;  %1825 = vmatprep.subr.bf16.mxu1 %v2702_v58  ;;  %v2769_v57 = vld [vmem:[%s3893_s1 + $0x640] ss:$8 sps:$4 sm:$0xff]   ;;  %v2774_v58 = vld [vmem:[%s3893_s1 + $0x254] ss:$8 sps:$4 sm:$0xff]  }
  0x65   :  { %2037 = vmatprep.subr.bf16.mxu0 %v2705_v59  ;;  %v2777_v59 = vld [vmem:[%s3893_s1 + $0x654] ss:$8 sps:$4 sm:$0xff]  }
  0x67   :  { %1826 = vmatpush1.bf16.msra.mxu1 %v2700_v60  ;;  %v2772_v60 = vld [vmem:[%s3893_s1 + $0x250] ss:$8 sps:$4 sm:$0xff]  }
  0x68   :  { %2038 = vmatpush1.bf16.msra.mxu0 %v2703_v61  ;;  %1827 = vmatprep.subr.bf16.mxu1 %v2708_v62  ;;  %v2775_v61 = vld [vmem:[%s3893_s1 + $0x650] ss:$8 sps:$4 sm:$0xff]   ;;  %v2780_v62 = vld [vmem:[%s3893_s1 + $0x264] ss:$8 sps:$4 sm:$0xff]  }
  0x69   :  { %2039 = vmatprep.subr.bf16.mxu0 %v2711_v63  ;;  %v2783_v63 = vld [vmem:[%s3893_s1 + $0x664] ss:$8 sps:$4 sm:$0xff]  }
  0x6b   :  { %1828 = vmatpush1.bf16.msra.mxu1 %v2706_v0  ;;  %v2778_v0 = vld [vmem:[%s3893_s1 + $0x260] ss:$8 sps:$4 sm:$0xff]  }
  0x6c   :  { %2040 = vmatpush1.bf16.msra.mxu0 %v2709_v1  ;;  %1829 = vmatprep.subr.bf16.mxu1 %v2714_v2  ;;  %v2781_v1 = vld [vmem:[%s3893_s1 + $0x660] ss:$8 sps:$4 sm:$0xff]   ;;  %v2786_v2 = vld [vmem:[%s3893_s1 + $0x274] ss:$8 sps:$4 sm:$0xff]  }
  0x6d   :  { %2041 = vmatprep.subr.bf16.mxu0 %v2717_v3  ;;  %v2789_v3 = vld [vmem:[%s3893_s1 + $0x674] ss:$8 sps:$4 sm:$0xff]  }
  0x6f   :  { %1830 = vmatpush1.bf16.msra.mxu1 %v2712_v4  ;;  %v2784_v4 = vld [vmem:[%s3893_s1 + $0x270] ss:$8 sps:$4 sm:$0xff]  }
  0x70   :  { %2042 = vmatpush1.bf16.msra.mxu0 %v2715_v5  ;;  %1831 = vmatprep.subr.bf16.mxu1 %v2720_v6  ;;  %v2787_v5 = vld [vmem:[%s3893_s1 + $0x670] ss:$8 sps:$4 sm:$0xff]   ;;  %v2792_v6 = vld [vmem:[%s3893_s1 + $0x284] ss:$8 sps:$4 sm:$0xff]  }
  0x71   :  { %2043 = vmatprep.subr.bf16.mxu0 %v2723_v7  ;;  %v2795_v7 = vld [vmem:[%s3893_s1 + $0x684] ss:$8 sps:$4 sm:$0xff]  }
  0x73   :  { %1832 = vmatpush1.bf16.msra.mxu1 %v2718_v8  ;;  %v2790_v8 = vld [vmem:[%s3893_s1 + $0x280] ss:$8 sps:$4 sm:$0xff]  }
  0x74   :  { %2044 = vmatpush1.bf16.msra.mxu0 %v2721_v9  ;;  %1833 = vmatprep.subr.bf16.mxu1 %v2726_v10  ;;  %v2793_v9 = vld [vmem:[%s3893_s1 + $0x680] ss:$8 sps:$4 sm:$0xff]   ;;  %v2798_v10 = vld [vmem:[%s3893_s1 + $0x294] ss:$8 sps:$4 sm:$0xff]  }
  0x75   :  { %2045 = vmatprep.subr.bf16.mxu0 %v2729_v11  ;;  %v2801_v11 = vld [vmem:[%s3893_s1 + $0x694] ss:$8 sps:$4 sm:$0xff]  }
  0x77   :  { %1834 = vmatpush1.bf16.msra.mxu1 %v2724_v12  ;;  %v2796_v12 = vld [vmem:[%s3893_s1 + $0x290] ss:$8 sps:$4 sm:$0xff]  }
  0x78   :  { %2046 = vmatpush1.bf16.msra.mxu0 %v2727_v13  ;;  %1835 = vmatprep.subr.bf16.mxu1 %v2732_v14  ;;  %v2799_v13 = vld [vmem:[%s3893_s1 + $0x690] ss:$8 sps:$4 sm:$0xff]   ;;  %v2804_v14 = vld [vmem:[%s3893_s1 + $0x2a4] ss:$8 sps:$4 sm:$0xff]  }
  0x79   :  { %2047 = vmatprep.subr.bf16.mxu0 %v2735_v15  ;;  %v2807_v15 = vld [vmem:[%s3893_s1 + $0x6a4] ss:$8 sps:$4 sm:$0xff]  }
  0x7b   :  { %1836 = vmatpush1.bf16.msra.mxu1 %v2730_v16  ;;  %v2802_v16 = vld [vmem:[%s3893_s1 + $0x2a0] ss:$8 sps:$4 sm:$0xff]  }
  0x7c   :  { %2048 = vmatpush1.bf16.msra.mxu0 %v2733_v17  ;;  %1837 = vmatprep.subr.bf16.mxu1 %v2738_v18  ;;  %v2805_v17 = vld [vmem:[%s3893_s1 + $0x6a0] ss:$8 sps:$4 sm:$0xff]   ;;  %v2810_v18 = vld [vmem:[%s3893_s1 + $0x2b4] ss:$8 sps:$4 sm:$0xff]  }
  0x7d   :  { %2049 = vmatprep.subr.bf16.mxu0 %v2741_v19  ;;  %v2813_v19 = vld [vmem:[%s3893_s1 + $0x6b4] ss:$8 sps:$4 sm:$0xff]  }
  0x7f   :  { %1838 = vmatpush1.bf16.msra.mxu1 %v2736_v20  ;;  %v2808_v20 = vld [vmem:[%s3893_s1 + $0x2b0] ss:$8 sps:$4 sm:$0xff]  }
  0x80   :  { %2050 = vmatpush1.bf16.msra.mxu0 %v2739_v21  ;;  %1860 = vmatprep.subr.bf16.mxu1 %v2744_v22  ;;  %v2811_v21 = vld [vmem:[%s3893_s1 + $0x6b0] ss:$8 sps:$4 sm:$0xff]   ;;  %v2816_v22 = vld [vmem:[%s3893_s1 + $0x2c4] ss:$8 sps:$4 sm:$0xff]  }
  0x81   :  { %2072 = vmatprep.subr.bf16.mxu0 %v2747_v23  ;;  %v2819_v23 = vld [vmem:[%s3893_s1 + $0x6c4] ss:$8 sps:$4 sm:$0xff]  }
  0x82   :  { %1840 = vmatmul.mubr.bf16.vlgmr.msra.gmra.mrb[0].mxu1 %v2200_v27  ;;  %v2825_v27 = vld [vmem:[%s3893_s1 + $0x6d4] ss:$8 sps:$4 sm:$0xff]  }
  0x83   :  { %2052 = vmatmul.mubr.bf16.vlgmr.msra.gmra.mrb[0].mxu0 %v2208_v28  ;;  %1861 = vmatpush1.bf16.msra.mxu1 %v2742_v24  ;;  %v2814_v24 = vld [vmem:[%s3893_s1 + $0x2c0] ss:$8 sps:$4 sm:$0xff]   ;;  %v2820_v28 = vld [vmem:[%s3893_s1 + $0x2d0] ss:$8 sps:$4 sm:$0xff]  }
  0x84   :  { %2073 = vmatpush1.bf16.msra.mxu0 %v2745_v25  ;;  %1862 = vmatprep.subr.bf16.mxu1 %v2750_v30  ;;  %v2817_v25 = vld [vmem:[%s3893_s1 + $0x6c0] ss:$8 sps:$4 sm:$0xff]   ;;  %v2828_v30 = vld [vmem:[%s3893_s1 + $0x2e4] ss:$8 sps:$4 sm:$0xff]  }
  0x85   :  { %2074 = vmatprep.subr.bf16.mxu0 %v2753_v31  ;;  %1849 = vmatprep.mubr.bf16.mxu1 %v2217_v34  ;;  %v2831_v31 = vld [vmem:[%s3893_s1 + $0x6e4] ss:$8 sps:$4 sm:$0xff]   ;;  %v2834_v34 = vld [vmem:[%s3893_s1 + $0x2f4] ss:$8 sps:$4 sm:$0xff]  }
  0x86   :  { %2061 = vmatprep.mubr.bf16.mxu0 %v2225_v35  ;;  %v2837_v35 = vld [vmem:[%s3893_s1 + $0x6f4] ss:$8 sps:$4 sm:$0xff]  }
  0x87   :  { %1863 = vmatpush1.bf16.msra.mxu1 %v2748_v36  ;;  %v2832_v36 = vld [vmem:[%s3893_s1 + $0x2f0] ss:$8 sps:$4 sm:$0xff]  }
  0x88   :  { %2075 = vmatpush1.bf16.msra.mxu0 %v2751_v37  ;;  %1864 = vmatprep.subr.bf16.mxu1 %v2756_v38  ;;  %v2835_v37 = vld [vmem:[%s3893_s1 + $0x6f0] ss:$8 sps:$4 sm:$0xff]   ;;  %v2840_v38 = vld [vmem:[%s3893_s1 + $0x304] ss:$8 sps:$4 sm:$0xff]  }
  0x89   :  { %2076 = vmatprep.subr.bf16.mxu0 %v2759_v39  ;;  %v2843_v39 = vld [vmem:[%s3893_s1 + $0x704] ss:$8 sps:$4 sm:$0xff]  }
  0x8a   :  { %1850 = vmatmul.mubr.bf16.gmra.mrb[4].mxu1 %v2216_v43  ;;  %v2210_v43 = vcombine.low %v3451_v46, %v3456_v47  ;;  %v2846_v46 = vld [vmem:[%s3893_s1 + $0x314] ss:$8 sps:$4 sm:$0xff]  }
  0x8b   :  { %2062 = vmatmul.mubr.bf16.gmra.mrb[4].mxu0 %v2224_v44  ;;  %1865 = vmatpush1.bf16.msra.mxu1 %v2754_v40  ;;  %v32_v40 = vld [vmem:[%s3894_s0 + $0x90] sm:$0xff] }
  0x8c   :  { %2077 = vmatpush1.bf16.msra.mxu0 %v2757_v41  ;;  %1866 = vmatprep.subr.bf16.mxu1 %v2762_v48  ;;  %v2202_v41 = vcombine.low %v3441_v42, %v3446_v45  ;;  %v40_v44 = vld [vmem:[%s3894_s0 + $0xd0] sm:$0xff]  ;;  %v2838_v42 = vld [vmem:[%s3893_s1 + $0x300] ss:$8 sps:$4 sm:$0xff]  }
  0x8d   :  { %2078 = vmatprep.subr.bf16.mxu0 %v2765_v49  ;;  %1892 = vmatprep.mubr.bf16.mxu1 %v2203_v50  ;;  %v36_v48 = vld [vmem:[%s3894_s0 + $0xb0] sm:$0xff]  ;;  %v2841_v45 = vld [vmem:[%s3893_s1 + $0x700] ss:$8 sps:$4 sm:$0xff]   ;;  %v2219_v50 = vcombine.high %v32_v40, %v40_v44 }
  0x8e   :  { %2104 = vmatprep.mubr.bf16.mxu0 %v2211_v51  ;;  %v44_v49 = vld [vmem:[%s3894_s0 + $0xf0] sm:$0xff] }
  0x8f   :  { %1867 = vmatpush1.bf16.msra.mxu1 %v2760_v52  ;;  %v2849_v47 = vld [vmem:[%s3893_s1 + $0x714] ss:$8 sps:$4 sm:$0xff]   ;;  %v2227_v51 = vcombine.high %v36_v48, %v44_v49  ;;  %v2844_v52 = vld [vmem:[%s3893_s1 + $0x310] ss:$8 sps:$4 sm:$0xff]  }
  0x90   :  { %2079 = vmatpush1.bf16.msra.mxu0 %v2763_v53  ;;  %1868 = vmatprep.subr.bf16.mxu1 %v2768_v54  ;;  %v2847_v53 = vld [vmem:[%s3893_s1 + $0x710] ss:$8 sps:$4 sm:$0xff]   ;;  %v2852_v54 = vld [vmem:[%s3893_s1 + $0x324] ss:$8 sps:$4 sm:$0xff]  }
  0x91   :  { %2080 = vmatprep.subr.bf16.mxu0 %v2771_v55  ;;  %v2855_v55 = vld [vmem:[%s3893_s1 + $0x724] ss:$8 sps:$4 sm:$0xff]  }
  0x93   :  { %1869 = vmatpush1.bf16.msra.mxu1 %v2766_v56  ;;  %v3667_v56 = vld [vmem:[%s3894_s0 + $0x18] sm:$0xff] }
  0x94   :  { %2081 = vmatpush1.bf16.msra.mxu0 %v2769_v57  ;;  %1870 = vmatprep.subr.bf16.mxu1 %v2774_v58  ;;  %v2218_v57 = vcombine.low %v32_v40, %v40_v44  ;;  %v2226_v58 = vcombine.low %v36_v48, %v44_v49  ;;  %v2910_v40 = vld [vmem:[%s3893_s1 + $0x3c0] ss:$8 sps:$4 sm:$0xff]   ;;  %v2921_v44 = vld [vmem:[%s3893_s1 + $0x7d4] ss:$8 sps:$4 sm:$0xff]   ;;  %v2916_v48 = vld [vmem:[%s3893_s1 + $0x3d0] ss:$8 sps:$4 sm:$0xff]  }
  0x95   :  { %2082 = vmatprep.subr.bf16.mxu0 %v2777_v59  ;;  %v3672_v59 = vld [vmem:[%s3894_s0 + $0x58] sm:$0xff] }
  0x96   :  { %v2919_v49 = vld [vmem:[%s3893_s1 + $0x7d0] ss:$8 sps:$4 sm:$0xff]  }
  0x97   :  { %1871 = vmatpush1.bf16.msra.mxu1 %v2772_v60  ;;  %v3677_v60 = vld [vmem:[%s3894_s0 + $0x38] sm:$0xff] }
  0x98   :  { %2083 = vmatpush1.bf16.msra.mxu0 %v2775_v61  ;;  %1872 = vmatprep.subr.bf16.mxu1 %v2780_v62  ;;  %v3682_v61 = vld [vmem:[%s3894_s0 + $0x78] sm:$0xff]  ;;  %v2850_v62 = vld [vmem:[%s3893_s1 + $0x320] ss:$8 sps:$4 sm:$0xff]  }
  0x99   :  { %2084 = vmatprep.subr.bf16.mxu0 %v2783_v63  ;;  %v2853_v63 = vld [vmem:[%s3893_s1 + $0x720] ss:$8 sps:$4 sm:$0xff]  }
  0x9b   :  { %1873 = vmatpush1.bf16.msra.mxu1 %v2778_v0  ;;  %v2858_v0 = vld [vmem:[%s3893_s1 + $0x334] ss:$8 sps:$4 sm:$0xff]  }
  0x9c   :  { %2085 = vmatpush1.bf16.msra.mxu0 %v2781_v1  ;;  %1874 = vmatprep.subr.bf16.mxu1 %v2786_v2  ;;  %v2861_v1 = vld [vmem:[%s3893_s1 + $0x734] ss:$8 sps:$4 sm:$0xff]   ;;  %v2205_v2 = vcombine.high %v3667_v56, %v3672_v59 }
  0x9d   :  { %2086 = vmatprep.subr.bf16.mxu0 %v2789_v3  ;;  %v2213_v3 = vcombine.high %v3677_v60, %v3682_v61 }
  0x9f   :  { %1875 = vmatpush1.bf16.msra.mxu1 %v2784_v4  ;;  %v2856_v4 = vld [vmem:[%s3893_s1 + $0x330] ss:$8 sps:$4 sm:$0xff]  }
  0xa0   :  { %2087 = vmatpush1.bf16.msra.mxu0 %v2787_v5  ;;  %1876 = vmatprep.subr.bf16.mxu1 %v2792_v6  ;;  %v2859_v5 = vld [vmem:[%s3893_s1 + $0x730] ss:$8 sps:$4 sm:$0xff]   ;;  %v2864_v6 = vld [vmem:[%s3893_s1 + $0x344] ss:$8 sps:$4 sm:$0xff]  }
  0xa1   :  { %2088 = vmatprep.subr.bf16.mxu0 %v2795_v7  ;;  %v2867_v7 = vld [vmem:[%s3893_s1 + $0x744] ss:$8 sps:$4 sm:$0xff]  }
  0xa3   :  { %1877 = vmatpush1.bf16.msra.mxu1 %v2790_v8  ;;  %v2862_v8 = vld [vmem:[%s3893_s1 + $0x340] ss:$8 sps:$4 sm:$0xff]  }
  0xa4   :  { %2089 = vmatpush1.bf16.msra.mxu0 %v2793_v9  ;;  %1878 = vmatprep.subr.bf16.mxu1 %v2798_v10  ;;  %v2865_v9 = vld [vmem:[%s3893_s1 + $0x740] ss:$8 sps:$4 sm:$0xff]   ;;  %v2870_v10 = vld [vmem:[%s3893_s1 + $0x354] ss:$8 sps:$4 sm:$0xff]  }
  0xa5   :  { %2090 = vmatprep.subr.bf16.mxu0 %v2801_v11  ;;  %v2873_v11 = vld [vmem:[%s3893_s1 + $0x754] ss:$8 sps:$4 sm:$0xff]  }
  0xa7   :  { %1879 = vmatpush1.bf16.msra.mxu1 %v2796_v12  ;;  %v2868_v12 = vld [vmem:[%s3893_s1 + $0x350] ss:$8 sps:$4 sm:$0xff]  }
  0xa8   :  { %2091 = vmatpush1.bf16.msra.mxu0 %v2799_v13  ;;  %1880 = vmatprep.subr.bf16.mxu1 %v2804_v14  ;;  %v2871_v13 = vld [vmem:[%s3893_s1 + $0x750] ss:$8 sps:$4 sm:$0xff]   ;;  %v2876_v14 = vld [vmem:[%s3893_s1 + $0x364] ss:$8 sps:$4 sm:$0xff]  }
  0xa9   :  { %2092 = vmatprep.subr.bf16.mxu0 %v2807_v15  ;;  %v2879_v15 = vld [vmem:[%s3893_s1 + $0x764] ss:$8 sps:$4 sm:$0xff]  }
  0xab   :  { %1881 = vmatpush1.bf16.msra.mxu1 %v2802_v16  ;;  %v2874_v16 = vld [vmem:[%s3893_s1 + $0x360] ss:$8 sps:$4 sm:$0xff]  }
  0xac   :  { %2093 = vmatpush1.bf16.msra.mxu0 %v2805_v17  ;;  %1882 = vmatprep.subr.bf16.mxu1 %v2810_v18  ;;  %v2877_v17 = vld [vmem:[%s3893_s1 + $0x760] ss:$8 sps:$4 sm:$0xff]   ;;  %v2882_v18 = vld [vmem:[%s3893_s1 + $0x374] ss:$8 sps:$4 sm:$0xff]  }
  0xad   :  { %2094 = vmatprep.subr.bf16.mxu0 %v2813_v19  ;;  %v2885_v19 = vld [vmem:[%s3893_s1 + $0x774] ss:$8 sps:$4 sm:$0xff]  }
  0xaf   :  { %1883 = vmatpush1.bf16.msra.mxu1 %v2808_v20  ;;  %v2880_v20 = vld [vmem:[%s3893_s1 + $0x370] ss:$8 sps:$4 sm:$0xff]  }
  0xb0   :  { %2095 = vmatpush1.bf16.msra.mxu0 %v2811_v21  ;;  %1884 = vmatprep.subr.bf16.mxu1 %v2816_v22  ;;  %v2883_v21 = vld [vmem:[%s3893_s1 + $0x770] ss:$8 sps:$4 sm:$0xff]   ;;  %v2888_v22 = vld [vmem:[%s3893_s1 + $0x384] ss:$8 sps:$4 sm:$0xff]  }
  0xb1   :  { %2096 = vmatprep.subr.bf16.mxu0 %v2819_v23  ;;  %v2891_v23 = vld [vmem:[%s3893_s1 + $0x784] ss:$8 sps:$4 sm:$0xff]  }
  0xb3   :  { %1885 = vmatpush1.bf16.msra.mxu1 %v2814_v24  ;;  %v2886_v24 = vld [vmem:[%s3893_s1 + $0x380] ss:$8 sps:$4 sm:$0xff]  }
  0xb4   :  { %2097 = vmatpush1.bf16.msra.mxu0 %v2817_v25  ;;  %1886 = vmatprep.subr.bf16.mxu1 %v2822_v26  ;;  %v2889_v25 = vld [vmem:[%s3893_s1 + $0x780] ss:$8 sps:$4 sm:$0xff]   ;;  %v2894_v26 = vld [vmem:[%s3893_s1 + $0x394] ss:$8 sps:$4 sm:$0xff]  }
  0xb5   :  { %2098 = vmatprep.subr.bf16.mxu0 %v2825_v27  ;;  %v2897_v27 = vld [vmem:[%s3893_s1 + $0x794] ss:$8 sps:$4 sm:$0xff]  }
  0xb7   :  { %1887 = vmatpush1.bf16.msra.mxu1 %v2820_v28  ;;  %v2892_v28 = vld [vmem:[%s3893_s1 + $0x390] ss:$8 sps:$4 sm:$0xff]  }
  0xb8   :  { %2099 = vmatpush1.bf16.msra.mxu0 %v2823_v29  ;;  %1888 = vmatprep.subr.bf16.mxu1 %v2828_v30  ;;  %v2895_v29 = vld [vmem:[%s3893_s1 + $0x790] ss:$8 sps:$4 sm:$0xff]   ;;  %v2900_v30 = vld [vmem:[%s3893_s1 + $0x3a4] ss:$8 sps:$4 sm:$0xff]  }
  0xb9   :  { %2100 = vmatprep.subr.bf16.mxu0 %v2831_v31  ;;  %v2903_v31 = vld [vmem:[%s3893_s1 + $0x7a4] ss:$8 sps:$4 sm:$0xff]  }
  0xbb   :  { %1889 = vmatpush1.bf16.msra.mxu1 %v2826_v32  ;;  %v2898_v32 = vld [vmem:[%s3893_s1 + $0x3a0] ss:$8 sps:$4 sm:$0xff]  }
  0xbc   :  { %2101 = vmatpush1.bf16.msra.mxu0 %v2829_v33  ;;  %1890 = vmatprep.subr.bf16.mxu1 %v2834_v34  ;;  %v2901_v33 = vld [vmem:[%s3893_s1 + $0x7a0] ss:$8 sps:$4 sm:$0xff]   ;;  %v2906_v34 = vld [vmem:[%s3893_s1 + $0x3b4] ss:$8 sps:$4 sm:$0xff]  }
  0xbd   :  { %2102 = vmatprep.subr.bf16.mxu0 %v2837_v35  ;;  %v2909_v35 = vld [vmem:[%s3893_s1 + $0x7b4] ss:$8 sps:$4 sm:$0xff]  }
  0xbf   :  { %1891 = vmatpush1.bf16.msra.mxu1 %v2832_v36  ;;  %v2904_v36 = vld [vmem:[%s3893_s1 + $0x3b0] ss:$8 sps:$4 sm:$0xff]  }
  0xc0   :  { %2103 = vmatpush1.bf16.msra.mxu0 %v2835_v37  ;;  %1913 = vmatprep.subr.bf16.mxu1 %v2840_v38  ;;  %v2907_v37 = vld [vmem:[%s3893_s1 + $0x7b0] ss:$8 sps:$4 sm:$0xff]   ;;  %v2912_v38 = vld [vmem:[%s3893_s1 + $0x3c4] ss:$8 sps:$4 sm:$0xff]  }
  0xc1   :  { %2125 = vmatprep.subr.bf16.mxu0 %v2843_v39  ;;  %v2915_v39 = vld [vmem:[%s3893_s1 + $0x7c4] ss:$8 sps:$4 sm:$0xff]  }
  0xc2   :  { %1893 = vmatmul.mubr.bf16.vlgmr.msra.gmra.mrb[0].mxu1 %v2202_v41  ;;  %v2913_v41 = vld [vmem:[%s3893_s1 + $0x7c0] ss:$8 sps:$4 sm:$0xff]  }
  0xc3   :  { %2105 = vmatmul.mubr.bf16.vlgmr.msra.gmra.mrb[0].mxu0 %v2210_v43  ;;  %1914 = vmatpush1.bf16.msra.mxu1 %v2838_v42  ;;  %v2918_v43 = vld [vmem:[%s3893_s1 + $0x3d4] ss:$8 sps:$4 sm:$0xff]   ;;  %v2924_v42 = vld [vmem:[%s3893_s1 + $0x3e4] ss:$8 sps:$4 sm:$0xff]  }
  0xc4   :  { %2126 = vmatpush1.bf16.msra.mxu0 %v2841_v45  ;;  %1915 = vmatprep.subr.bf16.mxu1 %v2846_v46  ;;  %v2927_v45 = vld [vmem:[%s3893_s1 + $0x7e4] ss:$8 sps:$4 sm:$0xff]   ;;  %v2922_v46 = vld [vmem:[%s3893_s1 + $0x3e0] ss:$8 sps:$4 sm:$0xff]  }
  0xc5   :  { %2127 = vmatprep.subr.bf16.mxu0 %v2849_v47  ;;  %1902 = vmatprep.mubr.bf16.mxu1 %v2219_v50  ;;  %v2925_v47 = vld [vmem:[%s3893_s1 + $0x7e0] ss:$8 sps:$4 sm:$0xff]   ;;  %v2930_v50 = vld [vmem:[%s3893_s1 + $0x3f4] ss:$8 sps:$4 sm:$0xff]  }
  0xc6   :  { %2114 = vmatprep.mubr.bf16.mxu0 %v2227_v51  ;;  %v2933_v51 = vld [vmem:[%s3893_s1 + $0x7f4] ss:$8 sps:$4 sm:$0xff]  }
  0xc7   :  { %1916 = vmatpush1.bf16.msra.mxu1 %v2844_v52  ;;  %v2928_v52 = vld [vmem:[%s3893_s1 + $0x3f0] ss:$8 sps:$4 sm:$0xff]  }
  0xc8   :  { %2128 = vmatpush1.bf16.msra.mxu0 %v2847_v53  ;;  %1917 = vmatprep.subr.bf16.mxu1 %v2852_v54  ;;  %v2931_v53 = vld [vmem:[%s3893_s1 + $0x7f0] ss:$8 sps:$4 sm:$0xff]  }
  0xc9   :  { %2129 = vmatprep.subr.bf16.mxu0 %v2855_v55  ;;  %v33_v54 = vld [vmem:[%s3894_s0 + $0x98] sm:$0xff] }
  0xca   :  { %1903 = vmatmul.mubr.bf16.gmra.mrb[4].mxu1 %v2218_v57  ;;  %v41_v55 = vld [vmem:[%s3894_s0 + $0xd8] sm:$0xff] }
  0xcb   :  { %2115 = vmatmul.mubr.bf16.gmra.mrb[4].mxu0 %v2226_v58  ;;  %1918 = vmatpush1.bf16.msra.mxu1 %v2850_v62  ;;  %v37_v57 = vld [vmem:[%s3894_s0 + $0xb8] sm:$0xff]  ;;  %v2204_v62 = vcombine.low %v3667_v56, %v3672_v59  ;;  %v302_v56 = vld [vmem:[%s3895_s2] sm:$0x3] }
  0xcc   :  { %2130 = vmatpush1.bf16.msra.mxu0 %v2853_v63  ;;  %1919 = vmatprep.subr.bf16.mxu1 %v2858_v0  ;;  %v45_v58 = vld [vmem:[%s3894_s0 + $0xf8] sm:$0xff]  ;;  %v2212_v63 = vcombine.low %v3677_v60, %v3682_v61  ;;  %v2221_v0 = vcombine.high %v33_v54, %v41_v55 }
  0xcd   :  { %2131 = vmatprep.subr.bf16.mxu0 %v2861_v1  ;;  %1945 = vmatprep.mubr.bf16.mxu1 %v2205_v2  ;;  %v2229_v1 = vcombine.high %v37_v57, %v45_v58  ;;  %v2220_v2 = vcombine.low %v33_v54, %v41_v55 }
  0xce   :  { %2157 = vmatprep.mubr.bf16.mxu0 %v2213_v3  ;;  %v2228_v3 = vcombine.low %v37_v57, %v45_v58 }
  0xcf   :  { %1920 = vmatpush1.bf16.msra.mxu1 %v2856_v4  ;;  %v304_v4 = vlaneseq }
  0xd0   :  { %2132 = vmatpush1.bf16.msra.mxu0 %v2859_v5  ;;  %1921 = vmatprep.subr.bf16.mxu1 %v2864_v6 }
  0xd1   :  { %2133 = vmatprep.subr.bf16.mxu0 %v2867_v7  ;;  %v305_v5 = vshrl.u32 %v304_v4, 7 }
  0xd3   :  { %1922 = vmatpush1.bf16.msra.mxu1 %v2862_v8  ;;  %v306_v6 = vsub.s32 0, %v305_v5  ;;  %v310_v59 = vsub.s32 1, %v305_v5 }
  0xd4   :  { %2134 = vmatpush1.bf16.msra.mxu0 %v2865_v9  ;;  %1923 = vmatprep.subr.bf16.mxu1 %v2870_v10 }
  0xd5   :  { %2135 = vmatprep.subr.bf16.mxu0 %v2873_v11  ;;  %v307_v60 = vrot.slane %v302_v56, %v306_v6  ;;  %v311_v61 = vrot.slane %v302_v56, %v310_v59 }
  0xd7   :  { %1924 = vmatpush1.bf16.msra.mxu1 %v2868_v12 }
  0xd8   :  { %2136 = vmatpush1.bf16.msra.mxu0 %v2871_v13  ;;  %1925 = vmatprep.subr.bf16.mxu1 %v2876_v14 }
  0xd9   :  { %2137 = vmatprep.subr.bf16.mxu0 %v2879_v15 }
  0xdb   :  { %1926 = vmatpush1.bf16.msra.mxu1 %v2874_v16 }
  0xdc   :  { %2138 = vmatpush1.bf16.msra.mxu0 %v2877_v17  ;;  %1927 = vmatprep.subr.bf16.mxu1 %v2882_v18 }
  0xdd   :  { %2139 = vmatprep.subr.bf16.mxu0 %v2885_v19 }
  0xdf   :  { %1928 = vmatpush1.bf16.msra.mxu1 %v2880_v20 }
  0xe0   :  { %2140 = vmatpush1.bf16.msra.mxu0 %v2883_v21  ;;  %1929 = vmatprep.subr.bf16.mxu1 %v2888_v22 }
  0xe1   :  { %2141 = vmatprep.subr.bf16.mxu0 %v2891_v23 }
  0xe3   :  { %1930 = vmatpush1.bf16.msra.mxu1 %v2886_v24 }
  0xe4   :  { %2142 = vmatpush1.bf16.msra.mxu0 %v2889_v25  ;;  %1931 = vmatprep.subr.bf16.mxu1 %v2894_v26 }
  0xe5   :  { %2143 = vmatprep.subr.bf16.mxu0 %v2897_v27 }
  0xe7   :  { %1932 = vmatpush1.bf16.msra.mxu1 %v2892_v28 }
  0xe8   :  { %2144 = vmatpush1.bf16.msra.mxu0 %v2895_v29  ;;  %1933 = vmatprep.subr.bf16.mxu1 %v2900_v30 }
  0xe9   :  { %2145 = vmatprep.subr.bf16.mxu0 %v2903_v31 }
  0xeb   :  { %1934 = vmatpush1.bf16.msra.mxu1 %v2898_v32 }
  0xec   :  { %2146 = vmatpush1.bf16.msra.mxu0 %v2901_v33  ;;  %1935 = vmatprep.subr.bf16.mxu1 %v2906_v34 }
  0xed   :  { %2147 = vmatprep.subr.bf16.mxu0 %v2909_v35 }
  0xef   :  { %1936 = vmatpush1.bf16.msra.mxu1 %v2904_v36 }
  0xf0   :  { %2148 = vmatpush1.bf16.msra.mxu0 %v2907_v37  ;;  %1937 = vmatprep.subr.bf16.mxu1 %v2912_v38 }
  0xf1   :  { %2149 = vmatprep.subr.bf16.mxu0 %v2915_v39 }
  0xf3   :  { %1938 = vmatpush1.bf16.msra.mxu1 %v2910_v40 }
  0xf4   :  { %2150 = vmatpush1.bf16.msra.mxu0 %v2913_v41  ;;  %1939 = vmatprep.subr.bf16.mxu1 %v2918_v43 }
  0xf5   :  { %2151 = vmatprep.subr.bf16.mxu0 %v2921_v44 }
  0xf7   :  { %1940 = vmatpush1.bf16.msra.mxu1 %v2916_v48 }
  0xf8   :  { %2152 = vmatpush1.bf16.msra.mxu0 %v2919_v49  ;;  %1941 = vmatprep.subr.bf16.mxu1 %v2924_v42 }
  0xf9   :  { %2153 = vmatprep.subr.bf16.mxu0 %v2927_v45 }
  0xfb   :  { %1942 = vmatpush1.bf16.msra.mxu1 %v2922_v46 }
  0xfc   :  { %2154 = vmatpush1.bf16.msra.mxu0 %v2925_v47  ;;  %1943 = vmatprep.subr.bf16.mxu1 %v2930_v50 }
  0xfd   :  { %2155 = vmatprep.subr.bf16.mxu0 %v2933_v51 }
  0xff   :  { %1944 = vmatpush1.bf16.msra.mxu1 %v2928_v52 }
 0x100   :  { %2156 = vmatpush1.bf16.msra.mxu0 %v2931_v53 }
 0x102   :  { %1946 = vmatmul.mubr.bf16.vlgmr.msra.gmra.mrb[0].mxu1 %v2204_v62 }
 0x103   :  { %2158 = vmatmul.mubr.bf16.vlgmr.msra.gmra.mrb[0].mxu0 %v2212_v63  ;;  %1955 = vmatprep.mubr.bf16.mxu1 %v2221_v0 }
 0x104   :  { %2167 = vmatprep.mubr.bf16.mxu0 %v2229_v1 }
 0x10a   :  { %1956 = vmatmul.mubr.bf16.gmra.mrb[4].mxu1 %v2220_v2 }
 0x10b   :  { %2168 = vmatmul.mubr.bf16.gmra.mrb[4].mxu0 %v2228_v3 }
 0x1d5   :  { %v1947_v7 = vpop.f32.mrb[0].mxu1 }
 0x1d6   :  { %v2159_v8 = vpop.f32.mrb[0].mxu0  ;;  %v2486_v9 = vadd.f32 %v1947_v7, %v307_v60  ;;  %v1949_v10 = vpop.f32.mrb[1].mxu1 }
 0x1d7   :  { %v2161_v11 = vpop.f32.mrb[1].mxu0  ;;  %v2488_v12 = vadd.f32 %v1949_v10, %v311_v61  ;;  %v1951_v13 = vpop.f32.mrb[2].mxu1 }
 0x1d8   :  { %v2163_v14 = vpop.f32.mrb[2].mxu0  ;;  %v2487_v15 = vadd.f32 %v2486_v9, %v2159_v8  ;;  %v2490_v16 = vadd.f32 %v1951_v13, %v307_v60  ;;  %v1953_v17 = vpop.f32.mrb[3].mxu1 }
 0x1d9   :  { %v2165_v18 = vpop.f32.mrb[3].mxu0  ;;  %v2489_v19 = vadd.f32 %v2488_v12, %v2161_v11  ;;  %v2492_v20 = vadd.f32 %v1953_v17, %v311_v61 }
 0x1da   :  { %v2178_v21 = vmax.f32 %v2487_v15, 0.0  ;;  %v2491_v22 = vadd.f32 %v2490_v16, %v2163_v14 }
 0x1db   :  { %v2179_v23 = vmax.f32 %v2489_v19, 0.0  ;;  %v2493_v24 = vadd.f32 %v2492_v20, %v2165_v18 }
 0x1dc   :  { %2186 = vst [vmem:[%s3896_s3] sm:$0xff] %v2178_v21  ;;  %v2180_v25 = vmax.f32 %v2491_v22, 0.0 }
 0x1dd   :  { %2187 = vst [vmem:[%s3896_s3 + $0x8] sm:$0xff] %v2179_v23  ;;  %v2181_v26 = vmax.f32 %v2493_v24, 0.0  ;;  %v1957_v27 = vpop.f32.mrb[4].mxu1 }
 0x1de   :  { %v2169_v28 = vpop.f32.mrb[4].mxu0  ;;  %2188 = vst [vmem:[%s3896_s3 + $0x10] sm:$0xff] %v2180_v25  ;;  %v2494_v29 = vadd.f32 %v1957_v27, %v307_v60  ;;  %v1959_v30 = vpop.f32.mrb[5].mxu1 }
 0x1df   :  { %v2171_v31 = vpop.f32.mrb[5].mxu0  ;;  %2189 = vst [vmem:[%s3896_s3 + $0x18] sm:$0xff] %v2181_v26  ;;  %v2496_v32 = vadd.f32 %v1959_v30, %v311_v61  ;;  %v1961_v33 = vpop.f32.mrb[6].mxu1 }
 0x1e0   :  { %v2173_v34 = vpop.f32.mrb[6].mxu0  ;;  %v2495_v35 = vadd.f32 %v2494_v29, %v2169_v28  ;;  %v2498_v36 = vadd.f32 %v1961_v33, %v307_v60  ;;  %v1963_v37 = vpop.f32.mrb[7].mxu1 }
 0x1e1   :  { %v2175_v38 = vpop.f32.mrb[7].mxu0  ;;  %v2497_v39 = vadd.f32 %v2496_v32, %v2171_v31  ;;  %v2500_v40 = vadd.f32 %v1963_v37, %v311_v61 }
 0x1e2   :  { %v2182_v41 = vmax.f32 %v2495_v35, 0.0  ;;  %v2499_v43 = vadd.f32 %v2498_v36, %v2173_v34 }
 0x1e3   :  { %v2183_v44 = vmax.f32 %v2497_v39, 0.0  ;;  %v2501_v48 = vadd.f32 %v2500_v40, %v2175_v38 }
 0x1e4   :  { %2190 = vst [vmem:[%s3896_s3 + $0x20] sm:$0xff] %v2182_v41  ;;  %v2184_v49 = vmax.f32 %v2499_v43, 0.0 }
 0x1e5   :  { %2191 = vst [vmem:[%s3896_s3 + $0x28] sm:$0xff] %v2183_v44  ;;  %v2185_v42 = vmax.f32 %v2501_v48, 0.0 }
 0x1e6   :  { %2192 = vst [vmem:[%s3896_s3 + $0x30] sm:$0xff] %v2184_v49 }
 0x1e7   :  { %2193 = vst [vmem:[%s3896_s3 + $0x38] sm:$0xff] %v2185_v42 }

// kernel: vae_forward.14
= control target key start
LH: loop header
LB: loop body
LE: loop exit
PB: predicated region body
PF: predicated region fallthrough
CT: control target
= control target key end

     0   :  { %v3822_v22 = vmov 1966171168   ;;  %v546_v24 = vlaneseq  ;;  %vm2946_vm0 = vcmask 517120   ;;  %s4675_s1 = inlined_call_operand.vmem [shape: bf16[4096,64], index: 1, kind: input, shape index: {}]   ;;  %s4676_s0 = inlined_call_operand.vmem [shape: bf16[2,4096], index: 0, kind: input, shape index: {}]   ;;  %s4677_s2 = inlined_call_operand.vmem [shape: f32[1,64], index: 2, kind: input, shape index: {}]   ;;  %s4678_s3 = inlined_call_operand.vmem [shape: f32[2,64], index: 3, kind: output, shape index: {}]  }
   0x1   :  { %v3562_v0 = vld [vmem:[%s4675_s1 + $0x40] sm:$0xff]   ;;  %v3566_v4 = vld [vmem:[%s4675_s1 + $0x48] sm:$0xff]   ;;  %v3570_v8 = vld [vmem:[%s4675_s1 + $0x50] sm:$0xff]   ;;  %v544_v23 = vunpack.c.l.s4 %v3822_v22 }
   0x2   :  { %v3563_v1 = vld [vmem:[%s4675_s1 + $0xc0] sm:$0xff]   ;;  %3209 = vmatprep.subr.bf16.mxu0 %v3562_v0  ;;  %v3567_v5 = vld [vmem:[%s4675_s1 + $0xc8] sm:$0xff]   ;;  %v3571_v9 = vld [vmem:[%s4675_s1 + $0xd0] sm:$0xff]   ;;  %v547_v30 = vshrl.u32 %v546_v24, 7 }
   0x3   :  { %v3564_v2 = vld [vmem:[%s4675_s1] sm:$0xff]   ;;  %3231 = vmatprep.subr.bf16.mxu1 %v3563_v1  ;;  %v3568_v6 = vld [vmem:[%s4675_s1 + $0x8] sm:$0xff]   ;;  %v3572_v10 = vld [vmem:[%s4675_s1 + $0x10] sm:$0xff]   ;;  %v545_v29 = vunpack.c.0.s8 %v544_v23 }
   0x4   :  { %v3565_v3 = vld [vmem:[%s4675_s1 + $0x80] sm:$0xff]   ;;  %3210 = vmatpush3.bf16.msra.mxu0 %v3564_v2  ;;  %v3569_v7 = vld [vmem:[%s4675_s1 + $0x88] sm:$0xff]   ;;  %v3573_v11 = vld [vmem:[%s4675_s1 + $0x90] sm:$0xff]  }
   0x5   :  { %3232 = vmatpush3.bf16.msra.mxu1 %v3565_v3  ;;  %3211 = vmatprep.subr.bf16.mxu0 %v3566_v4  ;;  %v3574_v12 = vld [vmem:[%s4675_s1 + $0x58] sm:$0xff]   ;;  %v3578_v16 = vld [vmem:[%s4675_s1 + $0x60] sm:$0xff]   ;;  %v3582_v20 = vld [vmem:[%s4675_s1 + $0x68] sm:$0xff]   ;;  %v3933_v35 = vsub.s32 %v545_v29, %v547_v30 }
   0x6   :  { %3233 = vmatprep.subr.bf16.mxu1 %v3567_v5  ;;  %v3575_v13 = vld [vmem:[%s4675_s1 + $0xd8] sm:$0xff]   ;;  %v3579_v17 = vld [vmem:[%s4675_s1 + $0xe0] sm:$0xff]   ;;  %v3583_v21 = vld [vmem:[%s4675_s1 + $0xe8] sm:$0xff]  }
   0x7   :  { %v3576_v14 = vld [vmem:[%s4675_s1 + $0x18] sm:$0xff]   ;;  %v3580_v18 = vld [vmem:[%s4675_s1 + $0x20] sm:$0xff]   ;;  %v3584_v25 = vld [vmem:[%s4675_s1 + $0x28] sm:$0xff]  }
   0x8   :  { %3212 = vmatpush3.bf16.msra.mxu0 %v3568_v6  ;;  %v3577_v15 = vld [vmem:[%s4675_s1 + $0x98] sm:$0xff]   ;;  %v3581_v19 = vld [vmem:[%s4675_s1 + $0xa0] sm:$0xff]   ;;  %v3585_v26 = vld [vmem:[%s4675_s1 + $0xa8] sm:$0xff]  }
   0x9   :  { %3234 = vmatpush3.bf16.msra.mxu1 %v3569_v7  ;;  %3213 = vmatprep.subr.bf16.mxu0 %v3570_v8  ;;  %v3586_v27 = vld [vmem:[%s4675_s1 + $0x70] sm:$0xff]   ;;  %v3590_v33 = vld [vmem:[%s4675_s1 + $0x78] sm:$0xff]   ;;  %v15_v38 = vld [vmem:[%s4676_s0] sm:$0xff] }
   0xa   :  { %3235 = vmatprep.subr.bf16.mxu1 %v3571_v9  ;;  %v3587_v28 = vld [vmem:[%s4675_s1 + $0xf0] sm:$0xff]   ;;  %v3591_v34 = vld [vmem:[%s4675_s1 + $0xf8] sm:$0xff]   ;;  %v542_v39 = vcombine.high %v15_v38, %v15_v38  ;;  %v549_v40 = vrot.slane %v15_v38, %v3933_v35  ;;  %v3595_v41 = vld [vmem:[%s4675_s1 + $0x140] sm:$0xff]  }
   0xb   :  { %v3588_v31 = vld [vmem:[%s4675_s1 + $0x30] sm:$0xff]   ;;  %v3592_v36 = vld [vmem:[%s4675_s1 + $0x38] sm:$0xff]   ;;  %v3596_v42 = vld [vmem:[%s4675_s1 + $0x1c0] sm:$0xff]  }
   0xc   :  { %3214 = vmatpush3.bf16.msra.mxu0 %v3572_v10  ;;  %v3589_v32 = vld [vmem:[%s4675_s1 + $0xb0] sm:$0xff]   ;;  %v3593_v37 = vld [vmem:[%s4675_s1 + $0xb8] sm:$0xff]   ;;  %v557_v43 = vcombine.high %v549_v40, %v549_v40  ;;  %v565_v44 = vrot.slane %v549_v40, %v3933_v35  ;;  %v3953_v45 = vrot.slane %v542_v39, %v3933_v35  ;;  %v3597_v46 = vld [vmem:[%s4675_s1 + $0x100] sm:$0xff]  }
   0xd   :  { %3236 = vmatpush3.bf16.msra.mxu1 %v3573_v11  ;;  %3215 = vmatprep.subr.bf16.mxu0 %v3574_v12  ;;  %v3598_v48 = vld [vmem:[%s4675_s1 + $0x180] sm:$0xff]   ;;  %v3599_v51 = vld [vmem:[%s4675_s1 + $0x148] sm:$0xff]   ;;  %v3603_v58 = vld [vmem:[%s4675_s1 + $0x150] sm:$0xff]  }
   0xe   :  { %3237 = vmatprep.subr.bf16.mxu1 %v3575_v13  ;;  %v579_v47 = vrot.slane %v557_v43, %v3933_v35  ;;  %v558_v49 = vcombine.high %v3953_v45, %v3953_v45  ;;  %v587_v50 = vcombine.high %v565_v44, %v565_v44  ;;  %v3600_v53 = vld [vmem:[%s4675_s1 + $0x1c8] sm:$0xff]   ;;  %v3604_v59 = vld [vmem:[%s4675_s1 + $0x1d0] sm:$0xff]   ;;  %v3607_v62 = vld [vmem:[%s4675_s1 + $0x158] sm:$0xff]  }
   0xf   :  { %v3601_v55 = vld [vmem:[%s4675_s1 + $0x108] sm:$0xff]   ;;  %v3605_v60 = vld [vmem:[%s4675_s1 + $0x110] sm:$0xff]   ;;  %v3608_v63 = vld [vmem:[%s4675_s1 + $0x1d8] sm:$0xff]  }
  0x10   :  { %3216 = vmatpush3.bf16.msra.mxu0 %v3576_v14  ;;  %2338 = vmatprep.mubr.bf16.mxu0 %v579_v47  ;;  %v589_v52 = vcombine.high %v579_v47, %v579_v47  ;;  %v586_v54 = vrot.slane %v558_v49, %v3933_v35  ;;  %v3602_v56 = vld [vmem:[%s4675_s1 + $0x188] sm:$0xff]   ;;  %v3606_v61 = vld [vmem:[%s4675_s1 + $0x190] sm:$0xff]   ;;  %v3609_v0 = vld [vmem:[%s4675_s1 + $0x118] sm:$0xff]  }
  0x11   :  { %3238 = vmatpush3.bf16.msra.mxu1 %v3577_v15  ;;  %3217 = vmatprep.subr.bf16.mxu0 %v3578_v16  ;;  %v3610_v1 = vld [vmem:[%s4675_s1 + $0x198] sm:$0xff]   ;;  %v3611_v2 = vld [vmem:[%s4675_s1 + $0x160] sm:$0xff]   ;;  %v3615_v6 = vld [vmem:[%s4675_s1 + $0x168] sm:$0xff]  }
  0x12   :  { %3239 = vmatprep.subr.bf16.mxu1 %v3579_v17  ;;  %2378 = vmatprep.mubr.bf16.mxu1 %v589_v52  ;;  %v590_v57 = vcombine.high %v586_v54, %v586_v54  ;;  %v3612_v3 = vld [vmem:[%s4675_s1 + $0x1e0] sm:$0xff]   ;;  %v3616_v7 = vld [vmem:[%s4675_s1 + $0x1e8] sm:$0xff]   ;;  %v3619_v10 = vld [vmem:[%s4675_s1 + $0x170] sm:$0xff]  }
  0x13   :  { %v3613_v4 = vld [vmem:[%s4675_s1 + $0x120] sm:$0xff]   ;;  %v3617_v8 = vld [vmem:[%s4675_s1 + $0x128] sm:$0xff]   ;;  %v3620_v11 = vld [vmem:[%s4675_s1 + $0x1f0] sm:$0xff]  }
  0x14   :  { %3218 = vmatpush3.bf16.msra.mxu0 %v3580_v18  ;;  %v3614_v5 = vld [vmem:[%s4675_s1 + $0x1a0] sm:$0xff]   ;;  %v3618_v9 = vld [vmem:[%s4675_s1 + $0x1a8] sm:$0xff]   ;;  %v3621_v12 = vld [vmem:[%s4675_s1 + $0x130] sm:$0xff]   ;;  %v572_v18 = vrot.slane %v3953_v45, %v3933_v35 }
  0x15   :  { %3240 = vmatpush3.bf16.msra.mxu1 %v3581_v19  ;;  %3219 = vmatprep.subr.bf16.mxu0 %v3582_v20  ;;  %v3622_v13 = vld [vmem:[%s4675_s1 + $0x1b0] sm:$0xff]   ;;  %v3623_v14 = vld [vmem:[%s4675_s1 + $0x178] sm:$0xff]   ;;  %v3627_v19 = vld [vmem:[%s4675_s1 + $0x240] sm:$0xff]  }
  0x16   :  { %3241 = vmatprep.subr.bf16.mxu1 %v3583_v21  ;;  %v3624_v15 = vld [vmem:[%s4675_s1 + $0x1f8] sm:$0xff]   ;;  %v3628_v20 = vld [vmem:[%s4675_s1 + $0x2c0] sm:$0xff]   ;;  %v588_v23 = vcombine.high %v572_v18, %v572_v18  ;;  %v3631_v24 = vld [vmem:[%s4675_s1 + $0x248] sm:$0xff]  }
  0x17   :  { %v3625_v16 = vld [vmem:[%s4675_s1 + $0x138] sm:$0xff]   ;;  %v3629_v21 = vld [vmem:[%s4675_s1 + $0x200] sm:$0xff]   ;;  %v3636_v29 = vld [vmem:[%s4675_s1 + $0x2d0] sm:$0xff]  }
  0x18   :  { %3220 = vmatpush3.bf16.msra.mxu0 %v3584_v25  ;;  %v3626_v17 = vld [vmem:[%s4675_s1 + $0x1b8] sm:$0xff]   ;;  %v3630_v22 = vld [vmem:[%s4675_s1 + $0x280] sm:$0xff]   ;;  %v3632_v25 = vld [vmem:[%s4675_s1 + $0x2c8] sm:$0xff]  }
  0x19   :  { %3242 = vmatpush3.bf16.msra.mxu1 %v3585_v26  ;;  %3221 = vmatprep.subr.bf16.mxu0 %v3586_v27  ;;  %v3633_v26 = vld [vmem:[%s4675_s1 + $0x208] sm:$0xff]   ;;  %v3637_v30 = vld [vmem:[%s4675_s1 + $0x210] sm:$0xff]   ;;  %v3644_v38 = vld [vmem:[%s4675_s1 + $0x2e0] sm:$0xff]  }
  0x1a   :  { %3243 = vmatprep.subr.bf16.mxu1 %v3587_v28  ;;  %v3634_v27 = vld [vmem:[%s4675_s1 + $0x288] sm:$0xff]   ;;  %v3635_v28 = vld [vmem:[%s4675_s1 + $0x250] sm:$0xff]   ;;  %v3645_v39 = vld [vmem:[%s4675_s1 + $0x220] sm:$0xff]  }
  0x1b   :  { %v3646_v40 = vld [vmem:[%s4675_s1 + $0x2a0] sm:$0xff]   ;;  %v3649_v43 = vld [vmem:[%s4675_s1 + $0x228] sm:$0xff]   ;;  %v3651_v45 = vld [vmem:[%s4675_s1 + $0x270] sm:$0xff]  }
  0x1c   :  { %3222 = vmatpush3.bf16.msra.mxu0 %v3588_v31  ;;  %v3638_v31 = vld [vmem:[%s4675_s1 + $0x290] sm:$0xff]   ;;  %v3655_v49 = vld [vmem:[%s4675_s1 + $0x278] sm:$0xff]   ;;  %v16_v52 = vld [vmem:[%s4676_s0 + $0x8] sm:$0xff] }
  0x1d   :  { %3244 = vmatpush3.bf16.msra.mxu1 %v3589_v32  ;;  %3223 = vmatprep.subr.bf16.mxu0 %v3590_v33  ;;  %v3639_v32 = vld [vmem:[%s4675_s1 + $0x258] sm:$0xff]   ;;  %v3653_v47 = vld [vmem:[%s4675_s1 + $0x230] sm:$0xff]  }
  0x1e   :  { %3245 = vmatprep.subr.bf16.mxu1 %v3591_v34  ;;  %v3640_v33 = vld [vmem:[%s4675_s1 + $0x2d8] sm:$0xff]  }
  0x1f   :  { %v3641_v34 = vld [vmem:[%s4675_s1 + $0x218] sm:$0xff]  }
  0x20   :  { %3224 = vmatpush3.bf16.msra.mxu0 %v3592_v36  ;;  %v3642_v36 = vld [vmem:[%s4675_s1 + $0x298] sm:$0xff]  }
  0x21   :  { %3246 = vmatpush3.bf16.msra.mxu1 %v3593_v37  ;;  %3253 = vmatprep.subr.bf16.mxu0 %v3595_v41  ;;  %v3643_v37 = vld [vmem:[%s4675_s1 + $0x260] sm:$0xff]   ;;  %v3647_v41 = vld [vmem:[%s4675_s1 + $0x268] sm:$0xff]  }
  0x22   :  { %3275 = vmatprep.subr.bf16.mxu1 %v3596_v42  ;;  %v3648_v42 = vld [vmem:[%s4675_s1 + $0x2e8] sm:$0xff]  }
  0x23   :  { %2339 = vmatmul.mubr.bf16.vlgmr.msra.gmra.mrb[0].mxu0 %v565_v44  ;;  %v3650_v44 = vld [vmem:[%s4675_s1 + $0x2a8] sm:$0xff]  }
  0x24   :  { %3254 = vmatpush3.bf16.msra.mxu0 %v3597_v46  ;;  %2379 = vmatmul.mubr.bf16.vlgmr.msra.gmra.mrb[0].mxu1 %v587_v50  ;;  %v3652_v46 = vld [vmem:[%s4675_s1 + $0x2f0] sm:$0xff]   ;;  %v3656_v50 = vld [vmem:[%s4675_s1 + $0x2f8] sm:$0xff]  }
  0x25   :  { %3255 = vmatprep.subr.bf16.mxu0 %v3599_v51  ;;  %3276 = vmatpush3.bf16.msra.mxu1 %v3598_v48  ;;  %v3654_v48 = vld [vmem:[%s4675_s1 + $0x2b0] sm:$0xff]   ;;  %v3657_v51 = vld [vmem:[%s4675_s1 + $0x238] sm:$0xff]  }
  0x26   :  { %2418 = vmatprep.mubr.bf16.mxu0 %v586_v54  ;;  %3277 = vmatprep.subr.bf16.mxu1 %v3600_v53  ;;  %v3658_v53 = vld [vmem:[%s4675_s1 + $0x2b8] sm:$0xff]   ;;  %v598_v54 = vrot.slane %v16_v52, %v3933_v35 }
  0x27   :  { %2458 = vmatprep.mubr.bf16.mxu1 %v590_v57 }
  0x28   :  { %3256 = vmatpush3.bf16.msra.mxu0 %v3601_v55  ;;  %v591_v55 = vcombine.high %v16_v52, %v16_v52  ;;  %v606_v57 = vcombine.high %v598_v54, %v598_v54  ;;  %v3708_v52 = vld [vmem:[%s4675_s1 + $0x460] sm:$0xff]  }
  0x29   :  { %3257 = vmatprep.subr.bf16.mxu0 %v3603_v58  ;;  %3278 = vmatpush3.bf16.msra.mxu1 %v3602_v56  ;;  %v3659_v56 = vld [vmem:[%s4675_s1 + $0x340] sm:$0xff]   ;;  %v614_v58 = vrot.slane %v598_v54, %v3933_v35 }
  0x2a   :  { %3279 = vmatprep.subr.bf16.mxu1 %v3604_v59  ;;  %v3660_v59 = vld [vmem:[%s4675_s1 + $0x3c0] sm:$0xff]  }
  0x2b   :  { %v3710_v54 = vld [vmem:[%s4675_s1 + $0x420] sm:$0xff]  }
  0x2c   :  { %3258 = vmatpush3.bf16.msra.mxu0 %v3605_v60  ;;  %v4159_v60 = vrot.slane %v591_v55, %v3933_v35  ;;  %v3711_v55 = vld [vmem:[%s4675_s1 + $0x4a0] sm:$0xff]  }
  0x2d   :  { %3259 = vmatprep.subr.bf16.mxu0 %v3607_v62  ;;  %3280 = vmatpush3.bf16.msra.mxu1 %v3606_v61  ;;  %v3661_v61 = vld [vmem:[%s4675_s1 + $0x300] sm:$0xff]   ;;  %v628_v62 = vrot.slane %v606_v57, %v3933_v35  ;;  %v3713_v57 = vld [vmem:[%s4675_s1 + $0x4e8] sm:$0xff]  }
  0x2e   :  { %3281 = vmatprep.subr.bf16.mxu1 %v3608_v63  ;;  %v3662_v63 = vld [vmem:[%s4675_s1 + $0x380] sm:$0xff]  }
  0x30   :  { %3260 = vmatpush3.bf16.msra.mxu0 %v3609_v0  ;;  %v607_v0 = vcombine.high %v4159_v60, %v4159_v60 }
  0x31   :  { %3261 = vmatprep.subr.bf16.mxu0 %v3611_v2  ;;  %3282 = vmatpush3.bf16.msra.mxu1 %v3610_v1  ;;  %v636_v1 = vcombine.high %v614_v58, %v614_v58  ;;  %v3663_v2 = vld [vmem:[%s4675_s1 + $0x348] sm:$0xff]  }
  0x32   :  { %3283 = vmatprep.subr.bf16.mxu1 %v3612_v3  ;;  %v638_v3 = vcombine.high %v628_v62, %v628_v62 }
  0x34   :  { %3262 = vmatpush3.bf16.msra.mxu0 %v3613_v4  ;;  %v3664_v4 = vld [vmem:[%s4675_s1 + $0x3c8] sm:$0xff]  }
  0x35   :  { %3263 = vmatprep.subr.bf16.mxu0 %v3615_v6  ;;  %3284 = vmatpush3.bf16.msra.mxu1 %v3614_v5  ;;  %v635_v5 = vrot.slane %v607_v0, %v3933_v35  ;;  %v3665_v6 = vld [vmem:[%s4675_s1 + $0x308] sm:$0xff]   ;;  %v3720_v0 = vld [vmem:[%s4675_s1 + $0x478] sm:$0xff]  }
  0x36   :  { %3285 = vmatprep.subr.bf16.mxu1 %v3616_v7  ;;  %v3666_v7 = vld [vmem:[%s4675_s1 + $0x388] sm:$0xff]  }
  0x38   :  { %3264 = vmatpush3.bf16.msra.mxu0 %v3617_v8  ;;  %v639_v8 = vcombine.high %v635_v5, %v635_v5 }
  0x39   :  { %3265 = vmatprep.subr.bf16.mxu0 %v3619_v10  ;;  %3286 = vmatpush3.bf16.msra.mxu1 %v3618_v9  ;;  %v3667_v9 = vld [vmem:[%s4675_s1 + $0x350] sm:$0xff]  }
  0x3a   :  { %3287 = vmatprep.subr.bf16.mxu1 %v3620_v11  ;;  %v3668_v10 = vld [vmem:[%s4675_s1 + $0x3d0] sm:$0xff]  }
  0x3b   :  { %v3669_v11 = vld [vmem:[%s4675_s1 + $0x310] sm:$0xff]  }
  0x3c   :  { %3266 = vmatpush3.bf16.msra.mxu0 %v3621_v12  ;;  %v3670_v12 = vld [vmem:[%s4675_s1 + $0x390] sm:$0xff]  }
  0x3d   :  { %3267 = vmatprep.subr.bf16.mxu0 %v3623_v14  ;;  %3288 = vmatpush3.bf16.msra.mxu1 %v3622_v13  ;;  %v3671_v13 = vld [vmem:[%s4675_s1 + $0x358] sm:$0xff]  }
  0x3e   :  { %3289 = vmatprep.subr.bf16.mxu1 %v3624_v15  ;;  %v3672_v14 = vld [vmem:[%s4675_s1 + $0x3d8] sm:$0xff]  }
  0x3f   :  { %v3673_v15 = vld [vmem:[%s4675_s1 + $0x318] sm:$0xff]  }
  0x40   :  { %3268 = vmatpush3.bf16.msra.mxu0 %v3625_v16  ;;  %v3674_v16 = vld [vmem:[%s4675_s1 + $0x398] sm:$0xff]  }
  0x41   :  { %3297 = vmatprep.subr.bf16.mxu0 %v3627_v19  ;;  %3290 = vmatpush3.bf16.msra.mxu1 %v3626_v17  ;;  %v3675_v17 = vld [vmem:[%s4675_s1 + $0x360] sm:$0xff]  }
  0x42   :  { %3319 = vmatprep.subr.bf16.mxu1 %v3628_v20  ;;  %v3677_v19 = vld [vmem:[%s4675_s1 + $0x320] sm:$0xff]  }
  0x43   :  { %2419 = vmatmul.mubr.bf16.vlgmr.msra.gmra.mrb[4].mxu0 %v572_v18  ;;  %v3676_v18 = vld [vmem:[%s4675_s1 + $0x3e0] sm:$0xff]  }
  0x44   :  { %3298 = vmatpush3.bf16.msra.mxu0 %v3629_v21  ;;  %2459 = vmatmul.mubr.bf16.vlgmr.msra.gmra.mrb[4].mxu1 %v588_v23  ;;  %v3678_v20 = vld [vmem:[%s4675_s1 + $0x3a0] sm:$0xff]   ;;  %v3679_v21 = vld [vmem:[%s4675_s1 + $0x368] sm:$0xff]  }
  0x45   :  { %3299 = vmatprep.subr.bf16.mxu0 %v3631_v24  ;;  %3320 = vmatpush3.bf16.msra.mxu1 %v3630_v22  ;;  %v3680_v22 = vld [vmem:[%s4675_s1 + $0x3e8] sm:$0xff]  }
  0x46   :  { %3321 = vmatprep.subr.bf16.mxu1 %v3632_v25  ;;  %2498 = vmatprep.mubr.bf16.mxu0 %v628_v62  ;;  %v3681_v23 = vld [vmem:[%s4675_s1 + $0x328] sm:$0xff]   ;;  %v3683_v25 = vld [vmem:[%s4675_s1 + $0x370] sm:$0xff]  }
  0x47   :  { %2538 = vmatprep.mubr.bf16.mxu1 %v638_v3  ;;  %v3682_v24 = vld [vmem:[%s4675_s1 + $0x3a8] sm:$0xff]   ;;  %v3718_v62 = vld [vmem:[%s4675_s1 + $0x430] sm:$0xff]  }
  0x48   :  { %3300 = vmatpush3.bf16.msra.mxu0 %v3633_v26  ;;  %v3684_v26 = vld [vmem:[%s4675_s1 + $0x3f0] sm:$0xff]  }
  0x49   :  { %3301 = vmatprep.subr.bf16.mxu0 %v3635_v28  ;;  %3322 = vmatpush3.bf16.msra.mxu1 %v3634_v27  ;;  %v3685_v27 = vld [vmem:[%s4675_s1 + $0x330] sm:$0xff]  }
  0x4a   :  { %3323 = vmatprep.subr.bf16.mxu1 %v3636_v29  ;;  %v3686_v28 = vld [vmem:[%s4675_s1 + $0x3b0] sm:$0xff]   ;;  %v3687_v29 = vld [vmem:[%s4675_s1 + $0x378] sm:$0xff]  }
  0x4b   :  { %v17_v3 = vld [vmem:[%s4676_s0 + $0x10] sm:$0xff] }
  0x4c   :  { %3302 = vmatpush3.bf16.msra.mxu0 %v3637_v30  ;;  %v3688_v30 = vld [vmem:[%s4675_s1 + $0x3f8] sm:$0xff]  }
  0x4d   :  { %3303 = vmatprep.subr.bf16.mxu0 %v3639_v32  ;;  %3324 = vmatpush3.bf16.msra.mxu1 %v3638_v31  ;;  %v3689_v31 = vld [vmem:[%s4675_s1 + $0x338] sm:$0xff]  }
  0x4e   :  { %3325 = vmatprep.subr.bf16.mxu1 %v3640_v33  ;;  %v3690_v32 = vld [vmem:[%s4675_s1 + $0x3b8] sm:$0xff]   ;;  %v621_v33 = vrot.slane %v4159_v60, %v3933_v35  ;;  %v3716_v60 = vld [vmem:[%s4675_s1 + $0x470] sm:$0xff]  }
  0x50   :  { %3304 = vmatpush3.bf16.msra.mxu0 %v3641_v34  ;;  %v3692_v34 = vld [vmem:[%s4675_s1 + $0x440] sm:$0xff]  }
  0x51   :  { %3305 = vmatprep.subr.bf16.mxu0 %v3643_v37  ;;  %3326 = vmatpush3.bf16.msra.mxu1 %v3642_v36  ;;  %v3693_v36 = vld [vmem:[%s4675_s1 + $0x4c0] sm:$0xff]  }
  0x52   :  { %3327 = vmatprep.subr.bf16.mxu1 %v3644_v38  ;;  %v3694_v37 = vld [vmem:[%s4675_s1 + $0x400] sm:$0xff]  }
  0x53   :  { %v3695_v38 = vld [vmem:[%s4675_s1 + $0x480] sm:$0xff]  }
  0x54   :  { %3306 = vmatpush3.bf16.msra.mxu0 %v3645_v39  ;;  %v637_v39 = vcombine.high %v621_v33, %v621_v33 }
  0x55   :  { %3307 = vmatprep.subr.bf16.mxu0 %v3647_v41  ;;  %3328 = vmatpush3.bf16.msra.mxu1 %v3646_v40  ;;  %v3696_v40 = vld [vmem:[%s4675_s1 + $0x448] sm:$0xff]  }
  0x56   :  { %3329 = vmatprep.subr.bf16.mxu1 %v3648_v42  ;;  %v3697_v41 = vld [vmem:[%s4675_s1 + $0x4c8] sm:$0xff]  }
  0x57   :  { %v3698_v42 = vld [vmem:[%s4675_s1 + $0x408] sm:$0xff]  }
  0x58   :  { %3308 = vmatpush3.bf16.msra.mxu0 %v3649_v43  ;;  %v3699_v43 = vld [vmem:[%s4675_s1 + $0x488] sm:$0xff]  }
  0x59   :  { %3309 = vmatprep.subr.bf16.mxu0 %v3651_v45  ;;  %3330 = vmatpush3.bf16.msra.mxu1 %v3650_v44  ;;  %v3700_v44 = vld [vmem:[%s4675_s1 + $0x450] sm:$0xff]  }
  0x5a   :  { %3331 = vmatprep.subr.bf16.mxu1 %v3652_v46  ;;  %v3701_v45 = vld [vmem:[%s4675_s1 + $0x4d0] sm:$0xff]  }
  0x5b   :  { %v3702_v46 = vld [vmem:[%s4675_s1 + $0x410] sm:$0xff]  }
  0x5c   :  { %3310 = vmatpush3.bf16.msra.mxu0 %v3653_v47  ;;  %v3703_v47 = vld [vmem:[%s4675_s1 + $0x490] sm:$0xff]  }
  0x5d   :  { %3311 = vmatprep.subr.bf16.mxu0 %v3655_v49  ;;  %3332 = vmatpush3.bf16.msra.mxu1 %v3654_v48  ;;  %v3704_v48 = vld [vmem:[%s4675_s1 + $0x458] sm:$0xff]  }
  0x5e   :  { %3333 = vmatprep.subr.bf16.mxu1 %v3656_v50  ;;  %v3705_v49 = vld [vmem:[%s4675_s1 + $0x4d8] sm:$0xff]  }
  0x5f   :  { %v3706_v50 = vld [vmem:[%s4675_s1 + $0x418] sm:$0xff]  }
  0x60   :  { %3312 = vmatpush3.bf16.msra.mxu0 %v3657_v51  ;;  %v3707_v51 = vld [vmem:[%s4675_s1 + $0x498] sm:$0xff]  }
  0x61   :  { %3341 = vmatprep.subr.bf16.mxu0 %v3659_v56  ;;  %3334 = vmatpush3.bf16.msra.mxu1 %v3658_v53  ;;  %v3709_v53 = vld [vmem:[%s4675_s1 + $0x4e0] sm:$0xff]   ;;  %v3712_v56 = vld [vmem:[%s4675_s1 + $0x468] sm:$0xff]  }
  0x62   :  { %3363 = vmatprep.subr.bf16.mxu1 %v3660_v59  ;;  %v3715_v59 = vld [vmem:[%s4675_s1 + $0x4a8] sm:$0xff]  }
  0x63   :  { %2499 = vmatmul.mubr.bf16.vlgmr.msra.gmra.mrb[8].mxu0 %v614_v58  ;;  %v3714_v58 = vld [vmem:[%s4675_s1 + $0x428] sm:$0xff]  }
  0x64   :  { %3342 = vmatpush3.bf16.msra.mxu0 %v3661_v61  ;;  %2539 = vmatmul.mubr.bf16.vlgmr.msra.gmra.mrb[8].mxu1 %v636_v1  ;;  %v3717_v61 = vld [vmem:[%s4675_s1 + $0x4f0] sm:$0xff]   ;;  %v3721_v1 = vld [vmem:[%s4675_s1 + $0x4f8] sm:$0xff]  }
  0x65   :  { %3343 = vmatprep.subr.bf16.mxu0 %v3663_v2  ;;  %3364 = vmatpush3.bf16.msra.mxu1 %v3662_v63  ;;  %v3719_v63 = vld [vmem:[%s4675_s1 + $0x4b0] sm:$0xff]   ;;  %v3722_v2 = vld [vmem:[%s4675_s1 + $0x438] sm:$0xff]  }
  0x66   :  { %2578 = vmatprep.mubr.bf16.mxu0 %v635_v5  ;;  %3365 = vmatprep.subr.bf16.mxu1 %v3664_v4  ;;  %v3723_v4 = vld [vmem:[%s4675_s1 + $0x4b8] sm:$0xff]   ;;  %v647_v5 = vrot.slane %v17_v3, %v3933_v35 }
  0x67   :  { %2618 = vmatprep.mubr.bf16.mxu1 %v639_v8 }
  0x68   :  { %3344 = vmatpush3.bf16.msra.mxu0 %v3665_v6  ;;  %v640_v6 = vcombine.high %v17_v3, %v17_v3  ;;  %v655_v8 = vcombine.high %v647_v5, %v647_v5  ;;  %v3773_v3 = vld [vmem:[%s4675_s1 + $0x660] sm:$0xff]  }
  0x69   :  { %3345 = vmatprep.subr.bf16.mxu0 %v3667_v9  ;;  %3366 = vmatpush3.bf16.msra.mxu1 %v3666_v7  ;;  %v3724_v7 = vld [vmem:[%s4675_s1 + $0x540] sm:$0xff]   ;;  %v663_v9 = vrot.slane %v647_v5, %v3933_v35 }
  0x6a   :  { %3367 = vmatprep.subr.bf16.mxu1 %v3668_v10  ;;  %v3725_v10 = vld [vmem:[%s4675_s1 + $0x5c0] sm:$0xff]  }
  0x6b   :  { %v3775_v5 = vld [vmem:[%s4675_s1 + $0x620] sm:$0xff]  }
  0x6c   :  { %3346 = vmatpush3.bf16.msra.mxu0 %v3669_v11  ;;  %v4365_v11 = vrot.slane %v640_v6, %v3933_v35  ;;  %v3776_v6 = vld [vmem:[%s4675_s1 + $0x6a0] sm:$0xff]  }
  0x6d   :  { %3347 = vmatprep.subr.bf16.mxu0 %v3671_v13  ;;  %3368 = vmatpush3.bf16.msra.mxu1 %v3670_v12  ;;  %v3726_v12 = vld [vmem:[%s4675_s1 + $0x500] sm:$0xff]   ;;  %v677_v13 = vrot.slane %v655_v8, %v3933_v35  ;;  %v3778_v8 = vld [vmem:[%s4675_s1 + $0x6e8] sm:$0xff]  }
  0x6e   :  { %3369 = vmatprep.subr.bf16.mxu1 %v3672_v14  ;;  %v3727_v14 = vld [vmem:[%s4675_s1 + $0x580] sm:$0xff]  }
  0x70   :  { %3348 = vmatpush3.bf16.msra.mxu0 %v3673_v15  ;;  %v656_v15 = vcombine.high %v4365_v11, %v4365_v11 }
  0x71   :  { %3349 = vmatprep.subr.bf16.mxu0 %v3675_v17  ;;  %3370 = vmatpush3.bf16.msra.mxu1 %v3674_v16  ;;  %v685_v16 = vcombine.high %v663_v9, %v663_v9  ;;  %v3728_v17 = vld [vmem:[%s4675_s1 + $0x548] sm:$0xff]  }
  0x72   :  { %3371 = vmatprep.subr.bf16.mxu1 %v3676_v18  ;;  %v687_v18 = vcombine.high %v677_v13, %v677_v13 }
  0x74   :  { %3350 = vmatpush3.bf16.msra.mxu0 %v3677_v19  ;;  %v3729_v19 = vld [vmem:[%s4675_s1 + $0x5c8] sm:$0xff]  }
  0x75   :  { %3351 = vmatprep.subr.bf16.mxu0 %v3679_v21  ;;  %3372 = vmatpush3.bf16.msra.mxu1 %v3678_v20  ;;  %v684_v20 = vrot.slane %v656_v15, %v3933_v35  ;;  %v3730_v21 = vld [vmem:[%s4675_s1 + $0x508] sm:$0xff]   ;;  %v3785_v15 = vld [vmem:[%s4675_s1 + $0x678] sm:$0xff]  }
  0x76   :  { %3373 = vmatprep.subr.bf16.mxu1 %v3680_v22  ;;  %v3731_v22 = vld [vmem:[%s4675_s1 + $0x588] sm:$0xff]  }
  0x78   :  { %3352 = vmatpush3.bf16.msra.mxu0 %v3681_v23  ;;  %v688_v23 = vcombine.high %v684_v20, %v684_v20 }
  0x79   :  { %3353 = vmatprep.subr.bf16.mxu0 %v3683_v25  ;;  %3374 = vmatpush3.bf16.msra.mxu1 %v3682_v24  ;;  %v3732_v24 = vld [vmem:[%s4675_s1 + $0x550] sm:$0xff]  }
  0x7a   :  { %3375 = vmatprep.subr.bf16.mxu1 %v3684_v26  ;;  %v3733_v25 = vld [vmem:[%s4675_s1 + $0x5d0] sm:$0xff]  }
  0x7b   :  { %v3734_v26 = vld [vmem:[%s4675_s1 + $0x510] sm:$0xff]  }
  0x7c   :  { %3354 = vmatpush3.bf16.msra.mxu0 %v3685_v27  ;;  %v3735_v27 = vld [vmem:[%s4675_s1 + $0x590] sm:$0xff]  }
  0x7d   :  { %3355 = vmatprep.subr.bf16.mxu0 %v3687_v29  ;;  %3376 = vmatpush3.bf16.msra.mxu1 %v3686_v28  ;;  %v3736_v28 = vld [vmem:[%s4675_s1 + $0x558] sm:$0xff]  }
  0x7e   :  { %3377 = vmatprep.subr.bf16.mxu1 %v3688_v30  ;;  %v3737_v29 = vld [vmem:[%s4675_s1 + $0x5d8] sm:$0xff]  }
  0x7f   :  { %v3738_v30 = vld [vmem:[%s4675_s1 + $0x518] sm:$0xff]  }
  0x80   :  { %3356 = vmatpush3.bf16.msra.mxu0 %v3689_v31  ;;  %v3739_v31 = vld [vmem:[%s4675_s1 + $0x598] sm:$0xff]  }
  0x81   :  { %3385 = vmatprep.subr.bf16.mxu0 %v3692_v34  ;;  %3378 = vmatpush3.bf16.msra.mxu1 %v3690_v32  ;;  %v3740_v32 = vld [vmem:[%s4675_s1 + $0x560] sm:$0xff]  }
  0x82   :  { %3407 = vmatprep.subr.bf16.mxu1 %v3693_v36  ;;  %v3742_v34 = vld [vmem:[%s4675_s1 + $0x520] sm:$0xff]  }
  0x83   :  { %2579 = vmatmul.mubr.bf16.vlgmr.msra.gmra.mrb[12].mxu0 %v621_v33  ;;  %v3741_v33 = vld [vmem:[%s4675_s1 + $0x5e0] sm:$0xff]  }
  0x84   :  { %3386 = vmatpush3.bf16.msra.mxu0 %v3694_v37  ;;  %2619 = vmatmul.mubr.bf16.vlgmr.msra.gmra.mrb[12].mxu1 %v637_v39  ;;  %v3743_v36 = vld [vmem:[%s4675_s1 + $0x5a0] sm:$0xff]   ;;  %v3744_v37 = vld [vmem:[%s4675_s1 + $0x568] sm:$0xff]  }
  0x85   :  { %3387 = vmatprep.subr.bf16.mxu0 %v3696_v40  ;;  %3408 = vmatpush3.bf16.msra.mxu1 %v3695_v38  ;;  %v3745_v38 = vld [vmem:[%s4675_s1 + $0x5e8] sm:$0xff]  }
  0x86   :  { %3409 = vmatprep.subr.bf16.mxu1 %v3697_v41  ;;  %2658 = vmatprep.mubr.bf16.mxu0 %v677_v13  ;;  %v3746_v39 = vld [vmem:[%s4675_s1 + $0x528] sm:$0xff]   ;;  %v3748_v41 = vld [vmem:[%s4675_s1 + $0x570] sm:$0xff]  }
  0x87   :  { %2698 = vmatprep.mubr.bf16.mxu1 %v687_v18  ;;  %v3747_v40 = vld [vmem:[%s4675_s1 + $0x5a8] sm:$0xff]   ;;  %v3783_v13 = vld [vmem:[%s4675_s1 + $0x630] sm:$0xff]   ;;  %v18_v18 = vld [vmem:[%s4676_s0 + $0x18] sm:$0xff] }
  0x88   :  { %3388 = vmatpush3.bf16.msra.mxu0 %v3698_v42  ;;  %v3749_v42 = vld [vmem:[%s4675_s1 + $0x5f0] sm:$0xff]  }
  0x89   :  { %3389 = vmatprep.subr.bf16.mxu0 %v3700_v44  ;;  %3410 = vmatpush3.bf16.msra.mxu1 %v3699_v43  ;;  %v3750_v43 = vld [vmem:[%s4675_s1 + $0x530] sm:$0xff]  }
  0x8a   :  { %3411 = vmatprep.subr.bf16.mxu1 %v3701_v45  ;;  %v3751_v44 = vld [vmem:[%s4675_s1 + $0x5b0] sm:$0xff]   ;;  %v3752_v45 = vld [vmem:[%s4675_s1 + $0x578] sm:$0xff]  }
  0x8c   :  { %3390 = vmatpush3.bf16.msra.mxu0 %v3702_v46  ;;  %v3753_v46 = vld [vmem:[%s4675_s1 + $0x5f8] sm:$0xff]  }
  0x8d   :  { %3391 = vmatprep.subr.bf16.mxu0 %v3704_v48  ;;  %3412 = vmatpush3.bf16.msra.mxu1 %v3703_v47  ;;  %v3754_v47 = vld [vmem:[%s4675_s1 + $0x538] sm:$0xff]  }
  0x8e   :  { %3413 = vmatprep.subr.bf16.mxu1 %v3705_v49  ;;  %v3755_v48 = vld [vmem:[%s4675_s1 + $0x5b8] sm:$0xff]   ;;  %v670_v49 = vrot.slane %v4365_v11, %v3933_v35  ;;  %v3781_v11 = vld [vmem:[%s4675_s1 + $0x670] sm:$0xff]  }
  0x90   :  { %3392 = vmatpush3.bf16.msra.mxu0 %v3706_v50  ;;  %v3757_v50 = vld [vmem:[%s4675_s1 + $0x640] sm:$0xff]  }
  0x91   :  { %3393 = vmatprep.subr.bf16.mxu0 %v3708_v52  ;;  %3414 = vmatpush3.bf16.msra.mxu1 %v3707_v51  ;;  %v3758_v51 = vld [vmem:[%s4675_s1 + $0x6c0] sm:$0xff]  }
  0x92   :  { %3415 = vmatprep.subr.bf16.mxu1 %v3709_v53  ;;  %v3759_v52 = vld [vmem:[%s4675_s1 + $0x600] sm:$0xff]  }
  0x93   :  { %v3760_v53 = vld [vmem:[%s4675_s1 + $0x680] sm:$0xff]  }
  0x94   :  { %3394 = vmatpush3.bf16.msra.mxu0 %v3710_v54  ;;  %v686_v54 = vcombine.high %v670_v49, %v670_v49 }
  0x95   :  { %3395 = vmatprep.subr.bf16.mxu0 %v3712_v56  ;;  %3416 = vmatpush3.bf16.msra.mxu1 %v3711_v55  ;;  %v3761_v55 = vld [vmem:[%s4675_s1 + $0x648] sm:$0xff]  }
  0x96   :  { %3417 = vmatprep.subr.bf16.mxu1 %v3713_v57  ;;  %v3762_v56 = vld [vmem:[%s4675_s1 + $0x6c8] sm:$0xff]  }
  0x97   :  { %v3763_v57 = vld [vmem:[%s4675_s1 + $0x608] sm:$0xff]  }
  0x98   :  { %3396 = vmatpush3.bf16.msra.mxu0 %v3714_v58  ;;  %v3764_v58 = vld [vmem:[%s4675_s1 + $0x688] sm:$0xff]  }
  0x99   :  { %3397 = vmatprep.subr.bf16.mxu0 %v3716_v60  ;;  %3418 = vmatpush3.bf16.msra.mxu1 %v3715_v59  ;;  %v3765_v59 = vld [vmem:[%s4675_s1 + $0x650] sm:$0xff]  }
  0x9a   :  { %3419 = vmatprep.subr.bf16.mxu1 %v3717_v61  ;;  %v3766_v60 = vld [vmem:[%s4675_s1 + $0x6d0] sm:$0xff]  }
  0x9b   :  { %v3767_v61 = vld [vmem:[%s4675_s1 + $0x610] sm:$0xff]  }
  0x9c   :  { %3398 = vmatpush3.bf16.msra.mxu0 %v3718_v62  ;;  %v3768_v62 = vld [vmem:[%s4675_s1 + $0x690] sm:$0xff]  }
  0x9d   :  { %3399 = vmatprep.subr.bf16.mxu0 %v3720_v0  ;;  %3420 = vmatpush3.bf16.msra.mxu1 %v3719_v63  ;;  %v3769_v63 = vld [vmem:[%s4675_s1 + $0x658] sm:$0xff]  }
  0x9e   :  { %3421 = vmatprep.subr.bf16.mxu1 %v3721_v1  ;;  %v3770_v0 = vld [vmem:[%s4675_s1 + $0x6d8] sm:$0xff]  }
  0x9f   :  { %v3771_v1 = vld [vmem:[%s4675_s1 + $0x618] sm:$0xff]  }
  0xa0   :  { %3400 = vmatpush3.bf16.msra.mxu0 %v3722_v2  ;;  %v3772_v2 = vld [vmem:[%s4675_s1 + $0x698] sm:$0xff]  }
  0xa1   :  { %3429 = vmatprep.subr.bf16.mxu0 %v3724_v7  ;;  %3422 = vmatpush3.bf16.msra.mxu1 %v3723_v4  ;;  %v3774_v4 = vld [vmem:[%s4675_s1 + $0x6e0] sm:$0xff]   ;;  %v3777_v7 = vld [vmem:[%s4675_s1 + $0x668] sm:$0xff]  }
  0xa2   :  { %3451 = vmatprep.subr.bf16.mxu1 %v3725_v10  ;;  %v3780_v10 = vld [vmem:[%s4675_s1 + $0x6a8] sm:$0xff]  }
  0xa3   :  { %2659 = vmatmul.mubr.bf16.vlgmr.msra.gmra.mrb[16].mxu0 %v663_v9  ;;  %v3779_v9 = vld [vmem:[%s4675_s1 + $0x628] sm:$0xff]  }
  0xa4   :  { %3430 = vmatpush3.bf16.msra.mxu0 %v3726_v12  ;;  %2699 = vmatmul.mubr.bf16.vlgmr.msra.gmra.mrb[16].mxu1 %v685_v16  ;;  %v3782_v12 = vld [vmem:[%s4675_s1 + $0x6f0] sm:$0xff]   ;;  %v3786_v16 = vld [vmem:[%s4675_s1 + $0x6f8] sm:$0xff]  }
  0xa5   :  { %3431 = vmatprep.subr.bf16.mxu0 %v3728_v17  ;;  %3452 = vmatpush3.bf16.msra.mxu1 %v3727_v14  ;;  %v3784_v14 = vld [vmem:[%s4675_s1 + $0x6b0] sm:$0xff]   ;;  %v3787_v17 = vld [vmem:[%s4675_s1 + $0x638] sm:$0xff]  }
  0xa6   :  { %2738 = vmatprep.mubr.bf16.mxu0 %v684_v20  ;;  %3453 = vmatprep.subr.bf16.mxu1 %v3729_v19  ;;  %v696_v19 = vrot.slane %v18_v18, %v3933_v35  ;;  %v3789_v20 = vld [vmem:[%s4675_s1 + $0x740] sm:$0xff]  }
  0xa7   :  { %2778 = vmatprep.mubr.bf16.mxu1 %v688_v23 }
  0xa8   :  { %3432 = vmatpush3.bf16.msra.mxu0 %v3730_v21  ;;  %v689_v21 = vcombine.high %v18_v18, %v18_v18  ;;  %v704_v23 = vcombine.high %v696_v19, %v696_v19 }
  0xa9   :  { %3433 = vmatprep.subr.bf16.mxu0 %v3732_v24  ;;  %3454 = vmatpush3.bf16.msra.mxu1 %v3731_v22  ;;  %v3788_v22 = vld [vmem:[%s4675_s1 + $0x6b8] sm:$0xff]   ;;  %v712_v24 = vrot.slane %v696_v19, %v3933_v35 }
  0xaa   :  { %3455 = vmatprep.subr.bf16.mxu1 %v3733_v25  ;;  %v3790_v25 = vld [vmem:[%s4675_s1 + $0x7c0] sm:$0xff]  }
  0xac   :  { %3434 = vmatpush3.bf16.msra.mxu0 %v3734_v26  ;;  %v4571_v26 = vrot.slane %v689_v21, %v3933_v35 }
  0xad   :  { %3435 = vmatprep.subr.bf16.mxu0 %v3736_v28  ;;  %3456 = vmatpush3.bf16.msra.mxu1 %v3735_v27  ;;  %v726_v27 = vrot.slane %v704_v23, %v3933_v35  ;;  %v3791_v28 = vld [vmem:[%s4675_s1 + $0x700] sm:$0xff]  }
  0xae   :  { %3457 = vmatprep.subr.bf16.mxu1 %v3737_v29  ;;  %v705_v29 = vcombine.high %v4571_v26, %v4571_v26 }
  0xb0   :  { %3436 = vmatpush3.bf16.msra.mxu0 %v3738_v30  ;;  %v734_v30 = vcombine.high %v712_v24, %v712_v24 }
  0xb1   :  { %3437 = vmatprep.subr.bf16.mxu0 %v3740_v32  ;;  %3458 = vmatpush3.bf16.msra.mxu1 %v3739_v31  ;;  %v3793_v31 = vld [vmem:[%s4675_s1 + $0x748] sm:$0xff]   ;;  %v736_v32 = vcombine.high %v726_v27, %v726_v27 }
  0xb2   :  { %3459 = vmatprep.subr.bf16.mxu1 %v3741_v33  ;;  %v3792_v33 = vld [vmem:[%s4675_s1 + $0x780] sm:$0xff]  }
  0xb4   :  { %3438 = vmatpush3.bf16.msra.mxu0 %v3742_v34  ;;  %v733_v34 = vrot.slane %v705_v29, %v3933_v35 }
  0xb5   :  { %3439 = vmatprep.subr.bf16.mxu0 %v3744_v37  ;;  %3460 = vmatpush3.bf16.msra.mxu1 %v3743_v36  ;;  %v3794_v36 = vld [vmem:[%s4675_s1 + $0x7c8] sm:$0xff]  }
  0xb6   :  { %3461 = vmatprep.subr.bf16.mxu1 %v3745_v38  ;;  %v3795_v37 = vld [vmem:[%s4675_s1 + $0x708] sm:$0xff]   ;;  %v737_v38 = vcombine.high %v733_v34, %v733_v34 }
  0xb8   :  { %3440 = vmatpush3.bf16.msra.mxu0 %v3746_v39  ;;  %v3797_v39 = vld [vmem:[%s4675_s1 + $0x750] sm:$0xff]  }
  0xb9   :  { %3441 = vmatprep.subr.bf16.mxu0 %v3748_v41  ;;  %3462 = vmatpush3.bf16.msra.mxu1 %v3747_v40  ;;  %v3796_v40 = vld [vmem:[%s4675_s1 + $0x788] sm:$0xff]   ;;  %v3798_v41 = vld [vmem:[%s4675_s1 + $0x7d0] sm:$0xff]  }
  0xba   :  { %3463 = vmatprep.subr.bf16.mxu1 %v3749_v42  ;;  %v3799_v42 = vld [vmem:[%s4675_s1 + $0x710] sm:$0xff]  }
  0xbc   :  { %3442 = vmatpush3.bf16.msra.mxu0 %v3750_v43  ;;  %v3801_v43 = vld [vmem:[%s4675_s1 + $0x758] sm:$0xff]  }
  0xbd   :  { %3443 = vmatprep.subr.bf16.mxu0 %v3752_v45  ;;  %3464 = vmatpush3.bf16.msra.mxu1 %v3751_v44  ;;  %v3800_v44 = vld [vmem:[%s4675_s1 + $0x790] sm:$0xff]   ;;  %v3802_v45 = vld [vmem:[%s4675_s1 + $0x7d8] sm:$0xff]  }
  0xbe   :  { %3465 = vmatprep.subr.bf16.mxu1 %v3753_v46  ;;  %v3803_v46 = vld [vmem:[%s4675_s1 + $0x718] sm:$0xff]  }
  0xc0   :  { %3444 = vmatpush3.bf16.msra.mxu0 %v3754_v47  ;;  %v3805_v47 = vld [vmem:[%s4675_s1 + $0x760] sm:$0xff]  }
  0xc1   :  { %3473 = vmatprep.subr.bf16.mxu0 %v3757_v50  ;;  %3466 = vmatpush3.bf16.msra.mxu1 %v3755_v48  ;;  %v3804_v48 = vld [vmem:[%s4675_s1 + $0x798] sm:$0xff]   ;;  %v3807_v50 = vld [vmem:[%s4675_s1 + $0x720] sm:$0xff]  }
  0xc2   :  { %3495 = vmatprep.subr.bf16.mxu1 %v3758_v51  ;;  %v3809_v51 = vld [vmem:[%s4675_s1 + $0x768] sm:$0xff]  }
  0xc3   :  { %2739 = vmatmul.mubr.bf16.vlgmr.msra.gmra.mrb[20].mxu0 %v670_v49  ;;  %v3806_v49 = vld [vmem:[%s4675_s1 + $0x7e0] sm:$0xff]  }
  0xc4   :  { %3474 = vmatpush3.bf16.msra.mxu0 %v3759_v52  ;;  %2779 = vmatmul.mubr.bf16.vlgmr.msra.gmra.mrb[20].mxu1 %v686_v54  ;;  %v3808_v52 = vld [vmem:[%s4675_s1 + $0x7a0] sm:$0xff]  }
  0xc5   :  { %3475 = vmatprep.subr.bf16.mxu0 %v3761_v55  ;;  %3496 = vmatpush3.bf16.msra.mxu1 %v3760_v53  ;;  %v3810_v53 = vld [vmem:[%s4675_s1 + $0x7e8] sm:$0xff]   ;;  %v2952_v54 = vld [vmem:[%s4677_s2] ss:$0 sm:$0xff] }
  0xc6   :  { %3497 = vmatprep.subr.bf16.mxu1 %v3762_v56  ;;  %2818 = vmatprep.mubr.bf16.mxu0 %v726_v27  ;;  %v3811_v55 = vld [vmem:[%s4675_s1 + $0x728] sm:$0xff]  }
  0xc7   :  { %2858 = vmatprep.mubr.bf16.mxu1 %v736_v32 }
  0xc8   :  { %3476 = vmatpush3.bf16.msra.mxu0 %v3763_v57  ;;  %v3813_v57 = vld [vmem:[%s4675_s1 + $0x770] sm:$0xff]  }
  0xc9   :  { %3477 = vmatprep.subr.bf16.mxu0 %v3765_v59  ;;  %3498 = vmatpush3.bf16.msra.mxu1 %v3764_v58  ;;  %v3812_v59 = vld [vmem:[%s4675_s1 + $0x7a8] sm:$0xff]  }
  0xca   :  { %3499 = vmatprep.subr.bf16.mxu1 %v3766_v60 }
  0xcc   :  { %3478 = vmatpush3.bf16.msra.mxu0 %v3767_v61 }
  0xcd   :  { %3479 = vmatprep.subr.bf16.mxu0 %v3769_v63  ;;  %3500 = vmatpush3.bf16.msra.mxu1 %v3768_v62  ;;  %v3814_v63 = vld [vmem:[%s4675_s1 + $0x7f0] sm:$0xff]  }
  0xce   :  { %3501 = vmatprep.subr.bf16.mxu1 %v3770_v0  ;;  %v3815_v0 = vld [vmem:[%s4675_s1 + $0x730] sm:$0xff]  }
  0xd0   :  { %3480 = vmatpush3.bf16.msra.mxu0 %v3771_v1 }
  0xd1   :  { %3481 = vmatprep.subr.bf16.mxu0 %v3773_v3  ;;  %3502 = vmatpush3.bf16.msra.mxu1 %v3772_v2 }
  0xd2   :  { %3503 = vmatprep.subr.bf16.mxu1 %v3774_v4 }
  0xd4   :  { %3482 = vmatpush3.bf16.msra.mxu0 %v3775_v5 }
  0xd5   :  { %3483 = vmatprep.subr.bf16.mxu0 %v3777_v7  ;;  %3504 = vmatpush3.bf16.msra.mxu1 %v3776_v6  ;;  %v3817_v6 = vld [vmem:[%s4675_s1 + $0x778] sm:$0xff]  }
  0xd6   :  { %3505 = vmatprep.subr.bf16.mxu1 %v3778_v8  ;;  %v3816_v8 = vld [vmem:[%s4675_s1 + $0x7b0] sm:$0xff]  }
  0xd8   :  { %3484 = vmatpush3.bf16.msra.mxu0 %v3779_v9 }
  0xd9   :  { %3485 = vmatprep.subr.bf16.mxu0 %v3781_v11  ;;  %3506 = vmatpush3.bf16.msra.mxu1 %v3780_v10  ;;  %v3818_v10 = vld [vmem:[%s4675_s1 + $0x7f8] sm:$0xff]  }
  0xda   :  { %3507 = vmatprep.subr.bf16.mxu1 %v3782_v12  ;;  %v3819_v11 = vld [vmem:[%s4675_s1 + $0x738] sm:$0xff]   ;;  %v719_v12 = vrot.slane %v4571_v26, %v3933_v35 }
  0xdc   :  { %3486 = vmatpush3.bf16.msra.mxu0 %v3783_v13  ;;  %v3820_v13 = vld [vmem:[%s4675_s1 + $0x7b8] sm:$0xff]  }
  0xdd   :  { %3487 = vmatprep.subr.bf16.mxu0 %v3785_v15  ;;  %3508 = vmatpush3.bf16.msra.mxu1 %v3784_v14  ;;  %v735_v14 = vcombine.high %v719_v12, %v719_v12 }
  0xde   :  { %3509 = vmatprep.subr.bf16.mxu1 %v3786_v16 }
  0xe0   :  { %3488 = vmatpush3.bf16.msra.mxu0 %v3787_v17 }
  0xe1   :  { %3517 = vmatprep.subr.bf16.mxu0 %v3789_v20  ;;  %3510 = vmatpush3.bf16.msra.mxu1 %v3788_v22 }
  0xe2   :  { %3539 = vmatprep.subr.bf16.mxu1 %v3790_v25 }
  0xe3   :  { %2819 = vmatmul.mubr.bf16.vlgmr.msra.gmra.mrb[24].mxu0 %v712_v24 }
  0xe4   :  { %3518 = vmatpush3.bf16.msra.mxu0 %v3791_v28  ;;  %2859 = vmatmul.mubr.bf16.vlgmr.msra.gmra.mrb[24].mxu1 %v734_v30 }
  0xe5   :  { %3519 = vmatprep.subr.bf16.mxu0 %v3793_v31  ;;  %3540 = vmatpush3.bf16.msra.mxu1 %v3792_v33 }
  0xe6   :  { %2898 = vmatprep.mubr.bf16.mxu0 %v733_v34  ;;  %3541 = vmatprep.subr.bf16.mxu1 %v3794_v36 }
  0xe7   :  { %2938 = vmatprep.mubr.bf16.mxu1 %v737_v38 }
  0xe8   :  { %3520 = vmatpush3.bf16.msra.mxu0 %v3795_v37 }
  0xe9   :  { %3521 = vmatprep.subr.bf16.mxu0 %v3797_v39  ;;  %3542 = vmatpush3.bf16.msra.mxu1 %v3796_v40 }
  0xea   :  { %3543 = vmatprep.subr.bf16.mxu1 %v3798_v41 }
  0xec   :  { %3522 = vmatpush3.bf16.msra.mxu0 %v3799_v42 }
  0xed   :  { %3523 = vmatprep.subr.bf16.mxu0 %v3801_v43  ;;  %3544 = vmatpush3.bf16.msra.mxu1 %v3800_v44 }
  0xee   :  { %3545 = vmatprep.subr.bf16.mxu1 %v3802_v45 }
  0xf0   :  { %3524 = vmatpush3.bf16.msra.mxu0 %v3803_v46 }
  0xf1   :  { %3525 = vmatprep.subr.bf16.mxu0 %v3805_v47  ;;  %3546 = vmatpush3.bf16.msra.mxu1 %v3804_v48 }
  0xf2   :  { %3547 = vmatprep.subr.bf16.mxu1 %v3806_v49 }
  0xf4   :  { %3526 = vmatpush3.bf16.msra.mxu0 %v3807_v50 }
  0xf5   :  { %3527 = vmatprep.subr.bf16.mxu0 %v3809_v51  ;;  %3548 = vmatpush3.bf16.msra.mxu1 %v3808_v52 }
  0xf6   :  { %v3225_v56 = vpop.f32.mrb[0].mxu0  ;;  %3549 = vmatprep.subr.bf16.mxu1 %v3810_v53 }
  0xf7   :  { %v3226_v58 = vpop.f32.mrb[1].mxu0  ;;  %v3247_v60 = vpop.f32.mrb[0].mxu1 }
  0xf8   :  { %v3227_v61 = vadd.f32 %v3226_v58, %v3225_v56  ;;  %v3228_v62 = vpop.f32.mrb[2].mxu0  ;;  %v3248_v1 = vpop.f32.mrb[1].mxu1  ;;  %3528 = vmatpush3.bf16.msra.mxu0 %v3811_v55 }
  0xf9   :  { %v3229_v2 = vpop.f32.mrb[3].mxu0  ;;  %v3249_v4 = vadd.f32 %v3248_v1, %v3247_v60  ;;  %v3250_v5 = vpop.f32.mrb[2].mxu1  ;;  %3529 = vmatprep.subr.bf16.mxu0 %v3813_v57  ;;  %3550 = vmatpush3.bf16.msra.mxu1 %v3812_v59 }
  0xfa   :  { %v2341_v3 = vadd.f32 %v3227_v61, %v2952_v54  ;;  %v3251_v7 = vpop.f32.mrb[3].mxu1  ;;  %3551 = vmatprep.subr.bf16.mxu1 %v3814_v63 }
  0xfc   :  { %v2381_v9 = vadd.f32 %v3249_v4, %v2341_v3  ;;  %3530 = vmatpush3.bf16.msra.mxu0 %v3815_v0 }
  0xfd   :  { %3531 = vmatprep.subr.bf16.mxu0 %v3817_v6  ;;  %3552 = vmatpush3.bf16.msra.mxu1 %v3816_v8 }
  0xfe   :  { %3553 = vmatprep.subr.bf16.mxu1 %v3818_v10 }
 0x100   :  { %3532 = vmatpush3.bf16.msra.mxu0 %v3819_v11 }
 0x101   :  { %3554 = vmatpush3.bf16.msra.mxu1 %v3820_v13 }
 0x103   :  { %2899 = vmatmul.mubr.bf16.vlgmr.msra.gmra.mrb[28].mxu0 %v719_v12 }
 0x104   :  { %2939 = vmatmul.mubr.bf16.vlgmr.msra.gmra.mrb[28].mxu1 %v735_v14 }
 0x116   :  { %v3269_v15 = vpop.f32.mrb[4].mxu0 }
 0x117   :  { %v3270_v16 = vpop.f32.mrb[5].mxu0  ;;  %v3291_v17 = vpop.f32.mrb[4].mxu1 }
 0x118   :  { %v3271_v18 = vadd.f32 %v3270_v16, %v3269_v15  ;;  %v3272_v19 = vpop.f32.mrb[6].mxu0  ;;  %v3292_v20 = vpop.f32.mrb[5].mxu1 }
 0x119   :  { %v3273_v21 = vpop.f32.mrb[7].mxu0  ;;  %v3293_v35 = vadd.f32 %v3292_v20, %v3291_v17  ;;  %v3294_v23 = vpop.f32.mrb[6].mxu1 }
 0x11a   :  { %v2421_v22 = vadd.f32 %v3271_v18, %v2381_v9  ;;  %v3295_v24 = vpop.f32.mrb[7].mxu1 }
 0x11c   :  { %v2461_v25 = vadd.f32 %v3293_v35, %v2421_v22 }
 0x136   :  { %v3313_v26 = vpop.f32.mrb[8].mxu0 }
 0x137   :  { %v3314_v27 = vpop.f32.mrb[9].mxu0  ;;  %v3335_v28 = vpop.f32.mrb[8].mxu1 }
 0x138   :  { %v3315_v29 = vadd.f32 %v3314_v27, %v3313_v26  ;;  %v3316_v30 = vpop.f32.mrb[10].mxu0  ;;  %v3336_v31 = vpop.f32.mrb[9].mxu1 }
 0x139   :  { %v3317_v32 = vpop.f32.mrb[11].mxu0  ;;  %v3337_v34 = vadd.f32 %v3336_v31, %v3335_v28  ;;  %v3338_v36 = vpop.f32.mrb[10].mxu1 }
 0x13a   :  { %v2501_v33 = vadd.f32 %v3315_v29, %v2461_v25  ;;  %v3339_v37 = vpop.f32.mrb[11].mxu1 }
 0x13c   :  { %v2541_v38 = vadd.f32 %v3337_v34, %v2501_v33 }
 0x156   :  { %v3357_v39 = vpop.f32.mrb[12].mxu0 }
 0x157   :  { %v3358_v40 = vpop.f32.mrb[13].mxu0  ;;  %v3379_v41 = vpop.f32.mrb[12].mxu1 }
 0x158   :  { %v3359_v42 = vadd.f32 %v3358_v40, %v3357_v39  ;;  %v3360_v43 = vpop.f32.mrb[14].mxu0  ;;  %v3380_v44 = vpop.f32.mrb[13].mxu1 }
 0x159   :  { %v3361_v45 = vpop.f32.mrb[15].mxu0  ;;  %v3381_v47 = vadd.f32 %v3380_v44, %v3379_v41  ;;  %v3382_v48 = vpop.f32.mrb[14].mxu1 }
 0x15a   :  { %v2581_v46 = vadd.f32 %v3359_v42, %v2541_v38  ;;  %v3383_v49 = vpop.f32.mrb[15].mxu1 }
 0x15c   :  { %v2621_v50 = vadd.f32 %v3381_v47, %v2581_v46 }
 0x176   :  { %v3401_v51 = vpop.f32.mrb[16].mxu0 }
 0x177   :  { %v3402_v52 = vpop.f32.mrb[17].mxu0  ;;  %v3423_v53 = vpop.f32.mrb[16].mxu1 }
 0x178   :  { %v3403_v54 = vadd.f32 %v3402_v52, %v3401_v51  ;;  %v3404_v55 = vpop.f32.mrb[18].mxu0  ;;  %v3424_v56 = vpop.f32.mrb[17].mxu1 }
 0x179   :  { %v3405_v57 = vpop.f32.mrb[19].mxu0  ;;  %v3425_v59 = vadd.f32 %v3424_v56, %v3423_v53  ;;  %v3426_v60 = vpop.f32.mrb[18].mxu1 }
 0x17a   :  { %v2661_v58 = vadd.f32 %v3403_v54, %v2621_v50  ;;  %v3427_v61 = vpop.f32.mrb[19].mxu1 }
 0x17c   :  { %v2701_v62 = vadd.f32 %v3425_v59, %v2661_v58 }
 0x196   :  { %v3445_v63 = vpop.f32.mrb[20].mxu0 }
 0x197   :  { %v3446_v0 = vpop.f32.mrb[21].mxu0  ;;  %v3467_v1 = vpop.f32.mrb[20].mxu1 }
 0x198   :  { %v3447_v2 = vadd.f32 %v3446_v0, %v3445_v63  ;;  %v3448_v3 = vpop.f32.mrb[22].mxu0  ;;  %v3468_v4 = vpop.f32.mrb[21].mxu1 }
 0x199   :  { %v3449_v5 = vpop.f32.mrb[23].mxu0  ;;  %v3469_v7 = vadd.f32 %v3468_v4, %v3467_v1  ;;  %v3470_v8 = vpop.f32.mrb[22].mxu1 }
 0x19a   :  { %v2741_v6 = vadd.f32 %v3447_v2, %v2701_v62  ;;  %v3471_v9 = vpop.f32.mrb[23].mxu1 }
 0x19c   :  { %v2781_v10 = vadd.f32 %v3469_v7, %v2741_v6 }
 0x1b6   :  { %v3489_v11 = vpop.f32.mrb[24].mxu0 }
 0x1b7   :  { %v3490_v12 = vpop.f32.mrb[25].mxu0  ;;  %v3511_v13 = vpop.f32.mrb[24].mxu1 }
 0x1b8   :  { %v3491_v14 = vadd.f32 %v3490_v12, %v3489_v11  ;;  %v3492_v15 = vpop.f32.mrb[26].mxu0  ;;  %v3512_v16 = vpop.f32.mrb[25].mxu1 }
 0x1b9   :  { %v3493_v17 = vpop.f32.mrb[27].mxu0  ;;  %v3513_v19 = vadd.f32 %v3512_v16, %v3511_v13  ;;  %v3514_v20 = vpop.f32.mrb[26].mxu1 }
 0x1ba   :  { %v2821_v18 = vadd.f32 %v3491_v14, %v2781_v10  ;;  %v3515_v21 = vpop.f32.mrb[27].mxu1 }
 0x1bc   :  { %v2861_v22 = vadd.f32 %v3513_v19, %v2821_v18 }
 0x1d6   :  { %v3533_v35 = vpop.f32.mrb[28].mxu0 }
 0x1d7   :  { %v3534_v23 = vpop.f32.mrb[29].mxu0  ;;  %v3555_v24 = vpop.f32.mrb[28].mxu1 }
 0x1d8   :  { %v3535_v25 = vadd.f32 %v3534_v23, %v3533_v35  ;;  %v3536_v26 = vpop.f32.mrb[30].mxu0  ;;  %v3556_v27 = vpop.f32.mrb[29].mxu1 }
 0x1d9   :  { %v3537_v28 = vpop.f32.mrb[31].mxu0  ;;  %v3557_v30 = vadd.f32 %v3556_v27, %v3555_v24  ;;  %v3558_v31 = vpop.f32.mrb[30].mxu1 }
 0x1da   :  { %v2901_v29 = vadd.f32 %v3535_v25, %v2861_v22  ;;  %v3559_v32 = vpop.f32.mrb[31].mxu1 }
 0x1dc   :  { %v2941_v33 = vadd.f32 %v3557_v30, %v2901_v29 }
 0x1de   :  { %2947 = vst.msk [vmem:[%s4678_s3] sm:$0x3] %vm2946_vm0, %v2941_v33 }

// kernel: vae_forward.15
= control target key start
LH: loop header
LB: loop body
LE: loop exit
PB: predicated region body
PF: predicated region fallthrough
CT: control target
= control target key end

     0   :  { %s697_s12 = smov 0   ;;  %s699_s13 = smov 0   ;;  %s772_s0 = inlined_call_operand.vmem [shape: bf16[2,32], index: 0, kind: input, shape index: {}]   ;;  %s773_s1 = inlined_call_operand.vmem [shape: bf16[32,9216], index: 1, kind: input, shape index: {}]   ;;  %s774_s2 = inlined_call_operand.vmem [shape: f32[1,9216], index: 2, kind: input, shape index: {}]   ;;  %s775_s3 = inlined_call_operand.vmem [shape: f32[2,9216], index: 3, kind: output, shape index: {}]  }
   0x1   :  { %s701_s14 = smov 0   ;;  %s703_s15 = smov 0  }
   0x2   :  { %s705_s16 = smov 0  }
   0x3 LB: > { %s22_s17 = sadd.s32 1, %s669_s15  ;;  %p65_p1 = scmp.ne.s32.totalorder %s661_s13, %s657_s12  ;;  %s673_s16 = sphi %s705_s16, %s13_s16   ;;  %s669_s15 = sphi %s703_s15, %s779_s15   ;;  %s665_s14 = sphi %s701_s14, %s778_s14   ;;  %s661_s13 = sphi %s699_s13, %s777_s13   ;;  %s657_s12 = sphi %s697_s12, %s776_s12  }
   0x4   : > { %p23_p0 = scmp.ge.s32.totalorder %s22_s17, 18  ;;  %p66_p2 = scmp.eq.s32.totalorder %s673_s16, 0 }
   0x5   : > { %s58_s19 = sadd.s32 1, %s661_s13  ;;  %p559_p5 = scmp.ge.s32.totalorder %s673_s16, 18 }
   0x6   : > { %s781_s17 = smov (%p23_p0, %s22_s17), 0  ;;  %p67_p3 = por %p66_p2, %p65_p1 }
   0x7   : > { %s55_s18 = ssub.s32 %s669_s15, %s781_s17  ;;  %151 = sbr.rel (%p559_p5) target bundleno = 22 (0x16), region = 20 }
   0x8   : > { %p56_p4 = scmp.eq.s32.totalorder %s55_s18, 0 }
   0xa   : > { %s732_s20 = scalar_select %p56_p4, %s661_s13, %s58_s19  }
   0xe   : > { %154 = sbr.rel (!%p67_p3) target bundleno = 22 (0x16), region = 24  ;;  %s156_s21 = sand.u32 (%p67_p3), 1, %s661_s13  }
   0xf   : > { %s580_s22 = sshll.u32 (%p67_p3), %s669_s15, 4  ;;  %s560_s23 = sshll.u32 (%p67_p3), %s156_s21, 6 }
  0x10   : > { %s161_s26 = scalar_lea.vmem (%p67_p3), %s773_s1, %s580_s22  ;;  %s158_s27 = scalar_lea.vmem (%p67_p3), [#allocation2], %s560_s23 }
  0x11   : > { %v174_v0 = vld [vmem:[%s161_s26] sm:$0xff] (%p67_p3)  ;;  %v176_v1 = vld [vmem:[%s161_s26 + $0x8] sm:$0xff] (%p67_p3) }
  0x12   : > { %v178_v2 = vld [vmem:[%s161_s26 + $0x120] sm:$0xff] (%p67_p3)  ;;  %175 = vst [vmem:[%s158_s27] sm:$0xff] (%p67_p3), %v174_v0  ;;  %177 = vst [vmem:[%s158_s27 + $0x8] sm:$0xff] (%p67_p3), %v176_v1  ;;  %v180_v3 = vld [vmem:[%s161_s26 + $0x128] sm:$0xff] (%p67_p3) }
  0x13   : > { %179 = vst [vmem:[%s158_s27 + $0x10] sm:$0xff] (%p67_p3), %v178_v2  ;;  %v182_v4 = vld [vmem:[%s161_s26 + $0x240] sm:$0xff] (%p67_p3)  ;;  %v184_v5 = vld [vmem:[%s161_s26 + $0x248] sm:$0xff] (%p67_p3)  ;;  %181 = vst [vmem:[%s158_s27 + $0x18] sm:$0xff] (%p67_p3), %v180_v3 }
  0x14   : > { %183 = vst [vmem:[%s158_s27 + $0x20] sm:$0xff] (%p67_p3), %v182_v4  ;;  %185 = vst [vmem:[%s158_s27 + $0x28] sm:$0xff] (%p67_p3), %v184_v5  ;;  %v186_v6 = vld [vmem:[%s161_s26 + $0x360] sm:$0xff] (%p67_p3)  ;;  %v188_v7 = vld [vmem:[%s161_s26 + $0x368] sm:$0xff] (%p67_p3) }
  0x15   : > { %187 = vst [vmem:[%s158_s27 + $0x30] sm:$0xff] %v186_v6  ;;  %189 = vst [vmem:[%s158_s27 + $0x38] sm:$0xff] %v188_v7 }
  0x16 PF: > { %p563_p6 = scmp.ge.s32.totalorder %s673_s16, 1  ;;  %p202_p7 = scmp.lt.s32.totalorder %s673_s16, 19 }
  0x18   : > { %p203_p8 = pnand %p563_p6, %p202_p7 }
  0x19   : > { %s209_s28 = sand.u32 (!%p203_p8), 1, %s657_s12   ;;  %v675_v8 = vmov (!%p203_p8), 0   ;;  %v263_v17 = vld [vmem:[%s772_s0] sm:$0x1] (!%p203_p8)  ;;  %vm334_vm0 = vcmask (!%p203_p8), 261120   ;;  %s565_s6 = sshll.u32 (!%p203_p8), %s665_s14, 2  ;;  %v274_v18 = vlaneseq (!%p203_p8) }
  0x1a   : > { %206 = sbr.rel (%p203_p8) target bundleno = 261 (0x105), region = 51  ;;  %s564_s29 = sshll.u32 (!%p203_p8), %s209_s28, 6  ;;  %370 = vmatprep.mubr.bf16.mxu0 (!%p203_p8), %v675_v8  ;;  %411 = vmatprep.mubr.bf16.mxu1 (!%p203_p8), %v675_v8  ;;  %v676_v25 = vmov (!%p203_p8), 1983009808  }
  0x1b   : > { %s211_s30 = scalar_lea.vmem (!%p203_p8), [#allocation2], %s564_s29  ;;  %p248_p9 = scmp.lt.s32.totalorder (!%p203_p8), %s565_s6, 71  ;;  %v275_v19 = vshrl.u32 (!%p203_p8), %v274_v18, 7  ;;  %v431_v26 = vunpack.c.l.s4 (!%p203_p8), %v676_v25 }
  0x1c   : > { %v623_v9 = vld [vmem:[%s211_s30 + $0x4] ss:$16 sps:$4 sm:$0xff] (!%p203_p8)   ;;  %v625_v10 = vld [vmem:[%s211_s30 + $0xc] ss:$16 sps:$4 sm:$0xff] (!%p203_p8)   ;;  %v627_v11 = vld [vmem:[%s211_s30] ss:$16 sps:$4 sm:$0xff] (!%p203_p8)  }
  0x1d   : > { %338 = vmatprep.subr.bf16.mxu0 (!%p203_p8), %v623_v9  ;;  %v628_v12 = vld [vmem:[%s211_s30 + $0x8] ss:$16 sps:$4 sm:$0xff] (!%p203_p8)   ;;  %379 = vmatprep.subr.bf16.mxu1 (!%p203_p8), %v625_v10  ;;  %v629_v13 = vld [vmem:[%s211_s30 + $0x24] ss:$16 sps:$4 sm:$0xff] (!%p203_p8)   ;;  %v631_v14 = vld [vmem:[%s211_s30 + $0x2c] ss:$16 sps:$4 sm:$0xff] (!%p203_p8)   ;;  %v432_v33 = vunpack.c.0.s8 (!%p203_p8), %v431_v26 }
  0x1e   : > { %339 = vmatpush1.bf16.msra.mxu0 (!%p203_p8), %v627_v11  ;;  %380 = vmatpush1.bf16.msra.mxu1 (!%p203_p8), %v628_v12  ;;  %v633_v15 = vld [vmem:[%s211_s30 + $0x20] ss:$16 sps:$4 sm:$0xff] (!%p203_p8)   ;;  %v634_v16 = vld [vmem:[%s211_s30 + $0x28] ss:$16 sps:$4 sm:$0xff] (!%p203_p8)   ;;  %v276_v20 = vsub.s32 (!%p203_p8), 0, %v275_v19  ;;  %v284_v21 = vsub.s32 (!%p203_p8), 2, %v275_v19 }
  0x1f   : > { %340 = vmatprep.subr.bf16.mxu0 (!%p203_p8), %v629_v13  ;;  %381 = vmatprep.subr.bf16.mxu1 (!%p203_p8), %v631_v14  ;;  %v280_v23 = vsub.s32 (!%p203_p8), 1, %v275_v19  ;;  %v288_v24 = vsub.s32 (!%p203_p8), 3, %v275_v19  ;;  %v435_v47 = vsub.s32 (!%p203_p8), %v432_v33, %v275_v19 }
  0x21   : > { %s783_s6 = smov (!%p248_p9, %s565_s6), 71 }
  0x22   : > { %341 = vmatpush1.bf16.msra.mxu0 %v633_v15  ;;  %382 = vmatpush1.bf16.msra.mxu1 %v634_v16  ;;  %s250_s9 = scalar_lea.vmem %s774_s2, %s783_s6  ;;  %s567_s10 = sshll.u32 %s783_s6, 1 }
  0x23   : > { %v272_v22 = vld [vmem:[%s250_s9] sm:$0xf]  ;;  %s260_s14 = scalar_lea.vmem %s775_s3, %s567_s10 }
  0x24   : > { %v277_v27 = vrot.slane %v272_v22, %v276_v20  ;;  %v285_v28 = vrot.slane %v272_v22, %v284_v21  ;;  %v281_v29 = vrot.slane %v272_v22, %v280_v23  ;;  %v289_v30 = vrot.slane %v272_v22, %v288_v24 }
  0x25   : > { %576 = vmatmul.mubr.msk.bf16.vlgmr.msra.gmra.mrb[0].mxu0 %vm334_vm0, %v263_v17  ;;  %577 = vmatmul.mubr.msk.bf16.vlgmr.msra.gmra.mrb[0].mxu1 %vm334_vm0, %v263_v17 }
  0xf8   : > { %v372_v31 = vpop.f32.mrb[0].mxu0  ;;  %v413_v32 = vpop.f32.mrb[0].mxu1 }
  0xf9   : > { %v373_v34 = vadd.f32 %v372_v31, %v277_v27  ;;  %v414_v35 = vadd.f32 %v413_v32, %v285_v28  ;;  %v374_v36 = vpop.f32.mrb[1].mxu0  ;;  %v415_v37 = vpop.f32.mrb[1].mxu1 }
  0xfa   : > { %v375_v38 = vadd.f32 %v374_v36, %v281_v29  ;;  %v416_v39 = vadd.f32 %v415_v37, %v289_v30  ;;  %v376_v40 = vpop.f32.mrb[2].mxu0  ;;  %v417_v41 = vpop.f32.mrb[2].mxu1 }
  0xfb   : > { %v420_v42 = vmax.f32 %v373_v34, 0.0  ;;  %v422_v43 = vmax.f32 %v414_v35, 0.0  ;;  %v377_v44 = vpop.f32.mrb[3].mxu0  ;;  %v418_v45 = vpop.f32.mrb[3].mxu1 }
  0xfc   : > { %v421_v46 = vmax.f32 %v375_v38, 0.0  ;;  %v423_v48 = vmax.f32 %v416_v39, 0.0 }
  0xfe   : > { %v428_v49 = vcombine.low %v420_v42, %v421_v46  ;;  %v429_v50 = vcombine.low %v422_v43, %v423_v48 }
 0x100   : > { %v436_v51 = vrot.slane %v428_v49, %v435_v47  ;;  %v443_v52 = vrot.slane %v429_v50, %v435_v47 }
 0x102   : > { %v444_v53 = vcombine.low %v436_v51, %v443_v52 }
 0x104   : > { %446 = vst [vmem:[%s260_s14] sm:$0xff] %v444_v53 }
 0x105 PF: > { %s13_s16 = sadd.s32 1, %s673_s16   ;;  %s776_s12 = smov %s661_s13 }
 0x106   : > { %p10_p10 = scmp.ge.s32.totalorder %s13_s16, 20   ;;  %s777_s13 = smov %s732_s20 }
 0x107   : > { %s778_s14 = smov %s669_s15  ;;  %s779_s15 = smov %s781_s17 }
 0x108   :  { %12 = sbr.rel (!%p10_p10) target bundleno = 3 (0x3), region = 96 }

// kernel: tile.23
= control target key start
LH: loop header
LB: loop body
LE: loop exit
PB: predicated region body
PF: predicated region fallthrough
CT: control target
= control target key end

     0   :  { %s22_s0 = inlined_call_operand.vmem [shape: f32[128], index: 0, kind: input, shape index: {}]   ;;  %s23_s1 = inlined_call_operand.vmem [shape: f32[4,128], index: 1, kind: output, shape index: {}]  }
   0x1   :  { %v4_v0 = vld [vmem:[%s22_s0] ss:$0 sm:$0xff] }
   0x2   :  { %5 = vst [vmem:[%s23_s1] sm:$0xf] %v4_v0 }

// kernel: vae_forward.16
= control target key start
LH: loop header
LB: loop body
LE: loop exit
PB: predicated region body
PF: predicated region fallthrough
CT: control target
= control target key end

     0   :  { %s4895_s1 = inlined_call_operand.vmem [shape: bf16[1024,512], index: 1, kind: input, shape index: {}]   ;;  %s4896_s0 = inlined_call_operand.vmem [shape: bf16[98,1024], index: 0, kind: input, shape index: {}]   ;;  %s4897_s2 = inlined_call_operand.vmem [shape: f32[1,512], index: 2, kind: input, shape index: {}]   ;;  %s4898_s3 = inlined_call_operand.vmem [shape: f32[98,512], index: 3, kind: output, shape index: {}]  }
   0x1   :  { %v3340_v0 = vld [vmem:[%s4895_s1 + $0x4] ss:$16 sps:$4 sm:$0xff]   ;;  %v3342_v1 = vld [vmem:[%s4895_s1 + $0xc] ss:$16 sps:$4 sm:$0xff]   ;;  %v3344_v2 = vld [vmem:[%s4895_s1] ss:$16 sps:$4 sm:$0xff]  }
   0x2   :  { %1892 = vmatprep.subr.bf16.mxu0 %v3340_v0  ;;  %v3345_v3 = vld [vmem:[%s4895_s1 + $0x8] ss:$16 sps:$4 sm:$0xff]   ;;  %2296 = vmatprep.subr.bf16.mxu1 %v3342_v1  ;;  %v3346_v4 = vld [vmem:[%s4895_s1 + $0x24] ss:$16 sps:$4 sm:$0xff]   ;;  %v3348_v5 = vld [vmem:[%s4895_s1 + $0x2c] ss:$16 sps:$4 sm:$0xff]  }
   0x3   :  { %1893 = vmatpush1.bf16.msra.mxu0 %v3344_v2  ;;  %2297 = vmatpush1.bf16.msra.mxu1 %v3345_v3  ;;  %v3350_v6 = vld [vmem:[%s4895_s1 + $0x20] ss:$16 sps:$4 sm:$0xff]   ;;  %v3351_v7 = vld [vmem:[%s4895_s1 + $0x28] ss:$16 sps:$4 sm:$0xff]   ;;  %v3352_v8 = vld [vmem:[%s4895_s1 + $0x44] ss:$16 sps:$4 sm:$0xff]  }
   0x4   :  { %1894 = vmatprep.subr.bf16.mxu0 %v3346_v4  ;;  %2298 = vmatprep.subr.bf16.mxu1 %v3348_v5  ;;  %v3354_v9 = vld [vmem:[%s4895_s1 + $0x4c] ss:$16 sps:$4 sm:$0xff]   ;;  %v3356_v10 = vld [vmem:[%s4895_s1 + $0x40] ss:$16 sps:$4 sm:$0xff]   ;;  %v3357_v11 = vld [vmem:[%s4895_s1 + $0x48] ss:$16 sps:$4 sm:$0xff]  }
   0x5   :  { %v3358_v12 = vld [vmem:[%s4895_s1 + $0x64] ss:$16 sps:$4 sm:$0xff]   ;;  %v3360_v13 = vld [vmem:[%s4895_s1 + $0x6c] ss:$16 sps:$4 sm:$0xff]   ;;  %v3362_v14 = vld [vmem:[%s4895_s1 + $0x60] ss:$16 sps:$4 sm:$0xff]  }
   0x6   :  { %v3363_v15 = vld [vmem:[%s4895_s1 + $0x68] ss:$16 sps:$4 sm:$0xff]   ;;  %v3364_v16 = vld [vmem:[%s4895_s1 + $0x84] ss:$16 sps:$4 sm:$0xff]   ;;  %v3366_v17 = vld [vmem:[%s4895_s1 + $0x8c] ss:$16 sps:$4 sm:$0xff]  }
   0x7   :  { %1895 = vmatpush1.bf16.msra.mxu0 %v3350_v6  ;;  %2299 = vmatpush1.bf16.msra.mxu1 %v3351_v7  ;;  %v3368_v18 = vld [vmem:[%s4895_s1 + $0x80] ss:$16 sps:$4 sm:$0xff]   ;;  %v3369_v19 = vld [vmem:[%s4895_s1 + $0x88] ss:$16 sps:$4 sm:$0xff]   ;;  %v3370_v20 = vld [vmem:[%s4895_s1 + $0xa4] ss:$16 sps:$4 sm:$0xff]  }
   0x8   :  { %1896 = vmatprep.subr.bf16.mxu0 %v3352_v8  ;;  %2300 = vmatprep.subr.bf16.mxu1 %v3354_v9  ;;  %v3372_v21 = vld [vmem:[%s4895_s1 + $0xac] ss:$16 sps:$4 sm:$0xff]   ;;  %v3374_v22 = vld [vmem:[%s4895_s1 + $0xa0] ss:$16 sps:$4 sm:$0xff]   ;;  %v3375_v23 = vld [vmem:[%s4895_s1 + $0xa8] ss:$16 sps:$4 sm:$0xff]  }
   0x9   :  { %v3376_v24 = vld [vmem:[%s4895_s1 + $0xc4] ss:$16 sps:$4 sm:$0xff]   ;;  %v3378_v25 = vld [vmem:[%s4895_s1 + $0xcc] ss:$16 sps:$4 sm:$0xff]   ;;  %v3380_v26 = vld [vmem:[%s4895_s1 + $0xc0] ss:$16 sps:$4 sm:$0xff]  }
   0xa   :  { %v3381_v27 = vld [vmem:[%s4895_s1 + $0xc8] ss:$16 sps:$4 sm:$0xff]   ;;  %v3382_v28 = vld [vmem:[%s4895_s1 + $0xe4] ss:$16 sps:$4 sm:$0xff]   ;;  %v3384_v29 = vld [vmem:[%s4895_s1 + $0xec] ss:$16 sps:$4 sm:$0xff]  }
   0xb   :  { %1897 = vmatpush1.bf16.msra.mxu0 %v3356_v10  ;;  %2301 = vmatpush1.bf16.msra.mxu1 %v3357_v11  ;;  %v3386_v30 = vld [vmem:[%s4895_s1 + $0xe0] ss:$16 sps:$4 sm:$0xff]   ;;  %v3387_v31 = vld [vmem:[%s4895_s1 + $0xe8] ss:$16 sps:$4 sm:$0xff]   ;;  %v3388_v32 = vld [vmem:[%s4895_s1 + $0x104] ss:$16 sps:$4 sm:$0xff]  }
   0xc   :  { %1898 = vmatprep.subr.bf16.mxu0 %v3358_v12  ;;  %2302 = vmatprep.subr.bf16.mxu1 %v3360_v13  ;;  %v3390_v33 = vld [vmem:[%s4895_s1 + $0x10c] ss:$16 sps:$4 sm:$0xff]   ;;  %v3392_v34 = vld [vmem:[%s4895_s1 + $0x100] ss:$16 sps:$4 sm:$0xff]   ;;  %v3393_v35 = vld [vmem:[%s4895_s1 + $0x108] ss:$16 sps:$4 sm:$0xff]  }
   0xd   :  { %v3394_v36 = vld [vmem:[%s4895_s1 + $0x124] ss:$16 sps:$4 sm:$0xff]   ;;  %v3396_v37 = vld [vmem:[%s4895_s1 + $0x12c] ss:$16 sps:$4 sm:$0xff]   ;;  %v3398_v38 = vld [vmem:[%s4895_s1 + $0x120] ss:$16 sps:$4 sm:$0xff]  }
   0xe   :  { %v3399_v39 = vld [vmem:[%s4895_s1 + $0x128] ss:$16 sps:$4 sm:$0xff]   ;;  %v3400_v40 = vld [vmem:[%s4895_s1 + $0x144] ss:$16 sps:$4 sm:$0xff]   ;;  %v3402_v41 = vld [vmem:[%s4895_s1 + $0x14c] ss:$16 sps:$4 sm:$0xff]  }
   0xf   :  { %1899 = vmatpush1.bf16.msra.mxu0 %v3362_v14  ;;  %2303 = vmatpush1.bf16.msra.mxu1 %v3363_v15  ;;  %v3404_v42 = vld [vmem:[%s4895_s1 + $0x140] ss:$16 sps:$4 sm:$0xff]   ;;  %v3405_v43 = vld [vmem:[%s4895_s1 + $0x148] ss:$16 sps:$4 sm:$0xff]   ;;  %v3406_v44 = vld [vmem:[%s4895_s1 + $0x164] ss:$16 sps:$4 sm:$0xff]  }
  0x10   :  { %1900 = vmatprep.subr.bf16.mxu0 %v3364_v16  ;;  %2304 = vmatprep.subr.bf16.mxu1 %v3366_v17  ;;  %v3408_v45 = vld [vmem:[%s4895_s1 + $0x16c] ss:$16 sps:$4 sm:$0xff]   ;;  %v14_v46 = vld [vmem:[%s4896_s0] sm:$0xff]  ;;  %v3411_v49 = vld [vmem:[%s4895_s1 + $0x168] ss:$16 sps:$4 sm:$0xff]  }
  0x11   :  { %v18_v47 = vld [vmem:[%s4896_s0 + $0x20] sm:$0xff]  ;;  %v3414_v52 = vld [vmem:[%s4895_s1 + $0x18c] ss:$16 sps:$4 sm:$0xff]   ;;  %v3417_v54 = vld [vmem:[%s4895_s1 + $0x188] ss:$16 sps:$4 sm:$0xff]  }
  0x12   :  { %v3410_v48 = vld [vmem:[%s4895_s1 + $0x160] ss:$16 sps:$4 sm:$0xff]   ;;  %v2809_v50 = vcombine.high %v14_v46, %v18_v47  ;;  %v3412_v51 = vld [vmem:[%s4895_s1 + $0x184] ss:$16 sps:$4 sm:$0xff]   ;;  %v3420_v56 = vld [vmem:[%s4895_s1 + $0x1ac] ss:$16 sps:$4 sm:$0xff]   ;;  %v2808_v6 = vcombine.low %v14_v46, %v18_v47 }
  0x13   :  { %1901 = vmatpush1.bf16.msra.mxu0 %v3368_v18  ;;  %2305 = vmatpush1.bf16.msra.mxu1 %v3369_v19  ;;  %v3416_v53 = vld [vmem:[%s4895_s1 + $0x180] ss:$16 sps:$4 sm:$0xff]   ;;  %v3418_v55 = vld [vmem:[%s4895_s1 + $0x1a4] ss:$16 sps:$4 sm:$0xff]   ;;  %v3423_v58 = vld [vmem:[%s4895_s1 + $0x1a8] ss:$16 sps:$4 sm:$0xff]  }
  0x14   :  { %1902 = vmatprep.subr.bf16.mxu0 %v3370_v20  ;;  %2306 = vmatprep.subr.bf16.mxu1 %v3372_v21  ;;  %v3422_v57 = vld [vmem:[%s4895_s1 + $0x1a0] ss:$16 sps:$4 sm:$0xff]   ;;  %v3424_v59 = vld [vmem:[%s4895_s1 + $0x1c4] ss:$16 sps:$4 sm:$0xff]   ;;  %v3426_v60 = vld [vmem:[%s4895_s1 + $0x1cc] ss:$16 sps:$4 sm:$0xff]  }
  0x15   :  { %1924 = vmatprep.mubr.bf16.mxu0 %v2809_v50  ;;  %2328 = vmatprep.mubr.bf16.mxu1 %v2809_v50  ;;  %v3428_v61 = vld [vmem:[%s4895_s1 + $0x1c0] ss:$16 sps:$4 sm:$0xff]   ;;  %v3429_v62 = vld [vmem:[%s4895_s1 + $0x1c8] ss:$16 sps:$4 sm:$0xff]   ;;  %v3430_v63 = vld [vmem:[%s4895_s1 + $0x1e4] ss:$16 sps:$4 sm:$0xff]  }
  0x16   :  { %v3432_v0 = vld [vmem:[%s4895_s1 + $0x1ec] ss:$16 sps:$4 sm:$0xff]   ;;  %v3434_v1 = vld [vmem:[%s4895_s1 + $0x1e0] ss:$16 sps:$4 sm:$0xff]   ;;  %v3435_v2 = vld [vmem:[%s4895_s1 + $0x1e8] ss:$16 sps:$4 sm:$0xff]  }
  0x17   :  { %1903 = vmatpush1.bf16.msra.mxu0 %v3374_v22  ;;  %2307 = vmatpush1.bf16.msra.mxu1 %v3375_v23  ;;  %v3438_v3 = vld [vmem:[%s4895_s1 + $0x204] ss:$16 sps:$4 sm:$0xff]   ;;  %v3441_v4 = vld [vmem:[%s4895_s1 + $0x20c] ss:$16 sps:$4 sm:$0xff]   ;;  %v3436_v8 = vld [vmem:[%s4895_s1 + $0x200] ss:$16 sps:$4 sm:$0xff]  }
  0x18   :  { %1904 = vmatprep.subr.bf16.mxu0 %v3376_v24  ;;  %2308 = vmatprep.subr.bf16.mxu1 %v3378_v25  ;;  %v22_v5 = vld [vmem:[%s4896_s0 + $0x40] sm:$0xff]  ;;  %v3439_v9 = vld [vmem:[%s4895_s1 + $0x208] ss:$16 sps:$4 sm:$0xff]   ;;  %v3447_v11 = vld [vmem:[%s4895_s1 + $0x22c] ss:$16 sps:$4 sm:$0xff]  }
  0x19   :  { %v26_v7 = vld [vmem:[%s4896_s0 + $0x60] sm:$0xff]  ;;  %v3445_v14 = vld [vmem:[%s4895_s1 + $0x228] ss:$16 sps:$4 sm:$0xff]   ;;  %v3453_v16 = vld [vmem:[%s4895_s1 + $0x24c] ss:$16 sps:$4 sm:$0xff]  }
  0x1a   :  { %v3444_v10 = vld [vmem:[%s4895_s1 + $0x224] ss:$16 sps:$4 sm:$0xff]   ;;  %v2817_v12 = vcombine.high %v22_v5, %v26_v7  ;;  %v3442_v13 = vld [vmem:[%s4895_s1 + $0x220] ss:$16 sps:$4 sm:$0xff]   ;;  %v2816_v17 = vcombine.low %v22_v5, %v26_v7  ;;  %v3451_v21 = vld [vmem:[%s4895_s1 + $0x248] ss:$16 sps:$4 sm:$0xff]  }
  0x1b   :  { %1905 = vmatpush1.bf16.msra.mxu0 %v3380_v26  ;;  %2309 = vmatpush1.bf16.msra.mxu1 %v3381_v27  ;;  %v3450_v15 = vld [vmem:[%s4895_s1 + $0x244] ss:$16 sps:$4 sm:$0xff]   ;;  %v3448_v20 = vld [vmem:[%s4895_s1 + $0x240] ss:$16 sps:$4 sm:$0xff]   ;;  %v3459_v23 = vld [vmem:[%s4895_s1 + $0x26c] ss:$16 sps:$4 sm:$0xff]  }
  0x1c   :  { %1906 = vmatprep.subr.bf16.mxu0 %v3382_v28  ;;  %2310 = vmatprep.subr.bf16.mxu1 %v3384_v29  ;;  %v30_v18 = vld [vmem:[%s4896_s0 + $0x80] sm:$0xff]  ;;  %v3457_v26 = vld [vmem:[%s4895_s1 + $0x268] ss:$16 sps:$4 sm:$0xff]   ;;  %v3465_v28 = vld [vmem:[%s4895_s1 + $0x28c] ss:$16 sps:$4 sm:$0xff]  }
  0x1d   :  { %v34_v19 = vld [vmem:[%s4896_s0 + $0xa0] sm:$0xff]  ;;  %v3483_v47 = vld [vmem:[%s4895_s1 + $0x2ec] ss:$16 sps:$4 sm:$0xff]   ;;  %v3481_v50 = vld [vmem:[%s4895_s1 + $0x2e8] ss:$16 sps:$4 sm:$0xff]  }
  0x1e   :  { %v3456_v22 = vld [vmem:[%s4895_s1 + $0x264] ss:$16 sps:$4 sm:$0xff]   ;;  %v2825_v24 = vcombine.high %v30_v18, %v34_v19  ;;  %v3454_v25 = vld [vmem:[%s4895_s1 + $0x260] ss:$16 sps:$4 sm:$0xff]  }
  0x1f   :  { %1907 = vmatpush1.bf16.msra.mxu0 %v3386_v30  ;;  %2311 = vmatpush1.bf16.msra.mxu1 %v3387_v31  ;;  %v3462_v27 = vld [vmem:[%s4895_s1 + $0x284] ss:$16 sps:$4 sm:$0xff]   ;;  %v3460_v29 = vld [vmem:[%s4895_s1 + $0x280] ss:$16 sps:$4 sm:$0xff]   ;;  %v3463_v30 = vld [vmem:[%s4895_s1 + $0x288] ss:$16 sps:$4 sm:$0xff]   ;;  %v2824_v31 = vcombine.low %v30_v18, %v34_v19 }
  0x20   :  { %1908 = vmatprep.subr.bf16.mxu0 %v3388_v32  ;;  %2312 = vmatprep.subr.bf16.mxu1 %v3390_v33  ;;  %v38_v32 = vld [vmem:[%s4896_s0 + $0xc0] sm:$0xff]  ;;  %v3519_v18 = vld [vmem:[%s4895_s1 + $0x3ac] ss:$16 sps:$4 sm:$0xff]  }
  0x21   :  { %v42_v33 = vld [vmem:[%s4896_s0 + $0xe0] sm:$0xff] }
  0x22   :  { %v3480_v46 = vld [vmem:[%s4895_s1 + $0x2e4] ss:$16 sps:$4 sm:$0xff]  }
  0x23   :  { %1909 = vmatpush1.bf16.msra.mxu0 %v3392_v34  ;;  %2313 = vmatpush1.bf16.msra.mxu1 %v3393_v35  ;;  %v3468_v34 = vld [vmem:[%s4895_s1 + $0x2a4] ss:$16 sps:$4 sm:$0xff]   ;;  %v3471_v35 = vld [vmem:[%s4895_s1 + $0x2ac] ss:$16 sps:$4 sm:$0xff]  }
  0x24   :  { %1910 = vmatprep.subr.bf16.mxu0 %v3394_v36  ;;  %2314 = vmatprep.subr.bf16.mxu1 %v3396_v37  ;;  %v2833_v36 = vcombine.high %v38_v32, %v42_v33  ;;  %v3466_v37 = vld [vmem:[%s4895_s1 + $0x2a0] ss:$16 sps:$4 sm:$0xff]   ;;  %v3504_v5 = vld [vmem:[%s4895_s1 + $0x364] ss:$16 sps:$4 sm:$0xff]  }
  0x27   :  { %1911 = vmatpush1.bf16.msra.mxu0 %v3398_v38  ;;  %2315 = vmatpush1.bf16.msra.mxu1 %v3399_v39  ;;  %v3469_v38 = vld [vmem:[%s4895_s1 + $0x2a8] ss:$16 sps:$4 sm:$0xff]   ;;  %v3474_v39 = vld [vmem:[%s4895_s1 + $0x2c4] ss:$16 sps:$4 sm:$0xff]  }
  0x28   :  { %1912 = vmatprep.subr.bf16.mxu0 %v3400_v40  ;;  %2316 = vmatprep.subr.bf16.mxu1 %v3402_v41  ;;  %v3477_v40 = vld [vmem:[%s4895_s1 + $0x2cc] ss:$16 sps:$4 sm:$0xff]   ;;  %v3472_v41 = vld [vmem:[%s4895_s1 + $0x2c0] ss:$16 sps:$4 sm:$0xff]  }
  0x2b   :  { %1913 = vmatpush1.bf16.msra.mxu0 %v3404_v42  ;;  %2317 = vmatpush1.bf16.msra.mxu1 %v3405_v43  ;;  %v46_v42 = vld [vmem:[%s4896_s0 + $0x100] sm:$0xff]  ;;  %v2832_v43 = vcombine.low %v38_v32, %v42_v33  ;;  %v23_v33 = vld [vmem:[%s4896_s0 + $0x48] sm:$0xff] }
  0x2c   :  { %1914 = vmatprep.subr.bf16.mxu0 %v3406_v44  ;;  %2318 = vmatprep.subr.bf16.mxu1 %v3408_v45  ;;  %v50_v44 = vld [vmem:[%s4896_s0 + $0x120] sm:$0xff]  ;;  %v3475_v45 = vld [vmem:[%s4895_s1 + $0x2c8] ss:$16 sps:$4 sm:$0xff]  }
  0x2d   :  { %v3534_v32 = vld [vmem:[%s4895_s1 + $0x400] ss:$16 sps:$4 sm:$0xff]  }
  0x2f   :  { %1915 = vmatpush1.bf16.msra.mxu0 %v3410_v48  ;;  %2319 = vmatpush1.bf16.msra.mxu1 %v3411_v49  ;;  %v2841_v48 = vcombine.high %v46_v42, %v50_v44  ;;  %v3478_v49 = vld [vmem:[%s4895_s1 + $0x2e0] ss:$16 sps:$4 sm:$0xff]  }
  0x30   :  { %1916 = vmatprep.subr.bf16.mxu0 %v3412_v51  ;;  %2320 = vmatprep.subr.bf16.mxu1 %v3414_v52  ;;  %v3486_v51 = vld [vmem:[%s4895_s1 + $0x304] ss:$16 sps:$4 sm:$0xff]   ;;  %v3489_v52 = vld [vmem:[%s4895_s1 + $0x30c] ss:$16 sps:$4 sm:$0xff]  }
  0x33   :  { %1917 = vmatpush1.bf16.msra.mxu0 %v3416_v53  ;;  %2321 = vmatpush1.bf16.msra.mxu1 %v3417_v54  ;;  %v3484_v53 = vld [vmem:[%s4895_s1 + $0x300] ss:$16 sps:$4 sm:$0xff]   ;;  %v2840_v54 = vcombine.low %v46_v42, %v50_v44  ;;  %v3548_v42 = vld [vmem:[%s4895_s1 + $0x444] ss:$16 sps:$4 sm:$0xff]   ;;  %v31_v44 = vld [vmem:[%s4896_s0 + $0x88] sm:$0xff] }
  0x34   :  { %1918 = vmatprep.subr.bf16.mxu0 %v3418_v55  ;;  %2322 = vmatprep.subr.bf16.mxu1 %v3420_v56  ;;  %v54_v55 = vld [vmem:[%s4896_s0 + $0x140] sm:$0xff] }
  0x35   :  { %v58_v56 = vld [vmem:[%s4896_s0 + $0x160] sm:$0xff] }
  0x37   :  { %1919 = vmatpush1.bf16.msra.mxu0 %v3422_v57  ;;  %2323 = vmatpush1.bf16.msra.mxu1 %v3423_v58  ;;  %v3487_v57 = vld [vmem:[%s4895_s1 + $0x308] ss:$16 sps:$4 sm:$0xff]   ;;  %v3492_v58 = vld [vmem:[%s4895_s1 + $0x324] ss:$16 sps:$4 sm:$0xff]  }
  0x38   :  { %1920 = vmatprep.subr.bf16.mxu0 %v3424_v59  ;;  %2324 = vmatprep.subr.bf16.mxu1 %v3426_v60  ;;  %v3495_v59 = vld [vmem:[%s4895_s1 + $0x32c] ss:$16 sps:$4 sm:$0xff]   ;;  %v2849_v60 = vcombine.high %v54_v55, %v58_v56 }
  0x3b   :  { %1921 = vmatpush1.bf16.msra.mxu0 %v3428_v61  ;;  %2325 = vmatpush1.bf16.msra.mxu1 %v3429_v62  ;;  %v3490_v61 = vld [vmem:[%s4895_s1 + $0x320] ss:$16 sps:$4 sm:$0xff]   ;;  %v3493_v62 = vld [vmem:[%s4895_s1 + $0x328] ss:$16 sps:$4 sm:$0xff]  }
  0x3c   :  { %1922 = vmatprep.subr.bf16.mxu0 %v3430_v63  ;;  %2326 = vmatprep.subr.bf16.mxu1 %v3432_v0  ;;  %v3498_v63 = vld [vmem:[%s4895_s1 + $0x344] ss:$16 sps:$4 sm:$0xff]   ;;  %v3501_v0 = vld [vmem:[%s4895_s1 + $0x34c] ss:$16 sps:$4 sm:$0xff]  }
  0x3f   :  { %1923 = vmatpush1.bf16.msra.mxu0 %v3434_v1  ;;  %2327 = vmatpush1.bf16.msra.mxu1 %v3435_v2  ;;  %v3496_v1 = vld [vmem:[%s4895_s1 + $0x340] ss:$16 sps:$4 sm:$0xff]   ;;  %v2848_v2 = vcombine.low %v54_v55, %v58_v56  ;;  %v3563_v55 = vld [vmem:[%s4895_s1 + $0x48c] ss:$16 sps:$4 sm:$0xff]  }
  0x40   :  { %1993 = vmatprep.subr.bf16.mxu0 %v3438_v3  ;;  %2397 = vmatprep.subr.bf16.mxu1 %v3441_v4  ;;  %v62_v3 = vld [vmem:[%s4896_s0 + $0x180] sm:$0x11]  ;;  %v3499_v4 = vld [vmem:[%s4895_s1 + $0x348] ss:$16 sps:$4 sm:$0xff]  }
  0x41   :  { %v2857_v7 = vcombine.high %v62_v3, %v62_v3  ;;  %v3558_v56 = vld [vmem:[%s4895_s1 + $0x480] ss:$16 sps:$4 sm:$0xff]  }
  0x42   :  { %1925 = vmatmul.mubr.bf16.vlgmr.msra.gmra.mrb[0].mxu0 %v2808_v6  ;;  %2329 = vmatmul.mubr.bf16.vlgmr.msra.gmra.mrb[0].mxu1 %v2808_v6  ;;  %v3507_v6 = vld [vmem:[%s4895_s1 + $0x36c] ss:$16 sps:$4 sm:$0xff]  }
  0x43   :  { %1994 = vmatpush1.bf16.msra.mxu0 %v3436_v8  ;;  %2398 = vmatpush1.bf16.msra.mxu1 %v3439_v9  ;;  %v3502_v8 = vld [vmem:[%s4895_s1 + $0x360] ss:$16 sps:$4 sm:$0xff]   ;;  %v3505_v9 = vld [vmem:[%s4895_s1 + $0x368] ss:$16 sps:$4 sm:$0xff]  }
  0x44   :  { %1995 = vmatprep.subr.bf16.mxu0 %v3444_v10  ;;  %2399 = vmatprep.subr.bf16.mxu1 %v3447_v11  ;;  %v3510_v10 = vld [vmem:[%s4895_s1 + $0x384] ss:$16 sps:$4 sm:$0xff]   ;;  %v3513_v11 = vld [vmem:[%s4895_s1 + $0x38c] ss:$16 sps:$4 sm:$0xff]  }
  0x45   :  { %1934 = vmatprep.mubr.bf16.mxu0 %v2817_v12  ;;  %2338 = vmatprep.mubr.bf16.mxu1 %v2817_v12  ;;  %v2856_v12 = vcombine.low %v62_v3, %v62_v3  ;;  %v3575_v3 = vld [vmem:[%s4895_s1 + $0x4cc] ss:$16 sps:$4 sm:$0xff]  }
  0x47   :  { %1996 = vmatpush1.bf16.msra.mxu0 %v3442_v13  ;;  %2400 = vmatpush1.bf16.msra.mxu1 %v3445_v14  ;;  %v15_v13 = vld [vmem:[%s4896_s0 + $0x8] sm:$0xff] }
  0x48   :  { %1997 = vmatprep.subr.bf16.mxu0 %v3450_v15  ;;  %2401 = vmatprep.subr.bf16.mxu1 %v3453_v16  ;;  %v19_v14 = vld [vmem:[%s4896_s0 + $0x28] sm:$0xff]  ;;  %v3508_v15 = vld [vmem:[%s4895_s1 + $0x380] ss:$16 sps:$4 sm:$0xff]  }
  0x49   :  { %v3511_v16 = vld [vmem:[%s4895_s1 + $0x388] ss:$16 sps:$4 sm:$0xff]   ;;  %v2811_v19 = vcombine.high %v15_v13, %v19_v14 }
  0x4a   :  { %1935 = vmatmul.mubr.bf16.gmra.mrb[4].mxu0 %v2816_v17  ;;  %2339 = vmatmul.mubr.bf16.gmra.mrb[4].mxu1 %v2816_v17  ;;  %v3516_v17 = vld [vmem:[%s4895_s1 + $0x3a4] ss:$16 sps:$4 sm:$0xff]  }
  0x4b   :  { %1998 = vmatpush1.bf16.msra.mxu0 %v3448_v20  ;;  %2402 = vmatpush1.bf16.msra.mxu1 %v3451_v21  ;;  %v3514_v20 = vld [vmem:[%s4895_s1 + $0x3a0] ss:$16 sps:$4 sm:$0xff]   ;;  %v3517_v21 = vld [vmem:[%s4895_s1 + $0x3a8] ss:$16 sps:$4 sm:$0xff]  }
  0x4c   :  { %1999 = vmatprep.subr.bf16.mxu0 %v3456_v22  ;;  %2403 = vmatprep.subr.bf16.mxu1 %v3459_v23  ;;  %v3523_v22 = vld [vmem:[%s4895_s1 + $0x3c4] ss:$16 sps:$4 sm:$0xff]   ;;  %v3526_v23 = vld [vmem:[%s4895_s1 + $0x3cc] ss:$16 sps:$4 sm:$0xff]  }
  0x4d   :  { %1944 = vmatprep.mubr.bf16.mxu0 %v2825_v24  ;;  %2348 = vmatprep.mubr.bf16.mxu1 %v2825_v24  ;;  %v3521_v24 = vld [vmem:[%s4895_s1 + $0x3c0] ss:$16 sps:$4 sm:$0xff]  }
  0x4f   :  { %2000 = vmatpush1.bf16.msra.mxu0 %v3454_v25  ;;  %2404 = vmatpush1.bf16.msra.mxu1 %v3457_v26  ;;  %v3524_v25 = vld [vmem:[%s4895_s1 + $0x3c8] ss:$16 sps:$4 sm:$0xff]   ;;  %v3530_v26 = vld [vmem:[%s4895_s1 + $0x3e4] ss:$16 sps:$4 sm:$0xff]  }
  0x50   :  { %2001 = vmatprep.subr.bf16.mxu0 %v3462_v27  ;;  %2405 = vmatprep.subr.bf16.mxu1 %v3465_v28  ;;  %v3533_v27 = vld [vmem:[%s4895_s1 + $0x3ec] ss:$16 sps:$4 sm:$0xff]   ;;  %v3528_v28 = vld [vmem:[%s4895_s1 + $0x3e0] ss:$16 sps:$4 sm:$0xff]  }
  0x52   :  { %1945 = vmatmul.mubr.bf16.gmra.mrb[8].mxu0 %v2824_v31  ;;  %2349 = vmatmul.mubr.bf16.gmra.mrb[8].mxu1 %v2824_v31  ;;  %v3539_v31 = vld [vmem:[%s4895_s1 + $0x40c] ss:$16 sps:$4 sm:$0xff]  }
  0x53   :  { %2002 = vmatpush1.bf16.msra.mxu0 %v3460_v29  ;;  %2406 = vmatpush1.bf16.msra.mxu1 %v3463_v30  ;;  %v3531_v29 = vld [vmem:[%s4895_s1 + $0x3e8] ss:$16 sps:$4 sm:$0xff]   ;;  %v3536_v30 = vld [vmem:[%s4895_s1 + $0x404] ss:$16 sps:$4 sm:$0xff]  }
  0x54   :  { %2003 = vmatprep.subr.bf16.mxu0 %v3468_v34  ;;  %2407 = vmatprep.subr.bf16.mxu1 %v3471_v35  ;;  %v2810_v34 = vcombine.low %v15_v13, %v19_v14  ;;  %v27_v35 = vld [vmem:[%s4896_s0 + $0x68] sm:$0xff]  ;;  %v3584_v14 = vld [vmem:[%s4895_s1 + $0x504] ss:$16 sps:$4 sm:$0xff]  }
  0x55   :  { %1954 = vmatprep.mubr.bf16.mxu0 %v2833_v36  ;;  %2358 = vmatprep.mubr.bf16.mxu1 %v2833_v36  ;;  %v3537_v36 = vld [vmem:[%s4895_s1 + $0x408] ss:$16 sps:$4 sm:$0xff]  }
  0x56   :  { %v3579_v13 = vld [vmem:[%s4895_s1 + $0x4e8] ss:$16 sps:$4 sm:$0xff]  }
  0x57   :  { %2004 = vmatpush1.bf16.msra.mxu0 %v3466_v37  ;;  %2408 = vmatpush1.bf16.msra.mxu1 %v3469_v38  ;;  %v3542_v37 = vld [vmem:[%s4895_s1 + $0x424] ss:$16 sps:$4 sm:$0xff]   ;;  %v3545_v38 = vld [vmem:[%s4895_s1 + $0x42c] ss:$16 sps:$4 sm:$0xff]  }
  0x58   :  { %2005 = vmatprep.subr.bf16.mxu0 %v3474_v39  ;;  %2409 = vmatprep.subr.bf16.mxu1 %v3477_v40  ;;  %v2819_v39 = vcombine.high %v23_v33, %v27_v35  ;;  %v3540_v40 = vld [vmem:[%s4895_s1 + $0x420] ss:$16 sps:$4 sm:$0xff]  }
  0x5a   :  { %1955 = vmatmul.mubr.bf16.gmra.mrb[12].mxu0 %v2832_v43  ;;  %2359 = vmatmul.mubr.bf16.gmra.mrb[12].mxu1 %v2832_v43  ;;  %v3551_v43 = vld [vmem:[%s4895_s1 + $0x44c] ss:$16 sps:$4 sm:$0xff]  }
  0x5b   :  { %2006 = vmatpush1.bf16.msra.mxu0 %v3472_v41  ;;  %2410 = vmatpush1.bf16.msra.mxu1 %v3475_v45  ;;  %v3543_v41 = vld [vmem:[%s4895_s1 + $0x428] ss:$16 sps:$4 sm:$0xff]   ;;  %v2818_v45 = vcombine.low %v23_v33, %v27_v35  ;;  %v3605_v33 = vld [vmem:[%s4895_s1 + $0x56c] ss:$16 sps:$4 sm:$0xff]   ;;  %v3600_v35 = vld [vmem:[%s4895_s1 + $0x560] ss:$16 sps:$4 sm:$0xff]  }
  0x5c   :  { %2007 = vmatprep.subr.bf16.mxu0 %v3480_v46  ;;  %2411 = vmatprep.subr.bf16.mxu1 %v3483_v47  ;;  %v35_v46 = vld [vmem:[%s4896_s0 + $0xa8] sm:$0xff]  ;;  %v3546_v47 = vld [vmem:[%s4895_s1 + $0x440] ss:$16 sps:$4 sm:$0xff]  }
  0x5d   :  { %1964 = vmatprep.mubr.bf16.mxu0 %v2841_v48  ;;  %2368 = vmatprep.mubr.bf16.mxu1 %v2841_v48  ;;  %v3549_v48 = vld [vmem:[%s4895_s1 + $0x448] ss:$16 sps:$4 sm:$0xff]  }
  0x5f   :  { %2008 = vmatpush1.bf16.msra.mxu0 %v3478_v49  ;;  %2412 = vmatpush1.bf16.msra.mxu1 %v3481_v50  ;;  %v3554_v49 = vld [vmem:[%s4895_s1 + $0x464] ss:$16 sps:$4 sm:$0xff]   ;;  %v3557_v50 = vld [vmem:[%s4895_s1 + $0x46c] ss:$16 sps:$4 sm:$0xff]  }
  0x60   :  { %2009 = vmatprep.subr.bf16.mxu0 %v3486_v51  ;;  %2413 = vmatprep.subr.bf16.mxu1 %v3489_v52  ;;  %v2827_v51 = vcombine.high %v31_v44, %v35_v46  ;;  %v3552_v52 = vld [vmem:[%s4895_s1 + $0x460] ss:$16 sps:$4 sm:$0xff]  }
  0x62   :  { %1965 = vmatmul.mubr.bf16.gmra.mrb[16].mxu0 %v2840_v54  ;;  %2369 = vmatmul.mubr.bf16.gmra.mrb[16].mxu1 %v2840_v54  ;;  %v3560_v54 = vld [vmem:[%s4895_s1 + $0x484] ss:$16 sps:$4 sm:$0xff]  }
  0x63   :  { %2010 = vmatpush1.bf16.msra.mxu0 %v3484_v53  ;;  %2414 = vmatpush1.bf16.msra.mxu1 %v3487_v57  ;;  %v3555_v53 = vld [vmem:[%s4895_s1 + $0x468] ss:$16 sps:$4 sm:$0xff]  }
  0x64   :  { %2011 = vmatprep.subr.bf16.mxu0 %v3492_v58  ;;  %2415 = vmatprep.subr.bf16.mxu1 %v3495_v59  ;;  %v3561_v57 = vld [vmem:[%s4895_s1 + $0x488] ss:$16 sps:$4 sm:$0xff]   ;;  %v2826_v58 = vcombine.low %v31_v44, %v35_v46  ;;  %v3614_v44 = vld [vmem:[%s4895_s1 + $0x5a4] ss:$16 sps:$4 sm:$0xff]  }
  0x65   :  { %1974 = vmatprep.mubr.bf16.mxu0 %v2849_v60  ;;  %2378 = vmatprep.mubr.bf16.mxu1 %v2849_v60  ;;  %v39_v59 = vld [vmem:[%s4896_s0 + $0xc8] sm:$0xff] }
  0x66   :  { %v43_v60 = vld [vmem:[%s4896_s0 + $0xe8] sm:$0xff] }
  0x67   :  { %2012 = vmatpush1.bf16.msra.mxu0 %v3490_v61  ;;  %2416 = vmatpush1.bf16.msra.mxu1 %v3493_v62  ;;  %v3566_v61 = vld [vmem:[%s4895_s1 + $0x4a4] ss:$16 sps:$4 sm:$0xff]   ;;  %v3569_v62 = vld [vmem:[%s4895_s1 + $0x4ac] ss:$16 sps:$4 sm:$0xff]  }
  0x68   :  { %2013 = vmatprep.subr.bf16.mxu0 %v3498_v63  ;;  %2417 = vmatprep.subr.bf16.mxu1 %v3501_v0  ;;  %v2835_v63 = vcombine.high %v39_v59, %v43_v60  ;;  %v3564_v0 = vld [vmem:[%s4895_s1 + $0x4a0] ss:$16 sps:$4 sm:$0xff]  }
  0x6a   :  { %1975 = vmatmul.mubr.bf16.gmra.mrb[20].mxu0 %v2848_v2  ;;  %2379 = vmatmul.mubr.bf16.gmra.mrb[20].mxu1 %v2848_v2  ;;  %v3572_v2 = vld [vmem:[%s4895_s1 + $0x4c4] ss:$16 sps:$4 sm:$0xff]  }
  0x6b   :  { %2014 = vmatpush1.bf16.msra.mxu0 %v3496_v1  ;;  %2418 = vmatpush1.bf16.msra.mxu1 %v3499_v4  ;;  %v3567_v1 = vld [vmem:[%s4895_s1 + $0x4a8] ss:$16 sps:$4 sm:$0xff]  }
  0x6c   :  { %2015 = vmatprep.subr.bf16.mxu0 %v3504_v5  ;;  %2419 = vmatprep.subr.bf16.mxu1 %v3507_v6  ;;  %v47_v4 = vld [vmem:[%s4896_s0 + $0x108] sm:$0xff]  ;;  %v2834_v5 = vcombine.low %v39_v59, %v43_v60  ;;  %v24_v60 = vld [vmem:[%s4896_s0 + $0x50] sm:$0xff] }
  0x6d   :  { %1984 = vmatprep.mubr.bf16.mxu0 %v2857_v7  ;;  %2388 = vmatprep.mubr.bf16.mxu1 %v2857_v7  ;;  %v51_v6 = vld [vmem:[%s4896_s0 + $0x128] sm:$0xff]  ;;  %v3570_v7 = vld [vmem:[%s4895_s1 + $0x4c0] ss:$16 sps:$4 sm:$0xff]  }
  0x6f   :  { %2016 = vmatpush1.bf16.msra.mxu0 %v3502_v8  ;;  %2420 = vmatpush1.bf16.msra.mxu1 %v3505_v9  ;;  %v3573_v8 = vld [vmem:[%s4895_s1 + $0x4c8] ss:$16 sps:$4 sm:$0xff]   ;;  %v3578_v9 = vld [vmem:[%s4895_s1 + $0x4e4] ss:$16 sps:$4 sm:$0xff]  }
  0x70   :  { %2017 = vmatprep.subr.bf16.mxu0 %v3510_v10  ;;  %2421 = vmatprep.subr.bf16.mxu1 %v3513_v11  ;;  %v3581_v10 = vld [vmem:[%s4895_s1 + $0x4ec] ss:$16 sps:$4 sm:$0xff]   ;;  %v2843_v11 = vcombine.high %v47_v4, %v51_v6 }
  0x72   :  { %1985 = vmatmul.mubr.bf16.gmra.mrb[24].mxu0 %v2856_v12  ;;  %2389 = vmatmul.mubr.bf16.gmra.mrb[24].mxu1 %v2856_v12  ;;  %v3576_v12 = vld [vmem:[%s4895_s1 + $0x4e0] ss:$16 sps:$4 sm:$0xff]  }
  0x73   :  { %2018 = vmatpush1.bf16.msra.mxu0 %v3508_v15  ;;  %2422 = vmatpush1.bf16.msra.mxu1 %v3511_v16  ;;  %v3587_v15 = vld [vmem:[%s4895_s1 + $0x50c] ss:$16 sps:$4 sm:$0xff]   ;;  %v2842_v16 = vcombine.low %v47_v4, %v51_v6  ;;  %v3641_v4 = vld [vmem:[%s4895_s1 + $0x628] ss:$16 sps:$4 sm:$0xff]  }
  0x74   :  { %2019 = vmatprep.subr.bf16.mxu0 %v3516_v17  ;;  %2423 = vmatprep.subr.bf16.mxu1 %v3519_v18  ;;  %v55_v17 = vld [vmem:[%s4896_s0 + $0x148] sm:$0xff] }
  0x75   :  { %2025 = vmatprep.mubr.bf16.mxu0 %v2811_v19  ;;  %2429 = vmatprep.mubr.bf16.mxu1 %v2811_v19  ;;  %v59_v18 = vld [vmem:[%s4896_s0 + $0x168] sm:$0xff]  ;;  %v3582_v19 = vld [vmem:[%s4895_s1 + $0x500] ss:$16 sps:$4 sm:$0xff]  }
  0x76   :  { %v3649_v6 = vld [vmem:[%s4895_s1 + $0x64c] ss:$16 sps:$4 sm:$0xff]  }
  0x77   :  { %2020 = vmatpush1.bf16.msra.mxu0 %v3514_v20  ;;  %2424 = vmatpush1.bf16.msra.mxu1 %v3517_v21  ;;  %v3585_v20 = vld [vmem:[%s4895_s1 + $0x508] ss:$16 sps:$4 sm:$0xff]   ;;  %v3590_v21 = vld [vmem:[%s4895_s1 + $0x524] ss:$16 sps:$4 sm:$0xff]  }
  0x78   :  { %2021 = vmatprep.subr.bf16.mxu0 %v3523_v22  ;;  %2425 = vmatprep.subr.bf16.mxu1 %v3526_v23  ;;  %v3593_v22 = vld [vmem:[%s4895_s1 + $0x52c] ss:$16 sps:$4 sm:$0xff]   ;;  %v2851_v23 = vcombine.high %v55_v17, %v59_v18 }
  0x7b   :  { %2022 = vmatpush1.bf16.msra.mxu0 %v3521_v24  ;;  %2426 = vmatpush1.bf16.msra.mxu1 %v3524_v25  ;;  %v3588_v24 = vld [vmem:[%s4895_s1 + $0x520] ss:$16 sps:$4 sm:$0xff]   ;;  %v3591_v25 = vld [vmem:[%s4895_s1 + $0x528] ss:$16 sps:$4 sm:$0xff]  }
  0x7c   :  { %2023 = vmatprep.subr.bf16.mxu0 %v3530_v26  ;;  %2427 = vmatprep.subr.bf16.mxu1 %v3533_v27  ;;  %v3596_v26 = vld [vmem:[%s4895_s1 + $0x544] ss:$16 sps:$4 sm:$0xff]   ;;  %v3599_v27 = vld [vmem:[%s4895_s1 + $0x54c] ss:$16 sps:$4 sm:$0xff]  }
  0x7f   :  { %2024 = vmatpush1.bf16.msra.mxu0 %v3528_v28  ;;  %2428 = vmatpush1.bf16.msra.mxu1 %v3531_v29  ;;  %v3594_v28 = vld [vmem:[%s4895_s1 + $0x540] ss:$16 sps:$4 sm:$0xff]   ;;  %v3597_v29 = vld [vmem:[%s4895_s1 + $0x548] ss:$16 sps:$4 sm:$0xff]  }
  0x80   :  { %2094 = vmatprep.subr.bf16.mxu0 %v3536_v30  ;;  %2498 = vmatprep.subr.bf16.mxu1 %v3539_v31  ;;  %v2850_v30 = vcombine.low %v55_v17, %v59_v18  ;;  %v63_v31 = vld [vmem:[%s4896_s0 + $0x188] sm:$0x11]  ;;  %v3658_v17 = vld [vmem:[%s4895_s1 + $0x684] ss:$16 sps:$4 sm:$0xff]  }
  0x81   :  { %v3661_v18 = vld [vmem:[%s4895_s1 + $0x68c] ss:$16 sps:$4 sm:$0xff]  }
  0x82   :  { %2026 = vmatmul.mubr.bf16.vlgmr.msra.gmra.mrb[0].mxu0 %v2810_v34  ;;  %2430 = vmatmul.mubr.bf16.vlgmr.msra.gmra.mrb[0].mxu1 %v2810_v34  ;;  %v2859_v34 = vcombine.high %v63_v31, %v63_v31 }
  0x83   :  { %2095 = vmatpush1.bf16.msra.mxu0 %v3534_v32  ;;  %2499 = vmatpush1.bf16.msra.mxu1 %v3537_v36  ;;  %v3602_v32 = vld [vmem:[%s4895_s1 + $0x564] ss:$16 sps:$4 sm:$0xff]   ;;  %v3603_v36 = vld [vmem:[%s4895_s1 + $0x568] ss:$16 sps:$4 sm:$0xff]  }
  0x84   :  { %2096 = vmatprep.subr.bf16.mxu0 %v3542_v37  ;;  %2500 = vmatprep.subr.bf16.mxu1 %v3545_v38  ;;  %v3608_v37 = vld [vmem:[%s4895_s1 + $0x584] ss:$16 sps:$4 sm:$0xff]   ;;  %v3611_v38 = vld [vmem:[%s4895_s1 + $0x58c] ss:$16 sps:$4 sm:$0xff]  }
  0x85   :  { %2035 = vmatprep.mubr.bf16.mxu0 %v2819_v39  ;;  %2439 = vmatprep.mubr.bf16.mxu1 %v2819_v39  ;;  %v16_v39 = vld [vmem:[%s4896_s0 + $0x10] sm:$0xff] }
  0x87   :  { %2097 = vmatpush1.bf16.msra.mxu0 %v3540_v40  ;;  %2501 = vmatpush1.bf16.msra.mxu1 %v3543_v41  ;;  %v2858_v40 = vcombine.low %v63_v31, %v63_v31  ;;  %v20_v41 = vld [vmem:[%s4896_s0 + $0x30] sm:$0xff] }
  0x88   :  { %2098 = vmatprep.subr.bf16.mxu0 %v3548_v42  ;;  %2502 = vmatprep.subr.bf16.mxu1 %v3551_v43  ;;  %v3606_v42 = vld [vmem:[%s4895_s1 + $0x580] ss:$16 sps:$4 sm:$0xff]   ;;  %v3609_v43 = vld [vmem:[%s4895_s1 + $0x588] ss:$16 sps:$4 sm:$0xff]   ;;  %v2813_v46 = vcombine.high %v16_v39, %v20_v41  ;;  %v2812_v59 = vcombine.low %v16_v39, %v20_v41  ;;  %v3682_v41 = vld [vmem:[%s4895_s1 + $0x704] ss:$16 sps:$4 sm:$0xff]  }
  0x89   :  { %v3674_v39 = vld [vmem:[%s4895_s1 + $0x6e0] ss:$16 sps:$4 sm:$0xff]  }
  0x8a   :  { %2036 = vmatmul.mubr.bf16.gmra.mrb[4].mxu0 %v2818_v45  ;;  %2440 = vmatmul.mubr.bf16.gmra.mrb[4].mxu1 %v2818_v45  ;;  %v3617_v45 = vld [vmem:[%s4895_s1 + $0x5ac] ss:$16 sps:$4 sm:$0xff]  }
  0x8b   :  { %2099 = vmatpush1.bf16.msra.mxu0 %v3546_v47  ;;  %2503 = vmatpush1.bf16.msra.mxu1 %v3549_v48  ;;  %v3612_v47 = vld [vmem:[%s4895_s1 + $0x5a0] ss:$16 sps:$4 sm:$0xff]   ;;  %v3615_v48 = vld [vmem:[%s4895_s1 + $0x5a8] ss:$16 sps:$4 sm:$0xff]  }
  0x8c   :  { %2100 = vmatprep.subr.bf16.mxu0 %v3554_v49  ;;  %2504 = vmatprep.subr.bf16.mxu1 %v3557_v50  ;;  %v3621_v49 = vld [vmem:[%s4895_s1 + $0x5c4] ss:$16 sps:$4 sm:$0xff]   ;;  %v3624_v50 = vld [vmem:[%s4895_s1 + $0x5cc] ss:$16 sps:$4 sm:$0xff]  }
  0x8d   :  { %2045 = vmatprep.mubr.bf16.mxu0 %v2827_v51  ;;  %2449 = vmatprep.mubr.bf16.mxu1 %v2827_v51  ;;  %v3619_v51 = vld [vmem:[%s4895_s1 + $0x5c0] ss:$16 sps:$4 sm:$0xff]  }
  0x8f   :  { %2101 = vmatpush1.bf16.msra.mxu0 %v3552_v52  ;;  %2505 = vmatpush1.bf16.msra.mxu1 %v3555_v53  ;;  %v3622_v52 = vld [vmem:[%s4895_s1 + $0x5c8] ss:$16 sps:$4 sm:$0xff]   ;;  %v3628_v53 = vld [vmem:[%s4895_s1 + $0x5e4] ss:$16 sps:$4 sm:$0xff]  }
  0x90   :  { %2102 = vmatprep.subr.bf16.mxu0 %v3560_v54  ;;  %2506 = vmatprep.subr.bf16.mxu1 %v3563_v55  ;;  %v3631_v54 = vld [vmem:[%s4895_s1 + $0x5ec] ss:$16 sps:$4 sm:$0xff]   ;;  %v3626_v55 = vld [vmem:[%s4895_s1 + $0x5e0] ss:$16 sps:$4 sm:$0xff]  }
  0x92   :  { %2046 = vmatmul.mubr.bf16.gmra.mrb[8].mxu0 %v2826_v58  ;;  %2450 = vmatmul.mubr.bf16.gmra.mrb[8].mxu1 %v2826_v58  ;;  %v3637_v58 = vld [vmem:[%s4895_s1 + $0x60c] ss:$16 sps:$4 sm:$0xff]  }
  0x93   :  { %2103 = vmatpush1.bf16.msra.mxu0 %v3558_v56  ;;  %2507 = vmatpush1.bf16.msra.mxu1 %v3561_v57  ;;  %v3629_v56 = vld [vmem:[%s4895_s1 + $0x5e8] ss:$16 sps:$4 sm:$0xff]   ;;  %v3634_v57 = vld [vmem:[%s4895_s1 + $0x604] ss:$16 sps:$4 sm:$0xff]  }
  0x94   :  { %2104 = vmatprep.subr.bf16.mxu0 %v3566_v61  ;;  %2508 = vmatprep.subr.bf16.mxu1 %v3569_v62  ;;  %v28_v61 = vld [vmem:[%s4896_s0 + $0x70] sm:$0xff] }
  0x95   :  { %2055 = vmatprep.mubr.bf16.mxu0 %v2835_v63  ;;  %2459 = vmatprep.mubr.bf16.mxu1 %v2835_v63  ;;  %v3632_v62 = vld [vmem:[%s4895_s1 + $0x600] ss:$16 sps:$4 sm:$0xff]   ;;  %v3635_v63 = vld [vmem:[%s4895_s1 + $0x608] ss:$16 sps:$4 sm:$0xff]  }
  0x97   :  { %2105 = vmatpush1.bf16.msra.mxu0 %v3564_v0  ;;  %2509 = vmatpush1.bf16.msra.mxu1 %v3567_v1  ;;  %v3640_v0 = vld [vmem:[%s4895_s1 + $0x624] ss:$16 sps:$4 sm:$0xff]   ;;  %v3643_v1 = vld [vmem:[%s4895_s1 + $0x62c] ss:$16 sps:$4 sm:$0xff]  }
  0x98   :  { %2106 = vmatprep.subr.bf16.mxu0 %v3572_v2  ;;  %2510 = vmatprep.subr.bf16.mxu1 %v3575_v3  ;;  %v2821_v2 = vcombine.high %v24_v60, %v28_v61  ;;  %v3638_v3 = vld [vmem:[%s4895_s1 + $0x620] ss:$16 sps:$4 sm:$0xff]  }
  0x9a   :  { %2056 = vmatmul.mubr.bf16.gmra.mrb[12].mxu0 %v2834_v5  ;;  %2460 = vmatmul.mubr.bf16.gmra.mrb[12].mxu1 %v2834_v5  ;;  %v3646_v5 = vld [vmem:[%s4895_s1 + $0x644] ss:$16 sps:$4 sm:$0xff]  }
  0x9b   :  { %2107 = vmatpush1.bf16.msra.mxu0 %v3570_v7  ;;  %2511 = vmatpush1.bf16.msra.mxu1 %v3573_v8  ;;  %v2820_v7 = vcombine.low %v24_v60, %v28_v61  ;;  %v32_v8 = vld [vmem:[%s4896_s0 + $0x90] sm:$0xff]  ;;  %v3703_v60 = vld [vmem:[%s4895_s1 + $0x76c] ss:$16 sps:$4 sm:$0xff]  }
  0x9c   :  { %2108 = vmatprep.subr.bf16.mxu0 %v3578_v9  ;;  %2512 = vmatprep.subr.bf16.mxu1 %v3581_v10  ;;  %v36_v9 = vld [vmem:[%s4896_s0 + $0xb0] sm:$0xff] }
  0x9d   :  { %2065 = vmatprep.mubr.bf16.mxu0 %v2843_v11  ;;  %2469 = vmatprep.mubr.bf16.mxu1 %v2843_v11  ;;  %v3644_v10 = vld [vmem:[%s4895_s1 + $0x640] ss:$16 sps:$4 sm:$0xff]   ;;  %v3647_v11 = vld [vmem:[%s4895_s1 + $0x648] ss:$16 sps:$4 sm:$0xff]  }
  0x9f   :  { %2109 = vmatpush1.bf16.msra.mxu0 %v3576_v12  ;;  %2513 = vmatpush1.bf16.msra.mxu1 %v3579_v13  ;;  %v3652_v12 = vld [vmem:[%s4895_s1 + $0x664] ss:$16 sps:$4 sm:$0xff]   ;;  %v3655_v13 = vld [vmem:[%s4895_s1 + $0x66c] ss:$16 sps:$4 sm:$0xff]  }
  0xa0   :  { %2110 = vmatprep.subr.bf16.mxu0 %v3584_v14  ;;  %2514 = vmatprep.subr.bf16.mxu1 %v3587_v15  ;;  %v2829_v14 = vcombine.high %v32_v8, %v36_v9  ;;  %v3650_v15 = vld [vmem:[%s4895_s1 + $0x660] ss:$16 sps:$4 sm:$0xff]  }
  0xa2   :  { %2066 = vmatmul.mubr.bf16.gmra.mrb[16].mxu0 %v2842_v16  ;;  %2470 = vmatmul.mubr.bf16.gmra.mrb[16].mxu1 %v2842_v16  ;;  %v3653_v16 = vld [vmem:[%s4895_s1 + $0x668] ss:$16 sps:$4 sm:$0xff]  }
  0xa3   :  { %2111 = vmatpush1.bf16.msra.mxu0 %v3582_v19  ;;  %2515 = vmatpush1.bf16.msra.mxu1 %v3585_v20  ;;  %v2828_v19 = vcombine.low %v32_v8, %v36_v9  ;;  %v40_v20 = vld [vmem:[%s4896_s0 + $0xd0] sm:$0xff]  ;;  %v3715_v8 = vld [vmem:[%s4895_s1 + $0x7ac] ss:$16 sps:$4 sm:$0xff]  }
  0xa4   :  { %2112 = vmatprep.subr.bf16.mxu0 %v3590_v21  ;;  %2516 = vmatprep.subr.bf16.mxu1 %v3593_v22  ;;  %v44_v21 = vld [vmem:[%s4896_s0 + $0xf0] sm:$0xff] }
  0xa5   :  { %2075 = vmatprep.mubr.bf16.mxu0 %v2851_v23  ;;  %2479 = vmatprep.mubr.bf16.mxu1 %v2851_v23  ;;  %v3656_v22 = vld [vmem:[%s4895_s1 + $0x680] ss:$16 sps:$4 sm:$0xff]   ;;  %v3659_v23 = vld [vmem:[%s4895_s1 + $0x688] ss:$16 sps:$4 sm:$0xff]   ;;  %v2836_v31 = vcombine.low %v40_v20, %v44_v21 }
  0xa7   :  { %2113 = vmatpush1.bf16.msra.mxu0 %v3588_v24  ;;  %2517 = vmatpush1.bf16.msra.mxu1 %v3591_v25  ;;  %v3664_v24 = vld [vmem:[%s4895_s1 + $0x6a4] ss:$16 sps:$4 sm:$0xff]   ;;  %v3667_v25 = vld [vmem:[%s4895_s1 + $0x6ac] ss:$16 sps:$4 sm:$0xff]  }
  0xa8   :  { %2114 = vmatprep.subr.bf16.mxu0 %v3596_v26  ;;  %2518 = vmatprep.subr.bf16.mxu1 %v3599_v27  ;;  %v2837_v26 = vcombine.high %v40_v20, %v44_v21  ;;  %v3662_v27 = vld [vmem:[%s4895_s1 + $0x6a0] ss:$16 sps:$4 sm:$0xff]   ;;  %v25_v20 = vld [vmem:[%s4896_s0 + $0x58] sm:$0xff] }
  0xa9   :  { %v29_v21 = vld [vmem:[%s4896_s0 + $0x78] sm:$0xff] }
  0xaa   :  { %2076 = vmatmul.mubr.bf16.gmra.mrb[20].mxu0 %v2850_v30  ;;  %2480 = vmatmul.mubr.bf16.gmra.mrb[20].mxu1 %v2850_v30  ;;  %v3673_v30 = vld [vmem:[%s4895_s1 + $0x6cc] ss:$16 sps:$4 sm:$0xff]  }
  0xab   :  { %2115 = vmatpush1.bf16.msra.mxu0 %v3594_v28  ;;  %2519 = vmatpush1.bf16.msra.mxu1 %v3597_v29  ;;  %v3665_v28 = vld [vmem:[%s4895_s1 + $0x6a8] ss:$16 sps:$4 sm:$0xff]   ;;  %v3670_v29 = vld [vmem:[%s4895_s1 + $0x6c4] ss:$16 sps:$4 sm:$0xff]  }
  0xac   :  { %2116 = vmatprep.subr.bf16.mxu0 %v3602_v32  ;;  %2520 = vmatprep.subr.bf16.mxu1 %v3605_v33  ;;  %v48_v32 = vld [vmem:[%s4896_s0 + $0x110] sm:$0xff] }
  0xad   :  { %2085 = vmatprep.mubr.bf16.mxu0 %v2859_v34  ;;  %2489 = vmatprep.mubr.bf16.mxu1 %v2859_v34  ;;  %v52_v33 = vld [vmem:[%s4896_s0 + $0x130] sm:$0xff] }
  0xae   :  { %v3668_v34 = vld [vmem:[%s4895_s1 + $0x6c0] ss:$16 sps:$4 sm:$0xff]  }
  0xaf   :  { %2117 = vmatpush1.bf16.msra.mxu0 %v3600_v35  ;;  %2521 = vmatpush1.bf16.msra.mxu1 %v3603_v36  ;;  %v3671_v35 = vld [vmem:[%s4895_s1 + $0x6c8] ss:$16 sps:$4 sm:$0xff]   ;;  %v3676_v36 = vld [vmem:[%s4895_s1 + $0x6e4] ss:$16 sps:$4 sm:$0xff]  }
  0xb0   :  { %2118 = vmatprep.subr.bf16.mxu0 %v3608_v37  ;;  %2522 = vmatprep.subr.bf16.mxu1 %v3611_v38  ;;  %v3679_v37 = vld [vmem:[%s4895_s1 + $0x6ec] ss:$16 sps:$4 sm:$0xff]   ;;  %v2845_v38 = vcombine.high %v48_v32, %v52_v33 }
  0xb2   :  { %2086 = vmatmul.mubr.bf16.gmra.mrb[24].mxu0 %v2858_v40  ;;  %2490 = vmatmul.mubr.bf16.gmra.mrb[24].mxu1 %v2858_v40  ;;  %v3677_v40 = vld [vmem:[%s4895_s1 + $0x6e8] ss:$16 sps:$4 sm:$0xff]  }
  0xb3   :  { %2119 = vmatpush1.bf16.msra.mxu0 %v3606_v42  ;;  %2523 = vmatpush1.bf16.msra.mxu1 %v3609_v43  ;;  %v3685_v42 = vld [vmem:[%s4895_s1 + $0x70c] ss:$16 sps:$4 sm:$0xff]   ;;  %v2844_v43 = vcombine.low %v48_v32, %v52_v33 }
  0xb4   :  { %2120 = vmatprep.subr.bf16.mxu0 %v3614_v44  ;;  %2524 = vmatprep.subr.bf16.mxu1 %v3617_v45  ;;  %v56_v44 = vld [vmem:[%s4896_s0 + $0x150] sm:$0xff]  ;;  %v49_v32 = vld [vmem:[%s4896_s0 + $0x118] sm:$0xff] }
  0xb5   :  { %2126 = vmatprep.mubr.bf16.mxu0 %v2813_v46  ;;  %2530 = vmatprep.mubr.bf16.mxu1 %v2813_v46  ;;  %v60_v45 = vld [vmem:[%s4896_s0 + $0x170] sm:$0xff]  ;;  %v53_v33 = vld [vmem:[%s4896_s0 + $0x138] sm:$0xff] }
  0xb6   :  { %v3680_v46 = vld [vmem:[%s4895_s1 + $0x700] ss:$16 sps:$4 sm:$0xff]  }
  0xb7   :  { %2121 = vmatpush1.bf16.msra.mxu0 %v3612_v47  ;;  %2525 = vmatpush1.bf16.msra.mxu1 %v3615_v48  ;;  %v3683_v47 = vld [vmem:[%s4895_s1 + $0x708] ss:$16 sps:$4 sm:$0xff]   ;;  %v3688_v48 = vld [vmem:[%s4895_s1 + $0x724] ss:$16 sps:$4 sm:$0xff]  }
  0xb8   :  { %2122 = vmatprep.subr.bf16.mxu0 %v3621_v49  ;;  %2526 = vmatprep.subr.bf16.mxu1 %v3624_v50  ;;  %v3691_v49 = vld [vmem:[%s4895_s1 + $0x72c] ss:$16 sps:$4 sm:$0xff]   ;;  %v2853_v50 = vcombine.high %v56_v44, %v60_v45 }
  0xbb   :  { %2123 = vmatpush1.bf16.msra.mxu0 %v3619_v51  ;;  %2527 = vmatpush1.bf16.msra.mxu1 %v3622_v52  ;;  %v3686_v51 = vld [vmem:[%s4895_s1 + $0x720] ss:$16 sps:$4 sm:$0xff]   ;;  %v3689_v52 = vld [vmem:[%s4895_s1 + $0x728] ss:$16 sps:$4 sm:$0xff]  }
  0xbc   :  { %2124 = vmatprep.subr.bf16.mxu0 %v3628_v53  ;;  %2528 = vmatprep.subr.bf16.mxu1 %v3631_v54  ;;  %v3694_v53 = vld [vmem:[%s4895_s1 + $0x744] ss:$16 sps:$4 sm:$0xff]   ;;  %v3697_v54 = vld [vmem:[%s4895_s1 + $0x74c] ss:$16 sps:$4 sm:$0xff]  }
  0xbf   :  { %2125 = vmatpush1.bf16.msra.mxu0 %v3626_v55  ;;  %2529 = vmatpush1.bf16.msra.mxu1 %v3629_v56  ;;  %v2852_v55 = vcombine.low %v56_v44, %v60_v45  ;;  %v64_v56 = vld [vmem:[%s4896_s0 + $0x190] sm:$0x11]  ;;  %v324_v44 = vlaneseq }
  0xc0   :  { %2195 = vmatprep.subr.bf16.mxu0 %v3634_v57  ;;  %2599 = vmatprep.subr.bf16.mxu1 %v3637_v58  ;;  %v3692_v57 = vld [vmem:[%s4895_s1 + $0x740] ss:$16 sps:$4 sm:$0xff]   ;;  %v3695_v58 = vld [vmem:[%s4895_s1 + $0x748] ss:$16 sps:$4 sm:$0xff]   ;;  %v2861_v61 = vcombine.high %v64_v56, %v64_v56 }
  0xc1   :  { %v325_v45 = vshrl.u32 %v324_v44, 7 }
  0xc2   :  { %2127 = vmatmul.mubr.bf16.vlgmr.msra.gmra.mrb[0].mxu0 %v2812_v59  ;;  %2531 = vmatmul.mubr.bf16.vlgmr.msra.gmra.mrb[0].mxu1 %v2812_v59  ;;  %v3700_v59 = vld [vmem:[%s4895_s1 + $0x764] ss:$16 sps:$4 sm:$0xff]  }
  0xc3   :  { %2196 = vmatpush1.bf16.msra.mxu0 %v3632_v62  ;;  %2600 = vmatpush1.bf16.msra.mxu1 %v3635_v63  ;;  %v3698_v62 = vld [vmem:[%s4895_s1 + $0x760] ss:$16 sps:$4 sm:$0xff]   ;;  %v3701_v63 = vld [vmem:[%s4895_s1 + $0x768] ss:$16 sps:$4 sm:$0xff]  }
  0xc4   :  { %2197 = vmatprep.subr.bf16.mxu0 %v3640_v0  ;;  %2601 = vmatprep.subr.bf16.mxu1 %v3643_v1  ;;  %v3706_v0 = vld [vmem:[%s4895_s1 + $0x784] ss:$16 sps:$4 sm:$0xff]   ;;  %v3709_v1 = vld [vmem:[%s4895_s1 + $0x78c] ss:$16 sps:$4 sm:$0xff]  }
  0xc5   :  { %2136 = vmatprep.mubr.bf16.mxu0 %v2821_v2  ;;  %2540 = vmatprep.mubr.bf16.mxu1 %v2821_v2  ;;  %v2860_v2 = vcombine.low %v64_v56, %v64_v56 }
  0xc7   :  { %2198 = vmatpush1.bf16.msra.mxu0 %v3638_v3  ;;  %2602 = vmatpush1.bf16.msra.mxu1 %v3641_v4  ;;  %v17_v3 = vld [vmem:[%s4896_s0 + $0x18] sm:$0xff] }
  0xc8   :  { %2199 = vmatprep.subr.bf16.mxu0 %v3646_v5  ;;  %2603 = vmatprep.subr.bf16.mxu1 %v3649_v6  ;;  %v21_v4 = vld [vmem:[%s4896_s0 + $0x38] sm:$0xff]  ;;  %v3704_v5 = vld [vmem:[%s4895_s1 + $0x780] ss:$16 sps:$4 sm:$0xff]  }
  0xc9   :  { %v3707_v6 = vld [vmem:[%s4895_s1 + $0x788] ss:$16 sps:$4 sm:$0xff]   ;;  %v2815_v9 = vcombine.high %v17_v3, %v21_v4 }
  0xca   :  { %2137 = vmatmul.mubr.bf16.gmra.mrb[4].mxu0 %v2820_v7  ;;  %2541 = vmatmul.mubr.bf16.gmra.mrb[4].mxu1 %v2820_v7  ;;  %v3712_v7 = vld [vmem:[%s4895_s1 + $0x7a4] ss:$16 sps:$4 sm:$0xff]  }
  0xcb   :  { %2200 = vmatpush1.bf16.msra.mxu0 %v3644_v10  ;;  %2604 = vmatpush1.bf16.msra.mxu1 %v3647_v11  ;;  %v3710_v10 = vld [vmem:[%s4895_s1 + $0x7a0] ss:$16 sps:$4 sm:$0xff]   ;;  %v3713_v11 = vld [vmem:[%s4895_s1 + $0x7a8] ss:$16 sps:$4 sm:$0xff]  }
  0xcc   :  { %2201 = vmatprep.subr.bf16.mxu0 %v3652_v12  ;;  %2605 = vmatprep.subr.bf16.mxu1 %v3655_v13  ;;  %v3720_v12 = vld [vmem:[%s4895_s1 + $0x7c4] ss:$16 sps:$4 sm:$0xff]   ;;  %v3723_v13 = vld [vmem:[%s4895_s1 + $0x7cc] ss:$16 sps:$4 sm:$0xff]  }
  0xcd   :  { %2146 = vmatprep.mubr.bf16.mxu0 %v2829_v14  ;;  %2550 = vmatprep.mubr.bf16.mxu1 %v2829_v14  ;;  %v3718_v14 = vld [vmem:[%s4895_s1 + $0x7c0] ss:$16 sps:$4 sm:$0xff]  }
  0xcf   :  { %2202 = vmatpush1.bf16.msra.mxu0 %v3650_v15  ;;  %2606 = vmatpush1.bf16.msra.mxu1 %v3653_v16  ;;  %v3721_v15 = vld [vmem:[%s4895_s1 + $0x7c8] ss:$16 sps:$4 sm:$0xff]   ;;  %v3726_v16 = vld [vmem:[%s4895_s1 + $0x7e4] ss:$16 sps:$4 sm:$0xff]  }
  0xd0   :  { %2203 = vmatprep.subr.bf16.mxu0 %v3658_v17  ;;  %2607 = vmatprep.subr.bf16.mxu1 %v3661_v18  ;;  %v3729_v17 = vld [vmem:[%s4895_s1 + $0x7ec] ss:$16 sps:$4 sm:$0xff]   ;;  %v3724_v18 = vld [vmem:[%s4895_s1 + $0x7e0] ss:$16 sps:$4 sm:$0xff]  }
  0xd2   :  { %2147 = vmatmul.mubr.bf16.gmra.mrb[8].mxu0 %v2828_v19  ;;  %2551 = vmatmul.mubr.bf16.gmra.mrb[8].mxu1 %v2828_v19  ;;  %v3727_v19 = vld [vmem:[%s4895_s1 + $0x7e8] ss:$16 sps:$4 sm:$0xff]  }
  0xd3   :  { %2204 = vmatpush1.bf16.msra.mxu0 %v3656_v22  ;;  %2608 = vmatpush1.bf16.msra.mxu1 %v3659_v23  ;;  %v2814_v22 = vcombine.low %v17_v3, %v21_v4  ;;  %v2823_v23 = vcombine.high %v25_v20, %v29_v21 }
  0xd4   :  { %2205 = vmatprep.subr.bf16.mxu0 %v3664_v24  ;;  %2609 = vmatprep.subr.bf16.mxu1 %v3667_v25  ;;  %v33_v24 = vld [vmem:[%s4896_s0 + $0x98] sm:$0xff] }
  0xd5   :  { %2156 = vmatprep.mubr.bf16.mxu0 %v2837_v26  ;;  %2560 = vmatprep.mubr.bf16.mxu1 %v2837_v26  ;;  %v37_v25 = vld [vmem:[%s4896_s0 + $0xb8] sm:$0xff]  ;;  %v2822_v26 = vcombine.low %v25_v20, %v29_v21 }
  0xd7   :  { %2206 = vmatpush1.bf16.msra.mxu0 %v3662_v27  ;;  %2610 = vmatpush1.bf16.msra.mxu1 %v3665_v28  ;;  %v2831_v27 = vcombine.high %v33_v24, %v37_v25  ;;  %v41_v28 = vld [vmem:[%s4896_s0 + $0xd8] sm:$0xff] }
  0xd8   :  { %2207 = vmatprep.subr.bf16.mxu0 %v3670_v29  ;;  %2611 = vmatprep.subr.bf16.mxu1 %v3673_v30  ;;  %v45_v29 = vld [vmem:[%s4896_s0 + $0xf8] sm:$0xff]  ;;  %v2830_v30 = vcombine.low %v33_v24, %v37_v25 }
  0xda   :  { %2157 = vmatmul.mubr.bf16.gmra.mrb[12].mxu0 %v2836_v31  ;;  %2561 = vmatmul.mubr.bf16.gmra.mrb[12].mxu1 %v2836_v31  ;;  %v2839_v31 = vcombine.high %v41_v28, %v45_v29 }
  0xdb   :  { %2208 = vmatpush1.bf16.msra.mxu0 %v3668_v34  ;;  %2612 = vmatpush1.bf16.msra.mxu1 %v3671_v35  ;;  %v2838_v34 = vcombine.low %v41_v28, %v45_v29  ;;  %v2847_v35 = vcombine.high %v49_v32, %v53_v33 }
  0xdc   :  { %2209 = vmatprep.subr.bf16.mxu0 %v3676_v36  ;;  %2613 = vmatprep.subr.bf16.mxu1 %v3679_v37  ;;  %v57_v36 = vld [vmem:[%s4896_s0 + $0x158] sm:$0xff] }
  0xdd   :  { %2166 = vmatprep.mubr.bf16.mxu0 %v2845_v38  ;;  %2570 = vmatprep.mubr.bf16.mxu1 %v2845_v38  ;;  %v61_v37 = vld [vmem:[%s4896_s0 + $0x178] sm:$0xff]  ;;  %v2846_v38 = vcombine.low %v49_v32, %v53_v33 }
  0xdf   :  { %2210 = vmatpush1.bf16.msra.mxu0 %v3674_v39  ;;  %2614 = vmatpush1.bf16.msra.mxu1 %v3677_v40  ;;  %v2855_v39 = vcombine.high %v57_v36, %v61_v37  ;;  %v65_v40 = vld [vmem:[%s4896_s0 + $0x198] sm:$0x11] }
  0xe0   :  { %2211 = vmatprep.subr.bf16.mxu0 %v3682_v41  ;;  %2615 = vmatprep.subr.bf16.mxu1 %v3685_v42  ;;  %v2854_v41 = vcombine.low %v57_v36, %v61_v37  ;;  %v2863_v42 = vcombine.high %v65_v40, %v65_v40 }
  0xe2   :  { %2167 = vmatmul.mubr.bf16.gmra.mrb[16].mxu0 %v2844_v43  ;;  %2571 = vmatmul.mubr.bf16.gmra.mrb[16].mxu1 %v2844_v43  ;;  %v2862_v43 = vcombine.low %v65_v40, %v65_v40 }
  0xe3   :  { %2212 = vmatpush1.bf16.msra.mxu0 %v3680_v46  ;;  %2616 = vmatpush1.bf16.msra.mxu1 %v3683_v47  ;;  %v326_v46 = vsub.s32 0, %v325_v45  ;;  %v334_v47 = vsub.s32 2, %v325_v45 }
  0xe4   :  { %2213 = vmatprep.subr.bf16.mxu0 %v3688_v48  ;;  %2617 = vmatprep.subr.bf16.mxu1 %v3691_v49  ;;  %v322_v48 = vld [vmem:[%s4897_s2] sm:$0xf]  ;;  %v330_v49 = vsub.s32 1, %v325_v45 }
  0xe5   :  { %2176 = vmatprep.mubr.bf16.mxu0 %v2853_v50  ;;  %2580 = vmatprep.mubr.bf16.mxu1 %v2853_v50  ;;  %v338_v50 = vsub.s32 3, %v325_v45 }
  0xe7   :  { %2214 = vmatpush1.bf16.msra.mxu0 %v3686_v51  ;;  %2618 = vmatpush1.bf16.msra.mxu1 %v3689_v52  ;;  %v4679_v51 = vrot.slane %v322_v48, %v326_v46  ;;  %v4681_v52 = vrot.slane %v322_v48, %v334_v47 }
  0xe8   :  { %2215 = vmatprep.subr.bf16.mxu0 %v3694_v53  ;;  %2619 = vmatprep.subr.bf16.mxu1 %v3697_v54  ;;  %v4683_v53 = vrot.slane %v322_v48, %v330_v49  ;;  %v4685_v54 = vrot.slane %v322_v48, %v338_v50 }
  0xea   :  { %2177 = vmatmul.mubr.bf16.gmra.mrb[20].mxu0 %v2852_v55  ;;  %2581 = vmatmul.mubr.bf16.gmra.mrb[20].mxu1 %v2852_v55 }
  0xeb   :  { %2216 = vmatpush1.bf16.msra.mxu0 %v3692_v57  ;;  %2620 = vmatpush1.bf16.msra.mxu1 %v3695_v58 }
  0xec   :  { %2217 = vmatprep.subr.bf16.mxu0 %v3700_v59  ;;  %2621 = vmatprep.subr.bf16.mxu1 %v3703_v60 }
  0xed   :  { %2186 = vmatprep.mubr.bf16.mxu0 %v2861_v61  ;;  %2590 = vmatprep.mubr.bf16.mxu1 %v2861_v61 }
  0xef   :  { %2218 = vmatpush1.bf16.msra.mxu0 %v3698_v62  ;;  %2622 = vmatpush1.bf16.msra.mxu1 %v3701_v63 }
  0xf0   :  { %2219 = vmatprep.subr.bf16.mxu0 %v3706_v0  ;;  %2623 = vmatprep.subr.bf16.mxu1 %v3709_v1 }
  0xf2   :  { %2187 = vmatmul.mubr.bf16.gmra.mrb[24].mxu0 %v2860_v2  ;;  %2591 = vmatmul.mubr.bf16.gmra.mrb[24].mxu1 %v2860_v2 }
  0xf3   :  { %2220 = vmatpush1.bf16.msra.mxu0 %v3704_v5  ;;  %2624 = vmatpush1.bf16.msra.mxu1 %v3707_v6 }
  0xf4   :  { %2221 = vmatprep.subr.bf16.mxu0 %v3712_v7  ;;  %2625 = vmatprep.subr.bf16.mxu1 %v3715_v8 }
  0xf5   :  { %2227 = vmatprep.mubr.bf16.mxu0 %v2815_v9  ;;  %2631 = vmatprep.mubr.bf16.mxu1 %v2815_v9 }
  0xf7   :  { %2222 = vmatpush1.bf16.msra.mxu0 %v3710_v10  ;;  %2626 = vmatpush1.bf16.msra.mxu1 %v3713_v11 }
  0xf8   :  { %2223 = vmatprep.subr.bf16.mxu0 %v3720_v12  ;;  %2627 = vmatprep.subr.bf16.mxu1 %v3723_v13 }
  0xfb   :  { %2224 = vmatpush1.bf16.msra.mxu0 %v3718_v14  ;;  %2628 = vmatpush1.bf16.msra.mxu1 %v3721_v15 }
  0xfc   :  { %2225 = vmatprep.subr.bf16.mxu0 %v3726_v16  ;;  %2629 = vmatprep.subr.bf16.mxu1 %v3729_v17 }
  0xff   :  { %2226 = vmatpush1.bf16.msra.mxu0 %v3724_v18  ;;  %2630 = vmatpush1.bf16.msra.mxu1 %v3727_v19 }
 0x102   :  { %2228 = vmatmul.mubr.bf16.vlgmr.msra.gmra.mrb[0].mxu0 %v2814_v22  ;;  %2632 = vmatmul.mubr.bf16.vlgmr.msra.gmra.mrb[0].mxu1 %v2814_v22 }
 0x103   :  { %2237 = vmatprep.mubr.bf16.mxu0 %v2823_v23  ;;  %2641 = vmatprep.mubr.bf16.mxu1 %v2823_v23 }
 0x10a   :  { %2238 = vmatmul.mubr.bf16.gmra.mrb[4].mxu0 %v2822_v26  ;;  %2642 = vmatmul.mubr.bf16.gmra.mrb[4].mxu1 %v2822_v26 }
 0x10b   :  { %2247 = vmatprep.mubr.bf16.mxu0 %v2831_v27  ;;  %2651 = vmatprep.mubr.bf16.mxu1 %v2831_v27 }
 0x112   :  { %2248 = vmatmul.mubr.bf16.gmra.mrb[8].mxu0 %v2830_v30  ;;  %2652 = vmatmul.mubr.bf16.gmra.mrb[8].mxu1 %v2830_v30 }
 0x113   :  { %2257 = vmatprep.mubr.bf16.mxu0 %v2839_v31  ;;  %2661 = vmatprep.mubr.bf16.mxu1 %v2839_v31 }
 0x11a   :  { %2258 = vmatmul.mubr.bf16.gmra.mrb[12].mxu0 %v2838_v34  ;;  %2662 = vmatmul.mubr.bf16.gmra.mrb[12].mxu1 %v2838_v34 }
 0x11b   :  { %2267 = vmatprep.mubr.bf16.mxu0 %v2847_v35  ;;  %2671 = vmatprep.mubr.bf16.mxu1 %v2847_v35 }
 0x122   :  { %2268 = vmatmul.mubr.bf16.gmra.mrb[16].mxu0 %v2846_v38  ;;  %2672 = vmatmul.mubr.bf16.gmra.mrb[16].mxu1 %v2846_v38 }
 0x123   :  { %2277 = vmatprep.mubr.bf16.mxu0 %v2855_v39  ;;  %2681 = vmatprep.mubr.bf16.mxu1 %v2855_v39 }
 0x12a   :  { %2278 = vmatmul.mubr.bf16.gmra.mrb[20].mxu0 %v2854_v41  ;;  %2682 = vmatmul.mubr.bf16.gmra.mrb[20].mxu1 %v2854_v41 }
 0x12b   :  { %2287 = vmatprep.mubr.bf16.mxu0 %v2863_v42  ;;  %2691 = vmatprep.mubr.bf16.mxu1 %v2863_v42 }
 0x132   :  { %2288 = vmatmul.mubr.bf16.gmra.mrb[24].mxu0 %v2862_v43  ;;  %2692 = vmatmul.mubr.bf16.gmra.mrb[24].mxu1 %v2862_v43 }
 0x1d5   :  { %v2229_v55 = vpop.f32.mrb[0].mxu0  ;;  %v2633_v56 = vpop.f32.mrb[0].mxu1 }
 0x1d6   :  { %v3120_v57 = vadd.f32 %v2229_v55, %v4679_v51  ;;  %v3146_v58 = vadd.f32 %v2633_v56, %v4681_v52  ;;  %v2231_v59 = vpop.f32.mrb[1].mxu0  ;;  %v2635_v60 = vpop.f32.mrb[1].mxu1 }
 0x1d7   :  { %v3121_v61 = vadd.f32 %v2231_v59, %v4683_v53  ;;  %v3147_v62 = vadd.f32 %v2635_v60, %v4685_v54  ;;  %v2233_v63 = vpop.f32.mrb[2].mxu0  ;;  %v2637_v0 = vpop.f32.mrb[2].mxu1 }
 0x1d8   :  { %v2700_v1 = vmax.f32 %v3120_v57, 0.0  ;;  %v2702_v2 = vmax.f32 %v3146_v58, 0.0  ;;  %v3122_v3 = vadd.f32 %v2233_v63, %v4679_v51  ;;  %v3148_v4 = vadd.f32 %v2637_v0, %v4681_v52  ;;  %v2235_v5 = vpop.f32.mrb[3].mxu0  ;;  %v2639_v6 = vpop.f32.mrb[3].mxu1 }
 0x1d9   :  { %v2701_v7 = vmax.f32 %v3121_v61, 0.0  ;;  %v2703_v8 = vmax.f32 %v3147_v62, 0.0  ;;  %v3123_v9 = vadd.f32 %v2235_v5, %v4683_v53  ;;  %v3149_v10 = vadd.f32 %v2639_v6, %v4685_v54 }
 0x1da   :  { %2752 = vst [vmem:[%s4898_s3] sm:$0xff] %v2700_v1  ;;  %2754 = vst [vmem:[%s4898_s3 + $0x10] sm:$0xff] %v2702_v2  ;;  %v2704_v11 = vmax.f32 %v3122_v3, 0.0  ;;  %v2706_v12 = vmax.f32 %v3148_v4, 0.0 }
 0x1db   :  { %2753 = vst [vmem:[%s4898_s3 + $0x8] sm:$0xff] %v2701_v7  ;;  %2755 = vst [vmem:[%s4898_s3 + $0x18] sm:$0xff] %v2703_v8  ;;  %v2705_v13 = vmax.f32 %v3123_v9, 0.0  ;;  %v2707_v14 = vmax.f32 %v3149_v10, 0.0 }
 0x1dc   :  { %2756 = vst [vmem:[%s4898_s3 + $0x20] sm:$0xff] %v2704_v11  ;;  %2758 = vst [vmem:[%s4898_s3 + $0x30] sm:$0xff] %v2706_v12 }
 0x1dd   :  { %2757 = vst [vmem:[%s4898_s3 + $0x28] sm:$0xff] %v2705_v13  ;;  %2759 = vst [vmem:[%s4898_s3 + $0x38] sm:$0xff] %v2707_v14  ;;  %v2239_v15 = vpop.f32.mrb[4].mxu0  ;;  %v2643_v16 = vpop.f32.mrb[4].mxu1 }
 0x1de   :  { %v3124_v17 = vadd.f32 %v2239_v15, %v4679_v51  ;;  %v3150_v18 = vadd.f32 %v2643_v16, %v4681_v52  ;;  %v2241_v19 = vpop.f32.mrb[5].mxu0  ;;  %v2645_v20 = vpop.f32.mrb[5].mxu1 }
 0x1df   :  { %v3125_v21 = vadd.f32 %v2241_v19, %v4683_v53  ;;  %v3151_v22 = vadd.f32 %v2645_v20, %v4685_v54  ;;  %v2243_v23 = vpop.f32.mrb[6].mxu0  ;;  %v2647_v24 = vpop.f32.mrb[6].mxu1 }
 0x1e0   :  { %v2708_v25 = vmax.f32 %v3124_v17, 0.0  ;;  %v2710_v26 = vmax.f32 %v3150_v18, 0.0  ;;  %v3126_v27 = vadd.f32 %v2243_v23, %v4679_v51  ;;  %v3152_v28 = vadd.f32 %v2647_v24, %v4681_v52  ;;  %v2245_v29 = vpop.f32.mrb[7].mxu0  ;;  %v2649_v30 = vpop.f32.mrb[7].mxu1 }
 0x1e1   :  { %v2709_v31 = vmax.f32 %v3125_v21, 0.0  ;;  %v2711_v32 = vmax.f32 %v3151_v22, 0.0  ;;  %v3127_v33 = vadd.f32 %v2245_v29, %v4683_v53  ;;  %v3153_v34 = vadd.f32 %v2649_v30, %v4685_v54 }
 0x1e2   :  { %2760 = vst [vmem:[%s4898_s3 + $0x40] sm:$0xff] %v2708_v25  ;;  %2762 = vst [vmem:[%s4898_s3 + $0x50] sm:$0xff] %v2710_v26  ;;  %v2712_v35 = vmax.f32 %v3126_v27, 0.0  ;;  %v2714_v36 = vmax.f32 %v3152_v28, 0.0 }
 0x1e3   :  { %2761 = vst [vmem:[%s4898_s3 + $0x48] sm:$0xff] %v2709_v31  ;;  %2763 = vst [vmem:[%s4898_s3 + $0x58] sm:$0xff] %v2711_v32  ;;  %v2713_v37 = vmax.f32 %v3127_v33, 0.0  ;;  %v2715_v38 = vmax.f32 %v3153_v34, 0.0 }
 0x1e4   :  { %2764 = vst [vmem:[%s4898_s3 + $0x60] sm:$0xff] %v2712_v35  ;;  %2766 = vst [vmem:[%s4898_s3 + $0x70] sm:$0xff] %v2714_v36 }
 0x1e5   :  { %2765 = vst [vmem:[%s4898_s3 + $0x68] sm:$0xff] %v2713_v37  ;;  %2767 = vst [vmem:[%s4898_s3 + $0x78] sm:$0xff] %v2715_v38  ;;  %v2249_v39 = vpop.f32.mrb[8].mxu0  ;;  %v2653_v40 = vpop.f32.mrb[8].mxu1 }
 0x1e6   :  { %v3128_v41 = vadd.f32 %v2249_v39, %v4679_v51  ;;  %v3154_v42 = vadd.f32 %v2653_v40, %v4681_v52  ;;  %v2251_v43 = vpop.f32.mrb[9].mxu0  ;;  %v2655_v44 = vpop.f32.mrb[9].mxu1 }
 0x1e7   :  { %v3129_v45 = vadd.f32 %v2251_v43, %v4683_v53  ;;  %v3155_v46 = vadd.f32 %v2655_v44, %v4685_v54  ;;  %v2253_v47 = vpop.f32.mrb[10].mxu0  ;;  %v2657_v48 = vpop.f32.mrb[10].mxu1 }
 0x1e8   :  { %v2716_v49 = vmax.f32 %v3128_v41, 0.0  ;;  %v2718_v50 = vmax.f32 %v3154_v42, 0.0  ;;  %v3130_v55 = vadd.f32 %v2253_v47, %v4679_v51  ;;  %v3156_v56 = vadd.f32 %v2657_v48, %v4681_v52  ;;  %v2255_v57 = vpop.f32.mrb[11].mxu0  ;;  %v2659_v58 = vpop.f32.mrb[11].mxu1 }
 0x1e9   :  { %v2717_v59 = vmax.f32 %v3129_v45, 0.0  ;;  %v2719_v60 = vmax.f32 %v3155_v46, 0.0  ;;  %v3131_v61 = vadd.f32 %v2255_v57, %v4683_v53  ;;  %v3157_v62 = vadd.f32 %v2659_v58, %v4685_v54 }
 0x1ea   :  { %2768 = vst [vmem:[%s4898_s3 + $0x80] sm:$0xff] %v2716_v49  ;;  %2770 = vst [vmem:[%s4898_s3 + $0x90] sm:$0xff] %v2718_v50  ;;  %v2720_v63 = vmax.f32 %v3130_v55, 0.0  ;;  %v2722_v0 = vmax.f32 %v3156_v56, 0.0 }
 0x1eb   :  { %2769 = vst [vmem:[%s4898_s3 + $0x88] sm:$0xff] %v2717_v59  ;;  %2771 = vst [vmem:[%s4898_s3 + $0x98] sm:$0xff] %v2719_v60  ;;  %v2721_v1 = vmax.f32 %v3131_v61, 0.0  ;;  %v2723_v2 = vmax.f32 %v3157_v62, 0.0 }
 0x1ec   :  { %2772 = vst [vmem:[%s4898_s3 + $0xa0] sm:$0xff] %v2720_v63  ;;  %2774 = vst [vmem:[%s4898_s3 + $0xb0] sm:$0xff] %v2722_v0 }
 0x1ed   :  { %2773 = vst [vmem:[%s4898_s3 + $0xa8] sm:$0xff] %v2721_v1  ;;  %2775 = vst [vmem:[%s4898_s3 + $0xb8] sm:$0xff] %v2723_v2  ;;  %v2259_v3 = vpop.f32.mrb[12].mxu0  ;;  %v2663_v4 = vpop.f32.mrb[12].mxu1 }
 0x1ee   :  { %v3132_v5 = vadd.f32 %v2259_v3, %v4679_v51  ;;  %v3158_v6 = vadd.f32 %v2663_v4, %v4681_v52  ;;  %v2261_v7 = vpop.f32.mrb[13].mxu0  ;;  %v2665_v8 = vpop.f32.mrb[13].mxu1 }
 0x1ef   :  { %v3133_v9 = vadd.f32 %v2261_v7, %v4683_v53  ;;  %v3159_v10 = vadd.f32 %v2665_v8, %v4685_v54  ;;  %v2263_v11 = vpop.f32.mrb[14].mxu0  ;;  %v2667_v12 = vpop.f32.mrb[14].mxu1 }
 0x1f0   :  { %v2724_v13 = vmax.f32 %v3132_v5, 0.0  ;;  %v2726_v14 = vmax.f32 %v3158_v6, 0.0  ;;  %v3134_v15 = vadd.f32 %v2263_v11, %v4679_v51  ;;  %v3160_v16 = vadd.f32 %v2667_v12, %v4681_v52  ;;  %v2265_v17 = vpop.f32.mrb[15].mxu0  ;;  %v2669_v18 = vpop.f32.mrb[15].mxu1 }
 0x1f1   :  { %v2725_v19 = vmax.f32 %v3133_v9, 0.0  ;;  %v2727_v20 = vmax.f32 %v3159_v10, 0.0  ;;  %v3135_v21 = vadd.f32 %v2265_v17, %v4683_v53  ;;  %v3161_v22 = vadd.f32 %v2669_v18, %v4685_v54 }
 0x1f2   :  { %2776 = vst [vmem:[%s4898_s3 + $0xc0] sm:$0xff] %v2724_v13  ;;  %2778 = vst [vmem:[%s4898_s3 + $0xd0] sm:$0xff] %v2726_v14  ;;  %v2728_v23 = vmax.f32 %v3134_v15, 0.0  ;;  %v2730_v24 = vmax.f32 %v3160_v16, 0.0 }
 0x1f3   :  { %2777 = vst [vmem:[%s4898_s3 + $0xc8] sm:$0xff] %v2725_v19  ;;  %2779 = vst [vmem:[%s4898_s3 + $0xd8] sm:$0xff] %v2727_v20  ;;  %v2729_v25 = vmax.f32 %v3135_v21, 0.0  ;;  %v2731_v26 = vmax.f32 %v3161_v22, 0.0 }
 0x1f4   :  { %2780 = vst [vmem:[%s4898_s3 + $0xe0] sm:$0xff] %v2728_v23  ;;  %2782 = vst [vmem:[%s4898_s3 + $0xf0] sm:$0xff] %v2730_v24 }
 0x1f5   :  { %2781 = vst [vmem:[%s4898_s3 + $0xe8] sm:$0xff] %v2729_v25  ;;  %2783 = vst [vmem:[%s4898_s3 + $0xf8] sm:$0xff] %v2731_v26  ;;  %v2269_v27 = vpop.f32.mrb[16].mxu0  ;;  %v2673_v28 = vpop.f32.mrb[16].mxu1 }
 0x1f6   :  { %v3136_v29 = vadd.f32 %v2269_v27, %v4679_v51  ;;  %v3162_v30 = vadd.f32 %v2673_v28, %v4681_v52  ;;  %v2271_v31 = vpop.f32.mrb[17].mxu0  ;;  %v2675_v32 = vpop.f32.mrb[17].mxu1 }
 0x1f7   :  { %v3137_v33 = vadd.f32 %v2271_v31, %v4683_v53  ;;  %v3163_v34 = vadd.f32 %v2675_v32, %v4685_v54  ;;  %v2273_v35 = vpop.f32.mrb[18].mxu0  ;;  %v2677_v36 = vpop.f32.mrb[18].mxu1 }
 0x1f8   :  { %v2732_v37 = vmax.f32 %v3136_v29, 0.0  ;;  %v2734_v38 = vmax.f32 %v3162_v30, 0.0  ;;  %v3138_v39 = vadd.f32 %v2273_v35, %v4679_v51  ;;  %v3164_v40 = vadd.f32 %v2677_v36, %v4681_v52  ;;  %v2275_v41 = vpop.f32.mrb[19].mxu0  ;;  %v2679_v42 = vpop.f32.mrb[19].mxu1 }
 0x1f9   :  { %v2733_v43 = vmax.f32 %v3137_v33, 0.0  ;;  %v2735_v44 = vmax.f32 %v3163_v34, 0.0  ;;  %v3139_v45 = vadd.f32 %v2275_v41, %v4683_v53  ;;  %v3165_v46 = vadd.f32 %v2679_v42, %v4685_v54 }
 0x1fa   :  { %2784 = vst [vmem:[%s4898_s3 + $0x100] sm:$0xff] %v2732_v37  ;;  %2786 = vst [vmem:[%s4898_s3 + $0x110] sm:$0xff] %v2734_v38  ;;  %v2736_v47 = vmax.f32 %v3138_v39, 0.0  ;;  %v2738_v48 = vmax.f32 %v3164_v40, 0.0 }
 0x1fb   :  { %2785 = vst [vmem:[%s4898_s3 + $0x108] sm:$0xff] %v2733_v43  ;;  %2787 = vst [vmem:[%s4898_s3 + $0x118] sm:$0xff] %v2735_v44  ;;  %v2737_v49 = vmax.f32 %v3139_v45, 0.0  ;;  %v2739_v50 = vmax.f32 %v3165_v46, 0.0 }
 0x1fc   :  { %2788 = vst [vmem:[%s4898_s3 + $0x120] sm:$0xff] %v2736_v47  ;;  %2790 = vst [vmem:[%s4898_s3 + $0x130] sm:$0xff] %v2738_v48 }
 0x1fd   :  { %2789 = vst [vmem:[%s4898_s3 + $0x128] sm:$0xff] %v2737_v49  ;;  %2791 = vst [vmem:[%s4898_s3 + $0x138] sm:$0xff] %v2739_v50  ;;  %v2279_v55 = vpop.f32.mrb[20].mxu0  ;;  %v2683_v56 = vpop.f32.mrb[20].mxu1 }
 0x1fe   :  { %v3140_v57 = vadd.f32 %v2279_v55, %v4679_v51  ;;  %v3166_v58 = vadd.f32 %v2683_v56, %v4681_v52  ;;  %v2281_v59 = vpop.f32.mrb[21].mxu0  ;;  %v2685_v60 = vpop.f32.mrb[21].mxu1 }
 0x1ff   :  { %v3141_v61 = vadd.f32 %v2281_v59, %v4683_v53  ;;  %v3167_v62 = vadd.f32 %v2685_v60, %v4685_v54  ;;  %v2283_v63 = vpop.f32.mrb[22].mxu0  ;;  %v2687_v0 = vpop.f32.mrb[22].mxu1 }
 0x200   :  { %v2740_v1 = vmax.f32 %v3140_v57, 0.0  ;;  %v2742_v2 = vmax.f32 %v3166_v58, 0.0  ;;  %v3142_v3 = vadd.f32 %v2283_v63, %v4679_v51  ;;  %v3168_v4 = vadd.f32 %v2687_v0, %v4681_v52  ;;  %v2285_v5 = vpop.f32.mrb[23].mxu0  ;;  %v2689_v6 = vpop.f32.mrb[23].mxu1 }
 0x201   :  { %v2741_v7 = vmax.f32 %v3141_v61, 0.0  ;;  %v2743_v8 = vmax.f32 %v3167_v62, 0.0  ;;  %v3143_v9 = vadd.f32 %v2285_v5, %v4683_v53  ;;  %v3169_v10 = vadd.f32 %v2689_v6, %v4685_v54 }
 0x202   :  { %2792 = vst [vmem:[%s4898_s3 + $0x140] sm:$0xff] %v2740_v1  ;;  %2794 = vst [vmem:[%s4898_s3 + $0x150] sm:$0xff] %v2742_v2  ;;  %v2744_v11 = vmax.f32 %v3142_v3, 0.0  ;;  %v2746_v12 = vmax.f32 %v3168_v4, 0.0 }
 0x203   :  { %2793 = vst [vmem:[%s4898_s3 + $0x148] sm:$0xff] %v2741_v7  ;;  %2795 = vst [vmem:[%s4898_s3 + $0x158] sm:$0xff] %v2743_v8  ;;  %v2745_v13 = vmax.f32 %v3143_v9, 0.0  ;;  %v2747_v14 = vmax.f32 %v3169_v10, 0.0 }
 0x204   :  { %2796 = vst [vmem:[%s4898_s3 + $0x160] sm:$0xff] %v2744_v11  ;;  %2798 = vst [vmem:[%s4898_s3 + $0x170] sm:$0xff] %v2746_v12 }
 0x205   :  { %2797 = vst [vmem:[%s4898_s3 + $0x168] sm:$0xff] %v2745_v13  ;;  %2799 = vst [vmem:[%s4898_s3 + $0x178] sm:$0xff] %v2747_v14  ;;  %v2289_v15 = vpop.f32.mrb[24].mxu0  ;;  %v2693_v16 = vpop.f32.mrb[24].mxu1 }
 0x206   :  { %v3144_v17 = vadd.f32 %v2289_v15, %v4679_v51  ;;  %v3170_v18 = vadd.f32 %v2693_v16, %v4681_v52  ;;  %v2291_v19 = vpop.f32.mrb[25].mxu0  ;;  %v2695_v20 = vpop.f32.mrb[25].mxu1 }
 0x207   :  { %v3145_v21 = vadd.f32 %v2291_v19, %v4683_v53  ;;  %v3171_v22 = vadd.f32 %v2695_v20, %v4685_v54  ;;  %v2293_v23 = vpop.f32.mrb[26].mxu0  ;;  %v2697_v24 = vpop.f32.mrb[26].mxu1 }
 0x208   :  { %v2748_v25 = vmax.f32 %v3144_v17, 0.0  ;;  %v2750_v26 = vmax.f32 %v3170_v18, 0.0  ;;  %v2294_v27 = vpop.f32.mrb[27].mxu0  ;;  %v2698_v28 = vpop.f32.mrb[27].mxu1 }
 0x209   :  { %v2749_v29 = vmax.f32 %v3145_v21, 0.0  ;;  %v2751_v30 = vmax.f32 %v3171_v22, 0.0 }
 0x20a   :  { %2800 = vst [vmem:[%s4898_s3 + $0x180] sm:$0x3] %v2748_v25  ;;  %2802 = vst [vmem:[%s4898_s3 + $0x190] sm:$0x3] %v2750_v26 }
 0x20b   :  { %2801 = vst [vmem:[%s4898_s3 + $0x188] sm:$0x3] %v2749_v29  ;;  %2803 = vst [vmem:[%s4898_s3 + $0x198] sm:$0x3] %v2751_v30 }

// kernel: tile.28
= control target key start
LH: loop header
LB: loop body
LE: loop exit
PB: predicated region body
PF: predicated region fallthrough
CT: control target
= control target key end

     0   :  { %s22_s0 = inlined_call_operand.vmem [shape: f32[64], index: 0, kind: input, shape index: {}]   ;;  %s23_s1 = inlined_call_operand.vmem [shape: f32[4,64], index: 1, kind: output, shape index: {}]  }
   0x1   :  { %v4_v0 = vld [vmem:[%s22_s0] ss:$0 sm:$0xff] }
   0x2   :  { %5 = vst [vmem:[%s23_s1] sm:$0xf] %v4_v0 }

// kernel: tile.29
= control target key start
LH: loop header
LB: loop body
LE: loop exit
PB: predicated region body
PF: predicated region fallthrough
CT: control target
= control target key end

     0   :  { %s6_s8 = smov 3  ;;  %vm8_vm0 = vcmask 523264   ;;  %s30_s9 = smov 64   ;;  %vm15_vm1 = vcmask 1048064   ;;  %s50_s0 = inlined_call_operand.vmem [shape: f32[4,64], index: 0, kind: input, shape index: {}]   ;;  %s51_s1 = inlined_call_operand.vmem [shape: f32[1,256], index: 1, kind: output, shape index: {}]  }
   0x1   :  { %v4_v0 = vld [vmem:[%s50_s0] sm:$0xf]  ;;  %s11_s0 = smov 3 }
   0x2   :  { %5 = vst [vmem:[#allocation1] sm:$0xf] %v4_v0 }
   0x9   :  { %v12_v1 = vld [vmem:[#allocation1 + $0x1] ss:$2 sm:%s11_s0]   ;;  %v7_v2 = vld [vmem:[#allocation1] ss:$2 sm:%s6_s8]  }
   0xa   :  { %13 = vrot.lane.b32.xlu0 %v12_v1, %s30_s9  ;;  %9 = vst.msk [vmem:[#allocation0] ss:$8 sm:$0x3] %vm8_vm0, %v7_v2  }
  0x7c   :  { %v14_v3 = vpop.permute.xlu0 %13  }
  0x7d   :  { %16 = vst.msk [vmem:[#allocation0] ss:$8 sm:$0x3] %vm15_vm1, %v14_v3  }
  0x84   :  { %v20_v4 = vld [vmem:[#allocation0] sm:$0x1]  ;;  %v24_v5 = vld [vmem:[#allocation0 + $0x8] sm:$0x1] }
  0x85   :  { %22 = vst [vmem:[%s51_s1] sm:$0x1] %v20_v4  ;;  %28 = vst [vmem:[%s51_s1 + $0x1] sm:$0x1] %v24_v5 }

// kernel: vae_forward.17
= control target key start
LH: loop header
LB: loop body
LE: loop exit
PB: predicated region body
PF: predicated region fallthrough
CT: control target
= control target key end

     0   :  { %s2181_s12 = smov 0   ;;  %s2183_s13 = smov 0   ;;  %s2619_s0 = inlined_call_operand.vmem [shape: bf16[512,512], index: 0, kind: input, shape index: {}]   ;;  %s2620_s1 = inlined_call_operand.vmem [shape: bf16[512,256], index: 1, kind: input, shape index: {}]   ;;  %s2621_s2 = inlined_call_operand.vmem [shape: f32[1,256], index: 2, kind: input, shape index: {}]   ;;  %s2622_s3 = inlined_call_operand.vmem [shape: f32[512,256], index: 3, kind: output, shape index: {}]  }
   0x1   :  { %s2185_s14 = smov 0  }
   0x2 LB: > { %s25_s15 = sadd.s32 1, %s2155_s13  ;;  %p1654_p0 = scmp.ge.s32.totalorder %s2159_s14, 1  ;;  %s2159_s14 = sphi %s2185_s14, %s13_s14   ;;  %s2155_s13 = sphi %s2183_s13, %s2624_s13   ;;  %s2151_s12 = sphi %s2181_s12, %s2623_s12  }
   0x3   : > { %p27_p1 = scmp.ge.s32.totalorder %s25_s15, 2  ;;  %p174_p2 = scmp.lt.s32.totalorder %s2159_s14, 3 }
   0x5   : > { %s2626_s15 = smov (%p27_p1, %s25_s15), 0  ;;  %p175_p3 = pnand %p1654_p0, %p174_p2 }
   0x6   : > { %v1945_v0 = vld [vmem:[%s2620_s1 + $0x4] ss:$8 sps:$4 sm:$0xff] (!%p175_p3)   ;;  %v1949_v2 = vld [vmem:[%s2620_s1] ss:$8 sps:$4 sm:$0xff] (!%p175_p3)   ;;  %v1951_v4 = vld [vmem:[%s2620_s1 + $0x14] ss:$8 sps:$4 sm:$0xff] (!%p175_p3)  }
   0x7   : > { %178 = sbr.rel (%p175_p3) target bundleno = 413 (0x19d), region = 32  ;;  %v1947_v1 = vld [vmem:[%s2620_s1 + $0x104] ss:$8 sps:$4 sm:$0xff] (!%p175_p3)   ;;  %1023 = vmatprep.subr.bf16.mxu1 (!%p175_p3), %v1945_v0  ;;  %v1950_v3 = vld [vmem:[%s2620_s1 + $0x100] ss:$8 sps:$4 sm:$0xff] (!%p175_p3)   ;;  %s1655_s30 = sshll.u32 (!%p175_p3), %s2151_s12, 5 }
   0x8   : > { %1216 = vmatprep.subr.bf16.mxu0 (!%p175_p3), %v1947_v1  ;;  %1024 = vmatpush1.bf16.msra.mxu1 (!%p175_p3), %v1949_v2  ;;  %v1953_v5 = vld [vmem:[%s2620_s1 + $0x114] ss:$8 sps:$4 sm:$0xff] (!%p175_p3)   ;;  %v1955_v6 = vld [vmem:[%s2620_s1 + $0x10] ss:$8 sps:$4 sm:$0xff] (!%p175_p3)   ;;  %v1957_v8 = vld [vmem:[%s2620_s1 + $0x24] ss:$8 sps:$4 sm:$0xff] (!%p175_p3)  }
   0x9   : > { %1217 = vmatpush1.bf16.msra.mxu0 (!%p175_p3), %v1950_v3  ;;  %1025 = vmatprep.subr.bf16.mxu1 (!%p175_p3), %v1951_v4  ;;  %v1956_v7 = vld [vmem:[%s2620_s1 + $0x110] ss:$8 sps:$4 sm:$0xff] (!%p175_p3)   ;;  %v1959_v9 = vld [vmem:[%s2620_s1 + $0x124] ss:$8 sps:$4 sm:$0xff] (!%p175_p3)   ;;  %v1961_v10 = vld [vmem:[%s2620_s1 + $0x20] ss:$8 sps:$4 sm:$0xff] (!%p175_p3)  }
   0xa   : > { %1218 = vmatprep.subr.bf16.mxu0 (!%p175_p3), %v1953_v5  ;;  %v1962_v11 = vld [vmem:[%s2620_s1 + $0x120] ss:$8 sps:$4 sm:$0xff] (!%p175_p3)   ;;  %v1963_v12 = vld [vmem:[%s2620_s1 + $0x34] ss:$8 sps:$4 sm:$0xff] (!%p175_p3)   ;;  %v1967_v14 = vld [vmem:[%s2620_s1 + $0x30] ss:$8 sps:$4 sm:$0xff] (!%p175_p3)  }
   0xb   : > { %v1965_v13 = vld [vmem:[%s2620_s1 + $0x134] ss:$8 sps:$4 sm:$0xff] (!%p175_p3)   ;;  %v1968_v15 = vld [vmem:[%s2620_s1 + $0x130] ss:$8 sps:$4 sm:$0xff] (!%p175_p3)   ;;  %v1969_v16 = vld [vmem:[%s2620_s1 + $0x44] ss:$8 sps:$4 sm:$0xff] (!%p175_p3)  }
   0xc   : > { %1026 = vmatpush1.bf16.msra.mxu1 (!%p175_p3), %v1955_v6  ;;  %v1971_v17 = vld [vmem:[%s2620_s1 + $0x144] ss:$8 sps:$4 sm:$0xff] (!%p175_p3)   ;;  %v1973_v18 = vld [vmem:[%s2620_s1 + $0x40] ss:$8 sps:$4 sm:$0xff] (!%p175_p3)   ;;  %v1975_v20 = vld [vmem:[%s2620_s1 + $0x54] ss:$8 sps:$4 sm:$0xff] (!%p175_p3)  }
   0xd   : > { %1219 = vmatpush1.bf16.msra.mxu0 (!%p175_p3), %v1956_v7  ;;  %1027 = vmatprep.subr.bf16.mxu1 (!%p175_p3), %v1957_v8  ;;  %v1974_v19 = vld [vmem:[%s2620_s1 + $0x140] ss:$8 sps:$4 sm:$0xff] (!%p175_p3)   ;;  %v1977_v21 = vld [vmem:[%s2620_s1 + $0x154] ss:$8 sps:$4 sm:$0xff] (!%p175_p3)   ;;  %v1979_v22 = vld [vmem:[%s2620_s1 + $0x50] ss:$8 sps:$4 sm:$0xff] (!%p175_p3)  }
   0xe   : > { %1220 = vmatprep.subr.bf16.mxu0 %v1959_v9  ;;  %v1980_v23 = vld [vmem:[%s2620_s1 + $0x150] ss:$8 sps:$4 sm:$0xff]   ;;  %v1981_v24 = vld [vmem:[%s2620_s1 + $0x64] ss:$8 sps:$4 sm:$0xff]   ;;  %v1985_v26 = vld [vmem:[%s2620_s1 + $0x60] ss:$8 sps:$4 sm:$0xff]  }
   0xf   : > { %v1983_v25 = vld [vmem:[%s2620_s1 + $0x164] ss:$8 sps:$4 sm:$0xff]   ;;  %v1986_v27 = vld [vmem:[%s2620_s1 + $0x160] ss:$8 sps:$4 sm:$0xff]   ;;  %v1987_v28 = vld [vmem:[%s2620_s1 + $0x74] ss:$8 sps:$4 sm:$0xff]  }
  0x10   : > { %1028 = vmatpush1.bf16.msra.mxu1 %v1961_v10  ;;  %v1989_v29 = vld [vmem:[%s2620_s1 + $0x174] ss:$8 sps:$4 sm:$0xff]   ;;  %v1991_v30 = vld [vmem:[%s2620_s1 + $0x70] ss:$8 sps:$4 sm:$0xff]   ;;  %v1993_v32 = vld [vmem:[%s2620_s1 + $0x84] ss:$8 sps:$4 sm:$0xff]  }
  0x11   : > { %1221 = vmatpush1.bf16.msra.mxu0 %v1962_v11  ;;  %1029 = vmatprep.subr.bf16.mxu1 %v1963_v12  ;;  %v1992_v31 = vld [vmem:[%s2620_s1 + $0x170] ss:$8 sps:$4 sm:$0xff]   ;;  %v1995_v33 = vld [vmem:[%s2620_s1 + $0x184] ss:$8 sps:$4 sm:$0xff]   ;;  %p214_p4 = scmp.lt.s32.totalorder %s1655_s30, 63 }
  0x12   : > { %1222 = vmatprep.subr.bf16.mxu0 %v1965_v13  ;;  %v1997_v34 = vld [vmem:[%s2620_s1 + $0x80] ss:$8 sps:$4 sm:$0xff]   ;;  %v1999_v36 = vld [vmem:[%s2620_s1 + $0x94] ss:$8 sps:$4 sm:$0xff]   ;;  %v2003_v38 = vld [vmem:[%s2620_s1 + $0x90] ss:$8 sps:$4 sm:$0xff]  }
  0x13   : > { %v1998_v35 = vld [vmem:[%s2620_s1 + $0x180] ss:$8 sps:$4 sm:$0xff]   ;;  %v2001_v37 = vld [vmem:[%s2620_s1 + $0x194] ss:$8 sps:$4 sm:$0xff]   ;;  %s2628_s30 = smov (!%p214_p4, %s1655_s30), 63 }
  0x14   : > { %1030 = vmatpush1.bf16.msra.mxu1 %v1967_v14  ;;  %v2004_v39 = vld [vmem:[%s2620_s1 + $0x190] ss:$8 sps:$4 sm:$0xff]   ;;  %v2005_v40 = vld [vmem:[%s2620_s1 + $0xa4] ss:$8 sps:$4 sm:$0xff]   ;;  %s1791_s5 = sshll.u32 %s2628_s30, 4 }
  0x15   : > { %1223 = vmatpush1.bf16.msra.mxu0 %v1968_v15  ;;  %1031 = vmatprep.subr.bf16.mxu1 %v1969_v16  ;;  %v2007_v41 = vld [vmem:[%s2620_s1 + $0x1a4] ss:$8 sps:$4 sm:$0xff]   ;;  %v2009_v42 = vld [vmem:[%s2620_s1 + $0xa0] ss:$8 sps:$4 sm:$0xff]   ;;  %v2011_v44 = vld [vmem:[%s2620_s1 + $0xb4] ss:$8 sps:$4 sm:$0xff]   ;;  %s2345_s17 = scalar_lea.vmem %s2619_s0, %s1791_s5  ;;  %s2483_s16 = scalar_lea.vmem %s2622_s3, %s1791_s5 }
  0x16   : > { %1224 = vmatprep.subr.bf16.mxu0 %v1971_v17  ;;  %v2010_v43 = vld [vmem:[%s2620_s1 + $0x1a0] ss:$8 sps:$4 sm:$0xff]   ;;  %v2013_v45 = vld [vmem:[%s2620_s1 + $0x1b4] ss:$8 sps:$4 sm:$0xff]   ;;  %v2015_v46 = vld [vmem:[%s2620_s1 + $0xb0] ss:$8 sps:$4 sm:$0xff]  }
  0x17   : > { %v2016_v47 = vld [vmem:[%s2620_s1 + $0x1b0] ss:$8 sps:$4 sm:$0xff]   ;;  %v2017_v48 = vld [vmem:[%s2620_s1 + $0xc4] ss:$8 sps:$4 sm:$0xff]   ;;  %v2021_v52 = vld [vmem:[%s2620_s1 + $0xc0] ss:$8 sps:$4 sm:$0xff]  }
  0x18   : > { %1032 = vmatpush1.bf16.msra.mxu1 %v1973_v18  ;;  %v2043_v49 = vld [vmem:[%s2345_s17 + $0x4] ss:$16 sps:$4 sm:$0xff]   ;;  %v2046_v51 = vld [vmem:[%s2345_s17 + $0xc] ss:$16 sps:$4 sm:$0xff]   ;;  %v2022_v53 = vld [vmem:[%s2620_s1 + $0x1c0] ss:$8 sps:$4 sm:$0xff]  }
  0x19   : > { %1225 = vmatpush1.bf16.msra.mxu0 %v1974_v19  ;;  %1033 = vmatprep.subr.bf16.mxu1 %v1975_v20  ;;  %v2019_v50 = vld [vmem:[%s2620_s1 + $0x1c4] ss:$8 sps:$4 sm:$0xff]   ;;  %v2023_v54 = vld [vmem:[%s2620_s1 + $0xd4] ss:$8 sps:$4 sm:$0xff]   ;;  %v2027_v56 = vld [vmem:[%s2620_s1 + $0xd0] ss:$8 sps:$4 sm:$0xff]  }
  0x1a   : > { %1226 = vmatprep.subr.bf16.mxu0 %v1977_v21  ;;  %1055 = vmatprep.mubr.bf16.mxu1 %v2043_v49  ;;  %v2025_v55 = vld [vmem:[%s2620_s1 + $0x1d4] ss:$8 sps:$4 sm:$0xff]   ;;  %v2028_v57 = vld [vmem:[%s2620_s1 + $0x1d0] ss:$8 sps:$4 sm:$0xff]   ;;  %v2029_v58 = vld [vmem:[%s2620_s1 + $0xe4] ss:$8 sps:$4 sm:$0xff]  }
  0x1b   : > { %1248 = vmatprep.mubr.bf16.mxu0 %v2046_v51  ;;  %v2031_v59 = vld [vmem:[%s2620_s1 + $0x1e4] ss:$8 sps:$4 sm:$0xff]   ;;  %v2033_v60 = vld [vmem:[%s2620_s1 + $0xe0] ss:$8 sps:$4 sm:$0xff]   ;;  %v2035_v62 = vld [vmem:[%s2620_s1 + $0xf4] ss:$8 sps:$4 sm:$0xff]  }
  0x1c   : > { %1034 = vmatpush1.bf16.msra.mxu1 %v1979_v22  ;;  %v2034_v61 = vld [vmem:[%s2620_s1 + $0x1e0] ss:$8 sps:$4 sm:$0xff]   ;;  %v2037_v63 = vld [vmem:[%s2620_s1 + $0x1f4] ss:$8 sps:$4 sm:$0xff]   ;;  %v2039_v0 = vld [vmem:[%s2620_s1 + $0xf0] ss:$8 sps:$4 sm:$0xff]  }
  0x1d   : > { %1227 = vmatpush1.bf16.msra.mxu0 %v1980_v23  ;;  %1035 = vmatprep.subr.bf16.mxu1 %v1981_v24  ;;  %v2040_v1 = vld [vmem:[%s2620_s1 + $0x1f0] ss:$8 sps:$4 sm:$0xff]   ;;  %v2047_v4 = vld [vmem:[%s2345_s17 + $0x24] ss:$16 sps:$4 sm:$0xff]   ;;  %v2049_v5 = vld [vmem:[%s2345_s17 + $0x2c] ss:$16 sps:$4 sm:$0xff]  }
  0x1e   : > { %1228 = vmatprep.subr.bf16.mxu0 %v1983_v25  ;;  %v2041_v2 = vld [vmem:[%s2345_s17] ss:$16 sps:$4 sm:$0xff]   ;;  %v2044_v3 = vld [vmem:[%s2345_s17 + $0x8] ss:$16 sps:$4 sm:$0xff]   ;;  %v2053_v8 = vld [vmem:[%s2345_s17 + $0x44] ss:$16 sps:$4 sm:$0xff]  }
  0x1f   : > { %v2051_v6 = vld [vmem:[%s2345_s17 + $0x20] ss:$16 sps:$4 sm:$0xff]   ;;  %v2052_v7 = vld [vmem:[%s2345_s17 + $0x28] ss:$16 sps:$4 sm:$0xff]   ;;  %v2055_v9 = vld [vmem:[%s2345_s17 + $0x4c] ss:$16 sps:$4 sm:$0xff]  }
  0x20   : > { %1036 = vmatpush1.bf16.msra.mxu1 %v1985_v26  ;;  %v2057_v10 = vld [vmem:[%s2345_s17 + $0x40] ss:$16 sps:$4 sm:$0xff]   ;;  %v2058_v11 = vld [vmem:[%s2345_s17 + $0x48] ss:$16 sps:$4 sm:$0xff]   ;;  %v2059_v12 = vld [vmem:[%s2345_s17 + $0x64] ss:$16 sps:$4 sm:$0xff]  }
  0x21   : > { %1229 = vmatpush1.bf16.msra.mxu0 %v1986_v27  ;;  %1037 = vmatprep.subr.bf16.mxu1 %v1987_v28  ;;  %v2061_v13 = vld [vmem:[%s2345_s17 + $0x6c] ss:$16 sps:$4 sm:$0xff]   ;;  %v2063_v14 = vld [vmem:[%s2345_s17 + $0x60] ss:$16 sps:$4 sm:$0xff]   ;;  %v2064_v15 = vld [vmem:[%s2345_s17 + $0x68] ss:$16 sps:$4 sm:$0xff]  }
  0x22   : > { %1230 = vmatprep.subr.bf16.mxu0 %v1989_v29  ;;  %v2065_v16 = vld [vmem:[%s2345_s17 + $0x84] ss:$16 sps:$4 sm:$0xff]   ;;  %v2067_v17 = vld [vmem:[%s2345_s17 + $0x8c] ss:$16 sps:$4 sm:$0xff]   ;;  %v2069_v18 = vld [vmem:[%s2345_s17 + $0x80] ss:$16 sps:$4 sm:$0xff]  }
  0x23   : > { %v2070_v19 = vld [vmem:[%s2345_s17 + $0x88] ss:$16 sps:$4 sm:$0xff]   ;;  %v2071_v20 = vld [vmem:[%s2345_s17 + $0xa4] ss:$16 sps:$4 sm:$0xff]   ;;  %v2073_v21 = vld [vmem:[%s2345_s17 + $0xac] ss:$16 sps:$4 sm:$0xff]  }
  0x24   : > { %1038 = vmatpush1.bf16.msra.mxu1 %v1991_v30  ;;  %v2075_v22 = vld [vmem:[%s2345_s17 + $0xa0] ss:$16 sps:$4 sm:$0xff]   ;;  %v2076_v23 = vld [vmem:[%s2345_s17 + $0xa8] ss:$16 sps:$4 sm:$0xff]   ;;  %v2077_v24 = vld [vmem:[%s2345_s17 + $0xc4] ss:$16 sps:$4 sm:$0xff]  }
  0x25   : > { %1231 = vmatpush1.bf16.msra.mxu0 %v1992_v31  ;;  %1039 = vmatprep.subr.bf16.mxu1 %v1993_v32  ;;  %v2079_v25 = vld [vmem:[%s2345_s17 + $0xcc] ss:$16 sps:$4 sm:$0xff]   ;;  %v2081_v26 = vld [vmem:[%s2345_s17 + $0xc0] ss:$16 sps:$4 sm:$0xff]   ;;  %v2082_v27 = vld [vmem:[%s2345_s17 + $0xc8] ss:$16 sps:$4 sm:$0xff]  }
  0x26   : > { %1232 = vmatprep.subr.bf16.mxu0 %v1995_v33  ;;  %v2083_v28 = vld [vmem:[%s2345_s17 + $0xe4] ss:$16 sps:$4 sm:$0xff]   ;;  %v2085_v29 = vld [vmem:[%s2345_s17 + $0xec] ss:$16 sps:$4 sm:$0xff]   ;;  %v2087_v30 = vld [vmem:[%s2345_s17 + $0xe0] ss:$16 sps:$4 sm:$0xff]  }
  0x27   : > { %v2088_v31 = vld [vmem:[%s2345_s17 + $0xe8] ss:$16 sps:$4 sm:$0xff]   ;;  %v2089_v32 = vld [vmem:[%s2345_s17 + $0x104] ss:$16 sps:$4 sm:$0xff]   ;;  %v2091_v33 = vld [vmem:[%s2345_s17 + $0x10c] ss:$16 sps:$4 sm:$0xff]  }
  0x28   : > { %1040 = vmatpush1.bf16.msra.mxu1 %v1997_v34  ;;  %v2093_v34 = vld [vmem:[%s2345_s17 + $0x100] ss:$16 sps:$4 sm:$0xff]   ;;  %v2115_v49 = vld [vmem:[%s2345_s17 + $0x18c] ss:$16 sps:$4 sm:$0xff]   ;;  %v2118_v51 = vld [vmem:[%s2345_s17 + $0x188] ss:$16 sps:$4 sm:$0xff]  }
  0x29   : > { %1233 = vmatpush1.bf16.msra.mxu0 %v1998_v35  ;;  %1041 = vmatprep.subr.bf16.mxu1 %v1999_v36  ;;  %v2094_v35 = vld [vmem:[%s2345_s17 + $0x108] ss:$16 sps:$4 sm:$0xff]   ;;  %v2095_v36 = vld [vmem:[%s2345_s17 + $0x124] ss:$16 sps:$4 sm:$0xff]  }
  0x2a   : > { %1234 = vmatprep.subr.bf16.mxu0 %v2001_v37  ;;  %v2097_v37 = vld [vmem:[%s2345_s17 + $0x12c] ss:$16 sps:$4 sm:$0xff]  }
  0x2c   : > { %1042 = vmatpush1.bf16.msra.mxu1 %v2003_v38  ;;  %v2099_v38 = vld [vmem:[%s2345_s17 + $0x120] ss:$16 sps:$4 sm:$0xff]  }
  0x2d   : > { %1235 = vmatpush1.bf16.msra.mxu0 %v2004_v39  ;;  %1043 = vmatprep.subr.bf16.mxu1 %v2005_v40  ;;  %v2100_v39 = vld [vmem:[%s2345_s17 + $0x128] ss:$16 sps:$4 sm:$0xff]   ;;  %v2101_v40 = vld [vmem:[%s2345_s17 + $0x144] ss:$16 sps:$4 sm:$0xff]  }
  0x2e   : > { %1236 = vmatprep.subr.bf16.mxu0 %v2007_v41  ;;  %v2103_v41 = vld [vmem:[%s2345_s17 + $0x14c] ss:$16 sps:$4 sm:$0xff]  }
  0x30   : > { %1044 = vmatpush1.bf16.msra.mxu1 %v2009_v42  ;;  %v2105_v42 = vld [vmem:[%s2345_s17 + $0x140] ss:$16 sps:$4 sm:$0xff]  }
  0x31   : > { %1237 = vmatpush1.bf16.msra.mxu0 %v2010_v43  ;;  %1045 = vmatprep.subr.bf16.mxu1 %v2011_v44  ;;  %v2106_v43 = vld [vmem:[%s2345_s17 + $0x148] ss:$16 sps:$4 sm:$0xff]   ;;  %v2107_v44 = vld [vmem:[%s2345_s17 + $0x164] ss:$16 sps:$4 sm:$0xff]  }
  0x32   : > { %1238 = vmatprep.subr.bf16.mxu0 %v2013_v45  ;;  %v2109_v45 = vld [vmem:[%s2345_s17 + $0x16c] ss:$16 sps:$4 sm:$0xff]  }
  0x34   : > { %1046 = vmatpush1.bf16.msra.mxu1 %v2015_v46  ;;  %v2111_v46 = vld [vmem:[%s2345_s17 + $0x160] ss:$16 sps:$4 sm:$0xff]  }
  0x35   : > { %1239 = vmatpush1.bf16.msra.mxu0 %v2016_v47  ;;  %1047 = vmatprep.subr.bf16.mxu1 %v2017_v48  ;;  %v2112_v47 = vld [vmem:[%s2345_s17 + $0x168] ss:$16 sps:$4 sm:$0xff]   ;;  %v2113_v48 = vld [vmem:[%s2345_s17 + $0x184] ss:$16 sps:$4 sm:$0xff]  }
  0x36   : > { %1240 = vmatprep.subr.bf16.mxu0 %v2019_v50  ;;  %v2117_v50 = vld [vmem:[%s2345_s17 + $0x180] ss:$16 sps:$4 sm:$0xff]  }
  0x38   : > { %1048 = vmatpush1.bf16.msra.mxu1 %v2021_v52  ;;  %v2119_v52 = vld [vmem:[%s2345_s17 + $0x1a4] ss:$16 sps:$4 sm:$0xff]  }
  0x39   : > { %1241 = vmatpush1.bf16.msra.mxu0 %v2022_v53  ;;  %1049 = vmatprep.subr.bf16.mxu1 %v2023_v54  ;;  %v2121_v53 = vld [vmem:[%s2345_s17 + $0x1ac] ss:$16 sps:$4 sm:$0xff]   ;;  %v2123_v54 = vld [vmem:[%s2345_s17 + $0x1a0] ss:$16 sps:$4 sm:$0xff]  }
  0x3a   : > { %1242 = vmatprep.subr.bf16.mxu0 %v2025_v55  ;;  %v2124_v55 = vld [vmem:[%s2345_s17 + $0x1a8] ss:$16 sps:$4 sm:$0xff]  }
  0x3c   : > { %1050 = vmatpush1.bf16.msra.mxu1 %v2027_v56  ;;  %v2125_v56 = vld [vmem:[%s2345_s17 + $0x1c4] ss:$16 sps:$4 sm:$0xff]  }
  0x3d   : > { %1243 = vmatpush1.bf16.msra.mxu0 %v2028_v57  ;;  %1051 = vmatprep.subr.bf16.mxu1 %v2029_v58  ;;  %v2127_v57 = vld [vmem:[%s2345_s17 + $0x1cc] ss:$16 sps:$4 sm:$0xff]   ;;  %v2129_v58 = vld [vmem:[%s2345_s17 + $0x1c0] ss:$16 sps:$4 sm:$0xff]  }
  0x3e   : > { %1244 = vmatprep.subr.bf16.mxu0 %v2031_v59  ;;  %v2130_v59 = vld [vmem:[%s2345_s17 + $0x1c8] ss:$16 sps:$4 sm:$0xff]  }
  0x40   : > { %1052 = vmatpush1.bf16.msra.mxu1 %v2033_v60  ;;  %v2131_v60 = vld [vmem:[%s2345_s17 + $0x1e4] ss:$16 sps:$4 sm:$0xff]  }
  0x41   : > { %1245 = vmatpush1.bf16.msra.mxu0 %v2034_v61  ;;  %1053 = vmatprep.subr.bf16.mxu1 %v2035_v62  ;;  %v2133_v61 = vld [vmem:[%s2345_s17 + $0x1ec] ss:$16 sps:$4 sm:$0xff]   ;;  %v2135_v62 = vld [vmem:[%s2345_s17 + $0x1e0] ss:$16 sps:$4 sm:$0xff]  }
  0x42   : > { %1246 = vmatprep.subr.bf16.mxu0 %v2037_v63  ;;  %v2136_v63 = vld [vmem:[%s2345_s17 + $0x1e8] ss:$16 sps:$4 sm:$0xff]  }
  0x44   : > { %1054 = vmatpush1.bf16.msra.mxu1 %v2039_v0  ;;  %v373_v0 = vlaneseq }
  0x45   : > { %1247 = vmatpush1.bf16.msra.mxu0 %v2040_v1 }
  0x46   : > { %v374_v1 = vshrl.u32 %v373_v0, 7 }
  0x47   : > { %1056 = vmatmul.mubr.bf16.vlgmr.msra.gmra.mrb[0].mxu1 %v2041_v2 }
  0x48   : > { %1249 = vmatmul.mubr.bf16.vlgmr.msra.gmra.mrb[0].mxu0 %v2044_v3  ;;  %1065 = vmatprep.mubr.bf16.mxu1 %v2047_v4  ;;  %v375_v2 = vsub.s32 0, %v374_v1  ;;  %v371_v3 = vld [vmem:[%s2621_s2] sm:$0x3]  ;;  %v379_v4 = vsub.s32 1, %v374_v1 }
  0x49   : > { %1258 = vmatprep.mubr.bf16.mxu0 %v2049_v5 }
  0x4a   : > { %v2471_v5 = vrot.slane %v371_v3, %v375_v2 }
  0x4f   : > { %1066 = vmatmul.mubr.bf16.gmra.mrb[4].mxu1 %v2051_v6  ;;  %v2473_v6 = vrot.slane %v371_v3, %v379_v4 }
  0x50   : > { %1259 = vmatmul.mubr.bf16.gmra.mrb[4].mxu0 %v2052_v7  ;;  %1075 = vmatprep.mubr.bf16.mxu1 %v2053_v8 }
  0x51   : > { %1268 = vmatprep.mubr.bf16.mxu0 %v2055_v9 }
  0x57   : > { %1076 = vmatmul.mubr.bf16.gmra.mrb[8].mxu1 %v2057_v10 }
  0x58   : > { %1269 = vmatmul.mubr.bf16.gmra.mrb[8].mxu0 %v2058_v11  ;;  %1085 = vmatprep.mubr.bf16.mxu1 %v2059_v12 }
  0x59   : > { %1278 = vmatprep.mubr.bf16.mxu0 %v2061_v13 }
  0x5f   : > { %1086 = vmatmul.mubr.bf16.gmra.mrb[12].mxu1 %v2063_v14 }
  0x60   : > { %1279 = vmatmul.mubr.bf16.gmra.mrb[12].mxu0 %v2064_v15  ;;  %1095 = vmatprep.mubr.bf16.mxu1 %v2065_v16 }
  0x61   : > { %1288 = vmatprep.mubr.bf16.mxu0 %v2067_v17 }
  0x67   : > { %1096 = vmatmul.mubr.bf16.gmra.mrb[16].mxu1 %v2069_v18 }
  0x68   : > { %1289 = vmatmul.mubr.bf16.gmra.mrb[16].mxu0 %v2070_v19  ;;  %1105 = vmatprep.mubr.bf16.mxu1 %v2071_v20 }
  0x69   : > { %1298 = vmatprep.mubr.bf16.mxu0 %v2073_v21 }
  0x6f   : > { %1106 = vmatmul.mubr.bf16.gmra.mrb[20].mxu1 %v2075_v22 }
  0x70   : > { %1299 = vmatmul.mubr.bf16.gmra.mrb[20].mxu0 %v2076_v23  ;;  %1115 = vmatprep.mubr.bf16.mxu1 %v2077_v24 }
  0x71   : > { %1308 = vmatprep.mubr.bf16.mxu0 %v2079_v25 }
  0x77   : > { %1116 = vmatmul.mubr.bf16.gmra.mrb[24].mxu1 %v2081_v26 }
  0x78   : > { %1309 = vmatmul.mubr.bf16.gmra.mrb[24].mxu0 %v2082_v27  ;;  %1125 = vmatprep.mubr.bf16.mxu1 %v2083_v28 }
  0x79   : > { %1318 = vmatprep.mubr.bf16.mxu0 %v2085_v29 }
  0x7f   : > { %1126 = vmatmul.mubr.bf16.gmra.mrb[28].mxu1 %v2087_v30 }
  0x80   : > { %1319 = vmatmul.mubr.bf16.gmra.mrb[28].mxu0 %v2088_v31  ;;  %1135 = vmatprep.mubr.bf16.mxu1 %v2089_v32 }
  0x81   : > { %1328 = vmatprep.mubr.bf16.mxu0 %v2091_v33 }
  0x87   : > { %1136 = vmatmul.mubr.bf16.gmra.mrb[32].mxu1 %v2093_v34 }
  0x88   : > { %1329 = vmatmul.mubr.bf16.gmra.mrb[32].mxu0 %v2094_v35  ;;  %1145 = vmatprep.mubr.bf16.mxu1 %v2095_v36 }
  0x89   : > { %1338 = vmatprep.mubr.bf16.mxu0 %v2097_v37 }
  0x8f   : > { %1146 = vmatmul.mubr.bf16.gmra.mrb[36].mxu1 %v2099_v38 }
  0x90   : > { %1339 = vmatmul.mubr.bf16.gmra.mrb[36].mxu0 %v2100_v39  ;;  %1155 = vmatprep.mubr.bf16.mxu1 %v2101_v40 }
  0x91   : > { %1348 = vmatprep.mubr.bf16.mxu0 %v2103_v41 }
  0x97   : > { %1156 = vmatmul.mubr.bf16.gmra.mrb[40].mxu1 %v2105_v42 }
  0x98   : > { %1349 = vmatmul.mubr.bf16.gmra.mrb[40].mxu0 %v2106_v43  ;;  %1165 = vmatprep.mubr.bf16.mxu1 %v2107_v44 }
  0x99   : > { %1358 = vmatprep.mubr.bf16.mxu0 %v2109_v45 }
  0x9f   : > { %1166 = vmatmul.mubr.bf16.gmra.mrb[44].mxu1 %v2111_v46 }
  0xa0   : > { %1359 = vmatmul.mubr.bf16.gmra.mrb[44].mxu0 %v2112_v47  ;;  %1175 = vmatprep.mubr.bf16.mxu1 %v2113_v48 }
  0xa1   : > { %1368 = vmatprep.mubr.bf16.mxu0 %v2115_v49 }
  0xa7   : > { %1176 = vmatmul.mubr.bf16.gmra.mrb[48].mxu1 %v2117_v50 }
  0xa8   : > { %1369 = vmatmul.mubr.bf16.gmra.mrb[48].mxu0 %v2118_v51  ;;  %1185 = vmatprep.mubr.bf16.mxu1 %v2119_v52 }
  0xa9   : > { %1378 = vmatprep.mubr.bf16.mxu0 %v2121_v53 }
  0xaf   : > { %1186 = vmatmul.mubr.bf16.gmra.mrb[52].mxu1 %v2123_v54 }
  0xb0   : > { %1379 = vmatmul.mubr.bf16.gmra.mrb[52].mxu0 %v2124_v55  ;;  %1195 = vmatprep.mubr.bf16.mxu1 %v2125_v56 }
  0xb1   : > { %1388 = vmatprep.mubr.bf16.mxu0 %v2127_v57 }
  0xb7   : > { %1196 = vmatmul.mubr.bf16.gmra.mrb[56].mxu1 %v2129_v58 }
  0xb8   : > { %1389 = vmatmul.mubr.bf16.gmra.mrb[56].mxu0 %v2130_v59  ;;  %1205 = vmatprep.mubr.bf16.mxu1 %v2131_v60 }
  0xb9   : > { %1398 = vmatprep.mubr.bf16.mxu0 %v2133_v61 }
  0xbf   : > { %1206 = vmatmul.mubr.bf16.gmra.mrb[60].mxu1 %v2135_v62 }
  0xc0   : > { %1399 = vmatmul.mubr.bf16.gmra.mrb[60].mxu0 %v2136_v63 }
 0x11a   : > { %v1057_v7 = vpop.f32.mrb[0].mxu1 }
 0x11b   : > { %v1250_v8 = vpop.f32.mrb[0].mxu0  ;;  %v1058_v9 = vadd.f32 %v1057_v7, %v2471_v5  ;;  %v1059_v10 = vpop.f32.mrb[1].mxu1 }
 0x11c   : > { %v1252_v11 = vpop.f32.mrb[1].mxu0  ;;  %v1060_v12 = vadd.f32 %v1059_v10, %v2473_v6  ;;  %v1061_v13 = vpop.f32.mrb[2].mxu1 }
 0x11d   : > { %v1254_v14 = vpop.f32.mrb[2].mxu0  ;;  %v1251_v15 = vadd.f32 %v1250_v8, %v1058_v9  ;;  %v1062_v16 = vadd.f32 %v1061_v13, %v2471_v5  ;;  %v1063_v17 = vpop.f32.mrb[3].mxu1 }
 0x11e   : > { %v1256_v18 = vpop.f32.mrb[3].mxu0  ;;  %v1253_v19 = vadd.f32 %v1252_v11, %v1060_v12  ;;  %v1064_v20 = vadd.f32 %v1063_v17, %v2473_v6 }
 0x11f   : > { %v1409_v21 = vmax.f32 %v1251_v15, 0.0  ;;  %v1255_v22 = vadd.f32 %v1254_v14, %v1062_v16 }
 0x120   : > { %v1410_v23 = vmax.f32 %v1253_v19, 0.0  ;;  %v1257_v24 = vadd.f32 %v1256_v18, %v1064_v20 }
 0x121   : > { %1473 = vst [vmem:[%s2483_s16] sm:$0xff] %v1409_v21  ;;  %v1411_v25 = vmax.f32 %v1255_v22, 0.0 }
 0x122   : > { %1474 = vst [vmem:[%s2483_s16 + $0x8] sm:$0xff] %v1410_v23  ;;  %v1412_v26 = vmax.f32 %v1257_v24, 0.0  ;;  %v1067_v27 = vpop.f32.mrb[4].mxu1 }
 0x123   : > { %v1260_v28 = vpop.f32.mrb[4].mxu0  ;;  %1475 = vst [vmem:[%s2483_s16 + $0x10] sm:$0xff] %v1411_v25  ;;  %v1068_v29 = vadd.f32 %v1067_v27, %v2471_v5  ;;  %v1069_v30 = vpop.f32.mrb[5].mxu1 }
 0x124   : > { %v1262_v31 = vpop.f32.mrb[5].mxu0  ;;  %1476 = vst [vmem:[%s2483_s16 + $0x18] sm:$0xff] %v1412_v26  ;;  %v1070_v32 = vadd.f32 %v1069_v30, %v2473_v6  ;;  %v1071_v33 = vpop.f32.mrb[6].mxu1 }
 0x125   : > { %v1264_v34 = vpop.f32.mrb[6].mxu0  ;;  %v1261_v35 = vadd.f32 %v1260_v28, %v1068_v29  ;;  %v1072_v36 = vadd.f32 %v1071_v33, %v2471_v5  ;;  %v1073_v37 = vpop.f32.mrb[7].mxu1 }
 0x126   : > { %v1266_v38 = vpop.f32.mrb[7].mxu0  ;;  %v1263_v39 = vadd.f32 %v1262_v31, %v1070_v32  ;;  %v1074_v40 = vadd.f32 %v1073_v37, %v2473_v6 }
 0x127   : > { %v1413_v41 = vmax.f32 %v1261_v35, 0.0  ;;  %v1265_v42 = vadd.f32 %v1264_v34, %v1072_v36 }
 0x128   : > { %v1414_v43 = vmax.f32 %v1263_v39, 0.0  ;;  %v1267_v44 = vadd.f32 %v1266_v38, %v1074_v40 }
 0x129   : > { %1477 = vst [vmem:[%s2483_s16 + $0x20] sm:$0xff] %v1413_v41  ;;  %v1415_v45 = vmax.f32 %v1265_v42, 0.0 }
 0x12a   : > { %1478 = vst [vmem:[%s2483_s16 + $0x28] sm:$0xff] %v1414_v43  ;;  %v1416_v46 = vmax.f32 %v1267_v44, 0.0  ;;  %v1077_v47 = vpop.f32.mrb[8].mxu1 }
 0x12b   : > { %v1270_v48 = vpop.f32.mrb[8].mxu0  ;;  %1479 = vst [vmem:[%s2483_s16 + $0x30] sm:$0xff] %v1415_v45  ;;  %v1078_v49 = vadd.f32 %v1077_v47, %v2471_v5  ;;  %v1079_v50 = vpop.f32.mrb[9].mxu1 }
 0x12c   : > { %v1272_v51 = vpop.f32.mrb[9].mxu0  ;;  %1480 = vst [vmem:[%s2483_s16 + $0x38] sm:$0xff] %v1416_v46  ;;  %v1080_v52 = vadd.f32 %v1079_v50, %v2473_v6  ;;  %v1081_v53 = vpop.f32.mrb[10].mxu1 }
 0x12d   : > { %v1274_v54 = vpop.f32.mrb[10].mxu0  ;;  %v1271_v55 = vadd.f32 %v1270_v48, %v1078_v49  ;;  %v1082_v56 = vadd.f32 %v1081_v53, %v2471_v5  ;;  %v1083_v57 = vpop.f32.mrb[11].mxu1 }
 0x12e   : > { %v1276_v58 = vpop.f32.mrb[11].mxu0  ;;  %v1273_v59 = vadd.f32 %v1272_v51, %v1080_v52  ;;  %v1084_v60 = vadd.f32 %v1083_v57, %v2473_v6 }
 0x12f   : > { %v1417_v61 = vmax.f32 %v1271_v55, 0.0  ;;  %v1275_v62 = vadd.f32 %v1274_v54, %v1082_v56 }
 0x130   : > { %v1418_v63 = vmax.f32 %v1273_v59, 0.0  ;;  %v1277_v0 = vadd.f32 %v1276_v58, %v1084_v60 }
 0x131   : > { %1481 = vst [vmem:[%s2483_s16 + $0x40] sm:$0xff] %v1417_v61  ;;  %v1419_v1 = vmax.f32 %v1275_v62, 0.0 }
 0x132   : > { %1482 = vst [vmem:[%s2483_s16 + $0x48] sm:$0xff] %v1418_v63  ;;  %v1420_v2 = vmax.f32 %v1277_v0, 0.0  ;;  %v1087_v3 = vpop.f32.mrb[12].mxu1 }
 0x133   : > { %v1280_v4 = vpop.f32.mrb[12].mxu0  ;;  %1483 = vst [vmem:[%s2483_s16 + $0x50] sm:$0xff] %v1419_v1  ;;  %v1088_v7 = vadd.f32 %v1087_v3, %v2471_v5  ;;  %v1089_v8 = vpop.f32.mrb[13].mxu1 }
 0x134   : > { %v1282_v9 = vpop.f32.mrb[13].mxu0  ;;  %1484 = vst [vmem:[%s2483_s16 + $0x58] sm:$0xff] %v1420_v2  ;;  %v1090_v10 = vadd.f32 %v1089_v8, %v2473_v6  ;;  %v1091_v11 = vpop.f32.mrb[14].mxu1 }
 0x135   : > { %v1284_v12 = vpop.f32.mrb[14].mxu0  ;;  %v1281_v13 = vadd.f32 %v1280_v4, %v1088_v7  ;;  %v1092_v14 = vadd.f32 %v1091_v11, %v2471_v5  ;;  %v1093_v15 = vpop.f32.mrb[15].mxu1 }
 0x136   : > { %v1286_v16 = vpop.f32.mrb[15].mxu0  ;;  %v1283_v17 = vadd.f32 %v1282_v9, %v1090_v10  ;;  %v1094_v18 = vadd.f32 %v1093_v15, %v2473_v6 }
 0x137   : > { %v1421_v19 = vmax.f32 %v1281_v13, 0.0  ;;  %v1285_v20 = vadd.f32 %v1284_v12, %v1092_v14 }
 0x138   : > { %v1422_v21 = vmax.f32 %v1283_v17, 0.0  ;;  %v1287_v22 = vadd.f32 %v1286_v16, %v1094_v18 }
 0x139   : > { %1485 = vst [vmem:[%s2483_s16 + $0x60] sm:$0xff] %v1421_v19  ;;  %v1423_v23 = vmax.f32 %v1285_v20, 0.0 }
 0x13a   : > { %1486 = vst [vmem:[%s2483_s16 + $0x68] sm:$0xff] %v1422_v21  ;;  %v1424_v24 = vmax.f32 %v1287_v22, 0.0  ;;  %v1097_v25 = vpop.f32.mrb[16].mxu1 }
 0x13b   : > { %v1290_v26 = vpop.f32.mrb[16].mxu0  ;;  %1487 = vst [vmem:[%s2483_s16 + $0x70] sm:$0xff] %v1423_v23  ;;  %v1098_v27 = vadd.f32 %v1097_v25, %v2471_v5  ;;  %v1099_v28 = vpop.f32.mrb[17].mxu1 }
 0x13c   : > { %v1292_v29 = vpop.f32.mrb[17].mxu0  ;;  %1488 = vst [vmem:[%s2483_s16 + $0x78] sm:$0xff] %v1424_v24  ;;  %v1100_v30 = vadd.f32 %v1099_v28, %v2473_v6  ;;  %v1101_v31 = vpop.f32.mrb[18].mxu1 }
 0x13d   : > { %v1294_v32 = vpop.f32.mrb[18].mxu0  ;;  %v1291_v33 = vadd.f32 %v1290_v26, %v1098_v27  ;;  %v1102_v34 = vadd.f32 %v1101_v31, %v2471_v5  ;;  %v1103_v35 = vpop.f32.mrb[19].mxu1 }
 0x13e   : > { %v1296_v36 = vpop.f32.mrb[19].mxu0  ;;  %v1293_v37 = vadd.f32 %v1292_v29, %v1100_v30  ;;  %v1104_v38 = vadd.f32 %v1103_v35, %v2473_v6 }
 0x13f   : > { %v1425_v39 = vmax.f32 %v1291_v33, 0.0  ;;  %v1295_v40 = vadd.f32 %v1294_v32, %v1102_v34 }
 0x140   : > { %v1426_v41 = vmax.f32 %v1293_v37, 0.0  ;;  %v1297_v42 = vadd.f32 %v1296_v36, %v1104_v38 }
 0x141   : > { %1489 = vst [vmem:[%s2483_s16 + $0x80] sm:$0xff] %v1425_v39  ;;  %v1427_v43 = vmax.f32 %v1295_v40, 0.0 }
 0x142   : > { %1490 = vst [vmem:[%s2483_s16 + $0x88] sm:$0xff] %v1426_v41  ;;  %v1428_v44 = vmax.f32 %v1297_v42, 0.0  ;;  %v1107_v45 = vpop.f32.mrb[20].mxu1 }
 0x143   : > { %v1300_v46 = vpop.f32.mrb[20].mxu0  ;;  %1491 = vst [vmem:[%s2483_s16 + $0x90] sm:$0xff] %v1427_v43  ;;  %v1108_v47 = vadd.f32 %v1107_v45, %v2471_v5  ;;  %v1109_v48 = vpop.f32.mrb[21].mxu1 }
 0x144   : > { %v1302_v49 = vpop.f32.mrb[21].mxu0  ;;  %1492 = vst [vmem:[%s2483_s16 + $0x98] sm:$0xff] %v1428_v44  ;;  %v1110_v50 = vadd.f32 %v1109_v48, %v2473_v6  ;;  %v1111_v51 = vpop.f32.mrb[22].mxu1 }
 0x145   : > { %v1304_v52 = vpop.f32.mrb[22].mxu0  ;;  %v1301_v53 = vadd.f32 %v1300_v46, %v1108_v47  ;;  %v1112_v54 = vadd.f32 %v1111_v51, %v2471_v5  ;;  %v1113_v55 = vpop.f32.mrb[23].mxu1 }
 0x146   : > { %v1306_v56 = vpop.f32.mrb[23].mxu0  ;;  %v1303_v57 = vadd.f32 %v1302_v49, %v1110_v50  ;;  %v1114_v58 = vadd.f32 %v1113_v55, %v2473_v6 }
 0x147   : > { %v1429_v59 = vmax.f32 %v1301_v53, 0.0  ;;  %v1305_v60 = vadd.f32 %v1304_v52, %v1112_v54 }
 0x148   : > { %v1430_v61 = vmax.f32 %v1303_v57, 0.0  ;;  %v1307_v62 = vadd.f32 %v1306_v56, %v1114_v58 }
 0x149   : > { %1493 = vst [vmem:[%s2483_s16 + $0xa0] sm:$0xff] %v1429_v59  ;;  %v1431_v63 = vmax.f32 %v1305_v60, 0.0 }
 0x14a   : > { %1494 = vst [vmem:[%s2483_s16 + $0xa8] sm:$0xff] %v1430_v61  ;;  %v1432_v0 = vmax.f32 %v1307_v62, 0.0  ;;  %v1117_v1 = vpop.f32.mrb[24].mxu1 }
 0x14b   : > { %v1310_v2 = vpop.f32.mrb[24].mxu0  ;;  %1495 = vst [vmem:[%s2483_s16 + $0xb0] sm:$0xff] %v1431_v63  ;;  %v1118_v3 = vadd.f32 %v1117_v1, %v2471_v5  ;;  %v1119_v4 = vpop.f32.mrb[25].mxu1 }
 0x14c   : > { %v1312_v7 = vpop.f32.mrb[25].mxu0  ;;  %1496 = vst [vmem:[%s2483_s16 + $0xb8] sm:$0xff] %v1432_v0  ;;  %v1120_v8 = vadd.f32 %v1119_v4, %v2473_v6  ;;  %v1121_v9 = vpop.f32.mrb[26].mxu1 }
 0x14d   : > { %v1314_v10 = vpop.f32.mrb[26].mxu0  ;;  %v1311_v11 = vadd.f32 %v1310_v2, %v1118_v3  ;;  %v1122_v12 = vadd.f32 %v1121_v9, %v2471_v5  ;;  %v1123_v13 = vpop.f32.mrb[27].mxu1 }
 0x14e   : > { %v1316_v14 = vpop.f32.mrb[27].mxu0  ;;  %v1313_v15 = vadd.f32 %v1312_v7, %v1120_v8  ;;  %v1124_v16 = vadd.f32 %v1123_v13, %v2473_v6 }
 0x14f   : > { %v1433_v17 = vmax.f32 %v1311_v11, 0.0  ;;  %v1315_v18 = vadd.f32 %v1314_v10, %v1122_v12 }
 0x150   : > { %v1434_v19 = vmax.f32 %v1313_v15, 0.0  ;;  %v1317_v20 = vadd.f32 %v1316_v14, %v1124_v16 }
 0x151   : > { %1497 = vst [vmem:[%s2483_s16 + $0xc0] sm:$0xff] %v1433_v17  ;;  %v1435_v21 = vmax.f32 %v1315_v18, 0.0 }
 0x152   : > { %1498 = vst [vmem:[%s2483_s16 + $0xc8] sm:$0xff] %v1434_v19  ;;  %v1436_v22 = vmax.f32 %v1317_v20, 0.0  ;;  %v1127_v23 = vpop.f32.mrb[28].mxu1 }
 0x153   : > { %v1320_v24 = vpop.f32.mrb[28].mxu0  ;;  %1499 = vst [vmem:[%s2483_s16 + $0xd0] sm:$0xff] %v1435_v21  ;;  %v1128_v25 = vadd.f32 %v1127_v23, %v2471_v5  ;;  %v1129_v26 = vpop.f32.mrb[29].mxu1 }
 0x154   : > { %v1322_v27 = vpop.f32.mrb[29].mxu0  ;;  %1500 = vst [vmem:[%s2483_s16 + $0xd8] sm:$0xff] %v1436_v22  ;;  %v1130_v28 = vadd.f32 %v1129_v26, %v2473_v6  ;;  %v1131_v29 = vpop.f32.mrb[30].mxu1 }
 0x155   : > { %v1324_v30 = vpop.f32.mrb[30].mxu0  ;;  %v1321_v31 = vadd.f32 %v1320_v24, %v1128_v25  ;;  %v1132_v32 = vadd.f32 %v1131_v29, %v2471_v5  ;;  %v1133_v33 = vpop.f32.mrb[31].mxu1 }
 0x156   : > { %v1326_v34 = vpop.f32.mrb[31].mxu0  ;;  %v1323_v35 = vadd.f32 %v1322_v27, %v1130_v28  ;;  %v1134_v36 = vadd.f32 %v1133_v33, %v2473_v6 }
 0x157   : > { %v1437_v37 = vmax.f32 %v1321_v31, 0.0  ;;  %v1325_v38 = vadd.f32 %v1324_v30, %v1132_v32 }
 0x158   : > { %v1438_v39 = vmax.f32 %v1323_v35, 0.0  ;;  %v1327_v40 = vadd.f32 %v1326_v34, %v1134_v36 }
 0x159   : > { %1501 = vst [vmem:[%s2483_s16 + $0xe0] sm:$0xff] %v1437_v37  ;;  %v1439_v41 = vmax.f32 %v1325_v38, 0.0 }
 0x15a   : > { %1502 = vst [vmem:[%s2483_s16 + $0xe8] sm:$0xff] %v1438_v39  ;;  %v1440_v42 = vmax.f32 %v1327_v40, 0.0  ;;  %v1137_v43 = vpop.f32.mrb[32].mxu1 }
 0x15b   : > { %v1330_v44 = vpop.f32.mrb[32].mxu0  ;;  %1503 = vst [vmem:[%s2483_s16 + $0xf0] sm:$0xff] %v1439_v41  ;;  %v1138_v45 = vadd.f32 %v1137_v43, %v2471_v5  ;;  %v1139_v46 = vpop.f32.mrb[33].mxu1 }
 0x15c   : > { %v1332_v47 = vpop.f32.mrb[33].mxu0  ;;  %1504 = vst [vmem:[%s2483_s16 + $0xf8] sm:$0xff] %v1440_v42  ;;  %v1140_v48 = vadd.f32 %v1139_v46, %v2473_v6  ;;  %v1141_v49 = vpop.f32.mrb[34].mxu1 }
 0x15d   : > { %v1334_v50 = vpop.f32.mrb[34].mxu0  ;;  %v1331_v51 = vadd.f32 %v1330_v44, %v1138_v45  ;;  %v1142_v52 = vadd.f32 %v1141_v49, %v2471_v5  ;;  %v1143_v53 = vpop.f32.mrb[35].mxu1 }
 0x15e   : > { %v1336_v54 = vpop.f32.mrb[35].mxu0  ;;  %v1333_v55 = vadd.f32 %v1332_v47, %v1140_v48  ;;  %v1144_v56 = vadd.f32 %v1143_v53, %v2473_v6 }
 0x15f   : > { %v1441_v57 = vmax.f32 %v1331_v51, 0.0  ;;  %v1335_v58 = vadd.f32 %v1334_v50, %v1142_v52 }
 0x160   : > { %v1442_v59 = vmax.f32 %v1333_v55, 0.0  ;;  %v1337_v60 = vadd.f32 %v1336_v54, %v1144_v56 }
 0x161   : > { %1505 = vst [vmem:[%s2483_s16 + $0x100] sm:$0xff] %v1441_v57  ;;  %v1443_v61 = vmax.f32 %v1335_v58, 0.0 }
 0x162   : > { %1506 = vst [vmem:[%s2483_s16 + $0x108] sm:$0xff] %v1442_v59  ;;  %v1444_v62 = vmax.f32 %v1337_v60, 0.0  ;;  %v1147_v63 = vpop.f32.mrb[36].mxu1 }
 0x163   : > { %v1340_v0 = vpop.f32.mrb[36].mxu0  ;;  %1507 = vst [vmem:[%s2483_s16 + $0x110] sm:$0xff] %v1443_v61  ;;  %v1148_v1 = vadd.f32 %v1147_v63, %v2471_v5  ;;  %v1149_v2 = vpop.f32.mrb[37].mxu1 }
 0x164   : > { %v1342_v3 = vpop.f32.mrb[37].mxu0  ;;  %1508 = vst [vmem:[%s2483_s16 + $0x118] sm:$0xff] %v1444_v62  ;;  %v1150_v4 = vadd.f32 %v1149_v2, %v2473_v6  ;;  %v1151_v7 = vpop.f32.mrb[38].mxu1 }
 0x165   : > { %v1344_v8 = vpop.f32.mrb[38].mxu0  ;;  %v1341_v9 = vadd.f32 %v1340_v0, %v1148_v1  ;;  %v1152_v10 = vadd.f32 %v1151_v7, %v2471_v5  ;;  %v1153_v11 = vpop.f32.mrb[39].mxu1 }
 0x166   : > { %v1346_v12 = vpop.f32.mrb[39].mxu0  ;;  %v1343_v13 = vadd.f32 %v1342_v3, %v1150_v4  ;;  %v1154_v14 = vadd.f32 %v1153_v11, %v2473_v6 }
 0x167   : > { %v1445_v15 = vmax.f32 %v1341_v9, 0.0  ;;  %v1345_v16 = vadd.f32 %v1344_v8, %v1152_v10 }
 0x168   : > { %v1446_v17 = vmax.f32 %v1343_v13, 0.0  ;;  %v1347_v18 = vadd.f32 %v1346_v12, %v1154_v14 }
 0x169   : > { %1509 = vst [vmem:[%s2483_s16 + $0x120] sm:$0xff] %v1445_v15  ;;  %v1447_v19 = vmax.f32 %v1345_v16, 0.0 }
 0x16a   : > { %1510 = vst [vmem:[%s2483_s16 + $0x128] sm:$0xff] %v1446_v17  ;;  %v1448_v20 = vmax.f32 %v1347_v18, 0.0  ;;  %v1157_v21 = vpop.f32.mrb[40].mxu1 }
 0x16b   : > { %v1350_v22 = vpop.f32.mrb[40].mxu0  ;;  %1511 = vst [vmem:[%s2483_s16 + $0x130] sm:$0xff] %v1447_v19  ;;  %v1158_v23 = vadd.f32 %v1157_v21, %v2471_v5  ;;  %v1159_v24 = vpop.f32.mrb[41].mxu1 }
 0x16c   : > { %v1352_v25 = vpop.f32.mrb[41].mxu0  ;;  %1512 = vst [vmem:[%s2483_s16 + $0x138] sm:$0xff] %v1448_v20  ;;  %v1160_v26 = vadd.f32 %v1159_v24, %v2473_v6  ;;  %v1161_v27 = vpop.f32.mrb[42].mxu1 }
 0x16d   : > { %v1354_v28 = vpop.f32.mrb[42].mxu0  ;;  %v1351_v29 = vadd.f32 %v1350_v22, %v1158_v23  ;;  %v1162_v30 = vadd.f32 %v1161_v27, %v2471_v5  ;;  %v1163_v31 = vpop.f32.mrb[43].mxu1 }
 0x16e   : > { %v1356_v32 = vpop.f32.mrb[43].mxu0  ;;  %v1353_v33 = vadd.f32 %v1352_v25, %v1160_v26  ;;  %v1164_v34 = vadd.f32 %v1163_v31, %v2473_v6 }
 0x16f   : > { %v1449_v35 = vmax.f32 %v1351_v29, 0.0  ;;  %v1355_v36 = vadd.f32 %v1354_v28, %v1162_v30 }
 0x170   : > { %v1450_v37 = vmax.f32 %v1353_v33, 0.0  ;;  %v1357_v38 = vadd.f32 %v1356_v32, %v1164_v34 }
 0x171   : > { %1513 = vst [vmem:[%s2483_s16 + $0x140] sm:$0xff] %v1449_v35  ;;  %v1451_v39 = vmax.f32 %v1355_v36, 0.0 }
 0x172   : > { %1514 = vst [vmem:[%s2483_s16 + $0x148] sm:$0xff] %v1450_v37  ;;  %v1452_v40 = vmax.f32 %v1357_v38, 0.0  ;;  %v1167_v41 = vpop.f32.mrb[44].mxu1 }
 0x173   : > { %v1360_v42 = vpop.f32.mrb[44].mxu0  ;;  %1515 = vst [vmem:[%s2483_s16 + $0x150] sm:$0xff] %v1451_v39  ;;  %v1168_v43 = vadd.f32 %v1167_v41, %v2471_v5  ;;  %v1169_v44 = vpop.f32.mrb[45].mxu1 }
 0x174   : > { %v1362_v45 = vpop.f32.mrb[45].mxu0  ;;  %1516 = vst [vmem:[%s2483_s16 + $0x158] sm:$0xff] %v1452_v40  ;;  %v1170_v46 = vadd.f32 %v1169_v44, %v2473_v6  ;;  %v1171_v47 = vpop.f32.mrb[46].mxu1 }
 0x175   : > { %v1364_v48 = vpop.f32.mrb[46].mxu0  ;;  %v1361_v49 = vadd.f32 %v1360_v42, %v1168_v43  ;;  %v1172_v50 = vadd.f32 %v1171_v47, %v2471_v5  ;;  %v1173_v51 = vpop.f32.mrb[47].mxu1 }
 0x176   : > { %v1366_v52 = vpop.f32.mrb[47].mxu0  ;;  %v1363_v53 = vadd.f32 %v1362_v45, %v1170_v46  ;;  %v1174_v54 = vadd.f32 %v1173_v51, %v2473_v6 }
 0x177   : > { %v1453_v55 = vmax.f32 %v1361_v49, 0.0  ;;  %v1365_v56 = vadd.f32 %v1364_v48, %v1172_v50 }
 0x178   : > { %v1454_v57 = vmax.f32 %v1363_v53, 0.0  ;;  %v1367_v58 = vadd.f32 %v1366_v52, %v1174_v54 }
 0x179   : > { %1517 = vst [vmem:[%s2483_s16 + $0x160] sm:$0xff] %v1453_v55  ;;  %v1455_v59 = vmax.f32 %v1365_v56, 0.0 }
 0x17a   : > { %1518 = vst [vmem:[%s2483_s16 + $0x168] sm:$0xff] %v1454_v57  ;;  %v1456_v60 = vmax.f32 %v1367_v58, 0.0  ;;  %v1177_v61 = vpop.f32.mrb[48].mxu1 }
 0x17b   : > { %v1370_v62 = vpop.f32.mrb[48].mxu0  ;;  %1519 = vst [vmem:[%s2483_s16 + $0x170] sm:$0xff] %v1455_v59  ;;  %v1178_v63 = vadd.f32 %v1177_v61, %v2471_v5  ;;  %v1179_v0 = vpop.f32.mrb[49].mxu1 }
 0x17c   : > { %v1372_v1 = vpop.f32.mrb[49].mxu0  ;;  %1520 = vst [vmem:[%s2483_s16 + $0x178] sm:$0xff] %v1456_v60  ;;  %v1180_v2 = vadd.f32 %v1179_v0, %v2473_v6  ;;  %v1181_v3 = vpop.f32.mrb[50].mxu1 }
 0x17d   : > { %v1374_v4 = vpop.f32.mrb[50].mxu0  ;;  %v1371_v7 = vadd.f32 %v1370_v62, %v1178_v63  ;;  %v1182_v8 = vadd.f32 %v1181_v3, %v2471_v5  ;;  %v1183_v9 = vpop.f32.mrb[51].mxu1 }
 0x17e   : > { %v1376_v10 = vpop.f32.mrb[51].mxu0  ;;  %v1373_v11 = vadd.f32 %v1372_v1, %v1180_v2  ;;  %v1184_v12 = vadd.f32 %v1183_v9, %v2473_v6 }
 0x17f   : > { %v1457_v13 = vmax.f32 %v1371_v7, 0.0  ;;  %v1375_v14 = vadd.f32 %v1374_v4, %v1182_v8 }
 0x180   : > { %v1458_v15 = vmax.f32 %v1373_v11, 0.0  ;;  %v1377_v16 = vadd.f32 %v1376_v10, %v1184_v12 }
 0x181   : > { %1521 = vst [vmem:[%s2483_s16 + $0x180] sm:$0xff] %v1457_v13  ;;  %v1459_v17 = vmax.f32 %v1375_v14, 0.0 }
 0x182   : > { %1522 = vst [vmem:[%s2483_s16 + $0x188] sm:$0xff] %v1458_v15  ;;  %v1460_v18 = vmax.f32 %v1377_v16, 0.0  ;;  %v1187_v19 = vpop.f32.mrb[52].mxu1 }
 0x183   : > { %v1380_v20 = vpop.f32.mrb[52].mxu0  ;;  %1523 = vst [vmem:[%s2483_s16 + $0x190] sm:$0xff] %v1459_v17  ;;  %v1188_v21 = vadd.f32 %v1187_v19, %v2471_v5  ;;  %v1189_v22 = vpop.f32.mrb[53].mxu1 }
 0x184   : > { %v1382_v23 = vpop.f32.mrb[53].mxu0  ;;  %1524 = vst [vmem:[%s2483_s16 + $0x198] sm:$0xff] %v1460_v18  ;;  %v1190_v24 = vadd.f32 %v1189_v22, %v2473_v6  ;;  %v1191_v25 = vpop.f32.mrb[54].mxu1 }
 0x185   : > { %v1384_v26 = vpop.f32.mrb[54].mxu0  ;;  %v1381_v27 = vadd.f32 %v1380_v20, %v1188_v21  ;;  %v1192_v28 = vadd.f32 %v1191_v25, %v2471_v5  ;;  %v1193_v29 = vpop.f32.mrb[55].mxu1 }
 0x186   : > { %v1386_v30 = vpop.f32.mrb[55].mxu0  ;;  %v1383_v31 = vadd.f32 %v1382_v23, %v1190_v24  ;;  %v1194_v32 = vadd.f32 %v1193_v29, %v2473_v6 }
 0x187   : > { %v1461_v33 = vmax.f32 %v1381_v27, 0.0  ;;  %v1385_v34 = vadd.f32 %v1384_v26, %v1192_v28 }
 0x188   : > { %v1462_v35 = vmax.f32 %v1383_v31, 0.0  ;;  %v1387_v36 = vadd.f32 %v1386_v30, %v1194_v32 }
 0x189   : > { %1525 = vst [vmem:[%s2483_s16 + $0x1a0] sm:$0xff] %v1461_v33  ;;  %v1463_v37 = vmax.f32 %v1385_v34, 0.0 }
 0x18a   : > { %1526 = vst [vmem:[%s2483_s16 + $0x1a8] sm:$0xff] %v1462_v35  ;;  %v1464_v38 = vmax.f32 %v1387_v36, 0.0  ;;  %v1197_v39 = vpop.f32.mrb[56].mxu1 }
 0x18b   : > { %v1390_v40 = vpop.f32.mrb[56].mxu0  ;;  %1527 = vst [vmem:[%s2483_s16 + $0x1b0] sm:$0xff] %v1463_v37  ;;  %v1198_v41 = vadd.f32 %v1197_v39, %v2471_v5  ;;  %v1199_v42 = vpop.f32.mrb[57].mxu1 }
 0x18c   : > { %v1392_v43 = vpop.f32.mrb[57].mxu0  ;;  %1528 = vst [vmem:[%s2483_s16 + $0x1b8] sm:$0xff] %v1464_v38  ;;  %v1200_v44 = vadd.f32 %v1199_v42, %v2473_v6  ;;  %v1201_v45 = vpop.f32.mrb[58].mxu1 }
 0x18d   : > { %v1394_v46 = vpop.f32.mrb[58].mxu0  ;;  %v1391_v47 = vadd.f32 %v1390_v40, %v1198_v41  ;;  %v1202_v48 = vadd.f32 %v1201_v45, %v2471_v5  ;;  %v1203_v49 = vpop.f32.mrb[59].mxu1 }
 0x18e   : > { %v1396_v50 = vpop.f32.mrb[59].mxu0  ;;  %v1393_v51 = vadd.f32 %v1392_v43, %v1200_v44  ;;  %v1204_v52 = vadd.f32 %v1203_v49, %v2473_v6 }
 0x18f   : > { %v1465_v53 = vmax.f32 %v1391_v47, 0.0  ;;  %v1395_v54 = vadd.f32 %v1394_v46, %v1202_v48 }
 0x190   : > { %v1466_v55 = vmax.f32 %v1393_v51, 0.0  ;;  %v1397_v56 = vadd.f32 %v1396_v50, %v1204_v52 }
 0x191   : > { %1529 = vst [vmem:[%s2483_s16 + $0x1c0] sm:$0xff] %v1465_v53  ;;  %v1467_v57 = vmax.f32 %v1395_v54, 0.0 }
 0x192   : > { %1530 = vst [vmem:[%s2483_s16 + $0x1c8] sm:$0xff] %v1466_v55  ;;  %v1468_v58 = vmax.f32 %v1397_v56, 0.0  ;;  %v1207_v59 = vpop.f32.mrb[60].mxu1 }
 0x193   : > { %v1400_v60 = vpop.f32.mrb[60].mxu0  ;;  %1531 = vst [vmem:[%s2483_s16 + $0x1d0] sm:$0xff] %v1467_v57  ;;  %v1208_v61 = vadd.f32 %v1207_v59, %v2471_v5  ;;  %v1209_v62 = vpop.f32.mrb[61].mxu1 }
 0x194   : > { %v1402_v63 = vpop.f32.mrb[61].mxu0  ;;  %1532 = vst [vmem:[%s2483_s16 + $0x1d8] sm:$0xff] %v1468_v58  ;;  %v1210_v0 = vadd.f32 %v1209_v62, %v2473_v6  ;;  %v1211_v1 = vpop.f32.mrb[62].mxu1 }
 0x195   : > { %v1404_v2 = vpop.f32.mrb[62].mxu0  ;;  %v1401_v3 = vadd.f32 %v1400_v60, %v1208_v61  ;;  %v1212_v4 = vadd.f32 %v1211_v1, %v2471_v5  ;;  %v1213_v7 = vpop.f32.mrb[63].mxu1 }
 0x196   : > { %v1406_v8 = vpop.f32.mrb[63].mxu0  ;;  %v1403_v9 = vadd.f32 %v1402_v63, %v1210_v0  ;;  %v1214_v10 = vadd.f32 %v1213_v7, %v2473_v6 }
 0x197   : > { %v1469_v11 = vmax.f32 %v1401_v3, 0.0  ;;  %v1405_v12 = vadd.f32 %v1404_v2, %v1212_v4 }
 0x198   : > { %v1470_v13 = vmax.f32 %v1403_v9, 0.0  ;;  %v1407_v14 = vadd.f32 %v1406_v8, %v1214_v10 }
 0x199   : > { %1533 = vst [vmem:[%s2483_s16 + $0x1e0] sm:$0xff] %v1469_v11  ;;  %v1471_v15 = vmax.f32 %v1405_v12, 0.0 }
 0x19a   : > { %1534 = vst [vmem:[%s2483_s16 + $0x1e8] sm:$0xff] %v1470_v13  ;;  %v1472_v16 = vmax.f32 %v1407_v14, 0.0 }
 0x19b   : > { %1535 = vst [vmem:[%s2483_s16 + $0x1f0] sm:$0xff] %v1471_v15 }
 0x19c   : > { %1536 = vst [vmem:[%s2483_s16 + $0x1f8] sm:$0xff] %v1472_v16 }
 0x19d PF: > { %s13_s14 = sadd.s32 1, %s2159_s14   ;;  %s2623_s12 = smov %s2155_s13 }
 0x19e   : > { %p10_p5 = scmp.ge.s32.totalorder %s13_s14, 4   ;;  %s2624_s13 = smov %s2626_s15 }
 0x1a0   :  { %12 = sbr.rel (!%p10_p5) target bundleno = 2 (0x2), region = 68 }

// kernel: tile.33
= control target key start
LH: loop header
LB: loop body
LE: loop exit
PB: predicated region body
PF: predicated region fallthrough
CT: control target
= control target key end

     0   :  { %s22_s0 = inlined_call_operand.vmem [shape: f32[32], index: 0, kind: input, shape index: {}]   ;;  %s23_s1 = inlined_call_operand.vmem [shape: f32[4,32], index: 1, kind: output, shape index: {}]  }
   0x1   :  { %v4_v0 = vld [vmem:[%s22_s0] ss:$0 sm:$0xff] }
   0x2   :  { %5 = vst [vmem:[%s23_s1] sm:$0xf] %v4_v0 }

// kernel: tile.34
= control target key start
LH: loop header
LB: loop body
LE: loop exit
PB: predicated region body
PF: predicated region fallthrough
CT: control target
= control target key end

     0   :  { %vm7_vm0 = vcmask 261120   ;;  %s37_s8 = smov 32   ;;  %s38_s9 = smov 64   ;;  %vm13_vm1 = vcmask 1048320   ;;  %vm19_vm2 = vcmask 785920   ;;  %vm25_vm3 = vcmask 523520   ;;  %s55_s0 = inlined_call_operand.vmem [shape: f32[4,32], index: 0, kind: input, shape index: {}]   ;;  %s56_s1 = inlined_call_operand.vmem [shape: f32[1,128], index: 1, kind: output, shape index: {}]  }
   0x1   :  { %v4_v0 = vld [vmem:[%s55_s0] sm:$0xf]  ;;  %s36_s0 = smov 96  }
   0x2   :  { %5 = vst [vmem:[#allocation1] sm:$0xf] %v4_v0 }
   0x9   :  { %v10_v1 = vld [vmem:[#allocation1 + $0x3] sm:$0x1]   ;;  %v22_v2 = vld [vmem:[#allocation1 + $0x1] sm:$0x1]   ;;  %v6_v3 = vld [vmem:[#allocation1] sm:$0x1]  }
   0xa   :  { %11 = vrot.lane.b32.xlu0 %v10_v1, %s36_s0  ;;  %23 = vrot.lane.b32.xlu1 %v22_v2, %s37_s8  ;;  %v16_v4 = vld [vmem:[#allocation1 + $0x2] sm:$0x1]   ;;  %8 = vst.msk [vmem:[#allocation0] sm:$0x1] %vm7_vm0, %v6_v3  }
   0xe   :  { %17 = vrot.lane.b32.xlu0 %v16_v4, %s38_s9 }
  0x7c   :  { %v12_v5 = vpop.permute.xlu0 %11   ;;  %v24_v6 = vpop.permute.xlu1 %23  }
  0x7d   :  { %14 = vst.msk [vmem:[#allocation0] sm:$0x1] %vm13_vm1, %v12_v5  }
  0x80   :  { %v18_v7 = vpop.permute.xlu0 %17  }
  0x81   :  { %20 = vst.msk [vmem:[#allocation0] sm:$0x1] %vm19_vm2, %v18_v7  }
  0x82   :  { %26 = vst.msk [vmem:[#allocation0] sm:$0x1] %vm25_vm3, %v24_v6  }
  0x89   :  { %v30_v8 = vld [vmem:[#allocation0] sm:$0x1] }
  0x8a   :  { %32 = vst [vmem:[%s56_s1] sm:$0x1] %v30_v8 }

// kernel: vae_forward.18
= control target key start
LH: loop header
LB: loop body
LE: loop exit
PB: predicated region body
PF: predicated region fallthrough
CT: control target
= control target key end

     0   :  { %s1207_s12 = smov 0   ;;  %s1209_s13 = smov 0   ;;  %s1400_s0 = inlined_call_operand.vmem [shape: bf16[1280,256], index: 0, kind: input, shape index: {}]   ;;  %s1401_s1 = inlined_call_operand.vmem [shape: bf16[256,128], index: 1, kind: input, shape index: {}]   ;;  %s1402_s2 = inlined_call_operand.vmem [shape: f32[1,128], index: 2, kind: input, shape index: {}]   ;;  %s1403_s3 = inlined_call_operand.vmem [shape: f32[1280,128], index: 3, kind: output, shape index: {}]  }
   0x1   :  { %s1211_s14 = smov 0  }
   0x2 LB: > { %s25_s15 = sadd.s32 1, %s1181_s13  ;;  %p889_p0 = scmp.ge.s32.totalorder %s1185_s14, 1  ;;  %s1185_s14 = sphi %s1211_s14, %s13_s14   ;;  %s1181_s13 = sphi %s1209_s13, %s1405_s13   ;;  %s1177_s12 = sphi %s1207_s12, %s1404_s12  }
   0x3   : > { %p27_p1 = scmp.ge.s32.totalorder %s25_s15, 5  ;;  %p170_p2 = scmp.lt.s32.totalorder %s1185_s14, 6 }
   0x5   : > { %s1407_s15 = smov (%p27_p1, %s25_s15), 0  ;;  %p171_p3 = pnand %p889_p0, %p170_p2 }
   0x6   : > { %v1099_v0 = vld [vmem:[%s1401_s1 + $0x40] sm:$0xff] (!%p171_p3)   ;;  %s890_s18 = sshll.u32 (!%p171_p3), %s1177_s12, 5  ;;  %v1101_v2 = vld [vmem:[%s1401_s1 + $0x48] sm:$0xff] (!%p171_p3)   ;;  %v1103_v4 = vld [vmem:[%s1401_s1 + $0x50] sm:$0xff] (!%p171_p3)  }
   0x7   : > { %174 = sbr.rel (%p171_p3) target bundleno = 317 (0x13d), region = 32  ;;  %v1100_v1 = vld [vmem:[%s1401_s1] sm:$0xff] (!%p171_p3)   ;;  %947 = vmatprep.subr.bf16.mxu0 (!%p171_p3), %v1099_v0  ;;  %1059 = vmatprep.subr.bf16.mxu1 (!%p171_p3), %v1099_v0  ;;  %v1102_v3 = vld [vmem:[%s1401_s1 + $0x8] sm:$0xff] (!%p171_p3)   ;;  %p206_p4 = scmp.lt.s32.totalorder (!%p171_p3), %s890_s18, 159  ;;  %v1104_v5 = vld [vmem:[%s1401_s1 + $0x10] sm:$0xff] (!%p171_p3)  }
   0x8   : > { %948 = vmatpush3.bf16.msra.mxu0 (!%p171_p3), %v1100_v1  ;;  %1067 = vmatpush3.bf16.msra.mxu1 (!%p171_p3), %v1100_v1  ;;  %v1105_v6 = vld [vmem:[%s1401_s1 + $0x58] sm:$0xff] (!%p171_p3)   ;;  %v1107_v8 = vld [vmem:[%s1401_s1 + $0x60] sm:$0xff] (!%p171_p3)   ;;  %v1109_v10 = vld [vmem:[%s1401_s1 + $0x68] sm:$0xff] (!%p171_p3)  }
   0x9   : > { %949 = vmatprep.subr.bf16.mxu0 (!%p171_p3), %v1101_v2  ;;  %1060 = vmatprep.subr.bf16.mxu1 (!%p171_p3), %v1101_v2  ;;  %v1106_v7 = vld [vmem:[%s1401_s1 + $0x18] sm:$0xff] (!%p171_p3)   ;;  %v1108_v9 = vld [vmem:[%s1401_s1 + $0x20] sm:$0xff] (!%p171_p3)   ;;  %v1110_v13 = vld [vmem:[%s1401_s1 + $0x28] sm:$0xff] (!%p171_p3)  }
   0xa   : > { %v1111_v14 = vld [vmem:[%s1401_s1 + $0x70] sm:$0xff] (!%p171_p3)   ;;  %v1113_v16 = vld [vmem:[%s1401_s1 + $0x78] sm:$0xff] (!%p171_p3)   ;;  %v1318_v50 = vld [vmem:[%s1402_s2] ss:$0 sm:$0xff] (!%p171_p3) }
   0xb   : > { %v1112_v15 = vld [vmem:[%s1401_s1 + $0x30] sm:$0xff] (!%p171_p3)   ;;  %v1114_v17 = vld [vmem:[%s1401_s1 + $0x38] sm:$0xff] (!%p171_p3)  }
   0xc   : > { %950 = vmatpush3.bf16.msra.mxu0 (!%p171_p3), %v1102_v3  ;;  %1068 = vmatpush3.bf16.msra.mxu1 (!%p171_p3), %v1102_v3 }
   0xd   : > { %951 = vmatprep.subr.bf16.mxu0 (!%p171_p3), %v1103_v4  ;;  %1061 = vmatprep.subr.bf16.mxu1 (!%p171_p3), %v1103_v4 }
   0xe   : > { %s1409_s18 = smov (!%p206_p4, %s890_s18), 159 }
   0xf   : > { %s946_s6 = sshll.u32 %s1409_s18, 3 }
  0x10   : > { %952 = vmatpush3.bf16.msra.mxu0 %v1104_v5  ;;  %1069 = vmatpush3.bf16.msra.mxu1 %v1104_v5  ;;  %s1260_s11 = scalar_lea.vmem %s1400_s0, %s946_s6  ;;  %s1327_s8 = scalar_lea.vmem %s1403_s3, %s946_s6 }
  0x11   : > { %953 = vmatprep.subr.bf16.mxu0 %v1105_v6  ;;  %1062 = vmatprep.subr.bf16.mxu1 %v1105_v6  ;;  %v1117_v11 = vld [vmem:[%s1260_s11 + $0x4] ss:$8 sps:$4 sm:$0xff]   ;;  %v1115_v18 = vld [vmem:[%s1260_s11] ss:$8 sps:$4 sm:$0xff]   ;;  %v1121_v20 = vld [vmem:[%s1260_s11 + $0x14] ss:$8 sps:$4 sm:$0xff]  }
  0x12   : > { %v1120_v12 = vld [vmem:[%s1260_s11 + $0x84] ss:$8 sps:$4 sm:$0xff]   ;;  %588 = vmatprep.mubr.bf16.mxu0 %v1117_v11  ;;  %v1118_v19 = vld [vmem:[%s1260_s11 + $0x80] ss:$8 sps:$4 sm:$0xff]   ;;  %v1123_v21 = vld [vmem:[%s1260_s11 + $0x94] ss:$8 sps:$4 sm:$0xff]  }
  0x13   : > { %652 = vmatprep.mubr.bf16.mxu1 %v1120_v12  ;;  %v1125_v22 = vld [vmem:[%s1260_s11 + $0x10] ss:$8 sps:$4 sm:$0xff]   ;;  %v1127_v24 = vld [vmem:[%s1260_s11 + $0x24] ss:$8 sps:$4 sm:$0xff]   ;;  %v1131_v26 = vld [vmem:[%s1260_s11 + $0x20] ss:$8 sps:$4 sm:$0xff]  }
  0x14   : > { %954 = vmatpush3.bf16.msra.mxu0 %v1106_v7  ;;  %1070 = vmatpush3.bf16.msra.mxu1 %v1106_v7  ;;  %v1126_v23 = vld [vmem:[%s1260_s11 + $0x90] ss:$8 sps:$4 sm:$0xff]   ;;  %v1129_v25 = vld [vmem:[%s1260_s11 + $0xa4] ss:$8 sps:$4 sm:$0xff]   ;;  %v1132_v27 = vld [vmem:[%s1260_s11 + $0xa0] ss:$8 sps:$4 sm:$0xff]  }
  0x15   : > { %955 = vmatprep.subr.bf16.mxu0 %v1107_v8  ;;  %1063 = vmatprep.subr.bf16.mxu1 %v1107_v8  ;;  %v1133_v28 = vld [vmem:[%s1260_s11 + $0x34] ss:$8 sps:$4 sm:$0xff]   ;;  %v1137_v30 = vld [vmem:[%s1260_s11 + $0x30] ss:$8 sps:$4 sm:$0xff]   ;;  %v1139_v32 = vld [vmem:[%s1260_s11 + $0x44] ss:$8 sps:$4 sm:$0xff]  }
  0x16   : > { %v1135_v29 = vld [vmem:[%s1260_s11 + $0xb4] ss:$8 sps:$4 sm:$0xff]   ;;  %v1138_v31 = vld [vmem:[%s1260_s11 + $0xb0] ss:$8 sps:$4 sm:$0xff]   ;;  %v1141_v33 = vld [vmem:[%s1260_s11 + $0xc4] ss:$8 sps:$4 sm:$0xff]  }
  0x17   : > { %v1143_v34 = vld [vmem:[%s1260_s11 + $0x40] ss:$8 sps:$4 sm:$0xff]   ;;  %v1145_v36 = vld [vmem:[%s1260_s11 + $0x54] ss:$8 sps:$4 sm:$0xff]   ;;  %v1149_v38 = vld [vmem:[%s1260_s11 + $0x50] ss:$8 sps:$4 sm:$0xff]  }
  0x18   : > { %956 = vmatpush3.bf16.msra.mxu0 %v1108_v9  ;;  %1071 = vmatpush3.bf16.msra.mxu1 %v1108_v9  ;;  %v1144_v35 = vld [vmem:[%s1260_s11 + $0xc0] ss:$8 sps:$4 sm:$0xff]   ;;  %v1147_v37 = vld [vmem:[%s1260_s11 + $0xd4] ss:$8 sps:$4 sm:$0xff]   ;;  %v1150_v39 = vld [vmem:[%s1260_s11 + $0xd0] ss:$8 sps:$4 sm:$0xff]  }
  0x19   : > { %957 = vmatprep.subr.bf16.mxu0 %v1109_v10  ;;  %1064 = vmatprep.subr.bf16.mxu1 %v1109_v10  ;;  %v1151_v40 = vld [vmem:[%s1260_s11 + $0x64] ss:$8 sps:$4 sm:$0xff]   ;;  %v1155_v42 = vld [vmem:[%s1260_s11 + $0x60] ss:$8 sps:$4 sm:$0xff]   ;;  %v1157_v44 = vld [vmem:[%s1260_s11 + $0x74] ss:$8 sps:$4 sm:$0xff]  }
  0x1a   : > { %v1153_v41 = vld [vmem:[%s1260_s11 + $0xe4] ss:$8 sps:$4 sm:$0xff]   ;;  %v1156_v43 = vld [vmem:[%s1260_s11 + $0xe0] ss:$8 sps:$4 sm:$0xff]   ;;  %v1159_v45 = vld [vmem:[%s1260_s11 + $0xf4] ss:$8 sps:$4 sm:$0xff]  }
  0x1b   : > { %v1161_v46 = vld [vmem:[%s1260_s11 + $0x70] ss:$8 sps:$4 sm:$0xff]  }
  0x1c   : > { %958 = vmatpush3.bf16.msra.mxu0 %v1110_v13  ;;  %1072 = vmatpush3.bf16.msra.mxu1 %v1110_v13  ;;  %v1162_v47 = vld [vmem:[%s1260_s11 + $0xf0] ss:$8 sps:$4 sm:$0xff]  }
  0x1d   : > { %959 = vmatprep.subr.bf16.mxu0 %v1111_v14  ;;  %1065 = vmatprep.subr.bf16.mxu1 %v1111_v14 }
  0x20   : > { %960 = vmatpush3.bf16.msra.mxu0 %v1112_v15  ;;  %1073 = vmatpush3.bf16.msra.mxu1 %v1112_v15 }
  0x21   : > { %961 = vmatprep.subr.bf16.mxu0 %v1113_v16  ;;  %1066 = vmatprep.subr.bf16.mxu1 %v1113_v16 }
  0x24   : > { %962 = vmatpush3.bf16.msra.mxu0 %v1114_v17  ;;  %1074 = vmatpush3.bf16.msra.mxu1 %v1114_v17 }
  0x27   : > { %589 = vmatmul.mubr.bf16.vlgmr.msra.gmra.mrb[0].mxu0 %v1115_v18  ;;  %653 = vmatmul.mubr.bf16.vlgmr.msra.gmra.mrb[0].mxu1 %v1118_v19 }
  0x28   : > { %596 = vmatprep.mubr.bf16.mxu0 %v1121_v20  ;;  %660 = vmatprep.mubr.bf16.mxu1 %v1123_v21 }
  0x2f   : > { %597 = vmatmul.mubr.bf16.gmra.mrb[4].mxu0 %v1125_v22  ;;  %661 = vmatmul.mubr.bf16.gmra.mrb[4].mxu1 %v1126_v23 }
  0x30   : > { %604 = vmatprep.mubr.bf16.mxu0 %v1127_v24  ;;  %668 = vmatprep.mubr.bf16.mxu1 %v1129_v25 }
  0x37   : > { %605 = vmatmul.mubr.bf16.gmra.mrb[8].mxu0 %v1131_v26  ;;  %669 = vmatmul.mubr.bf16.gmra.mrb[8].mxu1 %v1132_v27 }
  0x38   : > { %612 = vmatprep.mubr.bf16.mxu0 %v1133_v28  ;;  %676 = vmatprep.mubr.bf16.mxu1 %v1135_v29 }
  0x3f   : > { %613 = vmatmul.mubr.bf16.gmra.mrb[12].mxu0 %v1137_v30  ;;  %677 = vmatmul.mubr.bf16.gmra.mrb[12].mxu1 %v1138_v31 }
  0x40   : > { %620 = vmatprep.mubr.bf16.mxu0 %v1139_v32  ;;  %684 = vmatprep.mubr.bf16.mxu1 %v1141_v33 }
  0x47   : > { %621 = vmatmul.mubr.bf16.gmra.mrb[16].mxu0 %v1143_v34  ;;  %685 = vmatmul.mubr.bf16.gmra.mrb[16].mxu1 %v1144_v35 }
  0x48   : > { %628 = vmatprep.mubr.bf16.mxu0 %v1145_v36  ;;  %692 = vmatprep.mubr.bf16.mxu1 %v1147_v37 }
  0x4f   : > { %629 = vmatmul.mubr.bf16.gmra.mrb[20].mxu0 %v1149_v38  ;;  %693 = vmatmul.mubr.bf16.gmra.mrb[20].mxu1 %v1150_v39 }
  0x50   : > { %636 = vmatprep.mubr.bf16.mxu0 %v1151_v40  ;;  %700 = vmatprep.mubr.bf16.mxu1 %v1153_v41 }
  0x57   : > { %637 = vmatmul.mubr.bf16.gmra.mrb[24].mxu0 %v1155_v42  ;;  %701 = vmatmul.mubr.bf16.gmra.mrb[24].mxu1 %v1156_v43 }
  0x58   : > { %644 = vmatprep.mubr.bf16.mxu0 %v1157_v44  ;;  %708 = vmatprep.mubr.bf16.mxu1 %v1159_v45 }
  0x5f   : > { %645 = vmatmul.mubr.bf16.gmra.mrb[28].mxu0 %v1161_v46  ;;  %709 = vmatmul.mubr.bf16.gmra.mrb[28].mxu1 %v1162_v47 }
  0xfa   : > { %v963_v48 = vpop.f32.mrb[0].mxu0  ;;  %v1011_v49 = vpop.f32.mrb[0].mxu1 }
  0xfb   : > { %v964_v51 = vpop.f32.mrb[1].mxu0  ;;  %v1012_v52 = vpop.f32.mrb[1].mxu1 }
  0xfc   : > { %v965_v53 = vadd.f32 %v964_v51, %v963_v48  ;;  %v1013_v54 = vadd.f32 %v1012_v52, %v1011_v49  ;;  %v966_v55 = vpop.f32.mrb[2].mxu0  ;;  %v1014_v56 = vpop.f32.mrb[2].mxu1 }
  0xfd   : > { %v967_v57 = vpop.f32.mrb[3].mxu0  ;;  %v1015_v58 = vpop.f32.mrb[3].mxu1 }
  0xfe   : > { %v591_v59 = vadd.f32 %v965_v53, %v1318_v50  ;;  %v655_v60 = vadd.f32 %v1013_v54, %v1318_v50  ;;  %v968_v61 = vadd.f32 %v967_v57, %v966_v55  ;;  %v1016_v62 = vadd.f32 %v1015_v58, %v1014_v56 }
 0x100   : > { %v717_v63 = vmax.f32 %v591_v59, 0.0  ;;  %v733_v0 = vmax.f32 %v655_v60, 0.0  ;;  %v594_v1 = vadd.f32 %v968_v61, %v1318_v50  ;;  %v658_v2 = vadd.f32 %v1016_v62, %v1318_v50 }
 0x102   : > { %749 = vst [vmem:[%s1327_s8] sm:$0xff] %v717_v63  ;;  %765 = vst [vmem:[%s1327_s8 + $0x80] sm:$0xff] %v733_v0  ;;  %v718_v3 = vmax.f32 %v594_v1, 0.0  ;;  %v734_v4 = vmax.f32 %v658_v2, 0.0  ;;  %v969_v5 = vpop.f32.mrb[4].mxu0  ;;  %v1017_v6 = vpop.f32.mrb[4].mxu1 }
 0x103   : > { %v970_v7 = vpop.f32.mrb[5].mxu0  ;;  %v1018_v8 = vpop.f32.mrb[5].mxu1 }
 0x104   : > { %750 = vst [vmem:[%s1327_s8 + $0x8] sm:$0xff] %v718_v3  ;;  %766 = vst [vmem:[%s1327_s8 + $0x88] sm:$0xff] %v734_v4  ;;  %v971_v9 = vadd.f32 %v970_v7, %v969_v5  ;;  %v1019_v10 = vadd.f32 %v1018_v8, %v1017_v6  ;;  %v972_v11 = vpop.f32.mrb[6].mxu0  ;;  %v1020_v12 = vpop.f32.mrb[6].mxu1 }
 0x105   : > { %v973_v13 = vpop.f32.mrb[7].mxu0  ;;  %v1021_v14 = vpop.f32.mrb[7].mxu1 }
 0x106   : > { %v599_v15 = vadd.f32 %v971_v9, %v1318_v50  ;;  %v663_v16 = vadd.f32 %v1019_v10, %v1318_v50  ;;  %v974_v17 = vadd.f32 %v973_v13, %v972_v11  ;;  %v1022_v18 = vadd.f32 %v1021_v14, %v1020_v12 }
 0x108   : > { %v719_v19 = vmax.f32 %v599_v15, 0.0  ;;  %v735_v20 = vmax.f32 %v663_v16, 0.0  ;;  %v602_v21 = vadd.f32 %v974_v17, %v1318_v50  ;;  %v666_v22 = vadd.f32 %v1022_v18, %v1318_v50 }
 0x10a   : > { %751 = vst [vmem:[%s1327_s8 + $0x10] sm:$0xff] %v719_v19  ;;  %767 = vst [vmem:[%s1327_s8 + $0x90] sm:$0xff] %v735_v20  ;;  %v720_v23 = vmax.f32 %v602_v21, 0.0  ;;  %v736_v24 = vmax.f32 %v666_v22, 0.0  ;;  %v975_v25 = vpop.f32.mrb[8].mxu0  ;;  %v1023_v26 = vpop.f32.mrb[8].mxu1 }
 0x10b   : > { %v976_v27 = vpop.f32.mrb[9].mxu0  ;;  %v1024_v28 = vpop.f32.mrb[9].mxu1 }
 0x10c   : > { %752 = vst [vmem:[%s1327_s8 + $0x18] sm:$0xff] %v720_v23  ;;  %768 = vst [vmem:[%s1327_s8 + $0x98] sm:$0xff] %v736_v24  ;;  %v977_v29 = vadd.f32 %v976_v27, %v975_v25  ;;  %v1025_v30 = vadd.f32 %v1024_v28, %v1023_v26  ;;  %v978_v31 = vpop.f32.mrb[10].mxu0  ;;  %v1026_v32 = vpop.f32.mrb[10].mxu1 }
 0x10d   : > { %v979_v33 = vpop.f32.mrb[11].mxu0  ;;  %v1027_v34 = vpop.f32.mrb[11].mxu1 }
 0x10e   : > { %v607_v35 = vadd.f32 %v977_v29, %v1318_v50  ;;  %v671_v36 = vadd.f32 %v1025_v30, %v1318_v50  ;;  %v980_v37 = vadd.f32 %v979_v33, %v978_v31  ;;  %v1028_v38 = vadd.f32 %v1027_v34, %v1026_v32 }
 0x110   : > { %v721_v39 = vmax.f32 %v607_v35, 0.0  ;;  %v737_v40 = vmax.f32 %v671_v36, 0.0  ;;  %v610_v41 = vadd.f32 %v980_v37, %v1318_v50  ;;  %v674_v42 = vadd.f32 %v1028_v38, %v1318_v50 }
 0x112   : > { %753 = vst [vmem:[%s1327_s8 + $0x20] sm:$0xff] %v721_v39  ;;  %769 = vst [vmem:[%s1327_s8 + $0xa0] sm:$0xff] %v737_v40  ;;  %v722_v43 = vmax.f32 %v610_v41, 0.0  ;;  %v738_v44 = vmax.f32 %v674_v42, 0.0  ;;  %v981_v45 = vpop.f32.mrb[12].mxu0  ;;  %v1029_v46 = vpop.f32.mrb[12].mxu1 }
 0x113   : > { %v982_v47 = vpop.f32.mrb[13].mxu0  ;;  %v1030_v48 = vpop.f32.mrb[13].mxu1 }
 0x114   : > { %754 = vst [vmem:[%s1327_s8 + $0x28] sm:$0xff] %v722_v43  ;;  %770 = vst [vmem:[%s1327_s8 + $0xa8] sm:$0xff] %v738_v44  ;;  %v983_v49 = vadd.f32 %v982_v47, %v981_v45  ;;  %v1031_v51 = vadd.f32 %v1030_v48, %v1029_v46  ;;  %v984_v52 = vpop.f32.mrb[14].mxu0  ;;  %v1032_v53 = vpop.f32.mrb[14].mxu1 }
 0x115   : > { %v985_v54 = vpop.f32.mrb[15].mxu0  ;;  %v1033_v55 = vpop.f32.mrb[15].mxu1 }
 0x116   : > { %v615_v56 = vadd.f32 %v983_v49, %v1318_v50  ;;  %v679_v57 = vadd.f32 %v1031_v51, %v1318_v50  ;;  %v986_v58 = vadd.f32 %v985_v54, %v984_v52  ;;  %v1034_v59 = vadd.f32 %v1033_v55, %v1032_v53 }
 0x118   : > { %v723_v60 = vmax.f32 %v615_v56, 0.0  ;;  %v739_v61 = vmax.f32 %v679_v57, 0.0  ;;  %v618_v62 = vadd.f32 %v986_v58, %v1318_v50  ;;  %v682_v63 = vadd.f32 %v1034_v59, %v1318_v50 }
 0x11a   : > { %755 = vst [vmem:[%s1327_s8 + $0x30] sm:$0xff] %v723_v60  ;;  %771 = vst [vmem:[%s1327_s8 + $0xb0] sm:$0xff] %v739_v61  ;;  %v724_v0 = vmax.f32 %v618_v62, 0.0  ;;  %v740_v1 = vmax.f32 %v682_v63, 0.0  ;;  %v987_v2 = vpop.f32.mrb[16].mxu0  ;;  %v1035_v3 = vpop.f32.mrb[16].mxu1 }
 0x11b   : > { %v988_v4 = vpop.f32.mrb[17].mxu0  ;;  %v1036_v5 = vpop.f32.mrb[17].mxu1 }
 0x11c   : > { %756 = vst [vmem:[%s1327_s8 + $0x38] sm:$0xff] %v724_v0  ;;  %772 = vst [vmem:[%s1327_s8 + $0xb8] sm:$0xff] %v740_v1  ;;  %v989_v6 = vadd.f32 %v988_v4, %v987_v2  ;;  %v1037_v7 = vadd.f32 %v1036_v5, %v1035_v3  ;;  %v990_v8 = vpop.f32.mrb[18].mxu0  ;;  %v1038_v9 = vpop.f32.mrb[18].mxu1 }
 0x11d   : > { %v991_v10 = vpop.f32.mrb[19].mxu0  ;;  %v1039_v11 = vpop.f32.mrb[19].mxu1 }
 0x11e   : > { %v623_v12 = vadd.f32 %v989_v6, %v1318_v50  ;;  %v687_v13 = vadd.f32 %v1037_v7, %v1318_v50  ;;  %v992_v14 = vadd.f32 %v991_v10, %v990_v8  ;;  %v1040_v15 = vadd.f32 %v1039_v11, %v1038_v9 }
 0x120   : > { %v725_v16 = vmax.f32 %v623_v12, 0.0  ;;  %v741_v17 = vmax.f32 %v687_v13, 0.0  ;;  %v626_v18 = vadd.f32 %v992_v14, %v1318_v50  ;;  %v690_v19 = vadd.f32 %v1040_v15, %v1318_v50 }
 0x122   : > { %757 = vst [vmem:[%s1327_s8 + $0x40] sm:$0xff] %v725_v16  ;;  %773 = vst [vmem:[%s1327_s8 + $0xc0] sm:$0xff] %v741_v17  ;;  %v726_v20 = vmax.f32 %v626_v18, 0.0  ;;  %v742_v21 = vmax.f32 %v690_v19, 0.0  ;;  %v993_v22 = vpop.f32.mrb[20].mxu0  ;;  %v1041_v23 = vpop.f32.mrb[20].mxu1 }
 0x123   : > { %v994_v24 = vpop.f32.mrb[21].mxu0  ;;  %v1042_v25 = vpop.f32.mrb[21].mxu1 }
 0x124   : > { %758 = vst [vmem:[%s1327_s8 + $0x48] sm:$0xff] %v726_v20  ;;  %774 = vst [vmem:[%s1327_s8 + $0xc8] sm:$0xff] %v742_v21  ;;  %v995_v26 = vadd.f32 %v994_v24, %v993_v22  ;;  %v1043_v27 = vadd.f32 %v1042_v25, %v1041_v23  ;;  %v996_v28 = vpop.f32.mrb[22].mxu0  ;;  %v1044_v29 = vpop.f32.mrb[22].mxu1 }
 0x125   : > { %v997_v30 = vpop.f32.mrb[23].mxu0  ;;  %v1045_v31 = vpop.f32.mrb[23].mxu1 }
 0x126   : > { %v631_v32 = vadd.f32 %v995_v26, %v1318_v50  ;;  %v695_v33 = vadd.f32 %v1043_v27, %v1318_v50  ;;  %v998_v34 = vadd.f32 %v997_v30, %v996_v28  ;;  %v1046_v35 = vadd.f32 %v1045_v31, %v1044_v29 }
 0x128   : > { %v727_v36 = vmax.f32 %v631_v32, 0.0  ;;  %v743_v37 = vmax.f32 %v695_v33, 0.0  ;;  %v634_v38 = vadd.f32 %v998_v34, %v1318_v50  ;;  %v698_v39 = vadd.f32 %v1046_v35, %v1318_v50 }
 0x12a   : > { %759 = vst [vmem:[%s1327_s8 + $0x50] sm:$0xff] %v727_v36  ;;  %775 = vst [vmem:[%s1327_s8 + $0xd0] sm:$0xff] %v743_v37  ;;  %v728_v40 = vmax.f32 %v634_v38, 0.0  ;;  %v744_v41 = vmax.f32 %v698_v39, 0.0  ;;  %v999_v42 = vpop.f32.mrb[24].mxu0  ;;  %v1047_v43 = vpop.f32.mrb[24].mxu1 }
 0x12b   : > { %v1000_v44 = vpop.f32.mrb[25].mxu0  ;;  %v1048_v45 = vpop.f32.mrb[25].mxu1 }
 0x12c   : > { %760 = vst [vmem:[%s1327_s8 + $0x58] sm:$0xff] %v728_v40  ;;  %776 = vst [vmem:[%s1327_s8 + $0xd8] sm:$0xff] %v744_v41  ;;  %v1001_v46 = vadd.f32 %v1000_v44, %v999_v42  ;;  %v1049_v47 = vadd.f32 %v1048_v45, %v1047_v43  ;;  %v1002_v48 = vpop.f32.mrb[26].mxu0  ;;  %v1050_v49 = vpop.f32.mrb[26].mxu1 }
 0x12d   : > { %v1003_v51 = vpop.f32.mrb[27].mxu0  ;;  %v1051_v52 = vpop.f32.mrb[27].mxu1 }
 0x12e   : > { %v639_v53 = vadd.f32 %v1001_v46, %v1318_v50  ;;  %v703_v54 = vadd.f32 %v1049_v47, %v1318_v50  ;;  %v1004_v55 = vadd.f32 %v1003_v51, %v1002_v48  ;;  %v1052_v56 = vadd.f32 %v1051_v52, %v1050_v49 }
 0x130   : > { %v729_v57 = vmax.f32 %v639_v53, 0.0  ;;  %v745_v58 = vmax.f32 %v703_v54, 0.0  ;;  %v642_v59 = vadd.f32 %v1004_v55, %v1318_v50  ;;  %v706_v60 = vadd.f32 %v1052_v56, %v1318_v50 }
 0x132   : > { %761 = vst [vmem:[%s1327_s8 + $0x60] sm:$0xff] %v729_v57  ;;  %777 = vst [vmem:[%s1327_s8 + $0xe0] sm:$0xff] %v745_v58  ;;  %v730_v61 = vmax.f32 %v642_v59, 0.0  ;;  %v746_v62 = vmax.f32 %v706_v60, 0.0  ;;  %v1005_v63 = vpop.f32.mrb[28].mxu0  ;;  %v1053_v0 = vpop.f32.mrb[28].mxu1 }
 0x133   : > { %v1006_v1 = vpop.f32.mrb[29].mxu0  ;;  %v1054_v2 = vpop.f32.mrb[29].mxu1 }
 0x134   : > { %762 = vst [vmem:[%s1327_s8 + $0x68] sm:$0xff] %v730_v61  ;;  %778 = vst [vmem:[%s1327_s8 + $0xe8] sm:$0xff] %v746_v62  ;;  %v1007_v3 = vadd.f32 %v1006_v1, %v1005_v63  ;;  %v1055_v4 = vadd.f32 %v1054_v2, %v1053_v0  ;;  %v1008_v5 = vpop.f32.mrb[30].mxu0  ;;  %v1056_v6 = vpop.f32.mrb[30].mxu1 }
 0x135   : > { %v1009_v7 = vpop.f32.mrb[31].mxu0  ;;  %v1057_v8 = vpop.f32.mrb[31].mxu1 }
 0x136   : > { %v647_v9 = vadd.f32 %v1007_v3, %v1318_v50  ;;  %v711_v10 = vadd.f32 %v1055_v4, %v1318_v50  ;;  %v1010_v11 = vadd.f32 %v1009_v7, %v1008_v5  ;;  %v1058_v12 = vadd.f32 %v1057_v8, %v1056_v6 }
 0x138   : > { %v731_v13 = vmax.f32 %v647_v9, 0.0  ;;  %v747_v14 = vmax.f32 %v711_v10, 0.0  ;;  %v650_v15 = vadd.f32 %v1010_v11, %v1318_v50  ;;  %v714_v16 = vadd.f32 %v1058_v12, %v1318_v50 }
 0x13a   : > { %763 = vst [vmem:[%s1327_s8 + $0x70] sm:$0xff] %v731_v13  ;;  %779 = vst [vmem:[%s1327_s8 + $0xf0] sm:$0xff] %v747_v14  ;;  %v732_v17 = vmax.f32 %v650_v15, 0.0  ;;  %v748_v18 = vmax.f32 %v714_v16, 0.0 }
 0x13c   : > { %764 = vst [vmem:[%s1327_s8 + $0x78] sm:$0xff] %v732_v17  ;;  %780 = vst [vmem:[%s1327_s8 + $0xf8] sm:$0xff] %v748_v18 }
 0x13d PF: > { %s13_s14 = sadd.s32 1, %s1185_s14   ;;  %s1404_s12 = smov %s1181_s13 }
 0x13e   : > { %p10_p5 = scmp.ge.s32.totalorder %s13_s14, 7   ;;  %s1405_s13 = smov %s1407_s15 }
 0x140   :  { %12 = sbr.rel (!%p10_p5) target bundleno = 2 (0x2), region = 68 }

// kernel: tile.38
= control target key start
LH: loop header
LB: loop body
LE: loop exit
PB: predicated region body
PF: predicated region fallthrough
CT: control target
= control target key end

     0   :  { %s22_s0 = inlined_call_operand.vmem [shape: f32[3], index: 0, kind: input, shape index: {}]   ;;  %s23_s1 = inlined_call_operand.vmem [shape: f32[4,3], index: 1, kind: output, shape index: {}]  }
   0x1   :  { %v4_v0 = vld [vmem:[%s22_s0] ss:$0 sm:$0xff] }
   0x2   :  { %5 = vst [vmem:[%s23_s1] sm:$0xf] %v4_v0 }

// kernel: tile.39
= control target key start
LH: loop header
LB: loop body
LE: loop exit
PB: predicated region body
PF: predicated region fallthrough
CT: control target
= control target key end

     0   :  { %vm7_vm0 = vcmask 23552   ;;  %s37_s8 = smov 3   ;;  %s38_s9 = smov 6   ;;  %vm13_vm1 = vcmask 97352   ;;  %vm19_vm2 = vcmask 72752   ;;  %vm25_vm3 = vcmask 48152   ;;  %s55_s0 = inlined_call_operand.vmem [shape: f32[4,3], index: 0, kind: input, shape index: {}]   ;;  %s56_s1 = inlined_call_operand.vmem [shape: f32[1,12], index: 1, kind: output, shape index: {}]  }
   0x1   :  { %v4_v0 = vld [vmem:[%s55_s0] sm:$0xf]  ;;  %s36_s0 = smov 9  }
   0x2   :  { %5 = vst [vmem:[#allocation1] sm:$0xf] %v4_v0 }
   0x9   :  { %v10_v1 = vld [vmem:[#allocation1 + $0x3] sm:$0x1]   ;;  %v22_v2 = vld [vmem:[#allocation1 + $0x1] sm:$0x1]   ;;  %v6_v3 = vld [vmem:[#allocation1] sm:$0x1]  }
   0xa   :  { %11 = vrot.lane.b32.xlu0 %v10_v1, %s36_s0  ;;  %23 = vrot.lane.b32.xlu1 %v22_v2, %s37_s8  ;;  %v16_v4 = vld [vmem:[#allocation1 + $0x2] sm:$0x1]   ;;  %8 = vst.msk [vmem:[#allocation0] sm:$0x1] %vm7_vm0, %v6_v3  }
   0xe   :  { %17 = vrot.lane.b32.xlu0 %v16_v4, %s38_s9 }
  0x7c   :  { %v12_v5 = vpop.permute.xlu0 %11   ;;  %v24_v6 = vpop.permute.xlu1 %23  }
  0x7d   :  { %14 = vst.msk [vmem:[#allocation0] sm:$0x1] %vm13_vm1, %v12_v5  }
  0x80   :  { %v18_v7 = vpop.permute.xlu0 %17  }
  0x81   :  { %20 = vst.msk [vmem:[#allocation0] sm:$0x1] %vm19_vm2, %v18_v7  }
  0x82   :  { %26 = vst.msk [vmem:[#allocation0] sm:$0x1] %vm25_vm3, %v24_v6  }
  0x89   :  { %v30_v8 = vld [vmem:[#allocation0] sm:$0x1] }
  0x8a   :  { %32 = vst [vmem:[%s56_s1] sm:$0x1] %v30_v8 }

// kernel: vae_forward.19
= control target key start
LH: loop header
LB: loop body
LE: loop exit
PB: predicated region body
PF: predicated region fallthrough
CT: control target
= control target key end

     0   :  { %s1291_s12 = smov 0   ;;  %s1293_s13 = smov 0   ;;  %s1500_s0 = inlined_call_operand.vmem [shape: bf16[4864,128], index: 0, kind: input, shape index: {}]   ;;  %s1501_s1 = inlined_call_operand.vmem [shape: bf16[128,12], index: 1, kind: input, shape index: {}]   ;;  %s1502_s2 = inlined_call_operand.vmem [shape: f32[1,12], index: 2, kind: input, shape index: {}]   ;;  %s1503_s3 = inlined_call_operand.vmem [shape: f32[4864,12], index: 3, kind: output, shape index: {}]  }
   0x1   :  { %s1295_s14 = smov 0  }
   0x2 LB: > { %s25_s15 = sadd.s32 1, %s1265_s13  ;;  %p919_p0 = scmp.ge.s32.totalorder %s1269_s14, 1  ;;  %s1269_s14 = sphi %s1295_s14, %s13_s14   ;;  %s1265_s13 = sphi %s1293_s13, %s1505_s13   ;;  %s1261_s12 = sphi %s1291_s12, %s1504_s12  }
   0x3   : > { %p27_p1 = scmp.ge.s32.totalorder %s25_s15, 19  ;;  %p169_p2 = scmp.lt.s32.totalorder %s1269_s14, 20 }
   0x5   : > { %s1507_s15 = smov (%p27_p1, %s25_s15), 0  ;;  %p170_p3 = pnand %p919_p0, %p169_p2 }
   0x6   : > { %v1095_v0 = vld [vmem:[%s1501_s1] sm:$0xff] (!%p170_p3)   ;;  %s920_s18 = sshll.u32 (!%p170_p3), %s1261_s12, 5  ;;  %v1096_v1 = vld [vmem:[%s1501_s1 + $0x8] sm:$0xff] (!%p170_p3)   ;;  %v1097_v2 = vld [vmem:[%s1501_s1 + $0x10] sm:$0xff] (!%p170_p3)   ;;  %vm778_vm0 = vcmask (!%p170_p3), 97280  }
   0x7   : > { %173 = sbr.rel (%p170_p3) target bundleno = 339 (0x153), region = 32  ;;  %p204_p4 = scmp.lt.s32.totalorder (!%p170_p3), %s920_s18, 607  ;;  %1007 = vmatprep.subr.bf16.mxu0 (!%p170_p3), %v1095_v0  ;;  %1055 = vmatprep.subr.bf16.mxu1 (!%p170_p3), %v1095_v0  ;;  %v1098_v3 = vld [vmem:[%s1501_s1 + $0x18] sm:$0xff] (!%p170_p3)   ;;  %v1099_v6 = vld [vmem:[%s1501_s1 + $0x20] sm:$0xff] (!%p170_p3)   ;;  %v1100_v7 = vld [vmem:[%s1501_s1 + $0x28] sm:$0xff] (!%p170_p3)  }
   0x8   : > { %1008 = vmatpush3.bf16.msra.mxu0 (!%p170_p3), %v1095_v0  ;;  %1063 = vmatpush3.bf16.msra.mxu1 (!%p170_p3), %v1095_v0  ;;  %v1101_v8 = vld [vmem:[%s1501_s1 + $0x30] sm:$0xff] (!%p170_p3)   ;;  %v1102_v9 = vld [vmem:[%s1501_s1 + $0x38] sm:$0xff] (!%p170_p3)   ;;  %v1360_v24 = vld [vmem:[%s1502_s2] ss:$0 sm:$0xff] (!%p170_p3) }
   0x9   : > { %1009 = vmatprep.subr.bf16.mxu0 (!%p170_p3), %v1096_v1  ;;  %1056 = vmatprep.subr.bf16.mxu1 (!%p170_p3), %v1096_v1 }
   0xc   : > { %1010 = vmatpush3.bf16.msra.mxu0 (!%p170_p3), %v1096_v1  ;;  %1064 = vmatpush3.bf16.msra.mxu1 (!%p170_p3), %v1096_v1 }
   0xd   : > { %1011 = vmatprep.subr.bf16.mxu0 (!%p170_p3), %v1097_v2  ;;  %1057 = vmatprep.subr.bf16.mxu1 (!%p170_p3), %v1097_v2 }
   0xe   : > { %s1509_s18 = smov (!%p204_p4, %s920_s18), 607 }
   0xf   : > { %s921_s23 = sshll.u32 %s1509_s18, 2  ;;  %s923_s12 = sshll.u32 %s1509_s18, 3 }
  0x10   : > { %s1324_s26 = scalar_lea.vmem %s1500_s0, %s921_s23  ;;  %1012 = vmatpush3.bf16.msra.mxu0 %v1097_v2  ;;  %1065 = vmatpush3.bf16.msra.mxu1 %v1097_v2  ;;  %s1390_s18 = scalar_lea.vmem %s1503_s3, %s923_s12 }
  0x11   : > { %v1103_v4 = vld [vmem:[%s1324_s26] sm:$0xff]   ;;  %1013 = vmatprep.subr.bf16.mxu0 %v1098_v3  ;;  %1058 = vmatprep.subr.bf16.mxu1 %v1098_v3  ;;  %v1105_v10 = vld [vmem:[%s1324_s26 + $0x8] sm:$0xff]   ;;  %v1107_v12 = vld [vmem:[%s1324_s26 + $0x10] sm:$0xff]  }
  0x12   : > { %v1104_v5 = vld [vmem:[%s1324_s26 + $0x40] sm:$0xff]   ;;  %1023 = vmatprep.mubr.bf16.mxu0 %v1103_v4  ;;  %v1106_v11 = vld [vmem:[%s1324_s26 + $0x48] sm:$0xff]   ;;  %v1108_v13 = vld [vmem:[%s1324_s26 + $0x50] sm:$0xff]  }
  0x13   : > { %1039 = vmatprep.mubr.bf16.mxu1 %v1104_v5  ;;  %v1109_v14 = vld [vmem:[%s1324_s26 + $0x18] sm:$0xff]   ;;  %v1111_v16 = vld [vmem:[%s1324_s26 + $0x20] sm:$0xff]   ;;  %v1113_v18 = vld [vmem:[%s1324_s26 + $0x28] sm:$0xff]  }
  0x14   : > { %1014 = vmatpush3.bf16.msra.mxu0 %v1098_v3  ;;  %1066 = vmatpush3.bf16.msra.mxu1 %v1098_v3  ;;  %v1110_v15 = vld [vmem:[%s1324_s26 + $0x58] sm:$0xff]   ;;  %v1112_v17 = vld [vmem:[%s1324_s26 + $0x60] sm:$0xff]   ;;  %v1114_v19 = vld [vmem:[%s1324_s26 + $0x68] sm:$0xff]  }
  0x15   : > { %1015 = vmatprep.subr.bf16.mxu0 %v1099_v6  ;;  %1059 = vmatprep.subr.bf16.mxu1 %v1099_v6  ;;  %v1115_v20 = vld [vmem:[%s1324_s26 + $0x30] sm:$0xff]   ;;  %v1117_v22 = vld [vmem:[%s1324_s26 + $0x38] sm:$0xff]  }
  0x16   : > { %v1116_v21 = vld [vmem:[%s1324_s26 + $0x70] sm:$0xff]   ;;  %v1118_v23 = vld [vmem:[%s1324_s26 + $0x78] sm:$0xff]  }
  0x18   : > { %1016 = vmatpush3.bf16.msra.mxu0 %v1099_v6  ;;  %1067 = vmatpush3.bf16.msra.mxu1 %v1099_v6 }
  0x19   : > { %1017 = vmatprep.subr.bf16.mxu0 %v1100_v7  ;;  %1060 = vmatprep.subr.bf16.mxu1 %v1100_v7 }
  0x1c   : > { %1018 = vmatpush3.bf16.msra.mxu0 %v1100_v7  ;;  %1068 = vmatpush3.bf16.msra.mxu1 %v1100_v7 }
  0x1d   : > { %1019 = vmatprep.subr.bf16.mxu0 %v1101_v8  ;;  %1061 = vmatprep.subr.bf16.mxu1 %v1101_v8 }
  0x20   : > { %1020 = vmatpush3.bf16.msra.mxu0 %v1101_v8  ;;  %1069 = vmatpush3.bf16.msra.mxu1 %v1101_v8 }
  0x21   : > { %1021 = vmatprep.subr.bf16.mxu0 %v1102_v9  ;;  %1062 = vmatprep.subr.bf16.mxu1 %v1102_v9 }
  0x24   : > { %1022 = vmatpush3.bf16.msra.mxu0 %v1102_v9  ;;  %1070 = vmatpush3.bf16.msra.mxu1 %v1102_v9 }
  0x27   : > { %1024 = vmatmul.mubr.bf16.vlgmr.msra.gmra.mrb[0].mxu0 %v1105_v10  ;;  %1040 = vmatmul.mubr.bf16.vlgmr.msra.gmra.mrb[0].mxu1 %v1106_v11 }
  0x28   : > { %1027 = vmatprep.mubr.bf16.mxu0 %v1107_v12  ;;  %1043 = vmatprep.mubr.bf16.mxu1 %v1108_v13 }
  0x2f   : > { %1028 = vmatmul.mubr.bf16.gmra.mrb[4].mxu0 %v1109_v14  ;;  %1044 = vmatmul.mubr.bf16.gmra.mrb[4].mxu1 %v1110_v15 }
  0x30   : > { %1031 = vmatprep.mubr.bf16.mxu0 %v1111_v16  ;;  %1047 = vmatprep.mubr.bf16.mxu1 %v1112_v17 }
  0x37   : > { %1032 = vmatmul.mubr.bf16.gmra.mrb[8].mxu0 %v1113_v18  ;;  %1048 = vmatmul.mubr.bf16.gmra.mrb[8].mxu1 %v1114_v19 }
  0x38   : > { %1035 = vmatprep.mubr.bf16.mxu0 %v1115_v20  ;;  %1051 = vmatprep.mubr.bf16.mxu1 %v1116_v21 }
  0x3f   : > { %1036 = vmatmul.mubr.bf16.gmra.mrb[12].mxu0 %v1117_v22  ;;  %1052 = vmatmul.mubr.bf16.gmra.mrb[12].mxu1 %v1118_v23 }
  0xfa   : > { %v1025_v25 = vpop.f32.mrb[0].mxu0  ;;  %v1041_v26 = vpop.f32.mrb[0].mxu1 }
  0xfb   : > { %v468_v27 = vadd.f32 %v1025_v25, %v1360_v24  ;;  %v532_v28 = vadd.f32 %v1041_v26, %v1360_v24  ;;  %v459_v29 = vpop.f32.mrb[1].mxu0  ;;  %v523_v30 = vpop.f32.mrb[1].mxu1 }
  0xfc   : > { %v460_v31 = vadd.f32 %v1360_v24, %v459_v29  ;;  %v524_v32 = vadd.f32 %v1360_v24, %v523_v30  ;;  %v1026_v33 = vpop.f32.mrb[2].mxu0  ;;  %v1042_v34 = vpop.f32.mrb[2].mxu1 }
  0xfd   : > { %v951_v35 = vmul.f32 -1.442695, %v468_v27  ;;  %v967_v36 = vmul.f32 -1.442695, %v532_v28  ;;  %v471_v37 = vadd.f32 %v1026_v33, %v1360_v24  ;;  %v535_v38 = vadd.f32 %v1042_v34, %v1360_v24  ;;  %v462_v39 = vpop.f32.mrb[3].mxu0  ;;  %v526_v40 = vpop.f32.mrb[3].mxu1 }
  0xfe   : > { %v949_v41 = vmul.f32 -1.442695, %v460_v31  ;;  %v965_v42 = vmul.f32 -1.442695, %v524_v32  ;;  %v463_v43 = vadd.f32 %v1360_v24, %v462_v39  ;;  %v527_v44 = vadd.f32 %v1360_v24, %v526_v40 }
  0xff   : > { %1119 = vpow2.f32 %v951_v35  ;;  %v952_v45 = vmul.f32 -1.442695, %v471_v37  ;;  %v968_v46 = vmul.f32 -1.442695, %v535_v38 }
 0x100   : > { %1121 = vpow2.f32 %v967_v36  ;;  %v950_v47 = vmul.f32 -1.442695, %v463_v43  ;;  %v966_v48 = vmul.f32 -1.442695, %v527_v44 }
 0x101   : > { %1123 = vpow2.f32 %v949_v41 }
 0x102   : > { %1125 = vpow2.f32 %v965_v42  ;;  %v1029_v49 = vpop.f32.mrb[4].mxu0  ;;  %v1045_v50 = vpop.f32.mrb[4].mxu1 }
 0x103   : > { %1127 = vpow2.f32 %v952_v45  ;;  %v484_v51 = vadd.f32 %v1029_v49, %v1360_v24  ;;  %v548_v52 = vadd.f32 %v1045_v50, %v1360_v24  ;;  %v475_v53 = vpop.f32.mrb[5].mxu0  ;;  %v539_v54 = vpop.f32.mrb[5].mxu1 }
 0x104   : > { %1129 = vpow2.f32 %v968_v46  ;;  %v476_v55 = vadd.f32 %v1360_v24, %v475_v53  ;;  %v540_v56 = vadd.f32 %v1360_v24, %v539_v54  ;;  %v1030_v57 = vpop.f32.mrb[6].mxu0  ;;  %v1046_v58 = vpop.f32.mrb[6].mxu1 }
 0x105   : > { %1131 = vpow2.f32 %v950_v47  ;;  %v955_v59 = vmul.f32 -1.442695, %v484_v51  ;;  %v971_v60 = vmul.f32 -1.442695, %v548_v52  ;;  %v487_v61 = vadd.f32 %v1030_v57, %v1360_v24  ;;  %v478_v62 = vpop.f32.mrb[7].mxu0  ;;  %v542_v63 = vpop.f32.mrb[7].mxu1 }
 0x106   : > { %1133 = vpow2.f32 %v966_v48  ;;  %v953_v0 = vmul.f32 -1.442695, %v476_v55  ;;  %v969_v1 = vmul.f32 -1.442695, %v540_v56  ;;  %v551_v29 = vadd.f32 %v1046_v58, %v1360_v24 }
 0x107   : > { %1135 = vpow2.f32 %v955_v59  ;;  %v956_v2 = vmul.f32 -1.442695, %v487_v61  ;;  %v479_v32 = vadd.f32 %v1360_v24, %v478_v62  ;;  %v543_v36 = vadd.f32 %v1360_v24, %v542_v63 }
 0x108   : > { %1137 = vpow2.f32 %v971_v60  ;;  %v972_v46 = vmul.f32 -1.442695, %v551_v29 }
 0x109   : > { %v1120_v3 = vpop.eup %1119  ;;  %1139 = vpow2.f32 %v953_v0  ;;  %v954_v52 = vmul.f32 -1.442695, %v479_v32  ;;  %v970_v56 = vmul.f32 -1.442695, %v543_v36 }
 0x10a   : > { %v1122_v4 = vpop.eup %1121  ;;  %v684_v5 = vadd.f32 1.0, %v1120_v3  ;;  %1141 = vpow2.f32 %v969_v1  ;;  %v1033_v6 = vpop.f32.mrb[8].mxu0 }
 0x10b   : > { %v1049_v7 = vpop.f32.mrb[8].mxu1  ;;  %v1124_v8 = vpop.eup %1123  ;;  %v700_v9 = vadd.f32 1.0, %v1122_v4  ;;  %1143 = vpow2.f32 %v956_v2  ;;  %v500_v41 = vadd.f32 %v1033_v6, %v1360_v24 }
 0x10c   : > { %v491_v10 = vpop.f32.mrb[9].mxu0  ;;  %v555_v11 = vpop.f32.mrb[9].mxu1  ;;  %1145 = vrcp.f32 %v684_v5  ;;  %v682_v13 = vadd.f32 1.0, %v1124_v8  ;;  %v564_v47 = vadd.f32 %v1049_v7, %v1360_v24 }
 0x10d   : > { %v1126_v12 = vpop.eup %1125  ;;  %v1034_v14 = vpop.f32.mrb[10].mxu0  ;;  %1147 = vrcp.f32 %v700_v9  ;;  %v492_v53 = vadd.f32 %v1360_v24, %v491_v10  ;;  %v556_v57 = vadd.f32 %v1360_v24, %v555_v11  ;;  %v959_v59 = vmul.f32 -1.442695, %v500_v41 }
 0x10e   : > { %v1375_v15 = vpop.f32.mrb[10].mxu1  ;;  %v1128_v16 = vpop.eup %1127  ;;  %v698_v17 = vadd.f32 1.0, %v1126_v12  ;;  %1149 = vrcp.f32 %v682_v13  ;;  %v503_v60 = vadd.f32 %v1034_v14, %v1360_v24  ;;  %v975_v62 = vmul.f32 -1.442695, %v564_v47 }
 0x10f   : > { %v1377_v18 = vpop.f32.mrb[11].mxu0  ;;  %v1130_v19 = vpop.eup %1129  ;;  %v685_v20 = vadd.f32 1.0, %v1128_v16  ;;  %v567_v63 = vadd.f32 %v1375_v15, %v1360_v24  ;;  %v957_v1 = vmul.f32 -1.442695, %v492_v53  ;;  %v973_v4 = vmul.f32 -1.442695, %v556_v57 }
 0x110   : > { %v1379_v21 = vpop.f32.mrb[11].mxu1  ;;  %v1132_v22 = vpop.eup %1131  ;;  %1151 = vrcp.f32 %v698_v17  ;;  %v701_v23 = vadd.f32 1.0, %v1130_v19  ;;  %v495_v2 = vadd.f32 %v1360_v24, %v1377_v18  ;;  %v960_v7 = vmul.f32 -1.442695, %v503_v60 }
 0x111   : > { %v1134_v25 = vpop.eup %1133  ;;  %1153 = vrcp.f32 %v685_v20  ;;  %v683_v26 = vadd.f32 1.0, %v1132_v22  ;;  %v559_v5 = vadd.f32 %v1360_v24, %v1379_v21  ;;  %v976_v10 = vmul.f32 -1.442695, %v567_v63 }
 0x112   : > { %v1136_v27 = vpop.eup %1135  ;;  %1155 = vrcp.f32 %v701_v23  ;;  %v699_v28 = vadd.f32 1.0, %v1134_v25  ;;  %v1037_v33 = vpop.f32.mrb[12].mxu0  ;;  %v958_v13 = vmul.f32 -1.442695, %v495_v2 }
 0x113   : > { %v1138_v30 = vpop.eup %1137  ;;  %1157 = vrcp.f32 %v683_v26  ;;  %v688_v31 = vadd.f32 1.0, %v1136_v27  ;;  %v1053_v37 = vpop.f32.mrb[12].mxu1  ;;  %v516_v8 = vadd.f32 %v1037_v33, %v1360_v24  ;;  %v974_v15 = vmul.f32 -1.442695, %v559_v5 }
 0x114   : > { %v1140_v34 = vpop.eup %1139  ;;  %1159 = vrcp.f32 %v699_v28  ;;  %v704_v35 = vadd.f32 1.0, %v1138_v30  ;;  %v1385_v38 = vpop.f32.mrb[13].mxu0  ;;  %v580_v11 = vadd.f32 %v1053_v37, %v1360_v24 }
 0x115   : > { %v1142_v39 = vpop.eup %1141  ;;  %1161 = vrcp.f32 %v688_v31  ;;  %v686_v40 = vadd.f32 1.0, %v1140_v34  ;;  %v1393_v42 = vpop.f32.mrb[13].mxu1  ;;  %v963_v17 = vmul.f32 -1.442695, %v516_v8 }
 0x116   : > { %v1395_v43 = vpop.f32.mrb[14].mxu0  ;;  %v1144_v44 = vpop.eup %1143  ;;  %1163 = vrcp.f32 %v704_v35  ;;  %v702_v45 = vadd.f32 1.0, %v1142_v39  ;;  %v979_v19 = vmul.f32 -1.442695, %v580_v11 }
 0x117   : > { %v1398_v48 = vpop.f32.mrb[14].mxu1  ;;  %v1400_v49 = vpop.f32.mrb[15].mxu0  ;;  %1165 = vrcp.f32 %v686_v40  ;;  %v689_v51 = vadd.f32 1.0, %v1144_v44  ;;  %v508_v40 = vadd.f32 %v1360_v24, %v1385_v38 }
 0x118   : > { %v1146_v50 = vpop.eup %1145  ;;  %v1403_v54 = vpop.f32.mrb[15].mxu1  ;;  %1167 = vrcp.f32 %v702_v45  ;;  %v572_v45 = vadd.f32 %v1360_v24, %v1393_v42  ;;  %v583_v53 = vadd.f32 %v1398_v48, %v1360_v24  ;;  %v511_v42 = vadd.f32 %v1360_v24, %v1400_v49 }
 0x119   : > { %v1148_v55 = vpop.eup %1147  ;;  %781 = vst.msk [vmem:[%s1390_s18 + $0x10] sm:$0xff] %vm778_vm0, %v1146_v50  ;;  %1169 = vrcp.f32 %v689_v51  ;;  %v519_v50 = vadd.f32 %v1395_v43, %v1360_v24 }
 0x11a   : > { %v1150_v58 = vpop.eup %1149  ;;  %797 = vst.msk [vmem:[%s1390_s18 + $0x90] sm:$0xff] %vm778_vm0, %v1148_v55  ;;  %1171 = vpow2.f32 %v972_v46  ;;  %v977_v43 = vmul.f32 -1.442695, %v572_v45  ;;  %v980_v49 = vmul.f32 -1.442695, %v583_v53 }
 0x11b   : > { %v1152_v61 = vpop.eup %1151  ;;  %779 = vst.msk [vmem:[%s1390_s18] sm:$0xff] %vm778_vm0, %v1150_v58  ;;  %1173 = vpow2.f32 %v954_v52  ;;  %v964_v48 = vmul.f32 -1.442695, %v519_v50  ;;  %v962_v63 = vmul.f32 -1.442695, %v511_v42 }
 0x11c   : > { %v1154_v0 = vpop.eup %1153  ;;  %795 = vst.msk [vmem:[%s1390_s18 + $0x80] sm:$0xff] %vm778_vm0, %v1152_v61  ;;  %1175 = vpow2.f32 %v970_v56  ;;  %v961_v56 = vmul.f32 -1.442695, %v508_v40 }
 0x11d   : > { %v1156_v3 = vpop.eup %1155  ;;  %782 = vst.msk [vmem:[%s1390_s18 + $0x18] sm:$0xff] %vm778_vm0, %v1154_v0  ;;  %1177 = vpow2.f32 %v959_v59  ;;  %v575_v59 = vadd.f32 %v1360_v24, %v1403_v54 }
 0x11e   : > { %v1158_v6 = vpop.eup %1157  ;;  %798 = vst.msk [vmem:[%s1390_s18 + $0x98] sm:$0xff] %vm778_vm0, %v1156_v3  ;;  %1179 = vpow2.f32 %v975_v62 }
 0x11f   : > { %v1160_v9 = vpop.eup %1159  ;;  %780 = vst.msk [vmem:[%s1390_s18 + $0x8] sm:$0xff] %vm778_vm0, %v1158_v6  ;;  %1181 = vpow2.f32 %v957_v1  ;;  %v978_v54 = vmul.f32 -1.442695, %v575_v59 }
 0x120   : > { %v1162_v12 = vpop.eup %1161  ;;  %796 = vst.msk [vmem:[%s1390_s18 + $0x88] sm:$0xff] %vm778_vm0, %v1160_v9  ;;  %1183 = vpow2.f32 %v973_v4 }
 0x121   : > { %v1164_v14 = vpop.eup %1163  ;;  %785 = vst.msk [vmem:[%s1390_s18 + $0x30] sm:$0xff] %vm778_vm0, %v1162_v12  ;;  %1185 = vpow2.f32 %v960_v7 }
 0x122   : > { %v1166_v16 = vpop.eup %1165  ;;  %801 = vst.msk [vmem:[%s1390_s18 + $0xb0] sm:$0xff] %vm778_vm0, %v1164_v14  ;;  %1187 = vpow2.f32 %v976_v10 }
 0x123   : > { %v1168_v18 = vpop.eup %1167  ;;  %783 = vst.msk [vmem:[%s1390_s18 + $0x20] sm:$0xff] %vm778_vm0, %v1166_v16  ;;  %1189 = vpow2.f32 %v958_v13 }
 0x124   : > { %v1170_v20 = vpop.eup %1169  ;;  %799 = vst.msk [vmem:[%s1390_s18 + $0xa0] sm:$0xff] %vm778_vm0, %v1168_v18  ;;  %1191 = vpow2.f32 %v974_v15 }
 0x125   : > { %v1172_v21 = vpop.eup %1171  ;;  %786 = vst.msk [vmem:[%s1390_s18 + $0x38] sm:$0xff] %vm778_vm0, %v1170_v20  ;;  %1193 = vpow2.f32 %v963_v17 }
 0x126   : > { %v1174_v22 = vpop.eup %1173  ;;  %v705_v23 = vadd.f32 1.0, %v1172_v21  ;;  %1195 = vpow2.f32 %v979_v19 }
 0x127   : > { %v1176_v25 = vpop.eup %1175  ;;  %v687_v26 = vadd.f32 1.0, %v1174_v22 }
 0x128   : > { %v1178_v27 = vpop.eup %1177  ;;  %1197 = vrcp.f32 %v705_v23  ;;  %v703_v28 = vadd.f32 1.0, %v1176_v25 }
 0x129   : > { %v1180_v29 = vpop.eup %1179  ;;  %1199 = vrcp.f32 %v687_v26  ;;  %v692_v30 = vadd.f32 1.0, %v1178_v27 }
 0x12a   : > { %v1182_v31 = vpop.eup %1181  ;;  %1201 = vrcp.f32 %v703_v28  ;;  %v708_v32 = vadd.f32 1.0, %v1180_v29 }
 0x12b   : > { %v1184_v33 = vpop.eup %1183  ;;  %1203 = vrcp.f32 %v692_v30  ;;  %v690_v34 = vadd.f32 1.0, %v1182_v31 }
 0x12c   : > { %v1186_v35 = vpop.eup %1185  ;;  %1205 = vrcp.f32 %v708_v32  ;;  %v706_v36 = vadd.f32 1.0, %v1184_v33 }
 0x12d   : > { %v1188_v37 = vpop.eup %1187  ;;  %1207 = vrcp.f32 %v690_v34  ;;  %v693_v39 = vadd.f32 1.0, %v1186_v35 }
 0x12e   : > { %v1190_v41 = vpop.eup %1189  ;;  %1209 = vrcp.f32 %v706_v36  ;;  %v709_v44 = vadd.f32 1.0, %v1188_v37 }
 0x12f   : > { %v1192_v46 = vpop.eup %1191  ;;  %1211 = vrcp.f32 %v693_v39  ;;  %v691_v47 = vadd.f32 1.0, %v1190_v41 }
 0x130   : > { %v1194_v51 = vpop.eup %1193  ;;  %1213 = vrcp.f32 %v709_v44  ;;  %v707_v52 = vadd.f32 1.0, %v1192_v46 }
 0x131   : > { %v1196_v38 = vpop.eup %1195  ;;  %1215 = vrcp.f32 %v691_v47  ;;  %v696_v55 = vadd.f32 1.0, %v1194_v51 }
 0x132   : > { %v1198_v57 = vpop.eup %1197  ;;  %1217 = vrcp.f32 %v707_v52  ;;  %v712_v58 = vadd.f32 1.0, %v1196_v38 }
 0x133   : > { %v1200_v60 = vpop.eup %1199  ;;  %802 = vst.msk [vmem:[%s1390_s18 + $0xb8] sm:$0xff] %vm778_vm0, %v1198_v57  ;;  %1219 = vrcp.f32 %v696_v55 }
 0x134   : > { %v1202_v61 = vpop.eup %1201  ;;  %784 = vst.msk [vmem:[%s1390_s18 + $0x28] sm:$0xff] %vm778_vm0, %v1200_v60  ;;  %1221 = vrcp.f32 %v712_v58 }
 0x135   : > { %v1204_v62 = vpop.eup %1203  ;;  %800 = vst.msk [vmem:[%s1390_s18 + $0xa8] sm:$0xff] %vm778_vm0, %v1202_v61  ;;  %1223 = vpow2.f32 %v961_v56 }
 0x136   : > { %v1206_v24 = vpop.eup %1205  ;;  %789 = vst.msk [vmem:[%s1390_s18 + $0x50] sm:$0xff] %vm778_vm0, %v1204_v62  ;;  %1225 = vpow2.f32 %v977_v43 }
 0x137   : > { %v1208_v0 = vpop.eup %1207  ;;  %805 = vst.msk [vmem:[%s1390_s18 + $0xd0] sm:$0xff] %vm778_vm0, %v1206_v24  ;;  %1227 = vpow2.f32 %v964_v48 }
 0x138   : > { %v1210_v1 = vpop.eup %1209  ;;  %787 = vst.msk [vmem:[%s1390_s18 + $0x40] sm:$0xff] %vm778_vm0, %v1208_v0  ;;  %1229 = vpow2.f32 %v980_v49 }
 0x139   : > { %v1212_v2 = vpop.eup %1211  ;;  %803 = vst.msk [vmem:[%s1390_s18 + $0xc0] sm:$0xff] %vm778_vm0, %v1210_v1  ;;  %1231 = vpow2.f32 %v962_v63 }
 0x13a   : > { %v1214_v3 = vpop.eup %1213  ;;  %790 = vst.msk [vmem:[%s1390_s18 + $0x58] sm:$0xff] %vm778_vm0, %v1212_v2  ;;  %1233 = vpow2.f32 %v978_v54 }
 0x13b   : > { %v1216_v4 = vpop.eup %1215  ;;  %806 = vst.msk [vmem:[%s1390_s18 + $0xd8] sm:$0xff] %vm778_vm0, %v1214_v3 }
 0x13c   : > { %v1218_v5 = vpop.eup %1217  ;;  %788 = vst.msk [vmem:[%s1390_s18 + $0x48] sm:$0xff] %vm778_vm0, %v1216_v4 }
 0x13d   : > { %v1220_v6 = vpop.eup %1219  ;;  %804 = vst.msk [vmem:[%s1390_s18 + $0xc8] sm:$0xff] %vm778_vm0, %v1218_v5 }
 0x13e   : > { %v1222_v7 = vpop.eup %1221  ;;  %793 = vst.msk [vmem:[%s1390_s18 + $0x70] sm:$0xff] %vm778_vm0, %v1220_v6 }
 0x13f   : > { %v1224_v8 = vpop.eup %1223  ;;  %809 = vst.msk [vmem:[%s1390_s18 + $0xf0] sm:$0xff] %vm778_vm0, %v1222_v7 }
 0x140   : > { %v1226_v9 = vpop.eup %1225  ;;  %v694_v10 = vadd.f32 1.0, %v1224_v8 }
 0x141   : > { %v1228_v11 = vpop.eup %1227  ;;  %v710_v12 = vadd.f32 1.0, %v1226_v9 }
 0x142   : > { %v1230_v13 = vpop.eup %1229  ;;  %1235 = vrcp.f32 %v694_v10  ;;  %v697_v14 = vadd.f32 1.0, %v1228_v11 }
 0x143   : > { %v1232_v15 = vpop.eup %1231  ;;  %1237 = vrcp.f32 %v710_v12  ;;  %v713_v16 = vadd.f32 1.0, %v1230_v13 }
 0x144   : > { %v1234_v17 = vpop.eup %1233  ;;  %1239 = vrcp.f32 %v697_v14  ;;  %v695_v18 = vadd.f32 1.0, %v1232_v15 }
 0x145   : > { %1241 = vrcp.f32 %v713_v16  ;;  %v711_v19 = vadd.f32 1.0, %v1234_v17 }
 0x146   : > { %1243 = vrcp.f32 %v695_v18 }
 0x147   : > { %1245 = vrcp.f32 %v711_v19 }
 0x14c   : > { %v1236_v20 = vpop.eup %1235 }
 0x14d   : > { %v1238_v21 = vpop.eup %1237  ;;  %791 = vst.msk [vmem:[%s1390_s18 + $0x60] sm:$0xff] %vm778_vm0, %v1236_v20 }
 0x14e   : > { %v1240_v22 = vpop.eup %1239  ;;  %807 = vst.msk [vmem:[%s1390_s18 + $0xe0] sm:$0xff] %vm778_vm0, %v1238_v21 }
 0x14f   : > { %v1242_v23 = vpop.eup %1241  ;;  %794 = vst.msk [vmem:[%s1390_s18 + $0x78] sm:$0xff] %vm778_vm0, %v1240_v22 }
 0x150   : > { %v1244_v25 = vpop.eup %1243  ;;  %810 = vst.msk [vmem:[%s1390_s18 + $0xf8] sm:$0xff] %vm778_vm0, %v1242_v23 }
 0x151   : > { %v1246_v26 = vpop.eup %1245  ;;  %792 = vst.msk [vmem:[%s1390_s18 + $0x68] sm:$0xff] %vm778_vm0, %v1244_v25 }
 0x152   : > { %808 = vst.msk [vmem:[%s1390_s18 + $0xe8] sm:$0xff] %vm778_vm0, %v1246_v26 }
 0x153 PF: > { %s13_s14 = sadd.s32 1, %s1269_s14   ;;  %s1504_s12 = smov %s1265_s13 }
 0x154   : > { %p10_p5 = scmp.ge.s32.totalorder %s13_s14, 21   ;;  %s1505_s13 = smov %s1507_s15 }
 0x156   :  { %12 = sbr.rel (!%p10_p5) target bundleno = 2 (0x2), region = 68 }

</bundles_post_ra>
